<compile_context>
chip_gen: v7x
topology: tpu7x:2x2x1
jax: 0.10.0
libtpu: 0.0.40
codegen_flags: <defaults>
</compile_context>

<pallas_src>
import numpy as np
import jax
import jax.numpy as jnp
from jax import lax
from jax.experimental import pallas as pl
from jax.experimental.pallas import tpu as pltpu


def _lstm_cell_kernel(x_ref, h_ref, c_ref,
                      w1x_ref, w1h_ref, w2_ref, b1_ref, b2_ref,
                      nc_ref, nh_ref):
    _, H, W, Cin = x_ref.shape
    Hc = h_ref.shape[3]
    HW = H * W
    n_pad = (H + 2) * W

    # ---- column-edge masks, built ONCE per grid step (hoisted) --------------
    # mask_l zeroes column w == 0 (left-neighbour roll wraps there), mask_r
    # zeroes w == W-1.  Built at width max(Cin, Hc) and lane-sliced for
    # narrower operands so the iota/compare runs exactly once per step.
    Cm = max(Cin, Hc)
    w_col = lax.broadcasted_iota(jnp.int32, (W, Cm), 0)
    w_idx = jnp.broadcast_to(w_col[None], (H + 2, W, Cm)).reshape(n_pad, Cm)
    mask_l = (w_idx >= 1).astype(jnp.float32)
    mask_r = (w_idx <= W - 2).astype(jnp.float32)

    def im2col(a2):
        """a2: (HW, C) f32 -> (HW, 9*C) bf16 im2col matrix (tap-major columns).

        Tap t = ky*3 + kx holds a2's value at spatial offset (ky-1, kx-1) with
        zeros outside the image.  H taps are aligned row slices of the
        zero-row-padded tensor; W taps are XLU rolls + hoisted edge masks.  The
        roll wrap across row boundaries only ever lands in a masked column.
        """
        C = a2.shape[1]
        zrow = jnp.zeros((W, C), a2.dtype)
        ap = jnp.concatenate([zrow, a2, zrow], axis=0)            # (n_pad, C)
        left = pltpu.roll(ap, 1, 0) * mask_l[:, :C]               # a2[h, w-1]
        right = pltpu.roll(ap, n_pad - 1, 0) * mask_r[:, :C]      # a2[h, w+1]
        variants = (left, ap, right)
        cols = []
        for ky in range(3):
            r0 = ky * W
            for kx in range(3):
                cols.append(variants[kx][r0:r0 + HW])
        return jnp.concatenate(cols, axis=1).astype(jnp.bfloat16)

    x2 = x_ref[0].reshape(HW, Cin)       # f32
    h2 = h_ref[0].reshape(HW, Hc)        # f32

    # conv1: pointwise(depthwise(cat[x, h])) == two fused im2col MXU matmuls
    # (x / hidden channel groups kept separate -> no cat[x, h] materialized).
    b1 = (jnp.dot(im2col(x2), w1x_ref[...], preferred_element_type=jnp.float32)
          + jnp.dot(im2col(h2), w1h_ref[...], preferred_element_type=jnp.float32)
          + b1_ref[...])                                          # (HW, Hc) f32

    # conv2: pointwise(depthwise(b1)) == one fused im2col MXU matmul.
    gates = (jnp.dot(im2col(b1), w2_ref[...], preferred_element_type=jnp.float32)
             + b2_ref[...])              # (HW, 4*Hc) f32; forget_bias folded in

    cell = c_ref[0].reshape(HW, Hc)

    sg = jax.nn.sigmoid(gates)           # lane-dense over all 4*Hc gate lanes
    i_s = sg[:, 0 * Hc:1 * Hc]
    f_s = sg[:, 2 * Hc:3 * Hc]
    o_s = sg[:, 3 * Hc:4 * Hc]
    j_a = jnp.clip(gates[:, 1 * Hc:2 * Hc], 0.0, 6.0)             # activation = relu6

    new_cell = cell * f_s + i_s * j_a
    # TODO(synk): clip_state=True branch (clamp new_cell to [-6, 6]) not
    # emitted; module default is clip_state=False.
    new_hidden = jnp.clip(new_cell, 0.0, 6.0) * o_s

    # TODO(synk): on v5e (single vector-store slot) Hc < 128 lanes makes these
    # masked stores; a lane-dense (B, H, W*Hc) output layout is worth it for
    # store-bound production shapes.
    nc_ref[0] = new_cell.reshape(H, W, Hc).astype(nc_ref.dtype)
    nh_ref[0] = new_hidden.reshape(H, W, Hc).astype(nh_ref.dtype)


def bottleneck_lstm_cell(x, hidden, cell, params, forget_bias=1.0):
    """x: (B,H,W,Cin), hidden/cell: (B,H,W,Hc). Returns (output, state_dict)."""
    B, H, W, Cin = x.shape
    Hc = hidden.shape[-1]

    # Layout contract: the H-tap row slices of the padded (H+2)*W-row tensors
    # must stay tile-aligned (f32: 8 rows/sublane tile; bf16 packs 2 rows/sublane).
    assert W % 8 == 0, "W must be a multiple of 8 (f32 sublane alignment)"
    assert W % 16 == 0, "W must be a multiple of 16 (bf16 sublane packing)"

    # ---- wrapper-side weight folding + flattening to 2-D im2col weights -----
    dw1 = params['dw1_w'][:, 0, :]                       # (9, Cb)
    w1 = dw1[:, :, None] * params['pw1_w'][None]         # (9, Cb, Hc) f32
    w1x = w1[:, :Cin, :].reshape(9 * Cin, Hc).astype(jnp.bfloat16)
    w1h = w1[:, Cin:, :].reshape(9 * Hc, Hc).astype(jnp.bfloat16)
    b1f = (params['dw1_b'][0] @ params['pw1_w']
           + params['pw1_b'][0]).reshape(1, Hc).astype(jnp.float32)

    dw2 = params['dw2_w'][:, 0, :]                       # (9, Hc)
    w2 = (dw2[:, :, None] * params['pw2_w'][None]).reshape(9 * Hc, 4 * Hc)
    w2 = w2.astype(jnp.bfloat16)
    b2f = params['dw2_b'][0] @ params['pw2_w'] + params['pw2_b'][0]
    b2f = b2f.at[2 * Hc:3 * Hc].add(forget_bias)         # fold forget_bias into f
    b2f = b2f.reshape(1, 4 * Hc).astype(jnp.float32)

    def bcast_spec(shape):
        nd = len(shape)
        return pl.BlockSpec(shape, lambda b, _nd=nd: (0,) * _nd)

    in_specs = [
        pl.BlockSpec((1, H, W, Cin), lambda b: (b, 0, 0, 0)),   # x
        pl.BlockSpec((1, H, W, Hc), lambda b: (b, 0, 0, 0)),    # hidden
        pl.BlockSpec((1, H, W, Hc), lambda b: (b, 0, 0, 0)),    # cell
        bcast_spec(w1x.shape),
        bcast_spec(w1h.shape),
        bcast_spec(w2.shape),
        bcast_spec(b1f.shape),
        bcast_spec(b2f.shape),
    ]
    out_specs = [
        pl.BlockSpec((1, H, W, Hc), lambda b: (b, 0, 0, 0)),
        pl.BlockSpec((1, H, W, Hc), lambda b: (b, 0, 0, 0)),
    ]
    out_shape = [
        jax.ShapeDtypeStruct((B, H, W, Hc), jnp.float32),
        jax.ShapeDtypeStruct((B, H, W, Hc), jnp.float32),
    ]

    new_cell, new_hidden = pl.pallas_call(
        _lstm_cell_kernel,
        grid=(B,),
        in_specs=in_specs,
        out_specs=out_specs,
        out_shape=out_shape,
        compiler_params=pltpu.CompilerParams(
            dimension_semantics=("parallel",),
            vmem_limit_bytes=48 * 1024 * 1024),
    )(x, hidden, cell, w1x, w1h, w2, b1f, b2f)

    output = new_hidden
    return output, dict(cell=new_cell, hidden=new_hidden)


def init_params(key, in_channels, hidden_size, kernel_size=3):
    """Deterministic (xavier-uniform-ish) weight init matching the module's shapes."""
    Cb = in_channels + hidden_size
    k = kernel_size
    ks = jax.random.split(key, 8)

    def xavier(kk, shape, fan_in, fan_out):
        limit = (6.0 / (fan_in + fan_out)) ** 0.5
        return jax.random.uniform(kk, shape, jnp.float32, -limit, limit)

    return dict(
        # bottleneck_conv_depth: Conv2d(Cb, Cb, 3, pad=1, groups=Cb)
        dw1_w=xavier(ks[0], (k * k, 1, Cb), k * k, k * k),
        dw1_b=0.01 * jax.random.normal(ks[1], (1, Cb), jnp.float32),
        # bottleneck_conv_point: Conv2d(Cb, Hc, 1)
        pw1_w=xavier(ks[2], (Cb, hidden_size), Cb, hidden_size),
        pw1_b=0.01 * jax.random.normal(ks[3], (1, hidden_size), jnp.float32),
        # lstm_conv_depth: Conv2d(Hc, Hc, 3, pad=1, groups=Hc)
        dw2_w=xavier(ks[4], (k * k, 1, hidden_size), k * k, k * k),
        dw2_b=0.01 * jax.random.normal(ks[5], (1, hidden_size), jnp.float32),
        # lstm_conv_point: Conv2d(Hc, 4*Hc, 1)
        pw2_w=xavier(ks[6], (hidden_size, 4 * hidden_size), hidden_size, 4 * hidden_size),
        pw2_b=0.01 * jax.random.normal(ks[7], (1, 4 * hidden_size), jnp.float32),
    )


def _reference(x, hidden, cell, p, forget_bias=1.0):
    """Pure-JAX f32 reference (lax conv) mirroring the PyTorch forward, in NHWC."""
    xh = jnp.concatenate([x, hidden], axis=-1)
    Cb = xh.shape[-1]
    Hc = hidden.shape[-1]
    dn = ('NHWC', 'HWIO', 'NHWC')
    d1 = lax.conv_general_dilated(xh, p['dw1_w'].reshape(3, 3, 1, Cb), (1, 1), 'SAME',
                                  dimension_numbers=dn, feature_group_count=Cb)
    d1 = d1 + p['dw1_b'].reshape(1, 1, 1, Cb)
    b1 = lax.conv_general_dilated(d1, p['pw1_w'].reshape(1, 1, Cb, Hc), (1, 1), 'SAME',
                                  dimension_numbers=dn) + p['pw1_b'].reshape(1, 1, 1, Hc)
    d2 = lax.conv_general_dilated(b1, p['dw2_w'].reshape(3, 3, 1, Hc), (1, 1), 'SAME',
                                  dimension_numbers=dn, feature_group_count=Hc)
    d2 = d2 + p['dw2_b'].reshape(1, 1, 1, Hc)
    g = lax.conv_general_dilated(d2, p['pw2_w'].reshape(1, 1, Hc, 4 * Hc), (1, 1), 'SAME',
                                 dimension_numbers=dn) + p['pw2_b'].reshape(1, 1, 1, 4 * Hc)
    i, j, f, o = jnp.split(g, 4, axis=-1)
    relu6 = lambda v: jnp.clip(v, 0.0, 6.0)
    new_cell = cell * jax.nn.sigmoid(f + forget_bias) + jax.nn.sigmoid(i) * relu6(j)
    new_hidden = relu6(new_cell) * jax.nn.sigmoid(o)
    return new_cell, new_hidden


if __name__ == "__main__":
    key = jax.random.PRNGKey(0)
    B, Cin, H, W, Hc = 2, 4, 16, 16, 32
    kx, kh, kc, kp = jax.random.split(key, 4)

    x = jax.random.normal(kx, (B, H, W, Cin), jnp.float32)
    hidden = 0.5 * jax.random.normal(kh, (B, H, W, Hc), jnp.float32)
    cell = 0.5 * jax.random.normal(kc, (B, H, W, Hc), jnp.float32)
    params = init_params(kp, Cin, Hc)

    out, state = bottleneck_lstm_cell(x, hidden, cell, params, forget_bias=1.0)
    jax.block_until_ready(out)

    ref_cell, ref_hidden = _reference(x, hidden, cell, params, forget_bias=1.0)
    # bf16 MXU operands with f32 accumulation -> ~1e-2 level deviation from the
    # f32 reference over two stacked separable convs.
    np.testing.assert_allclose(np.asarray(state['cell']), np.asarray(ref_cell),
                               rtol=3e-2, atol=3e-2)
    np.testing.assert_allclose(np.asarray(state['hidden']), np.asarray(ref_hidden),
                               rtol=3e-2, atol=3e-2)
    print("KERNEL_OK")
</pallas_src>

<mosaic_0001>
module attributes {stable_mosaic.version = 11 : i64} {
  func.func @_lstm_cell_kernel(%arg0: i32, %arg1: memref<1x16x16x4xf32, #tpu.memory_space<vmem>>, %arg2: memref<1x16x16x32xf32, #tpu.memory_space<vmem>>, %arg3: memref<1x16x16x32xf32, #tpu.memory_space<vmem>>, %arg4: memref<36x32xbf16, #tpu.memory_space<vmem>>, %arg5: memref<288x32xbf16, #tpu.memory_space<vmem>>, %arg6: memref<288x128xbf16, #tpu.memory_space<vmem>>, %arg7: memref<1x32xf32, #tpu.memory_space<vmem>>, %arg8: memref<1x128xf32, #tpu.memory_space<vmem>>, %arg9: memref<1x16x16x32xf32, #tpu.memory_space<vmem>>, %arg10: memref<1x16x16x32xf32, #tpu.memory_space<vmem>>) attributes {dimension_semantics = [#tpu.dimension_semantics<parallel>], iteration_bounds = array<i64: 2>, scalar_prefetch = 0 : i64, scratch_operands = 0 : i64, tpu.core_type = #tpu.core_type<tc>, window_params = [{transform_indices = @transform_0, window_bounds = array<i64: 1, 16, 16, 4>}, {transform_indices = @transform_1, window_bounds = array<i64: 1, 16, 16, 32>}, {transform_indices = @transform_2, window_bounds = array<i64: 1, 16, 16, 32>}, {pipeline_mode = #tpu.pipeline_mode<synchronous>, transform_indices = @transform_3, window_bounds = array<i64: 36, 32>}, {pipeline_mode = #tpu.pipeline_mode<synchronous>, transform_indices = @transform_4, window_bounds = array<i64: 288, 32>}, {pipeline_mode = #tpu.pipeline_mode<synchronous>, transform_indices = @transform_5, window_bounds = array<i64: 288, 128>}, {pipeline_mode = #tpu.pipeline_mode<synchronous>, transform_indices = @transform_6, window_bounds = array<i64: 1, 32>}, {pipeline_mode = #tpu.pipeline_mode<synchronous>, transform_indices = @transform_7, window_bounds = array<i64: 1, 128>}, {transform_indices = @transform_8, window_bounds = array<i64: 1, 16, 16, 32>}, {transform_indices = @transform_9, window_bounds = array<i64: 1, 16, 16, 32>}]} {
    %0 = tpu.iota {dimensions = array<i32: 0>} : vector<16x32xi32>
    %1 = vector.shape_cast %0 : vector<16x32xi32> to vector<1x16x32xi32>
    %2 = vector.shape_cast %1 : vector<1x16x32xi32> to vector<1x16x32xi32>
    %3 = vector.broadcast %2 : vector<1x16x32xi32> to vector<18x16x32xi32>
    %4 = vector.shape_cast %3 : vector<18x16x32xi32> to vector<288x32xi32>
    %c1_i32 = arith.constant 1 : i32
    %5 = vector.broadcast %c1_i32 : i32 to vector<288x32xi32>
    %6 = arith.cmpi sge, %4, %5 : vector<288x32xi32>
    %7 = arith.extui %6 : vector<288x32xi1> to vector<288x32xi32>
    %8 = arith.sitofp %7 : vector<288x32xi32> to vector<288x32xf32>
    %c14_i32 = arith.constant 14 : i32
    %9 = vector.broadcast %c14_i32 : i32 to vector<288x32xi32>
    %10 = arith.cmpi sle, %4, %9 : vector<288x32xi32>
    %11 = arith.extui %10 : vector<288x32xi1> to vector<288x32xi32>
    %12 = arith.sitofp %11 : vector<288x32xi32> to vector<288x32xf32>
    %c0 = arith.constant 0 : index
    %c0_0 = arith.constant 0 : index
    %c0_1 = arith.constant 0 : index
    %c0_2 = arith.constant 0 : index
    %13 = vector.load %arg1[%c0, %c0_0, %c0_1, %c0_2] : memref<1x16x16x4xf32, #tpu.memory_space<vmem>>, vector<1x16x16x4xf32>
    %14 = vector.shape_cast %13 : vector<1x16x16x4xf32> to vector<16x16x4xf32>
    %15 = vector.shape_cast %14 : vector<16x16x4xf32> to vector<256x4xf32>
    %c0_3 = arith.constant 0 : index
    %c0_4 = arith.constant 0 : index
    %c0_5 = arith.constant 0 : index
    %c0_6 = arith.constant 0 : index
    %16 = vector.load %arg2[%c0_3, %c0_4, %c0_5, %c0_6] : memref<1x16x16x32xf32, #tpu.memory_space<vmem>>, vector<1x16x16x32xf32>
    %17 = vector.shape_cast %16 : vector<1x16x16x32xf32> to vector<16x16x32xf32>
    %18 = vector.shape_cast %17 : vector<16x16x32xf32> to vector<256x32xf32>
    %cst = arith.constant 0.000000e+00 : f32
    %19 = vector.broadcast %cst : f32 to vector<16x4xf32>
    %20 = tpu.concatenate %19, %15, %19 in 0 : vector<16x4xf32>, vector<256x4xf32>, vector<16x4xf32> -> vector<288x4xf32>
    %c1_i32_7 = arith.constant 1 : i32
    %21 = tpu.dynamic_rotate %20 by %c1_i32_7 dim 0 : vector<288x4xf32>, i32 -> vector<288x4xf32>
    %22 = vector.extract_strided_slice %8 {offsets = [0, 0], sizes = [288, 4], strides = [1, 1]} : vector<288x32xf32> to vector<288x4xf32>
    %23 = arith.mulf %21, %22 : vector<288x4xf32>
    %c287_i32 = arith.constant 287 : i32
    %24 = tpu.dynamic_rotate %20 by %c287_i32 dim 0 : vector<288x4xf32>, i32 -> vector<288x4xf32>
    %25 = vector.extract_strided_slice %12 {offsets = [0, 0], sizes = [288, 4], strides = [1, 1]} : vector<288x32xf32> to vector<288x4xf32>
    %26 = arith.mulf %24, %25 : vector<288x4xf32>
    %27 = vector.extract_strided_slice %23 {offsets = [0, 0], sizes = [256, 4], strides = [1, 1]} : vector<288x4xf32> to vector<256x4xf32>
    %28 = vector.extract_strided_slice %20 {offsets = [0, 0], sizes = [256, 4], strides = [1, 1]} : vector<288x4xf32> to vector<256x4xf32>
    %29 = vector.extract_strided_slice %26 {offsets = [0, 0], sizes = [256, 4], strides = [1, 1]} : vector<288x4xf32> to vector<256x4xf32>
    %30 = vector.extract_strided_slice %23 {offsets = [16, 0], sizes = [256, 4], strides = [1, 1]} : vector<288x4xf32> to vector<256x4xf32>
    %31 = vector.extract_strided_slice %20 {offsets = [16, 0], sizes = [256, 4], strides = [1, 1]} : vector<288x4xf32> to vector<256x4xf32>
    %32 = vector.extract_strided_slice %26 {offsets = [16, 0], sizes = [256, 4], strides = [1, 1]} : vector<288x4xf32> to vector<256x4xf32>
    %33 = vector.extract_strided_slice %23 {offsets = [32, 0], sizes = [256, 4], strides = [1, 1]} : vector<288x4xf32> to vector<256x4xf32>
    %34 = vector.extract_strided_slice %20 {offsets = [32, 0], sizes = [256, 4], strides = [1, 1]} : vector<288x4xf32> to vector<256x4xf32>
    %35 = vector.extract_strided_slice %26 {offsets = [32, 0], sizes = [256, 4], strides = [1, 1]} : vector<288x4xf32> to vector<256x4xf32>
    %36 = tpu.concatenate %27, %28, %29, %30, %31, %32, %33, %34, %35 in 1 : vector<256x4xf32>, vector<256x4xf32>, vector<256x4xf32>, vector<256x4xf32>, vector<256x4xf32>, vector<256x4xf32>, vector<256x4xf32>, vector<256x4xf32>, vector<256x4xf32> -> vector<256x36xf32>
    %37 = arith.truncf %36 : vector<256x36xf32> to vector<256x36xbf16>
    %c0_8 = arith.constant 0 : index
    %c0_9 = arith.constant 0 : index
    %38 = vector.load %arg4[%c0_8, %c0_9] : memref<36x32xbf16, #tpu.memory_space<vmem>>, vector<36x32xbf16>
    %cst_10 = arith.constant dense<0.000000e+00> : vector<256x32xf32>
    %39 = tpu.matmul %37, %38, %cst_10 {dimension_numbers = #tpu.dot_dimension_numbers<[1], [0], [0], [1], [0, 0, 1, 1], [], []>} : vector<256x36xbf16>, vector<36x32xbf16>, vector<256x32xf32> -> vector<256x32xf32>
    %cst_11 = arith.constant 0.000000e+00 : f32
    %40 = vector.broadcast %cst_11 : f32 to vector<16x32xf32>
    %41 = tpu.concatenate %40, %18, %40 in 0 : vector<16x32xf32>, vector<256x32xf32>, vector<16x32xf32> -> vector<288x32xf32>
    %c1_i32_12 = arith.constant 1 : i32
    %42 = tpu.dynamic_rotate %41 by %c1_i32_12 dim 0 : vector<288x32xf32>, i32 -> vector<288x32xf32>
    %43 = arith.mulf %42, %8 : vector<288x32xf32>
    %c287_i32_13 = arith.constant 287 : i32
    %44 = tpu.dynamic_rotate %41 by %c287_i32_13 dim 0 : vector<288x32xf32>, i32 -> vector<288x32xf32>
    %45 = arith.mulf %44, %12 : vector<288x32xf32>
    %46 = vector.extract_strided_slice %43 {offsets = [0, 0], sizes = [256, 32], strides = [1, 1]} : vector<288x32xf32> to vector<256x32xf32>
    %47 = vector.extract_strided_slice %41 {offsets = [0, 0], sizes = [256, 32], strides = [1, 1]} : vector<288x32xf32> to vector<256x32xf32>
    %48 = vector.extract_strided_slice %45 {offsets = [0, 0], sizes = [256, 32], strides = [1, 1]} : vector<288x32xf32> to vector<256x32xf32>
    %49 = vector.extract_strided_slice %43 {offsets = [16, 0], sizes = [256, 32], strides = [1, 1]} : vector<288x32xf32> to vector<256x32xf32>
    %50 = vector.extract_strided_slice %41 {offsets = [16, 0], sizes = [256, 32], strides = [1, 1]} : vector<288x32xf32> to vector<256x32xf32>
    %51 = vector.extract_strided_slice %45 {offsets = [16, 0], sizes = [256, 32], strides = [1, 1]} : vector<288x32xf32> to vector<256x32xf32>
    %52 = vector.extract_strided_slice %43 {offsets = [32, 0], sizes = [256, 32], strides = [1, 1]} : vector<288x32xf32> to vector<256x32xf32>
    %53 = vector.extract_strided_slice %41 {offsets = [32, 0], sizes = [256, 32], strides = [1, 1]} : vector<288x32xf32> to vector<256x32xf32>
    %54 = vector.extract_strided_slice %45 {offsets = [32, 0], sizes = [256, 32], strides = [1, 1]} : vector<288x32xf32> to vector<256x32xf32>
    %55 = tpu.concatenate %46, %47, %48, %49, %50, %51, %52, %53, %54 in 1 : vector<256x32xf32>, vector<256x32xf32>, vector<256x32xf32>, vector<256x32xf32>, vector<256x32xf32>, vector<256x32xf32>, vector<256x32xf32>, vector<256x32xf32>, vector<256x32xf32> -> vector<256x288xf32>
    %56 = arith.truncf %55 : vector<256x288xf32> to vector<256x288xbf16>
    %c0_14 = arith.constant 0 : index
    %c0_15 = arith.constant 0 : index
    %57 = vector.load %arg5[%c0_14, %c0_15] : memref<288x32xbf16, #tpu.memory_space<vmem>>, vector<288x32xbf16>
    %cst_16 = arith.constant dense<0.000000e+00> : vector<256x32xf32>
    %58 = tpu.matmul %56, %57, %cst_16 {dimension_numbers = #tpu.dot_dimension_numbers<[1], [0], [0], [1], [0, 0, 1, 1], [], []>} : vector<256x288xbf16>, vector<288x32xbf16>, vector<256x32xf32> -> vector<256x32xf32>
    %59 = arith.addf %39, %58 : vector<256x32xf32>
    %c0_17 = arith.constant 0 : index
    %c0_18 = arith.constant 0 : index
    %60 = vector.load %arg7[%c0_17, %c0_18] : memref<1x32xf32, #tpu.memory_space<vmem>>, vector<1x32xf32>
    %61 = vector.broadcast %60 : vector<1x32xf32> to vector<256x32xf32>
    %62 = arith.addf %59, %61 : vector<256x32xf32>
    %cst_19 = arith.constant 0.000000e+00 : f32
    %63 = vector.broadcast %cst_19 : f32 to vector<16x32xf32>
    %64 = tpu.concatenate %63, %62, %63 in 0 : vector<16x32xf32>, vector<256x32xf32>, vector<16x32xf32> -> vector<288x32xf32>
    %c1_i32_20 = arith.constant 1 : i32
    %65 = tpu.dynamic_rotate %64 by %c1_i32_20 dim 0 : vector<288x32xf32>, i32 -> vector<288x32xf32>
    %66 = arith.mulf %65, %8 : vector<288x32xf32>
    %c287_i32_21 = arith.constant 287 : i32
    %67 = tpu.dynamic_rotate %64 by %c287_i32_21 dim 0 : vector<288x32xf32>, i32 -> vector<288x32xf32>
    %68 = arith.mulf %67, %12 : vector<288x32xf32>
    %69 = vector.extract_strided_slice %66 {offsets = [0, 0], sizes = [256, 32], strides = [1, 1]} : vector<288x32xf32> to vector<256x32xf32>
    %70 = vector.extract_strided_slice %64 {offsets = [0, 0], sizes = [256, 32], strides = [1, 1]} : vector<288x32xf32> to vector<256x32xf32>
    %71 = vector.extract_strided_slice %68 {offsets = [0, 0], sizes = [256, 32], strides = [1, 1]} : vector<288x32xf32> to vector<256x32xf32>
    %72 = vector.extract_strided_slice %66 {offsets = [16, 0], sizes = [256, 32], strides = [1, 1]} : vector<288x32xf32> to vector<256x32xf32>
    %73 = vector.extract_strided_slice %64 {offsets = [16, 0], sizes = [256, 32], strides = [1, 1]} : vector<288x32xf32> to vector<256x32xf32>
    %74 = vector.extract_strided_slice %68 {offsets = [16, 0], sizes = [256, 32], strides = [1, 1]} : vector<288x32xf32> to vector<256x32xf32>
    %75 = vector.extract_strided_slice %66 {offsets = [32, 0], sizes = [256, 32], strides = [1, 1]} : vector<288x32xf32> to vector<256x32xf32>
    %76 = vector.extract_strided_slice %64 {offsets = [32, 0], sizes = [256, 32], strides = [1, 1]} : vector<288x32xf32> to vector<256x32xf32>
    %77 = vector.extract_strided_slice %68 {offsets = [32, 0], sizes = [256, 32], strides = [1, 1]} : vector<288x32xf32> to vector<256x32xf32>
    %78 = tpu.concatenate %69, %70, %71, %72, %73, %74, %75, %76, %77 in 1 : vector<256x32xf32>, vector<256x32xf32>, vector<256x32xf32>, vector<256x32xf32>, vector<256x32xf32>, vector<256x32xf32>, vector<256x32xf32>, vector<256x32xf32>, vector<256x32xf32> -> vector<256x288xf32>
    %79 = arith.truncf %78 : vector<256x288xf32> to vector<256x288xbf16>
    %c0_22 = arith.constant 0 : index
    %c0_23 = arith.constant 0 : index
    %80 = vector.load %arg6[%c0_22, %c0_23] : memref<288x128xbf16, #tpu.memory_space<vmem>>, vector<288x128xbf16>
    %cst_24 = arith.constant dense<0.000000e+00> : vector<256x128xf32>
    %81 = tpu.matmul %79, %80, %cst_24 {dimension_numbers = #tpu.dot_dimension_numbers<[1], [0], [0], [1], [0, 0, 1, 1], [], []>} : vector<256x288xbf16>, vector<288x128xbf16>, vector<256x128xf32> -> vector<256x128xf32>
    %c0_25 = arith.constant 0 : index
    %c0_26 = arith.constant 0 : index
    %82 = vector.load %arg8[%c0_25, %c0_26] : memref<1x128xf32, #tpu.memory_space<vmem>>, vector<1x128xf32>
    %83 = vector.broadcast %82 : vector<1x128xf32> to vector<256x128xf32>
    %84 = arith.addf %81, %83 : vector<256x128xf32>
    %c0_27 = arith.constant 0 : index
    %c0_28 = arith.constant 0 : index
    %c0_29 = arith.constant 0 : index
    %c0_30 = arith.constant 0 : index
    %85 = vector.load %arg3[%c0_27, %c0_28, %c0_29, %c0_30] : memref<1x16x16x32xf32, #tpu.memory_space<vmem>>, vector<1x16x16x32xf32>
    %86 = vector.shape_cast %85 : vector<1x16x16x32xf32> to vector<16x16x32xf32>
    %87 = vector.shape_cast %86 : vector<16x16x32xf32> to vector<256x32xf32>
    %88 = arith.negf %84 : vector<256x128xf32>
    %89 = math.exp %88 : vector<256x128xf32>
    %cst_31 = arith.constant 1.000000e+00 : f32
    %90 = vector.broadcast %cst_31 : f32 to vector<256x128xf32>
    %91 = arith.addf %90, %89 : vector<256x128xf32>
    %92 = arith.divf %90, %91 : vector<256x128xf32>
    %93 = vector.extract_strided_slice %92 {offsets = [0, 0], sizes = [256, 32], strides = [1, 1]} : vector<256x128xf32> to vector<256x32xf32>
    %94 = vector.extract_strided_slice %92 {offsets = [0, 64], sizes = [256, 32], strides = [1, 1]} : vector<256x128xf32> to vector<256x32xf32>
    %95 = vector.extract_strided_slice %92 {offsets = [0, 96], sizes = [256, 32], strides = [1, 1]} : vector<256x128xf32> to vector<256x32xf32>
    %96 = vector.extract_strided_slice %84 {offsets = [0, 32], sizes = [256, 32], strides = [1, 1]} : vector<256x128xf32> to vector<256x32xf32>
    %cst_32 = arith.constant 0.000000e+00 : f32
    %cst_33 = arith.constant 6.000000e+00 : f32
    %97 = vector.broadcast %cst_32 : f32 to vector<256x32xf32>
    %98 = arith.maximumf %97, %96 : vector<256x32xf32>
    %99 = vector.broadcast %cst_33 : f32 to vector<256x32xf32>
    %100 = arith.minimumf %99, %98 : vector<256x32xf32>
    %101 = arith.mulf %87, %94 : vector<256x32xf32>
    %102 = arith.mulf %93, %100 : vector<256x32xf32>
    %103 = arith.addf %101, %102 : vector<256x32xf32>
    %cst_34 = arith.constant 0.000000e+00 : f32
    %cst_35 = arith.constant 6.000000e+00 : f32
    %104 = vector.broadcast %cst_34 : f32 to vector<256x32xf32>
    %105 = arith.maximumf %104, %103 : vector<256x32xf32>
    %106 = vector.broadcast %cst_35 : f32 to vector<256x32xf32>
    %107 = arith.minimumf %106, %105 : vector<256x32xf32>
    %108 = arith.mulf %107, %95 : vector<256x32xf32>
    %109 = vector.shape_cast %103 : vector<256x32xf32> to vector<16x16x32xf32>
    %c0_36 = arith.constant 0 : index
    %c0_37 = arith.constant 0 : index
    %c0_38 = arith.constant 0 : index
    %c0_39 = arith.constant 0 : index
    %110 = vector.load %arg9[%c0_36, %c0_37, %c0_38, %c0_39] : memref<1x16x16x32xf32, #tpu.memory_space<vmem>>, vector<1x16x16x32xf32>
    %111 = vector.shape_cast %110 : vector<1x16x16x32xf32> to vector<16x16x32xf32>
    %112 = vector.shape_cast %109 : vector<16x16x32xf32> to vector<1x16x16x32xf32>
    tpu.vector_store %arg9[%c0_36, %c0_37, %c0_38, %c0_39], %112 {strides = array<i32>} : memref<1x16x16x32xf32, #tpu.memory_space<vmem>>, vector<1x16x16x32xf32>,
    %113 = vector.shape_cast %108 : vector<256x32xf32> to vector<16x16x32xf32>
    %c0_40 = arith.constant 0 : index
    %c0_41 = arith.constant 0 : index
    %c0_42 = arith.constant 0 : index
    %c0_43 = arith.constant 0 : index
    %114 = vector.load %arg10[%c0_40, %c0_41, %c0_42, %c0_43] : memref<1x16x16x32xf32, #tpu.memory_space<vmem>>, vector<1x16x16x32xf32>
    %115 = vector.shape_cast %114 : vector<1x16x16x32xf32> to vector<16x16x32xf32>
    %116 = vector.shape_cast %113 : vector<16x16x32xf32> to vector<1x16x16x32xf32>
    tpu.vector_store %arg10[%c0_40, %c0_41, %c0_42, %c0_43], %116 {strides = array<i32>} : memref<1x16x16x32xf32, #tpu.memory_space<vmem>>, vector<1x16x16x32xf32>,
    return
  }
  func.func @transform_0(%arg0: i32) -> (i32, i32, i32, i32) {
    %c0_i32 = arith.constant 0 : i32
    %c0_i32_0 = arith.constant 0 : i32
    %c0_i32_1 = arith.constant 0 : i32
    %c0_i32_2 = arith.constant 0 : i32
    return %arg0, %c0_i32, %c0_i32_0, %c0_i32_1 : i32, i32, i32, i32
  }
  func.func @transform_1(%arg0: i32) -> (i32, i32, i32, i32) {
    %c0_i32 = arith.constant 0 : i32
    %c0_i32_0 = arith.constant 0 : i32
    %c0_i32_1 = arith.constant 0 : i32
    %c0_i32_2 = arith.constant 0 : i32
    return %arg0, %c0_i32, %c0_i32_0, %c0_i32_1 : i32, i32, i32, i32
  }
  func.func @transform_2(%arg0: i32) -> (i32, i32, i32, i32) {
    %c0_i32 = arith.constant 0 : i32
    %c0_i32_0 = arith.constant 0 : i32
    %c0_i32_1 = arith.constant 0 : i32
    %c0_i32_2 = arith.constant 0 : i32
    return %arg0, %c0_i32, %c0_i32_0, %c0_i32_1 : i32, i32, i32, i32
  }
  func.func @transform_3(%arg0: i32) -> (i32, i32) {
    %c0_i32 = arith.constant 0 : i32
    %c0_i32_0 = arith.constant 0 : i32
    %c0_i32_1 = arith.constant 0 : i32
    return %c0_i32, %c0_i32_0 : i32, i32
  }
  func.func @transform_4(%arg0: i32) -> (i32, i32) {
    %c0_i32 = arith.constant 0 : i32
    %c0_i32_0 = arith.constant 0 : i32
    %c0_i32_1 = arith.constant 0 : i32
    return %c0_i32, %c0_i32_0 : i32, i32
  }
  func.func @transform_5(%arg0: i32) -> (i32, i32) {
    %c0_i32 = arith.constant 0 : i32
    %c0_i32_0 = arith.constant 0 : i32
    %c0_i32_1 = arith.constant 0 : i32
    return %c0_i32, %c0_i32_0 : i32, i32
  }
  func.func @transform_6(%arg0: i32) -> (i32, i32) {
    %c0_i32 = arith.constant 0 : i32
    %c0_i32_0 = arith.constant 0 : i32
    %c0_i32_1 = arith.constant 0 : i32
    return %c0_i32, %c0_i32_0 : i32, i32
  }
  func.func @transform_7(%arg0: i32) -> (i32, i32) {
    %c0_i32 = arith.constant 0 : i32
    %c0_i32_0 = arith.constant 0 : i32
    %c0_i32_1 = arith.constant 0 : i32
    return %c0_i32, %c0_i32_0 : i32, i32
  }
  func.func @transform_8(%arg0: i32) -> (i32, i32, i32, i32) {
    %c0_i32 = arith.constant 0 : i32
    %c0_i32_0 = arith.constant 0 : i32
    %c0_i32_1 = arith.constant 0 : i32
    %c0_i32_2 = arith.constant 0 : i32
    return %arg0, %c0_i32, %c0_i32_0, %c0_i32_1 : i32, i32, i32, i32
  }
  func.func @transform_9(%arg0: i32) -> (i32, i32, i32, i32) {
    %c0_i32 = arith.constant 0 : i32
    %c0_i32_0 = arith.constant 0 : i32
    %c0_i32_1 = arith.constant 0 : i32
    %c0_i32_2 = arith.constant 0 : i32
    return %arg0, %c0_i32, %c0_i32_0, %c0_i32_1 : i32, i32, i32, i32
  }
}

</mosaic_0001>

<bundles_post_ra>
// kernel: tpu_custom_call.1
= control target key start
LH: loop header
LB: loop body
LE: loop exit
PB: predicated region body
PF: predicated region fallthrough
CT: control target
= control target key end

     0   :  { %s14801_s0 = inlined_call_operand.vmem [shape: f32[2,16,16,4], index: 0, kind: input, shape index: {}]   ;;  %s14802_s1 = inlined_call_operand.vmem [shape: f32[2,16,16,32], index: 1, kind: input, shape index: {}]   ;;  %s14803_s2 = inlined_call_operand.hbm [shape: f32[2,16,16,32], index: 2, kind: input, shape index: {}]   ;;  %s14804_s3 = inlined_call_operand.vmem [shape: bf16[36,32], index: 3, kind: input, shape index: {}]   ;;  %s14805_s4 = inlined_call_operand.vmem [shape: bf16[288,32], index: 4, kind: input, shape index: {}]   ;;  %s14806_s5 = inlined_call_operand.vmem [shape: bf16[288,128], index: 5, kind: input, shape index: {}]   ;;  %s14807_s6 = inlined_call_operand.vmem [shape: f32[1,32], index: 6, kind: input, shape index: {}]   ;;  %s14808_s7 = inlined_call_operand.vmem [shape: f32[1,128], index: 7, kind: input, shape index: {}]   ;;  %s14809_s8 = inlined_call_operand.hbm [shape: f32[2,16,16,32], index: 8, kind: output, shape index: {0}]   ;;  %s14810_s9 = inlined_call_operand.hbm [shape: f32[2,16,16,32], index: 9, kind: output, shape index: {1}]  }
   0x1   :  { %15165 = sst [smem:[#allocation122_spill]] %s14801_s0 }
   0x2   :  { %15 = vsyncpa [#allocation3], 0 }
   0x3   :  { %17 = vsyncpa [#allocation3 + $0x1], 0 }
   0x4   :  { %18 = vsyncpa [#allocation4], 0 }
   0x5   :  { %20 = vsyncpa [#allocation4 + $0x1], 0 }
   0x6   :  { %21 = vsyncpa [#allocation7], 0 }
   0x7   :  { %23 = vsyncpa [#allocation7 + $0x1], 0  ;;  %s9071_s30 = smov 0   ;;  %s9073_s10 = smov 0  }
   0x8   :  { %s9075_s11 = smov 0   ;;  %s9077_s12 = smov 0  }
   0x9 LB: > { %s9092_s13 = sadd.s32 4294967295, %s9002_s12   ;;  %s6387_s14 = sadd.s32 4294967294, %s9002_s12   ;;  %s9002_s12 = sphi %s9077_s12, %s15935_s12   ;;  %s8998_s11 = sphi %s9075_s11, %s15934_s11   ;;  %s8994_s10 = sphi %s9073_s10, %s15933_s10   ;;  %s8990_s30 = sphi %s9071_s30, %s15932_s30  }
   0xa   : > { %s9096_s15 = sadd.s32 1, %s9002_s12   ;;  %s88_s16 = sadd.s32 1, %s8998_s11 }
   0xb   : > { %s85_s17 = ssub.s32 %s9002_s12, %s9096_s15  ;;  %p95_p0 = scmp.ne.s32.totalorder %s8998_s11, %s8994_s10 }
   0xc   : > { %p86_p1 = scmp.eq.s32.totalorder %s85_s17, 0  ;;  %p96_p2 = scmp.eq.s32.totalorder %s9002_s12, 0 }
   0xd   : > { %p101_p3 = scmp.ne.s32.totalorder %s8994_s10, %s8990_s30  ;;  %p102_p4 = scmp.eq.s32.totalorder %s9092_s13, 0 }
   0xe   : > { %s9108_s18 = scalar_select %p86_p1, %s8998_s11, %s88_s16  }
   0xf   : > { %p9110_p5 = por %p96_p2, %p95_p0  ;;  %p9114_p6 = por %p102_p4, %p101_p3 }
  0x10   : > { %p230_p7 = scmp.eq.s32.totalorder %s9092_s13, 1  ;;  %p236_p8 = scmp.eq.s32.totalorder %s6387_s14, 1 }
  0x11   : > { %p7012_p10 = scmp.lt.s32.totalorder %s9002_s12, 2  ;;  %s313_s23 = sand.u32 1, %s8998_s11  }
  0x12   : > { %p9121_p11 = por %p230_p7, %p95_p0  ;;  %p9125_p12 = por %p236_p8, %p101_p3 }
  0x13   : > { %s6532_s24 = sshll.u32 %s9002_s12, 12  ;;  %s6390_s25 = sshll.u32 %s313_s23, 8 }
  0x14   : > { %s15168_s21 = scalar_select %p9121_p11, 1, 0 }
  0x15   : > { %s15169_s22 = scalar_select %p9125_p12, 1, 0 }
  0x16   : > { %s9134_s28 = scalar_lea.hbm %s14803_s2, %s6532_s24  ;;  %s317_s29 = scalar_lea.vmem [#allocation2], %s6390_s25 }
  0x17   : > { %s324_s14 = sshll.u32 %s317_s29, 4  ;;  %p9138_p13 = pnand %p7012_p10, %p9110_p5  ;;  %s9142_s14 = int_to_ptr.vmem [resolvable:$true] %s324_s14 }
  0x18   : > { %s9144_s17 = scalar_lea.sflag [#allocation3], %s313_s23  ;;  %s8874_s26 = scalar_lea.hbm %s9134_s28, 4096 }
  0x19   : > { %p8875_p0 = scmp.ne.s32.totalorder %s9134_s28, %s8874_s26  ;;  %p8876_p1 = pneg %p9138_p13 }
  0x1a   : > { %s8879_s25 = scalar_lea.hbm %s14803_s2, 8192  ;;  %p8880_p4 = scmp.lt.u32.totalorder %s9134_s28, %s14803_s2 }
  0x1b   : > { %p8877_p2 = pnand %p8876_p1, %p8875_p0  ;;  %p8881_p5 = scmp.lt.u32.totalorder %s8879_s25, %s8874_s26 }
  0x1c   : > { %p8883_p8 = scmp.lt.u32.totalorder %s8874_s26, %s9134_s28 }
  0x1d   : > { %p8878_p3 = pneg %p8877_p2  ;;  %p8882_p7 = por %p8881_p5, %p8880_p4 }
  0x1f   : > { %p8884_p10 = por %p8883_p8, %p8882_p7 }
  0x21   : > { %p8885_p9 = pnand %p8884_p10, %p8878_p3 }
  0x23   : > { %8888 = shalt.err (!%p8885_p9)
}
  0x24   : > { %s8889_s23 = scalar_lea.vmem %s9142_s14, 4096  ;;  %s9004_s24 = smov [#allocation2]  }
  0x25   : > { %p8890_p0 = scmp.ne.s32.totalorder %s9142_s14, %s8889_s23  ;;  %s8894_s19 = sshll.u32 %s9004_s24, 4  ;;  %s8895_s19 = int_to_ptr.vmem [resolvable:$false] %s8894_s19 }
  0x26   : > { %s8896_s27 = scalar_lea.vmem %s8895_s19, 8192  ;;  %p8897_p11 = scmp.lt.s32.totalorder %s9142_s14, %s8895_s19 }
  0x27   : > { %p8892_p2 = pnand %p8890_p0, %p8876_p1  ;;  %p8898_p4 = scmp.lt.s32.totalorder %s8896_s27, %s8889_s23 }
  0x29   : > { %p8893_p12 = pneg %p8892_p2  ;;  %p8899_p5 = por %p8898_p4, %p8897_p11 }
  0x2b   : > { %p8900_p7 = pnand %p8899_p5, %p8893_p12 }
  0x2d   : > { %8903 = shalt.err (!%p8900_p7)
}
  0x2e   : > { %s9005_s26 = smov 128   ;;  %s9006_s25 = smov 8  }
  0x2f   : > { %7004 = dma.hbm_to_vmem [thread:$0]  (!%p9138_p13), %s9134_s28, 4096, %s9142_s14, %s9144_s17, %s9005_s26, %s9005_s26, %s9006_s25  }
  0x30   : > { %p6393_p9 = scmp.ge.s32.totalorder %s9002_s12, 1  ;;  %p332_p1 = scmp.lt.s32.totalorder %s9002_s12, 3 }
  0x32   : > { %p333_p3 = pnand %p6393_p9, %p332_p1 }
  0x34   : > { %336 = sbr.rel (%p333_p3) target bundleno = 1591 (0x637), region = 52 }
  0x3b   : > { %s9175_s29 = sand.u32 1, %s8994_s10  }
  0x3c   : > { %s9178_s23 = sshll.u32 %s9175_s29, 8  ;;  %s339_s24 = scalar_lea.sflag [#allocation3], %s9175_s29 }
  0x3d   : > { %s9182_s19 = scalar_lea.vmem [#allocation2], %s9178_s23 }
  0x3e   : > { %8977 = dma.done.wait (%p9114_p6), %s339_s24, 4096  }
  0x3f   : > { %8979 = vsyncadd (%p9114_p6), %s339_s24, 4294963200  ;;  %p392_p11 = scmp.lt.s32.totalorder %s9092_s13, 1  ;;  %s15171_s0 = sld [smem:[#allocation122_spill]]  ;;  %v14812_v4 = vmov 0.0   ;;  %v403_v10 = vlaneseq  ;;  %vm1779_vm4 = vcmask 261120   ;;  %vm1548_vm5 = vcmask 31744  }
  0x40   : > { %s9008_s20 = smov 4   ;;  %s15163_s26 = smov 8   ;;  %vm3517_vm6 = vcmask 1041408   ;;  %vm1581_vm7 = vcmask 64512   ;;  %vm1614_vm8 = vcmask 97280   ;;  %vm1647_vm9 = vcmask 130048  }
  0x41   : > { %s9190_s28 = scalar_select %p392_p11, %s9092_s13, 1  ;;  %v9243_v17 = vshrl.u32 %v403_v10, 7  ;;  %vm1680_vm10 = vcmask 162816   ;;  %vm1713_vm11 = vcmask 195584   ;;  %vm1746_vm12 = vcmask 228352  }
  0x42   : > { %s9010_s25 = smov 12   ;;  %s9011_s24 = smov 16   ;;  %vm3468_vm13 = vcmask 293888   ;;  %vm2729_vm14 = vcmask 523264   ;;  %vm2762_vm15 = vcmask 785408  }
  0x43   : > { %s6533_s14 = sshll.u32 %s9190_s28, 8  ;;  %v405_v25 = vadd.s32 8, %v9243_v17  ;;  %vm615_vm1 = vcmp.lt.s32.totalorder %v9243_v17, 7  ;;  %vm406_vm2 = vcmp.ge.s32.totalorder %v9243_v17, 1  ;;  %vm514_vm3 = vcmp.lt.s32.totalorder %v9243_v17, 1  ;;  %s9012_s16 = smov 20  }
  0x44   : > { %s9013_s28 = smov 24   ;;  %s9017_s17 = smov 96  }
  0x45   : > { %s9198_s27 = scalar_lea.vmem %s15171_s0, %s6533_s14  ;;  %vm413_vm0 = vcmp.le.s32.totalorder %v405_v25, 14  ;;  %p15925_p12 = scmp.ne.s32.totalorder %s15168_s21, 0 }
  0x46   : > { %v9201_v0 = vld [vmem:[%s9198_s27 + $0x18] sm:$0xff]  ;;  %v9204_v1 = vld [vmem:[%s9198_s27 + $0x20] sm:$0xff]  ;;  %v9214_v6 = vld [vmem:[%s9198_s27 + $0x28] sm:$0xff]  ;;  %v9318_v44 = vsel %vm413_vm0, 1.0, %v14812_v4 }
  0x47   : > { %v9207_v2 = vld [vmem:[%s9198_s27] sm:$0xff]  ;;  %v7070_v3 = vpack.i.bf16 %v9204_v1, %v9201_v0  ;;  %v9217_v7 = vld [vmem:[%s9198_s27 + $0x30] sm:$0xff]  ;;  %v9220_v8 = vld [vmem:[%s9198_s27 + $0x8] sm:$0xff]  ;;  %15172 = vst [vmem:[#allocation11_spill] sm:$0xff] %v9318_v44  ;;  %v586_v47 = vrot.slane %v9201_v0, 1  ;;  %v587_v49 = vrot.slane %v9204_v1, 1 }
  0x48   : > { %v7060_v5 = vpack.i.bf16 %v9207_v2, %v14812_v4  ;;  %v9223_v9 = vld [vmem:[%s9198_s27 + $0x10] sm:$0xff]  ;;  %v7075_v11 = vpack.i.bf16 %v9217_v7, %v9214_v6  ;;  %v9232_v13 = vld [vmem:[%s9198_s27 + $0x48] sm:$0xff]  ;;  %v9238_v15 = vld [vmem:[%s9198_s27 + $0x38] sm:$0xff]  ;;  %v583_v37 = vrot.slane %v9207_v2, 1  ;;  %v584_v38 = vrot.slane %v9220_v8, 1 }
  0x49   : > { %7071 = vrot.lane.b32.xlu1 %v7070_v3, %s9008_s20  ;;  %v7065_v12 = vpack.i.bf16 %v9223_v9, %v9220_v8  ;;  %v9235_v14 = vld [vmem:[%s9198_s27 + $0x50] sm:$0xff]  ;;  %v9241_v16 = vld [vmem:[%s9198_s27 + $0x40] sm:$0xff]  ;;  %v9252_v20 = vld [vmem:[%s9198_s27 + $0x68] sm:$0xff]  ;;  %v585_v39 = vrot.slane %v9223_v9, 1  ;;  %v588_v53 = vrot.slane %v9214_v6, 1  ;;  %v589_v54 = vrot.slane %v9217_v7, 1 }
  0x4a   : > { %7061 = vrot.lane.b32.xlu0 %v7060_v5, %s9008_s20  ;;  %v7085_v18 = vpack.i.bf16 %v9235_v14, %v9232_v13  ;;  %v7080_v19 = vpack.i.bf16 %v9241_v16, %v9238_v15  ;;  %v9255_v21 = vld [vmem:[%s9198_s27 + $0x70] sm:$0xff]  ;;  %v9258_v22 = vld [vmem:[%s9198_s27 + $0x58] sm:$0xff]  ;;  %v9261_v23 = vld [vmem:[%s9198_s27 + $0x60] sm:$0xff]  ;;  %v648_v48 = vsel %vm615_vm1, 0.0, %v583_v37  ;;  %v590_v59 = vrot.slane %v9238_v15, 1 }
  0x4b   : > { %v9264_v24 = vld [vmem:[%s9198_s27 + $0x88] sm:$0xff]  ;;  %v7095_v26 = vpack.i.bf16 %v9255_v21, %v9252_v20  ;;  %v7090_v27 = vpack.i.bf16 %v9261_v23, %v9258_v22  ;;  %v9274_v28 = vld [vmem:[%s9198_s27 + $0x90] sm:$0xff]  ;;  %v9277_v29 = vld [vmem:[%s9198_s27 + $0x78] sm:$0xff]  ;;  %v646_v50 = vsel %vm615_vm1, %v584_v38, %v585_v39  ;;  %v650_v57 = vmul.f32 %v9318_v44, %v648_v48 }
  0x4c   : > { %v9280_v30 = vld [vmem:[%s9198_s27 + $0x80] sm:$0xff]  ;;  %v9283_v31 = vld [vmem:[%s9198_s27 + $0xa8] sm:$0xff]  ;;  %v9286_v32 = vld [vmem:[%s9198_s27 + $0xb0] sm:$0xff]  ;;  %v7105_v34 = vpack.i.bf16 %v9274_v28, %v9264_v24  ;;  %v652_v58 = vmul.f32 %v9318_v44, %v646_v50  ;;  %v591_v60 = vrot.slane %v9241_v16, 1  ;;  %v647_v61 = vsel %vm615_vm1, %v583_v37, %v584_v38 }
  0x4d   : > { %7076 = vrot.lane.b32.xlu1 %v7075_v11, %s9008_s20  ;;  %v9289_v33 = vld [vmem:[%s9198_s27 + $0x98] sm:$0xff]  ;;  %v7100_v35 = vpack.i.bf16 %v9280_v30, %v9277_v29  ;;  %v9299_v36 = vld [vmem:[%s9198_s27 + $0xa0] sm:$0xff]  ;;  %v9305_v40 = vld [vmem:[%s9198_s27 + $0xc8] sm:$0xff]  ;;  %v7115_v42 = vpack.i.bf16 %v9286_v32, %v9283_v31  ;;  %v644_v62 = vsel %vm615_vm1, %v586_v47, %v587_v49  ;;  %v642_v3 = vsel %vm615_vm1, %v588_v53, %v589_v54 }
  0x4e   : > { %7066 = vrot.lane.b32.xlu0 %v7065_v12, %s9008_s20  ;;  %v9308_v41 = vld [vmem:[%s9198_s27 + $0xd0] sm:$0xff]  ;;  %v7110_v43 = vpack.i.bf16 %v9299_v36, %v9289_v33  ;;  %v9321_v45 = vld [vmem:[%s9198_s27 + $0xb8] sm:$0xff]  ;;  %v9324_v46 = vld [vmem:[%s9198_s27 + $0xc0] sm:$0xff]  ;;  %v592_v5 = vrot.slane %v9232_v13, 1  ;;  %v593_v10 = vrot.slane %v9235_v14, 1  ;;  %v7135_v12 = vpack.i.bf16 %v650_v57, %v14812_v4 }
  0x4f   : > { %v7125_v51 = vpack.i.bf16 %v9308_v41, %v9305_v40  ;;  %v7120_v52 = vpack.i.bf16 %v9324_v46, %v9321_v45  ;;  %v9341_v55 = vld [vmem:[%s9198_s27 + $0xd8] sm:$0xff]  ;;  %v9344_v56 = vld [vmem:[%s9198_s27 + $0xe0] sm:$0xff]  ;;  %v9363_v11 = vld [vmem:[%s9198_s27 + $0xe8] sm:$0xff]  ;;  %v654_v25 = vmul.f32 %v9318_v44, %v644_v62  ;;  %v643_v37 = vsel %vm615_vm1, %v587_v49, %v588_v53 }
  0x50   : > { %v7130_v63 = vpack.i.bf16 %v9344_v56, %v9341_v55  ;;  %v638_v38 = vsel %vm615_vm1, %v592_v5, %v593_v10  ;;  %v598_v49 = vrot.slane %v9277_v29, 1  ;;  %v600_v57 = vrot.slane %v9264_v24, 1 }
  0x51   : > { %7086 = vrot.lane.b32.xlu1 %v7085_v18, %s9008_s20  ;;  %v9366_v18 = vpack.i.bf16 %v652_v58, %v647_v61  ;;  %v601_v58 = vrot.slane %v9274_v28, 1  ;;  %v602_v61 = vrot.slane %v9289_v33, 1  ;;  %v603_v62 = vrot.slane %v9299_v36, 1 }
  0x52   : > { %7081 = vrot.lane.b32.xlu0 %v7080_v19, %s9008_s20  ;;  %v645_v19 = vsel %vm615_vm1, %v585_v39, %v586_v47  ;;  %v596_v39 = vrot.slane %v9252_v20, 1  ;;  %v641_v47 = vsel %vm615_vm1, %v589_v54, %v590_v59 }
  0x53   : > { %15173 = vst [vmem:[#allocation12_spill] sm:$0xff] %v9366_v18 }
  0x55   : > { %7096 = vrot.lane.b32.xlu1 %v7095_v26, %s9008_s20  ;;  %v656_v26 = vmul.f32 %v9318_v44, %v642_v3 }
  0x56   : > { %7091 = vrot.lane.b32.xlu0 %v7090_v27, %s9008_s20  ;;  %v640_v27 = vsel %vm615_vm1, %v590_v59, %v591_v60  ;;  %v639_v59 = vsel %vm615_vm1, %v591_v60, %v592_v5 }
  0x57   : > { %v658_v48 = vmul.f32 %v9318_v44, %v640_v27  ;;  %v9390_v50 = vpack.i.bf16 %v656_v26, %v643_v37  ;;  %v605_v26 = vrot.slane %v9286_v32, 1 }
  0x59   : > { %7106 = vrot.lane.b32.xlu1 %v7105_v34, %s9008_s20  ;;  %v594_v34 = vrot.slane %v9258_v22, 1  ;;  %15174 = vst [vmem:[#allocation13_spill] sm:$0xff] %v9390_v50 }
  0x5a   : > { %7101 = vrot.lane.b32.xlu0 %v7100_v35, %s9008_s20  ;;  %v595_v35 = vrot.slane %v9261_v23, 1 }
  0x5b   : > { %v637_v3 = vsel %vm615_vm1, %v593_v10, %v594_v34  ;;  %v604_v10 = vrot.slane %v9283_v31, 1 }
  0x5c   : > { %v636_v53 = vsel %vm615_vm1, %v594_v34, %v595_v35  ;;  %v635_v5 = vsel %vm615_vm1, %v595_v35, %v596_v39  ;;  %v630_v34 = vsel %vm615_vm1, %v600_v57, %v601_v58 }
  0x5d   : > { %7116 = vrot.lane.b32.xlu1 %v7115_v42, %s9008_s20  ;;  %v597_v42 = vrot.slane %v9255_v21, 1 }
  0x5e   : > { %7111 = vrot.lane.b32.xlu0 %v7110_v43, %s9008_s20  ;;  %v9385_v43 = vpack.i.bf16 %v654_v25, %v645_v19 }
  0x5f   : > { %v634_v54 = vsel %vm615_vm1, %v596_v39, %v597_v42 }
  0x60   : > { %v664_v19 = vmul.f32 %v9318_v44, %v634_v54  ;;  %v668_v54 = vmul.f32 %v9318_v44, %v630_v34 }
  0x61   : > { %7126 = vrot.lane.b32.xlu1 %v7125_v51, %s9008_s20  ;;  %v660_v51 = vmul.f32 %v9318_v44, %v638_v38  ;;  %v606_v38 = vrot.slane %v9321_v45, 1 }
  0x62   : > { %7121 = vrot.lane.b32.xlu0 %v7120_v52, %s9008_s20  ;;  %v599_v52 = vrot.slane %v9280_v30, 1  ;;  %v9438_v39 = vpack.i.bf16 %v664_v19, %v635_v5  ;;  %v611_v19 = vrot.slane %v9344_v56, 1  ;;  %v629_v5 = vsel %vm615_vm1, %v601_v58, %v602_v61 }
  0x63   : > { %v9420_v60 = vpack.i.bf16 %v660_v51, %v639_v59  ;;  %v633_v51 = vsel %vm615_vm1, %v597_v42, %v598_v49  ;;  %v626_v59 = vsel %vm615_vm1, %v604_v10, %v605_v26  ;;  %v627_v58 = vsel %vm615_vm1, %v603_v62, %v604_v10 }
  0x64   : > { %v632_v25 = vsel %vm615_vm1, %v598_v49, %v599_v52  ;;  %15178 = vst [vmem:[#allocation17_spill] sm:$0xff] %v9438_v39  ;;  %v631_v42 = vsel %vm615_vm1, %v599_v52, %v600_v57  ;;  %v610_v49 = vrot.slane %v9341_v55, 1  ;;  %v672_v27 = vmul.f32 %v9318_v44, %v626_v59 }
  0x65   : > { %775 = vrot.lane.b32.xlu1 %v9363_v11, %s9008_s20  ;;  %15176 = vst [vmem:[#allocation15_spill] sm:$0xff] %v9420_v60  ;;  %v666_v37 = vmul.f32 %v9318_v44, %v632_v25  ;;  %v9471_v57 = vpack.i.bf16 %v668_v54, %v631_v42  ;;  %v625_v59 = vsel %vm615_vm1, %v605_v26, %v606_v38  ;;  %v15185_v26 = vrot.slane %v9220_v8, 7 }
  0x66   : > { %7131 = vrot.lane.b32.xlu0 %v7130_v63, %s9008_s20  ;;  %v9408_v63 = vpack.i.bf16 %v658_v48, %v641_v47  ;;  %v607_v47 = vrot.slane %v9324_v46, 1  ;;  %v9434_v48 = vld [vmem:[%s9198_s27 + $0xf0] sm:$0xff]  ;;  %v620_v10 = vsel %vm615_vm1, %v610_v49, %v611_v19  ;;  %s9014_s20 = smov 28  }
  0x67   : > { %v9457_v25 = vpack.i.bf16 %v666_v37, %v633_v51  ;;  %v613_v52 = vrot.slane %v9434_v48, 1  ;;  %15180 = vst [vmem:[#allocation19_spill] sm:$0xff] %v9471_v57  ;;  %v484_v37 = vrot.slane %v9223_v9, 7  ;;  %v15181_v51 = vmov 0.0  }
  0x68   : > { %15175 = vst [vmem:[#allocation14_spill] sm:$0xff] %v9408_v63  ;;  %v624_v4 = vsel %vm615_vm1, %v606_v38, %v607_v47  ;;  %v482_v38 = vrot.slane %v9207_v2, 7 }
  0x69   : > { %7141 = vrot.lane.b32.xlu1 %v9366_v18, %s15163_s26  ;;  %15179 = vst [vmem:[#allocation18_spill] sm:$0xff] %v9457_v25  ;;  %v674_v54 = vmul.f32 %v9318_v44, %v624_v4  ;;  %v485_v4 = vrot.slane %v9201_v0, 7 }
  0x6a   : > { %7136 = vrot.lane.b32.xlu0 %v7135_v12, %s15163_s26  ;;  %v662_v12 = vmul.f32 %v9318_v44, %v636_v53  ;;  %v628_v53 = vsel %vm615_vm1, %v602_v61, %v603_v62 }
  0x6b   : > { %v670_v34 = vmul.f32 %v9318_v44, %v628_v53  ;;  %v9481_v53 = vsel %vm406_vm2, 1.0, %v15181_v51 }
  0x6c   : > { %v9436_v35 = vpack.i.bf16 %v662_v12, %v637_v3  ;;  %v608_v3 = vrot.slane %v9305_v40, 1  ;;  %v609_v12 = vrot.slane %v9308_v41, 1  ;;  %15182 = vst [vmem:[#allocation20_spill] sm:$0xff] %v9481_v53 }
  0x6d   : > { %7151 = vrot.lane.b32.xlu1 %v9390_v50, %s15163_s26  ;;  %v9491_v42 = vpack.i.bf16 %v670_v34, %v629_v5  ;;  %v487_v5 = vrot.slane %v9214_v6, 7  ;;  %v488_v34 = vrot.slane %v9217_v7, 7  ;;  %v9527_v50 = vld [vmem:[%s9198_s27 + $0xf8] sm:$0xff] }
  0x6e   : > { %7146 = vrot.lane.b32.xlu0 %v9385_v43, %s15163_s26  ;;  %15177 = vst [vmem:[#allocation16_spill] sm:$0xff] %v9436_v35  ;;  %v622_v61 = vsel %vm615_vm1, %v608_v3, %v609_v12  ;;  %v623_v62 = vsel %vm615_vm1, %v607_v47, %v608_v3  ;;  %v678_v3 = vmul.f32 %v9318_v44, %v620_v10  ;;  %v486_v10 = vrot.slane %v9204_v1, 7 }
  0x6f   : > { %15183 = vst [vmem:[#allocation21_spill] sm:$0xff] %v9491_v42  ;;  %v676_v51 = vmul.f32 %v9318_v44, %v622_v61  ;;  %v621_v61 = vsel %vm615_vm1, %v609_v12, %v610_v49  ;;  %v489_v12 = vrot.slane %v9238_v15, 7  ;;  %v614_v49 = vrot.slane %v9527_v50, 1 }
  0x71   : > { %7161 = vrot.lane.b32.xlu1 %v9420_v60, %s15163_s26  ;;  %v612_v60 = vrot.slane %v9363_v11, 1 }
  0x72   : > { %7156 = vrot.lane.b32.xlu0 %v9408_v63, %s15163_s26  ;;  %v495_v63 = vrot.slane %v9252_v20, 7 }
  0x75   : > { %7171 = vrot.lane.b32.xlu1 %v9438_v39, %s15163_s26  ;;  %v9493_v39 = vpack.i.bf16 %v672_v27, %v627_v58  ;;  %v545_v27 = vsel %vm514_vm3, %v15185_v26, %v484_v37  ;;  %v9513_v58 = vpack.i.bf16 %v674_v54, %v625_v59  ;;  %v619_v26 = vsel %vm615_vm1, %v611_v19, %v612_v60 }
  0x76   : > { %7166 = vrot.lane.b32.xlu0 %v9436_v35, %s15163_s26  ;;  %v618_v35 = vsel %vm615_vm1, %v612_v60, %v613_v52  ;;  %v9523_v47 = vmul.f32 %v9481_v53, %v545_v27  ;;  %v547_v60 = vsel %vm514_vm3, 0.0, %v482_v38  ;;  %v9541_v19 = vpack.i.bf16 %v678_v3, %v621_v61 }
  0x77   : > { %15184 = vst [vmem:[#allocation22_spill] sm:$0xff] %v9493_v39  ;;  %15186 = vst [vmem:[#allocation23_spill] sm:$0xff] %v9513_v58  ;;  %v512_v54 = vrot.slane %v9434_v48, 7  ;;  %v492_v27 = vrot.slane %v9235_v14, 7  ;;  %v15192_v3 = vrot.slane %v9220_v8, 7  ;;  %v9562_v59 = vmul.f32 %v9481_v53, %v547_v60 }
  0x78   : > { %15188 = vst [vmem:[#allocation25_spill] sm:$0xff] %v9523_v47  ;;  %15190 = vst [vmem:[#allocation27_spill] sm:$0xff] %v9541_v19  ;;  %v616_v60 = vsel %vm615_vm1, %v614_v49, 0.0 }
  0x79   : > { %7181 = vrot.lane.b32.xlu1 %v9471_v57, %s15163_s26  ;;  %v680_v57 = vmul.f32 %v9318_v44, %v618_v35  ;;  %v9535_v35 = vsel %vm514_vm3, %v484_v37, %v485_v4  ;;  %v491_v37 = vrot.slane %v9232_v13, 7  ;;  %v9559_v61 = vsel %vm514_vm3, %v482_v38, %v15192_v3  ;;  %15194 = vst [vmem:[#allocation30_spill] sm:$0xff] %v9562_v59 }
  0x7a   : > { %7176 = vrot.lane.b32.xlu0 %v9457_v25, %s15163_s26  ;;  %v9518_v25 = vpack.i.bf16 %v676_v51, %v623_v62  ;;  %15189 = vst [vmem:[#allocation26_spill] sm:$0xff] %v9535_v35  ;;  %v541_v51 = vsel %vm514_vm3, %v487_v5, %v488_v34  ;;  %15193 = vst [vmem:[#allocation29_spill] sm:$0xff] %v9559_v61  ;;  %v490_v38 = vrot.slane %v9241_v16, 7  ;;  %v15197_v3 = vrot.slane %v9363_v11, 7 }
  0x7b   : > { %v9547_v62 = vpack.i.bf16 %v680_v57, %v619_v26  ;;  %v543_v57 = vsel %vm514_vm3, %v485_v4, %v486_v10  ;;  %v9572_v26 = vsel %vm514_vm3, %v488_v34, %v489_v12  ;;  %v682_v34 = vmul.f32 %v9318_v44, %v616_v60 }
  0x7c   : > { %15187 = vst [vmem:[#allocation24_spill] sm:$0xff] %v9518_v25  ;;  %15195 = vst [vmem:[#allocation31_spill] sm:$0xff] %v9572_v26  ;;  %v537_v4 = vsel %vm514_vm3, %v491_v37, %v492_v27 }
  0x7d   : > { %7191 = vrot.lane.b32.xlu1 %v9493_v39, %s15163_s26  ;;  %15191 = vst [vmem:[#allocation28_spill] sm:$0xff] %v9547_v62  ;;  %v9553_v39 = vpack.i.bf16 %v9535_v35, %v9523_v47  ;;  %v9575_v47 = vmul.f32 %v9481_v53, %v541_v51  ;;  %v517_v35 = vsel %vm514_vm3, %v15197_v3, %v512_v54  ;;  %v496_v3 = vrot.slane %v9255_v21, 7 }
  0x7e   : > { %7186 = vrot.lane.b32.xlu0 %v9491_v42, %s15163_s26  ;;  %v9590_v51 = vsel %vm514_vm3, %v486_v10, %v487_v5  ;;  %v493_v42 = vrot.slane %v9258_v22, 7  ;;  %v539_v5 = vsel %vm514_vm3, %v489_v12, %v490_v38  ;;  %v494_v10 = vrot.slane %v9261_v23, 7 }
  0x7f   : > { %15196 = vst [vmem:[#allocation32_spill] sm:$0xff] %v9575_v47  ;;  %15198 = vst [vmem:[#allocation33_spill] sm:$0xff] %v9590_v51  ;;  %v497_v12 = vrot.slane %v9277_v29, 7 }
  0x81   : > { %7201 = vrot.lane.b32.xlu1 %v9518_v25, %s15163_s26  ;;  %v617_v25 = vsel %vm615_vm1, %v613_v52, %v614_v49  ;;  %v7215_v52 = vpack.i.bf16 %v9559_v61, %v9562_v59  ;;  %v580_v49 = vmul.f32 %v9481_v53, %v517_v35  ;;  %v9625_v61 = vmul.f32 %v9481_v53, %v537_v4 }
  0x82   : > { %7196 = vrot.lane.b32.xlu0 %v9513_v58, %s15163_s26  ;;  %v9593_v58 = vmul.f32 %v9481_v53, %v543_v57  ;;  %v9600_v18 = vpack.i.bf16 %v682_v34, %v617_v25  ;;  %v9614_v25 = vpack.i.bf16 %v9572_v26, %v9575_v47  ;;  %v15201_v57 = vrot.slane %v9527_v50, 7 }
  0x83   : > { %15202 = vst [vmem:[#allocation36_spill] sm:$0xff] %v9625_v61  ;;  %v9632_v35 = vsel %vm514_vm3, %v492_v27, %v493_v42  ;;  %v9636_v26 = vsel %vm514_vm3, %v490_v38, %v491_v37  ;;  %v535_v27 = vsel %vm514_vm3, %v493_v42, %v494_v10  ;;  %v499_v4 = vrot.slane %v9264_v24, 7 }
  0x84   : > { %15199 = vst [vmem:[#allocation34_spill] sm:$0xff] %v9593_v58  ;;  %15200 = vst [vmem:[#allocation35_spill] sm:$0xff] %v9600_v18  ;;  %v516_v60 = vsel %vm514_vm3, %v512_v54, %v15201_v57  ;;  %v9622_v34 = vpack.i.bf16 %v9590_v51, %v9593_v58  ;;  %v9639_v54 = vmul.f32 %v9481_v53, %v539_v5  ;;  %v500_v37 = vrot.slane %v9274_v28, 7 }
  0x85   : > { %7211 = vrot.lane.b32.xlu1 %v9547_v62, %s15163_s26  ;;  %v9628_v59 = vpack.i.bf16 %v516_v60, %v580_v49  ;;  %15203 = vst [vmem:[#allocation37_spill] sm:$0xff] %v9632_v35  ;;  %15204 = vst [vmem:[#allocation38_spill] sm:$0xff] %v9636_v26  ;;  %v533_v57 = vsel %vm514_vm3, %v495_v63, %v496_v3  ;;  %v498_v38 = vrot.slane %v9280_v30, 7  ;;  %v501_v51 = vrot.slane %v9289_v33, 7 }
  0x86   : > { %7206 = vrot.lane.b32.xlu0 %v9541_v19, %s15163_s26  ;;  %15205 = vst [vmem:[#allocation39_spill] sm:$0xff] %v9639_v54  ;;  %v9653_v5 = vpack.i.bf16 %v9632_v35, %v9625_v61  ;;  %v9657_v49 = vsel %vm514_vm3, %v496_v3, %v497_v12  ;;  %v9664_v42 = vmul.f32 %v9481_v53, %v533_v57  ;;  %v503_v57 = vrot.slane %v9283_v31, 7 }
  0x87   : > { %15207 = vst [vmem:[#allocation41_spill] sm:$0xff] %v9657_v49  ;;  %v9667_v60 = vmul.f32 %v9481_v53, %v535_v27  ;;  %v529_v3 = vsel %vm514_vm3, %v499_v4, %v500_v37  ;;  %v531_v35 = vsel %vm514_vm3, %v497_v12, %v498_v38  ;;  %v9682_v27 = vsel %vm514_vm3, %v494_v10, %v495_v63 }
  0x88   : > { %15206 = vst [vmem:[#allocation40_spill] sm:$0xff] %v9653_v5  ;;  %15208 = vst [vmem:[#allocation42_spill] sm:$0xff] %v9664_v42  ;;  %v9687_v61 = vpack.i.bf16 %v9657_v49, %v9664_v42  ;;  %v9691_v47 = vsel %vm514_vm3, %v500_v37, %v501_v51  ;;  %v9694_v12 = vmul.f32 %v9481_v53, %v529_v3  ;;  %v505_v37 = vrot.slane %v9321_v45, 7 }
  0x89   : > { %7221 = vrot.lane.b32.xlu1 %v9553_v39, %s9010_s25  ;;  %15209 = vst [vmem:[#allocation43_spill] sm:$0xff] %v9667_v60  ;;  %15210 = vst [vmem:[#allocation44_spill] sm:$0xff] %v9682_v27  ;;  %v9697_v58 = vmul.f32 %v9481_v53, %v531_v35  ;;  %v9705_v63 = vpack.i.bf16 %v9682_v27, %v9667_v60  ;;  %v9709_v10 = vsel %vm514_vm3, %v498_v38, %v499_v4 }
  0x8a   : > { %7216 = vrot.lane.b32.xlu0 %v7215_v52, %s9010_s25  ;;  %v9661_v52 = vpack.i.bf16 %v9636_v26, %v9639_v54  ;;  %v504_v54 = vrot.slane %v9286_v32, 7  ;;  %v502_v26 = vrot.slane %v9299_v36, 7  ;;  %15211 = vst [vmem:[#allocation45_spill] sm:$0xff] %v9691_v47  ;;  %15212 = vst [vmem:[#allocation46_spill] sm:$0xff] %v9694_v12  ;;  %v507_v49 = vrot.slane %v9305_v40, 7 }
  0x8b   : > { %15213 = vst [vmem:[#allocation47_spill] sm:$0xff] %v9697_v58  ;;  %15214 = vst [vmem:[#allocation48_spill] sm:$0xff] %v9709_v10  ;;  %v508_v42 = vrot.slane %v9308_v41, 7  ;;  %v9721_v60 = vpack.i.bf16 %v9691_v47, %v9694_v12  ;;  %v9725_v4 = vpack.i.bf16 %v9709_v10, %v9697_v58  ;;  %v510_v27 = vrot.slane %v9344_v56, 7 }
  0x8c   : > { %v525_v35 = vsel %vm514_vm3, %v503_v57, %v504_v54  ;;  %v527_v3 = vsel %vm514_vm3, %v501_v51, %v502_v26  ;;  %v9736_v51 = vsel %vm514_vm3, %v504_v54, %v505_v37  ;;  %v9740_v47 = vsel %vm514_vm3, %v502_v26, %v503_v57 }
  0x8d   : > { %7231 = vrot.lane.b32.xlu1 %v9614_v25, %s9010_s25  ;;  %v9728_v38 = vmul.f32 %v9481_v53, %v525_v35  ;;  %15216 = vst [vmem:[#allocation50_spill] sm:$0xff] %v9736_v51  ;;  %v9743_v58 = vmul.f32 %v9481_v53, %v527_v3  ;;  %v509_v35 = vrot.slane %v9341_v55, 7  ;;  %v521_v10 = vsel %vm514_vm3, %v507_v49, %v508_v42 }
  0x8e   : > { %7226 = vrot.lane.b32.xlu0 %v9622_v34, %s9010_s25  ;;  %v9764_v57 = vmul.f32 %v9481_v53, %v521_v10 }
  0x8f   : > { %15215 = vst [vmem:[#allocation49_spill] sm:$0xff] %v9728_v38  ;;  %v9753_v54 = vpack.i.bf16 %v9736_v51, %v9728_v38  ;;  %v9761_v26 = vpack.i.bf16 %v9740_v47, %v9743_v58  ;;  %v9771_v3 = vsel %vm514_vm3, %v508_v42, %v509_v35  ;;  %v519_v38 = vsel %vm514_vm3, %v509_v35, %v510_v27 }
  0x90   : > { %15217 = vst [vmem:[#allocation51_spill] sm:$0xff] %v9771_v3 }
  0x91   : > { %7241 = vrot.lane.b32.xlu1 %v9653_v5, %s9010_s25  ;;  %v506_v5 = vrot.slane %v9324_v46, 7 }
  0x92   : > { %7236 = vrot.lane.b32.xlu0 %v9661_v52, %s9010_s25 }
  0x93   : > { %v523_v12 = vsel %vm514_vm3, %v505_v37, %v506_v5  ;;  %v9775_v51 = vsel %vm514_vm3, %v506_v5, %v507_v49  ;;  %v9792_v5 = vmul.f32 %v9481_v53, %v519_v38  ;;  %v15219_v49 = vrot.slane %v9363_v11, 7 }
  0x94   : > { %v9767_v37 = vmul.f32 %v9481_v53, %v523_v12  ;;  %v9785_v12 = vpack.i.bf16 %v9771_v3, %v9764_v57  ;;  %v15221_v38 = vpack.i.bf16 %v9220_v8, %v9207_v2  ;;  %v7305_v3 = vpack.i.bf16 %v9214_v6, %v9204_v1 }
  0x95   : > { %7251 = vrot.lane.b32.xlu1 %v9687_v61, %s9010_s25  ;;  %15218 = vst [vmem:[#allocation52_spill] sm:$0xff] %v9792_v5  ;;  %v9798_v10 = vsel %vm514_vm3, %v510_v27, %v15219_v49  ;;  %v7300_v27 = vpack.i.bf16 %v9201_v0, %v9223_v9  ;;  %v7310_v49 = vpack.i.bf16 %v9238_v15, %v9217_v7 }
  0x96   : > { %7246 = vrot.lane.b32.xlu0 %v9705_v63, %s9010_s25  ;;  %v9789_v42 = vpack.i.bf16 %v9775_v51, %v9767_v37  ;;  %15220 = vst [vmem:[#allocation53_spill] sm:$0xff] %v9798_v10  ;;  %v9806_v35 = vpack.i.bf16 %v9798_v10, %v9792_v5  ;;  %v7320_v0 = vpack.i.bf16 %v9258_v22, %v9235_v14  ;;  %v8818_v10 = vld [vmem:[%s9198_s27 + $0xd0] sm:$0xff] }
  0x97   : > { %v7315_v9 = vpack.i.bf16 %v9232_v13, %v9241_v16  ;;  %v7330_v2 = vpack.i.bf16 %v9277_v29, %v9255_v21  ;;  %v7325_v1 = vpack.i.bf16 %v9252_v20, %v9261_v23  ;;  %v7340_v6 = vpack.i.bf16 %v9289_v33, %v9274_v28 }
  0x98   : > { %v7335_v7 = vpack.i.bf16 %v9264_v24, %v9280_v30  ;;  %v7350_v8 = vpack.i.bf16 %v9321_v45, %v9286_v32  ;;  %v7345_v13 = vpack.i.bf16 %v9283_v31, %v9299_v36  ;;  %v7360_v16 = vpack.i.bf16 %v9341_v55, %v9308_v41  ;;  %v15222_v32 = vld [vmem:[#allocation12_spill] sm:$0xff]  ;;  %v15224_v41 = vld [vmem:[#allocation13_spill] sm:$0xff] }
  0x99   : > { %7261 = vrot.lane.b32.xlu1 %v9721_v60, %s9010_s25  ;;  %v7355_v20 = vpack.i.bf16 %v9305_v40, %v9324_v46  ;;  %v9865_v23 = vpack.i.bf16 %v9527_v50, %v9434_v48  ;;  %v7365_v24 = vpack.i.bf16 %v9363_v11, %v9344_v56  ;;  %v15223_v40 = vld [vmem:[#allocation14_spill] sm:$0xff]  ;;  %v15225_v55 = vld [vmem:[#allocation16_spill] sm:$0xff]  ;;  %v15226_v56 = vld [vmem:[#allocation15_spill] sm:$0xff] }
  0x9a   : > { %7256 = vrot.lane.b32.xlu0 %v9725_v4, %s9010_s25 }
  0x9d   : > { %7271 = vrot.lane.b32.xlu1 %v9753_v54, %s9010_s25 }
  0x9e   : > { %7266 = vrot.lane.b32.xlu0 %v9761_v26, %s9010_s25 }
  0xa1   : > { %7281 = vrot.lane.b32.xlu1 %v9785_v12, %s9010_s25 }
  0xa2   : > { %7276 = vrot.lane.b32.xlu0 %v9789_v42, %s9010_s25 }
  0xa5   : > { %7291 = vrot.lane.b32.xlu1 %v9628_v59, %s9010_s25 }
  0xa6   : > { %7286 = vrot.lane.b32.xlu0 %v9806_v35, %s9010_s25  ;;  %s9925_s25 = scalar_lea.vmem %s14802_s1, %s6533_s14 }
  0xa9   : > { %7301 = vrot.lane.b32.xlu1 %v7300_v27, %s9011_s24  ;;  %v15228_v27 = vld [vmem:[#allocation17_spill] sm:$0xff] }
  0xaa   : > { %7296 = vrot.lane.b32.xlu0 %v15221_v38, %s9011_s24 }
  0xad   : > { %7311 = vrot.lane.b32.xlu1 %v7310_v49, %s9011_s24 }
  0xae   : > { %7306 = vrot.lane.b32.xlu0 %v7305_v3, %s9011_s24  ;;  %v15227_v3 = vld [vmem:[#allocation18_spill] sm:$0xff] }
  0xb1   : > { %7321 = vrot.lane.b32.xlu1 %v7320_v0, %s9011_s24  ;;  %v15230_v0 = vld [vmem:[#allocation21_spill] sm:$0xff] }
  0xb2   : > { %7316 = vrot.lane.b32.xlu0 %v7315_v9, %s9011_s24  ;;  %v15231_v9 = vld [vmem:[#allocation19_spill] sm:$0xff] }
  0xb5   : > { %7331 = vrot.lane.b32.xlu1 %v7330_v2, %s9011_s24 }
  0xb6   : > { %7326 = vrot.lane.b32.xlu0 %v7325_v1, %s9011_s24 }
  0xb9   : > { %7341 = vrot.lane.b32.xlu1 %v7340_v6, %s9011_s24  ;;  %v15234_v6 = vld [vmem:[#allocation23_spill] sm:$0xff] }
  0xba   : > { %7336 = vrot.lane.b32.xlu0 %v7335_v7, %s9011_s24  ;;  %v15235_v7 = vld [vmem:[#allocation22_spill] sm:$0xff] }
  0xbb   : > { %v9847_v14 = vpop.permute.xlu1 %7071 }
  0xbc   : > { %v9849_v15 = vpop.permute.xlu0 %7061 }
  0xbd   : > { %7351 = vrot.lane.b32.xlu1 %v7350_v8, %s9011_s24  ;;  %v9932_v8 = vld [vmem:[%s9925_s25 + $0x30] sm:$0xff] }
  0xbe   : > { %7346 = vrot.lane.b32.xlu0 %v7345_v13, %s9011_s24 }
  0xbf   : > { %v9857_v21 = vpop.permute.xlu1 %7076 }
  0xc0   : > { %v9859_v22 = vpop.permute.xlu0 %7066 }
  0xc1   : > { %7361 = vrot.lane.b32.xlu1 %v7360_v16, %s9011_s24 }
  0xc2   : > { %7356 = vrot.lane.b32.xlu0 %v7355_v20, %s9011_s24  ;;  %v14867_v20 = vrot.slane %v9932_v8, 1 }
  0xc3   : > { %v9869_v28 = vpop.permute.xlu1 %7086 }
  0xc4   : > { %v9871_v29 = vpop.permute.xlu0 %7081 }
  0xc5   : > { %7371 = vrot.lane.b32.xlu1 %v9865_v23, %s9011_s24 }
  0xc6   : > { %7366 = vrot.lane.b32.xlu0 %v7365_v24, %s9011_s24  ;;  %v9940_v24 = vld [vmem:[%s9925_s25 + $0x28] sm:$0xff] }
  0xc7   : > { %v9876_v30 = vpop.permute.xlu1 %7096 }
  0xc8   : > { %v9878_v31 = vpop.permute.xlu0 %7091 }
  0xc9   : > { %7381 = vrot.lane.b32.xlu1 %v9385_v43, %s9012_s16 }
  0xca   : > { %7376 = vrot.lane.b32.xlu0 %v15222_v32, %s9012_s16  ;;  %v15238_v32 = vld [vmem:[#allocation24_spill] sm:$0xff] }
  0xcb   : > { %v9884_v33 = vpop.permute.xlu1 %7106 }
  0xcc   : > { %v9886_v36 = vpop.permute.xlu0 %7101 }
  0xcd   : > { %7391 = vrot.lane.b32.xlu1 %v15223_v40, %s9012_s16 }
  0xce   : > { %7386 = vrot.lane.b32.xlu0 %v15224_v41, %s9012_s16 }
  0xcf   : > { %v9892_v45 = vpop.permute.xlu1 %7116 }
  0xd0   : > { %v9894_v46 = vpop.permute.xlu0 %7111 }
  0xd1   : > { %7401 = vrot.lane.b32.xlu1 %v15225_v55, %s9012_s16 }
  0xd2   : > { %7396 = vrot.lane.b32.xlu0 %v15226_v56, %s9012_s16 }
  0xd3   : > { %v9900_v11 = vpop.permute.xlu1 %7126 }
  0xd4   : > { %v9902_v48 = vpop.permute.xlu0 %7121 }
  0xd5   : > { %7411 = vrot.lane.b32.xlu1 %v15227_v3, %s9012_s16 }
  0xd6   : > { %7406 = vrot.lane.b32.xlu0 %v15228_v27, %s9012_s16 }
  0xd7   : > { %v9908_v38 = vpop.permute.xlu1 %775 }
  0xd8   : > { %15229 = vst [vmem:[#allocation12_spill] sm:$0xff] %v9908_v38  ;;  %v9910_v49 = vpop.permute.xlu0 %7131  ;;  %v8819_v38 = vld [vmem:[%s9198_s27 + $0xd8] sm:$0xff] }
  0xd9   : > { %7421 = vrot.lane.b32.xlu1 %v15230_v0, %s9012_s16 }
  0xda   : > { %7416 = vrot.lane.b32.xlu0 %v15231_v9, %s9012_s16 }
  0xdb   : > { %v9918_v1 = vpop.permute.xlu1 %7141 }
  0xdc   : > { %v9916_v2 = vpop.permute.xlu0 %7136  ;;  %15233 = vst [vmem:[#allocation13_spill] sm:$0xff] %v9918_v1 }
  0xdd   : > { %15232 = vst [vmem:[#allocation14_spill] sm:$0xff] %v9916_v2  ;;  %7431 = vrot.lane.b32.xlu1 %v15234_v6, %s9012_s16  ;;  %v1936_v6 = vrot.slane %v9940_v24, 1  ;;  %v8817_v2 = vld [vmem:[%s9198_s27 + $0xe8] sm:$0xff] }
  0xde   : > { %7426 = vrot.lane.b32.xlu0 %v15235_v7, %s9012_s16 }
  0xdf   : > { %v9936_v16 = vpop.permute.xlu1 %7151 }
  0xe0   : > { %v9934_v13 = vpop.permute.xlu0 %7146  ;;  %15237 = vst [vmem:[#allocation15_spill] sm:$0xff] %v9936_v16  ;;  %v1989_v16 = vsel %vm615_vm1, %v1936_v6, %v14867_v20 }
  0xe1   : > { %15236 = vst [vmem:[#allocation16_spill] sm:$0xff] %v9934_v13  ;;  %7441 = vrot.lane.b32.xlu1 %v9541_v19, %s9012_s16  ;;  %v9952_v13 = vld [vmem:[%s9925_s25 + $0x20] sm:$0xff] }
  0xe2   : > { %7436 = vrot.lane.b32.xlu0 %v15238_v32, %s9012_s16  ;;  %v14869_v19 = vrot.slane %v9952_v13, 1 }
  0xe3   : > { %v9949_v0 = vpop.permute.xlu1 %7161 }
  0xe4   : > { %v9947_v1 = vpop.permute.xlu0 %7156  ;;  %15240 = vst [vmem:[#allocation17_spill] sm:$0xff] %v9949_v0  ;;  %v9970_v0 = vsel %vm615_vm1, %v14869_v19, %v1936_v6  ;;  %v8625_v6 = vld [vmem:[%s14805_s4 + $0x80] sm:$0xff]  }
  0xe5   : > { %15239 = vst [vmem:[#allocation18_spill] sm:$0xff] %v9947_v1  ;;  %7451 = vrot.lane.b32.xlu1 %v9600_v18, %s9012_s16  ;;  %v9964_v1 = vmul.f32 %v9318_v44, %v1989_v16  ;;  %15242 = vst [vmem:[#allocation54_spill] sm:$0xff] %v9970_v0  ;;  %v9986_v16 = vld [vmem:[%s9925_s25 + $0x58] sm:$0xff]  ;;  %v462_v19 = vld [vmem:[%s9925_s25 + $0x60] sm:$0xff]  ;;  %6926 = vmatprep.subr.bf16.mxu1 %v8625_v6 }
  0xe6   : > { %7446 = vrot.lane.b32.xlu0 %v9547_v62, %s9012_s16  ;;  %15245 = vst [vmem:[#allocation57_spill] sm:$0xff] %v9986_v16  ;;  %v1942_v18 = vrot.slane %v9986_v16, 1  ;;  %v9995_v0 = vld [vmem:[%s9925_s25 + $0x50] sm:$0xff]  ;;  %6928 = vmatpush3.bf16.msra.mxu1 %v8625_v6  ;;  %s9016_s16 = smov 64  }
  0xe7   : > { %15241 = vst [vmem:[#allocation19_spill] sm:$0xff] %v9964_v1  ;;  %v9974_v20 = vpop.permute.xlu1 %7171  ;;  %v1943_v1 = vrot.slane %v462_v19, 1 }
  0xe8   : > { %v9972_v32 = vpop.permute.xlu0 %7166  ;;  %15244 = vst [vmem:[#allocation56_spill] sm:$0xff] %v9974_v20 }
  0xe9   : > { %15243 = vst [vmem:[#allocation55_spill] sm:$0xff] %v9972_v32  ;;  %7461 = vrot.lane.b32.xlu1 %v9622_v34, %s9013_s28  ;;  %v463_v34 = vld [vmem:[%s9925_s25 + $0x68] sm:$0xff]  ;;  %v1983_v19 = vsel %vm615_vm1, %v1942_v18, %v1943_v1 }
  0xea   : > { %7456 = vrot.lane.b32.xlu0 %v9553_v39, %s9013_s28  ;;  %v464_v39 = vld [vmem:[%s9925_s25 + $0x70] sm:$0xff]  ;;  %v1944_v7 = vrot.slane %v463_v34, 1 }
  0xeb   : > { %v9991_v20 = vpop.permute.xlu1 %7181  ;;  %v1945_v5 = vrot.slane %v464_v39, 1  ;;  %v465_v39 = vld [vmem:[%s9925_s25 + $0x78] sm:$0xff] }
  0xec   : > { %v9989_v32 = vpop.permute.xlu0 %7176  ;;  %15247 = vst [vmem:[#allocation59_spill] sm:$0xff] %v9991_v20  ;;  %v14882_v20 = vrot.slane %v9995_v0, 1 }
  0xed   : > { %15246 = vst [vmem:[#allocation58_spill] sm:$0xff] %v9989_v32  ;;  %7471 = vrot.lane.b32.xlu1 %v9661_v52, %s9013_s28  ;;  %v8626_v32 = vld [vmem:[%s14805_s4 + $0x88] sm:$0xff]  }
  0xee   : > { %7466 = vrot.lane.b32.xlu0 %v9614_v25, %s9013_s28  ;;  %6927 = vmatprep.subr.bf16.mxu1 %v8626_v32  ;;  %v10017_v52 = vsel %vm615_vm1, %v14882_v20, %v1942_v18  ;;  %v10020_v25 = vmul.f32 %v9318_v44, %v1983_v19 }
  0xef   : > { %v10011_v6 = vpop.permute.xlu1 %7191  ;;  %15250 = vst [vmem:[#allocation62_spill] sm:$0xff] %v10017_v52  ;;  %6929 = vmatpush3.bf16.msra.mxu1 %v8626_v32 }
  0xf0   : > { %v10009_v62 = vpop.permute.xlu0 %7186  ;;  %15249 = vst [vmem:[#allocation61_spill] sm:$0xff] %v10011_v6  ;;  %15251 = vst [vmem:[#allocation63_spill] sm:$0xff] %v10020_v25  ;;  %v2905_v6 = vpack.c.bf16 %v10020_v25, %v10017_v52 }
  0xf1   : > { %15248 = vst [vmem:[#allocation60_spill] sm:$0xff] %v10009_v62  ;;  %7481 = vrot.lane.b32.xlu1 %v9705_v63, %s9013_s28  ;;  %v15252_v62 = vld [vmem:[#allocation40_spill] sm:$0xff]  ;;  %v1981_v63 = vsel %vm615_vm1, %v1944_v7, %v1945_v5 }
  0xf2   : > { %7476 = vrot.lane.b32.xlu0 %v15252_v62, %s9013_s28  ;;  %6828 = vmatprep.mubr.msk.bf16.mxu1 %vm1779_vm4, %v2905_v6  ;;  %v10043_v62 = vsel %vm615_vm1, %v1943_v1, %v1944_v7  ;;  %v10046_v32 = vmul.f32 %v9318_v44, %v1981_v63  ;;  %v15259_v1 = vrot.slane %v9527_v50, 7 }
  0xf3   : > { %v10030_v20 = vpop.permute.xlu1 %7201  ;;  %15255 = vst [vmem:[#allocation65_spill] sm:$0xff] %v10043_v62 }
  0xf4   : > { %v10028_v18 = vpop.permute.xlu0 %7196  ;;  %15254 = vst [vmem:[#allocation64_spill] sm:$0xff] %v10030_v20  ;;  %15256 = vst [vmem:[#allocation66_spill] sm:$0xff] %v10046_v32  ;;  %v2908_v34 = vpack.c.bf16 %v10046_v32, %v10043_v62  ;;  %v515_v7 = vsel %vm514_vm3, %v15259_v1, 0.0  ;;  %v469_v1 = vld [vmem:[%s9925_s25 + $0x98] sm:$0xff]  ;;  %v8793_v20 = vld [vmem:[%s9198_s27 + $0x28] sm:$0xff]  ;;  %v7103_v62 = vunpack.i.l.bf16 %v9886_v36 }
  0xf5   : > { %15253 = vst [vmem:[#allocation40_spill] sm:$0xff] %v10028_v18  ;;  %7491 = vrot.lane.b32.xlu1 %v9725_v4, %s9013_s28  ;;  %v466_v4 = vld [vmem:[%s9925_s25 + $0x80] sm:$0xff]  ;;  %v582_v50 = vmul.f32 %v9481_v53, %v515_v7 }
  0xf6   : > { %7486 = vrot.lane.b32.xlu0 %v9687_v61, %s9013_s28  ;;  %v1946_v61 = vrot.slane %v465_v39, 1  ;;  %6829 = vmatmul.mubr.msk.bf16.vlgmr.msra.gmra.mrb[0].mxu1 %vm1779_vm4, %v2908_v34  ;;  %v468_v34 = vld [vmem:[%s9925_s25 + $0x90] sm:$0xff]  ;;  %v470_v7 = vld [vmem:[%s9925_s25 + $0xa0] sm:$0xff] }
  0xf7   : > { %v10051_v6 = vpop.permute.xlu1 %7211 }
  0xf8   : > { %v10049_v19 = vpop.permute.xlu0 %7206  ;;  %15258 = vst [vmem:[#allocation68_spill] sm:$0xff] %v10051_v6  ;;  %v1947_v6 = vrot.slane %v466_v4, 1 }
  0xf9   : > { %15257 = vst [vmem:[#allocation67_spill] sm:$0xff] %v10049_v19  ;;  %7501 = vrot.lane.b32.xlu1 %v9761_v26, %s9013_s28  ;;  %v467_v19 = vld [vmem:[%s9925_s25 + $0x88] sm:$0xff]  ;;  %v10079_v26 = vsel %vm615_vm1, %v1945_v5, %v1946_v61  ;;  %v15266_v5 = vmov 0.0  }
  0xfa   : > { %7496 = vrot.lane.b32.xlu0 %v9721_v60, %s9013_s28  ;;  %v1979_v60 = vsel %vm615_vm1, %v1946_v61, %v1947_v6  ;;  %15262 = vst [vmem:[#allocation71_spill] sm:$0xff] %v10079_v26  ;;  %v7530_v61 = vpack.i.bf16 %v15266_v5, %v582_v50 }
  0xfb   : > { %v10065_v63 = vpop.permute.xlu1 %7221 }
  0xfc   : > { %15260 = vst [vmem:[#allocation69_spill] sm:$0xff] %v10065_v63  ;;  %v10067_v52 = vpop.permute.xlu0 %7216  ;;  %v8792_v63 = vld [vmem:[%s9198_s27 + $0x20] sm:$0xff] }
  0xfd   : > { %15261 = vst [vmem:[#allocation70_spill] sm:$0xff] %v10067_v52  ;;  %7511 = vrot.lane.b32.xlu1 %v9789_v42, %s9013_s28  ;;  %v10087_v42 = vmul.f32 %v9318_v44, %v1979_v60  ;;  %v7540_v50 = vpack.i.bf16 %v8793_v20, %v8792_v63  ;;  %v471_v63 = vld [vmem:[%s9925_s25 + $0xa8] sm:$0xff] }
  0xfe   : > { %7506 = vrot.lane.b32.xlu0 %v9753_v54, %s9013_s28  ;;  %v1948_v54 = vrot.slane %v467_v19, 1  ;;  %v1950_v19 = vrot.slane %v469_v1, 1 }
  0xff   : > { %v10082_v39 = vpop.permute.xlu1 %7231  ;;  %15265 = vst [vmem:[#allocation74_spill] sm:$0xff] %v10087_v42 }
 0x100   : > { %15263 = vst [vmem:[#allocation72_spill] sm:$0xff] %v10082_v39  ;;  %v10084_v4 = vpop.permute.xlu0 %7226  ;;  %v1949_v39 = vrot.slane %v468_v34, 1  ;;  %v10109_v18 = vsel %vm615_vm1, %v1947_v6, %v1948_v54  ;;  %v8794_v34 = vld [vmem:[%s9198_s27 + $0x18] sm:$0xff] }
 0x101   : > { %15264 = vst [vmem:[#allocation73_spill] sm:$0xff] %v10084_v4  ;;  %7521 = vrot.lane.b32.xlu1 %v9806_v35, %s9013_s28  ;;  %v2911_v4 = vpack.c.bf16 %v10087_v42, %v10079_v26  ;;  %15269 = vst [vmem:[#allocation77_spill] sm:$0xff] %v10109_v18  ;;  %v15341_v42 = vld [vmem:[#allocation45_spill] sm:$0xff] }
 0x102   : > { %7516 = vrot.lane.b32.xlu0 %v9785_v12, %s9013_s28  ;;  %v1977_v35 = vsel %vm615_vm1, %v1948_v54, %v1949_v39  ;;  %v1951_v12 = vrot.slane %v470_v7, 1  ;;  %v10123_v6 = vsel %vm615_vm1, %v1949_v39, %v1950_v19  ;;  %v8796_v39 = vld [vmem:[%s9198_s27 + $0x48] sm:$0xff] }
 0x103   : > { %v10098_v60 = vpop.permute.xlu1 %7241  ;;  %6832 = vmatprep.mubr.msk.bf16.mxu1 %vm1779_vm4, %v2911_v4  ;;  %v8795_v4 = vld [vmem:[%s9198_s27 + $0x10] sm:$0xff]  ;;  %v10117_v1 = vmul.f32 %v9318_v44, %v1977_v35  ;;  %15271 = vst [vmem:[#allocation79_spill] sm:$0xff] %v10123_v6 }
 0x104   : > { %15267 = vst [vmem:[#allocation75_spill] sm:$0xff] %v10098_v60  ;;  %v10100_v52 = vpop.permute.xlu0 %7236  ;;  %v1975_v20 = vsel %vm615_vm1, %v1950_v19, %v1951_v12  ;;  %v472_v35 = vld [vmem:[%s9925_s25 + $0xb0] sm:$0xff]  ;;  %v8797_v19 = vld [vmem:[%s9198_s27 + $0x40] sm:$0xff]  ;;  %v1952_v60 = vrot.slane %v471_v63, 1 }
 0x105   : > { %15268 = vst [vmem:[#allocation76_spill] sm:$0xff] %v10100_v52  ;;  %7531 = vrot.lane.b32.xlu1 %v7530_v61, %s9013_s28  ;;  %v7535_v52 = vpack.i.bf16 %v8794_v34, %v8795_v4  ;;  %15270 = vst [vmem:[#allocation78_spill] sm:$0xff] %v10117_v1  ;;  %v2914_v7 = vpack.c.bf16 %v10117_v1, %v10109_v18  ;;  %v10133_v61 = vmul.f32 %v9318_v44, %v1975_v20  ;;  %v8798_v4 = vld [vmem:[%s9198_s27 + $0x30] sm:$0xff]  ;;  %v8801_v63 = vld [vmem:[%s9198_s27 + $0x60] sm:$0xff] }
 0x106   : > { %7526 = vrot.lane.b32.xlu0 %v9628_v59, %s9013_s28  ;;  %v7550_v34 = vpack.i.bf16 %v8796_v39, %v8797_v19  ;;  %v1953_v39 = vrot.slane %v472_v35, 1  ;;  %v10152_v19 = vld [vmem:[%s9925_s25 + $0xc0] sm:$0xff]  ;;  %s14420_s28 = scalar_lea.vmem [#allocation6], %s9178_s23 }
 0x107   : > { %v10126_v54 = vpop.permute.xlu1 %7251  ;;  %15274 = vst [vmem:[#allocation82_spill] sm:$0xff] %v10133_v61  ;;  %v2917_v20 = vpack.c.bf16 %v10133_v61, %v10123_v6  ;;  %6833 = vmatmul.mubr.msk.bf16.gmra.mrb[4].mxu1 %vm1779_vm4, %v2914_v7  ;;  %v8802_v7 = vld [vmem:[%s9198_s27 + $0x50] sm:$0xff]  ;;  %v8816_v18 = vld [vmem:[%s9198_s27 + $0xe0] sm:$0xff] }
 0x108   : > { %15272 = vst [vmem:[#allocation80_spill] sm:$0xff] %v10126_v54  ;;  %v10128_v59 = vpop.permute.xlu0 %7246 }
 0x109   : > { %15273 = vst [vmem:[#allocation81_spill] sm:$0xff] %v10128_v59  ;;  %7541 = vrot.lane.b32.xlu1 %v7540_v50, %s9014_s20  ;;  %v8799_v59 = vld [vmem:[%s9198_s27 + $0x38] sm:$0xff]  ;;  %6836 = vmatprep.mubr.msk.bf16.mxu1 %vm1779_vm4, %v2917_v20  ;;  %v1973_v20 = vsel %vm615_vm1, %v1952_v60, %v1953_v39 }
 0x10a   : > { %7536 = vrot.lane.b32.xlu0 %v7535_v52, %s9014_s20  ;;  %v7545_v54 = vpack.i.bf16 %v8799_v59, %v8798_v4  ;;  %v473_v50 = vld [vmem:[%s9925_s25 + $0xb8] sm:$0xff]  ;;  %v8800_v59 = vld [vmem:[%s9198_s27 + $0x68] sm:$0xff] }
 0x10b   : > { %v10146_v1 = vpop.permute.xlu1 %7261  ;;  %v7560_v4 = vpack.i.bf16 %v8800_v59, %v8801_v63  ;;  %v1954_v35 = vrot.slane %v473_v50, 1  ;;  %v10171_v59 = vmul.f32 %v9318_v44, %v1973_v20  ;;  %v1955_v63 = vrot.slane %v10152_v19, 1 }
 0x10c   : > { %15275 = vst [vmem:[#allocation83_spill] sm:$0xff] %v10146_v1  ;;  %v10148_v52 = vpop.permute.xlu0 %7256  ;;  %v8803_v1 = vld [vmem:[%s9198_s27 + $0x58] sm:$0xff] }
 0x10d   : > { %15276 = vst [vmem:[#allocation84_spill] sm:$0xff] %v10148_v52  ;;  %7551 = vrot.lane.b32.xlu1 %v7550_v34, %s9014_s20  ;;  %v7555_v61 = vpack.i.bf16 %v8803_v1, %v8802_v7  ;;  %v10164_v52 = vsel %vm615_vm1, %v1951_v12, %v1952_v60  ;;  %15280 = vst [vmem:[#allocation88_spill] sm:$0xff] %v10171_v59  ;;  %v8804_v1 = vld [vmem:[%s9198_s27 + $0x88] sm:$0xff]  ;;  %v8805_v7 = vld [vmem:[%s9198_s27 + $0x80] sm:$0xff]  ;;  %v1971_v20 = vsel %vm615_vm1, %v1954_v35, %v1955_v63 }
 0x10e   : > { %7546 = vrot.lane.b32.xlu0 %v7545_v54, %s9014_s20  ;;  %15277 = vst [vmem:[#allocation85_spill] sm:$0xff] %v10164_v52  ;;  %v7570_v6 = vpack.i.bf16 %v8804_v1, %v8805_v7  ;;  %v8806_v60 = vld [vmem:[%s9198_s27 + $0x70] sm:$0xff]  ;;  %v8807_v12 = vld [vmem:[%s9198_s27 + $0x78] sm:$0xff]  ;;  %v10186_v19 = vsel %vm615_vm1, %v1953_v39, %v1954_v35  ;;  %v8809_v39 = vld [vmem:[%s9198_s27 + $0xa0] sm:$0xff] }
 0x10f   : > { %v10166_v34 = vpop.permute.xlu1 %7271  ;;  %v7565_v50 = vpack.i.bf16 %v8807_v12, %v8806_v60  ;;  %15281 = vst [vmem:[#allocation89_spill] sm:$0xff] %v10186_v19  ;;  %v476_v1 = vld [vmem:[%s9925_s25 + $0xd0] sm:$0xff]  ;;  %v10196_v60 = vmul.f32 %v9318_v44, %v1971_v20  ;;  %v8811_v20 = vld [vmem:[%s9198_s27 + $0x98] sm:$0xff] }
 0x110   : > { %15278 = vst [vmem:[#allocation86_spill] sm:$0xff] %v10166_v34  ;;  %v10168_v54 = vpop.permute.xlu0 %7266  ;;  %v8808_v34 = vld [vmem:[%s9198_s27 + $0xa8] sm:$0xff] }
 0x111   : > { %15279 = vst [vmem:[#allocation87_spill] sm:$0xff] %v10168_v54  ;;  %7561 = vrot.lane.b32.xlu1 %v7560_v4, %s9014_s20  ;;  %v2920_v54 = vpack.c.bf16 %v10171_v59, %v10164_v52  ;;  %v475_v4 = vld [vmem:[%s9925_s25 + $0xc8] sm:$0xff]  ;;  %15284 = vst [vmem:[#allocation92_spill] sm:$0xff] %v10196_v60  ;;  %v7580_v35 = vpack.i.bf16 %v8808_v34, %v8809_v39  ;;  %v2923_v12 = vpack.c.bf16 %v10196_v60, %v10186_v19  ;;  %v8627_v34 = vld [vmem:[%s14804_s3] sm:$0xff]  }
 0x112   : > { %7556 = vrot.lane.b32.xlu0 %v7555_v61, %s9014_s20  ;;  %v1956_v25 = vrot.slane %v475_v4, 1  ;;  %v8813_v39 = vld [vmem:[%s9198_s27 + $0xc0] sm:$0xff]  ;;  %v8814_v52 = vld [vmem:[%s9198_s27 + $0xb0] sm:$0xff]  ;;  %v7600_v60 = vpack.i.bf16 %v8817_v2, %v8816_v18  ;;  %v477_v4 = vld [vmem:[%s9925_s25 + $0xd8] sm:$0xff]  ;;  %6852 = vmatprep.subr.bf16.mxu1 %v8627_v34 }
 0x113   : > { %v10190_v7 = vpop.permute.xlu1 %7281  ;;  %6837 = vmatmul.mubr.msk.bf16.gmra.mrb[8].mxu1 %vm1779_vm4, %v2920_v54  ;;  %v8810_v54 = vld [vmem:[%s9198_s27 + $0x90] sm:$0xff]  ;;  %v1958_v18 = vrot.slane %v477_v4, 1 }
 0x114   : > { %15282 = vst [vmem:[#allocation90_spill] sm:$0xff] %v10190_v7  ;;  %v10192_v61 = vpop.permute.xlu0 %7276  ;;  %v1957_v7 = vrot.slane %v476_v1, 1  ;;  %v478_v1 = vld [vmem:[%s9925_s25 + $0xe0] sm:$0xff]  ;;  %6840 = vmatprep.mubr.msk.bf16.mxu1 %vm1779_vm4, %v2923_v12  ;;  %v479_v12 = vld [vmem:[%s9925_s25 + $0xe8] sm:$0xff]  ;;  %6853 = vmatpush3.bf16.msra.mxu1 %v8627_v34 }
 0x115   : > { %15283 = vst [vmem:[#allocation91_spill] sm:$0xff] %v10192_v61  ;;  %7571 = vrot.lane.b32.xlu1 %v7570_v6, %s9014_s20  ;;  %v7575_v61 = vpack.i.bf16 %v8811_v20, %v8810_v54  ;;  %v10212_v6 = vmul.f32 0.0, %v9481_v53  ;;  %v8815_v54 = vld [vmem:[%s9198_s27 + $0xb8] sm:$0xff]  ;;  %v7595_v53 = vpack.i.bf16 %v8819_v38, %v8818_v10  ;;  %v8628_v38 = vld [vmem:[%s14804_s3 + $0x8] sm:$0xff]   ;;  %v7064_v10 = vunpack.i.h.bf16 %v9849_v15 }
 0x116   : > { %7566 = vrot.lane.b32.xlu0 %v7565_v50, %s9014_s20  ;;  %v8812_v50 = vld [vmem:[%s9198_s27 + $0xc8] sm:$0xff]  ;;  %v7585_v20 = vpack.i.bf16 %v8815_v54, %v8814_v52  ;;  %v10233_v52 = vsel %vm615_vm1, %v1955_v63, %v1956_v25  ;;  %v7073_v63 = vunpack.i.l.bf16 %v9847_v14  ;;  %6854 = vmatprep.subr.bf16.mxu1 %v8628_v38 }
 0x117   : > { %15285 = vst [vmem:[#allocation93_spill] sm:$0xff] %v10212_v6  ;;  %v7590_v59 = vpack.i.bf16 %v8812_v50, %v8813_v39  ;;  %v10222_v19 = vpop.permute.xlu1 %7291  ;;  %v1969_v50 = vsel %vm615_vm1, %v1956_v25, %v1957_v7  ;;  %15288 = vst [vmem:[#allocation96_spill] sm:$0xff] %v10233_v52  ;;  %v1959_v39 = vrot.slane %v478_v1, 1  ;;  %v7074_v25 = vunpack.i.h.bf16 %v9847_v14 }
 0x118   : > { %15286 = vst [vmem:[#allocation94_spill] sm:$0xff] %v10222_v19  ;;  %v10224_v16 = vpop.permute.xlu0 %7286  ;;  %v10238_v2 = vmul.f32 %v9318_v44, %v1969_v50  ;;  %v10261_v14 = vsel %vm615_vm1, %v1957_v7, %v1958_v18  ;;  %v481_v7 = vld [vmem:[%s9925_s25 + $0xf8] sm:$0xff]  ;;  %6855 = vmatpush3.bf16.msra.mxu1 %v8628_v38 }
 0x119   : > { %15287 = vst [vmem:[#allocation95_spill] sm:$0xff] %v10224_v16  ;;  %7581 = vrot.lane.b32.xlu1 %v7580_v35, %s9014_s20  ;;  %v480_v35 = vld [vmem:[%s9925_s25 + $0xf0] sm:$0xff]  ;;  %v1967_v50 = vsel %vm615_vm1, %v1958_v18, %v1959_v39  ;;  %15292 = vst [vmem:[#allocation100_spill] sm:$0xff] %v10261_v14  ;;  %v15295_v16 = vld [vmem:[#allocation34_spill] sm:$0xff]  ;;  %v1962_v38 = vrot.slane %v481_v7, 1 }
 0x11a   : > { %7576 = vrot.lane.b32.xlu0 %v7575_v61, %s9014_s20  ;;  %15289 = vst [vmem:[#allocation97_spill] sm:$0xff] %v10238_v2  ;;  %v7063_v61 = vunpack.i.l.bf16 %v9849_v15  ;;  %v2926_v1 = vpack.c.bf16 %v10238_v2, %v10233_v52  ;;  %v10266_v34 = vmul.f32 %v9318_v44, %v1967_v50  ;;  %v15294_v2 = vld [vmem:[#allocation26_spill] sm:$0xff]  ;;  %v10274_v15 = vsel %vm1548_vm5, %v15295_v16, %v7074_v25 }
 0x11b   : > { %v10250_v54 = vpop.permute.xlu1 %7301  ;;  %v10270_v52 = vsel %vm1548_vm5, %v15294_v2, %v7073_v63  ;;  %v15298_v25 = vld [vmem:[#allocation30_spill] sm:$0xff]  ;;  %v7069_v50 = vunpack.i.h.bf16 %v9859_v22  ;;  %v1963_v7 = vsel %vm615_vm1, %v1962_v38, 0.0 }
 0x11c   : > { %15290 = vst [vmem:[#allocation98_spill] sm:$0xff] %v10250_v54  ;;  %v10252_v4 = vpop.permute.xlu0 %7296  ;;  %15293 = vst [vmem:[#allocation101_spill] sm:$0xff] %v10266_v34  ;;  %v1961_v54 = vrot.slane %v480_v35, 1  ;;  %6841 = vmatmul.mubr.msk.bf16.gmra.mrb[12].mxu1 %vm1779_vm4, %v2926_v1  ;;  %v2929_v2 = vpack.c.bf16 %v10266_v34, %v10261_v14  ;;  %v10295_v63 = vsel %vm1548_vm5, %v15298_v25, %v7064_v10  ;;  %v7079_v35 = vunpack.i.h.bf16 %v9857_v21 }
 0x11d   : > { %15291 = vst [vmem:[#allocation99_spill] sm:$0xff] %v10252_v4  ;;  %7591 = vrot.lane.b32.xlu1 %v7590_v59, %s9014_s20  ;;  %v1960_v4 = vrot.slane %v479_v12, 1  ;;  %v10280_v59 = vsel %vm1548_vm5, %v10212_v6, %v7063_v61  ;;  %v7068_v34 = vunpack.i.l.bf16 %v9859_v22  ;;  %v7089_v25 = vunpack.i.h.bf16 %v9869_v28 }
 0x11e   : > { %7586 = vrot.lane.b32.xlu0 %v7585_v20, %s9014_s20  ;;  %v10283_v20 = vsel %vm1548_vm5, 0.0, %v7063_v61  ;;  %v7078_v61 = vunpack.i.l.bf16 %v9857_v21  ;;  %v7088_v21 = vunpack.i.l.bf16 %v9869_v28  ;;  %6844 = vmatprep.mubr.msk.bf16.mxu1 %vm1779_vm4, %v2929_v2  ;;  %v8629_v28 = vld [vmem:[%s14804_s3 + $0x10] ss:$0 sps:$4 sm:$0x33]  }
 0x11f   : > { %v10285_v18 = vpop.permute.xlu1 %7311  ;;  %v1965_v16 = vsel %vm615_vm1, %v1960_v4, %v1961_v54  ;;  %v10301_v1 = vsel %vm615_vm1, %v1959_v39, %v1960_v4  ;;  %v7084_v39 = vunpack.i.h.bf16 %v9871_v29  ;;  %v683_v4 = vmul.f32 0.0, %v9318_v44  ;;  %v15304_v2 = vld [vmem:[#allocation33_spill] sm:$0xff]  ;;  %6994 = vmatprep.subr.msk.bf16.mxu1 %vm3517_vm6, %v8629_v28 }
 0x120   : > { %15296 = vst [vmem:[#allocation26_spill] sm:$0xff] %v10285_v18  ;;  %v10287_v12 = vpop.permute.xlu0 %7306  ;;  %15299 = vst [vmem:[#allocation30_spill] sm:$0xff] %v10301_v1  ;;  %v10308_v10 = vmul.f32 %v9318_v44, %v1965_v16  ;;  %v15303_v16 = vld [vmem:[#allocation32_spill] sm:$0xff]  ;;  %v10332_v6 = vsel %vm1548_vm5, %v15304_v2, %v7078_v61  ;;  %v15307_v18 = vld [vmem:[#allocation29_spill] sm:$0xff]  ;;  %v7098_v2 = vunpack.i.l.bf16 %v9876_v30 }
 0x121   : > { %15297 = vst [vmem:[#allocation34_spill] sm:$0xff] %v10287_v12  ;;  %7601 = vrot.lane.b32.xlu1 %v7600_v60, %s9014_s20  ;;  %v10328_v14 = vsel %vm1548_vm5, %v15303_v16, %v7079_v35  ;;  %v10348_v35 = vsel %vm1548_vm5, %v15307_v18, %v7068_v34  ;;  %v10358_v61 = vld [vmem:[%s9925_s25] sm:$0xff]  ;;  %v15311_v34 = vld [vmem:[#allocation38_spill] sm:$0xff] }
 0x122   : > { %7596 = vrot.lane.b32.xlu0 %v7595_v53, %s9014_s20  ;;  %15300 = vst [vmem:[#allocation102_spill] sm:$0xff] %v10308_v10  ;;  %v2932_v60 = vpack.c.bf16 %v10308_v10, %v10301_v1  ;;  %v10340_v10 = vsel %vm615_vm1, %v1961_v54, %v1962_v38  ;;  %v15306_v1 = vld [vmem:[#allocation25_spill] sm:$0xff]  ;;  %v10361_v54 = vmul.f32 %v9318_v44, %v1963_v7  ;;  %v15312_v38 = vld [vmem:[#allocation39_spill] sm:$0xff]  ;;  %v7099_v7 = vunpack.i.h.bf16 %v9876_v30 }
 0x123   : > { %v10315_v22 = vpop.permute.xlu1 %7321  ;;  %15305 = vst [vmem:[#allocation32_spill] sm:$0xff] %v10340_v10  ;;  %v10344_v12 = vsel %vm1548_vm5, %v15306_v1, %v7069_v50  ;;  %v15309_v1 = vld [vmem:[#allocation36_spill] sm:$0xff]  ;;  %v10369_v18 = vsel %vm1548_vm5, %v15311_v34, %v7088_v21  ;;  %v10373_v16 = vsel %vm1548_vm5, %v15312_v38, %v7084_v39  ;;  %v15315_v34 = vld [vmem:[#allocation31_spill] sm:$0xff]  ;;  %v10398_v19 = vpack.i.bf16 %v10358_v61, %v15266_v5 }
 0x124   : > { %15301 = vst [vmem:[#allocation103_spill] sm:$0xff] %v10315_v22  ;;  %v10317_v53 = vpop.permute.xlu0 %7316  ;;  %v10336_v22 = vld [vmem:[%s9925_s25 + $0x8] sm:$0xff]  ;;  %15308 = vst [vmem:[#allocation33_spill] sm:$0xff] %v10361_v54  ;;  %v10365_v50 = vsel %vm1548_vm5, %v15309_v1, %v7089_v25  ;;  %6845 = vmatmul.mubr.msk.bf16.gmra.mrb[16].mxu1 %vm1779_vm4, %v2932_v60  ;;  %v7094_v25 = vunpack.i.h.bf16 %v9878_v31  ;;  %v2935_v39 = vpack.c.bf16 %v10361_v54, %v10340_v10  ;;  %v7093_v60 = vunpack.i.l.bf16 %v9878_v31 }
 0x125   : > { %15302 = vst [vmem:[#allocation104_spill] sm:$0xff] %v10317_v53  ;;  %v7083_v53 = vunpack.i.l.bf16 %v9871_v29  ;;  %1418 = vrot.lane.b32.xlu1 %v15266_v5, %s9014_s20  ;;  %v10355_v29 = vld [vmem:[%s9925_s25 + $0x10] sm:$0xff]  ;;  %15310 = vst [vmem:[#allocation25_spill] sm:$0xff] %v10365_v50  ;;  %v3519_v31 = vsel %vm3517_vm6, %v8629_v28, 0  ;;  %v7104_v30 = vunpack.i.h.bf16 %v9886_v36  ;;  %v1932_v54 = vrot.slane %v10336_v22, 1  ;;  %v15319_v28 = vld [vmem:[#allocation44_spill] sm:$0xff] }
 0x126   : > { %7606 = vrot.lane.b32.xlu0 %v9865_v23, %s9014_s20  ;;  %v10376_v23 = vpack.i.bf16 %v683_v4, %v15266_v5  ;;  %15316 = vst [vmem:[#allocation38_spill] sm:$0xff] %v10398_v19  ;;  %s9015_s20 = smov 32   ;;  %6848 = vmatprep.mubr.msk.bf16.mxu1 %vm1779_vm4, %v2935_v39  ;;  %v10425_v19 = vsel %vm1548_vm5, %v15319_v28, %v7098_v2  ;;  %v15323_v50 = vld [vmem:[#allocation37_spill] sm:$0xff]  ;;  %v15325_v36 = vld [vmem:[#allocation46_spill] sm:$0xff]  ;;  %v7114_v2 = vunpack.i.h.bf16 %v9894_v46 }
 0x127   : > { %v10382_v1 = vpop.permute.xlu1 %7331  ;;  %v10391_v38 = vsel %vm1548_vm5, %v15315_v34, %v7083_v53  ;;  %v10407_v53 = vld [vmem:[%s9925_s25 + $0x18] sm:$0xff]  ;;  %v15320_v34 = vld [vmem:[#allocation43_spill] sm:$0xff]  ;;  %6857 = vmatpush3.bf16.msra.mxu1 %v3519_v31 }
 0x128   : > { %15313 = vst [vmem:[#allocation29_spill] sm:$0xff] %v10382_v1  ;;  %v10384_v21 = vpop.permute.xlu0 %7326  ;;  %v7108_v1 = vunpack.i.l.bf16 %v9884_v33  ;;  %v10429_v32 = vsel %vm1548_vm5, %v15320_v34, %v7094_v25  ;;  %v10446_v34 = vld [vmem:[%s9925_s25 + $0x48] sm:$0xff]  ;;  %v10463_v25 = vld [vmem:[%s9925_s25 + $0x38] sm:$0xff] }
 0x129   : > { %15314 = vst [vmem:[#allocation36_spill] sm:$0xff] %v10384_v21  ;;  %v7109_v21 = vunpack.i.h.bf16 %v9884_v33  ;;  %7616 = vrot.lane.b32.xlu1 %v15224_v41, %s9015_s20  ;;  %v1933_v33 = vrot.slane %v10355_v29, 1  ;;  %v10417_v41 = vpack.c.bf16 %v683_v4, %v15266_v5  ;;  %15324 = vst [vmem:[#allocation44_spill] sm:$0xff] %v10446_v34 }
 0x12a   : > { %7611 = vrot.lane.b32.xlu0 %v9385_v43, %s9015_s20  ;;  %v15318_v43 = vld [vmem:[#allocation42_spill] sm:$0xff]  ;;  %15328 = vst [vmem:[#allocation37_spill] sm:$0xff] %v10463_v25 }
 0x12b   : > { %15317 = vst [vmem:[#allocation39_spill] sm:$0xff] %v10417_v41  ;;  %v10421_v10 = vsel %vm1548_vm5, %v15318_v43, %v7099_v7  ;;  %v10432_v39 = vpop.permute.xlu1 %7341  ;;  %v10438_v7 = vsel %vm1548_vm5, %v15323_v50, %v7093_v60  ;;  %v10450_v28 = vsel %vm1548_vm5, %v15325_v36, %v7109_v21  ;;  %v7119_v50 = vunpack.i.h.bf16 %v9892_v45  ;;  %v10466_v43 = vld [vmem:[%s9925_s25 + $0x40] sm:$0xff] }
 0x12c   : > { %15321 = vst [vmem:[#allocation31_spill] sm:$0xff] %v10432_v39  ;;  %v10434_v4 = vpop.permute.xlu0 %7336  ;;  %15326 = vst [vmem:[#allocation43_spill] sm:$0xff] %v10450_v28  ;;  %v7118_v60 = vunpack.i.l.bf16 %v9892_v45  ;;  %v15330_v21 = vld [vmem:[#allocation47_spill] sm:$0xff]  ;;  %v1931_v45 = vrot.slane %v10358_v61, 1  ;;  %6849 = vmatmul.mubr.msk.bf16.gmra.mrb[20].mxu1 %vm1779_vm4, %v10417_v41  ;;  %v7113_v28 = vunpack.i.l.bf16 %v9894_v46  ;;  %v1836_v41 = vrot.slane %v10407_v53, 7 }
 0x12d   : > { %15322 = vst [vmem:[#allocation42_spill] sm:$0xff] %v10434_v4  ;;  %v15327_v4 = vld [vmem:[#allocation48_spill] sm:$0xff]  ;;  %7626 = vrot.lane.b32.xlu1 %v15226_v56, %s9015_s20  ;;  %15329 = vst [vmem:[#allocation46_spill] sm:$0xff] %v10466_v43  ;;  %v10470_v36 = vsel %vm1548_vm5, %v15330_v21, %v7104_v30  ;;  %v15332_v56 = vld [vmem:[#allocation41_spill] sm:$0xff]  ;;  %v1835_v21 = vrot.slane %v10355_v29, 7 }
 0x12e   : > { %v10454_v31 = vsel %vm1548_vm5, %v15327_v4, %v7108_v1  ;;  %7621 = vrot.lane.b32.xlu0 %v15223_v40, %s9015_s20  ;;  %15331 = vst [vmem:[#allocation48_spill] sm:$0xff] %v10470_v36  ;;  %v1993_v4 = vsel %vm615_vm1, %v1932_v54, %v1933_v33  ;;  %v10480_v40 = vsel %vm1548_vm5, %v15332_v56, %v7103_v62  ;;  %v1995_v56 = vsel %vm615_vm1, 0.0, %v1931_v45  ;;  %v15335_v36 = vld [vmem:[#allocation49_spill] sm:$0xff] }
 0x12f   : > { %v10483_v39 = vpop.permute.xlu1 %7351  ;;  %v7129_v1 = vunpack.i.h.bf16 %v9900_v11  ;;  %v10511_v46 = vmul.f32 %v9318_v44, %v1993_v4  ;;  %v7128_v62 = vunpack.i.l.bf16 %v9900_v11  ;;  %v1996_v11 = vmul.f32 %v9318_v44, %v1995_v56 }
 0x130   : > { %15333 = vst [vmem:[#allocation47_spill] sm:$0xff] %v10483_v39  ;;  %v10485_v30 = vpop.permute.xlu0 %7346  ;;  %v10499_v39 = vsel %vm1548_vm5, %v15335_v36, %v7119_v50  ;;  %v7124_v50 = vunpack.i.h.bf16 %v9902_v48  ;;  %v7123_v36 = vunpack.i.l.bf16 %v9902_v48  ;;  %v15340_v48 = vrot.slane %v10336_v22, 7 }
 0x131   : > { %15334 = vst [vmem:[#allocation41_spill] sm:$0xff] %v10485_v30  ;;  %v10503_v30 = vsel %vm1548_vm5, %v9740_v47, %v7118_v60  ;;  %7636 = vrot.lane.b32.xlu1 %v15228_v27, %s9015_s20  ;;  %v15336_v47 = vrot.slane %v10407_v53, 1  ;;  %v10524_v27 = vsel %vm1548_vm5, %v9743_v58, %v7114_v2  ;;  %v10542_v58 = vsel %vm615_vm1, %v1931_v45, %v1932_v54  ;;  %v15343_v54 = vld [vmem:[#allocation50_spill] sm:$0xff]  ;;  %v15346_v45 = vld [vmem:[#allocation12_spill] sm:$0xff] }
 0x132   : > { %7631 = vrot.lane.b32.xlu0 %v15225_v55, %s9015_s20  ;;  %v1895_v26 = vsel %vm514_vm3, %v15340_v48, %v1835_v21  ;;  %v1833_v2 = vrot.slane %v10358_v61, 7  ;;  %v10548_v56 = vsel %vm1548_vm5, %v9764_v57, %v7129_v1  ;;  %v7133_v48 = vunpack.i.l.bf16 %v9910_v49  ;;  %v8630_v61 = vld [vmem:[%s14805_s4 + $0x40] sm:$0xff]  }
 0x133   : > { %v10520_v60 = vsel %vm615_vm1, %v1933_v33, %v15336_v47  ;;  %v10526_v55 = vpop.permute.xlu1 %7361  ;;  %v10538_v33 = vsel %vm1548_vm5, %v15341_v42, %v7113_v28  ;;  %v1837_v47 = vrot.slane %v9952_v13, 7  ;;  %15342 = vst [vmem:[#allocation45_spill] sm:$0xff] %v10548_v56  ;;  %v10563_v57 = vsel %vm1548_vm5, %v9775_v51, %v7128_v62  ;;  %v8631_v1 = vld [vmem:[%s14805_s4] sm:$0xff]   ;;  %v15347_v42 = vld [vmem:[#allocation53_spill] sm:$0xff]  ;;  %6537 = vmatprep.subr.bf16.mxu0 %v8630_v61 }
 0x134   : > { %15337 = vst [vmem:[#allocation49_spill] sm:$0xff] %v10520_v60  ;;  %15338 = vst [vmem:[#allocation105_spill] sm:$0xff] %v10526_v55  ;;  %v10528_v4 = vpop.permute.xlu0 %7356  ;;  %v10582_v51 = vsel %vm1548_vm5, %v15347_v42, %v15346_v45  ;;  %v15354_v55 = vld [vmem:[#allocation14_spill] sm:$0xff]  ;;  %v1897_v42 = vsel %vm514_vm3, 0.0, %v1833_v2  ;;  %v1838_v45 = vrot.slane %v9940_v24, 7  ;;  %6538 = vmatpush3.bf16.msra.mxu0 %v8631_v1  ;;  %v15362_v1 = vld [vmem:[#allocation13_spill] sm:$0xff] }
 0x135   : > { %15339 = vst [vmem:[#allocation106_spill] sm:$0xff] %v10528_v4  ;;  %v7134_v4 = vunpack.i.h.bf16 %v9910_v49  ;;  %7646 = vrot.lane.b32.xlu1 %v15231_v9, %s9015_s20  ;;  %v10567_v49 = vsel %vm1548_vm5, %v9767_v37, %v7124_v50  ;;  %v10571_v9 = vsel %vm1548_vm5, %v15343_v54, %v7123_v36  ;;  %v10591_v54 = vpack.i.bf16 %v1996_v11, %v15266_v5  ;;  %v15355_v36 = vld [vmem:[#allocation52_spill] sm:$0xff]  ;;  %v15357_v5 = vld [vmem:[#allocation51_spill] sm:$0xff] }
 0x136   : > { %7641 = vrot.lane.b32.xlu0 %v15227_v3, %s9015_s20  ;;  %v15344_v3 = vld [vmem:[#allocation20_spill] sm:$0xff]  ;;  %v7139_v56 = vunpack.i.h.bf16 %v15354_v55  ;;  %v7138_v61 = vunpack.i.l.bf16 %v15354_v55 }
 0x137   : > { %v10574_v28 = vmul.f32 %v15344_v3, %v1895_v26  ;;  %15348 = vst [vmem:[#allocation20_spill] sm:$0xff] %v10582_v51  ;;  %v10584_v62 = vpop.permute.xlu1 %7371  ;;  %15352 = vst [vmem:[#allocation107_spill] sm:$0xff] %v10591_v54  ;;  %v10595_v26 = vsel %vm514_vm3, %v1835_v21, %v1836_v41  ;;  %v10605_v11 = vsel %vm1548_vm5, %v15355_v36, %v7134_v4  ;;  %v15359_v54 = vld [vmem:[#allocation21_spill] sm:$0xff]  ;;  %v8632_v4 = vld [vmem:[%s14805_s4 + $0x48] sm:$0xff]   ;;  %v7144_v36 = vunpack.i.h.bf16 %v15362_v1 }
 0x138   : > { %15349 = vst [vmem:[#allocation12_spill] sm:$0xff] %v10584_v62  ;;  %v10586_v37 = vpop.permute.xlu0 %7366  ;;  %15353 = vst [vmem:[#allocation108_spill] sm:$0xff] %v10595_v26  ;;  %v10609_v21 = vsel %vm1548_vm5, %v15357_v5, %v7133_v48  ;;  %v15358_v62 = vld [vmem:[#allocation22_spill] sm:$0xff]  ;;  %v7143_v5 = vunpack.i.l.bf16 %v15362_v1  ;;  %v15364_v48 = vrot.slane %v9952_v13, 1  ;;  %v15368_v1 = vrot.slane %v10336_v22, 7  ;;  %6539 = vmatprep.subr.bf16.mxu0 %v8632_v4 }
 0x139   : > { %15345 = vst [vmem:[#allocation50_spill] sm:$0xff] %v10574_v28  ;;  %15350 = vst [vmem:[#allocation53_spill] sm:$0xff] %v10586_v37  ;;  %v1893_v37 = vsel %vm514_vm3, %v1836_v41, %v1837_v47  ;;  %7656 = vrot.lane.b32.xlu1 %v15358_v62, %s9015_s20  ;;  %v10625_v55 = vpack.i.bf16 %v10595_v26, %v10574_v28  ;;  %v15365_v62 = vrot.slane %v10407_v53, 1  ;;  %v8633_v41 = vld [vmem:[%s14805_s4 + $0x8] sm:$0xff]  }
 0x13a   : > { %15356 = vst [vmem:[#allocation14_spill] sm:$0xff] %v10605_v11  ;;  %7651 = vrot.lane.b32.xlu0 %v15359_v54, %s9015_s20  ;;  %v10644_v26 = vsel %vm514_vm3, %v1833_v2, %v15368_v1  ;;  %v10647_v28 = vmul.f32 %v15344_v3, %v1897_v42  ;;  %v10662_v2 = vsel %vm514_vm3, %v1837_v47, %v1838_v45  ;;  %v8634_v47 = vld [vmem:[%s14805_s4 + $0x50] sm:$0xff]  }
 0x13b   : > { %15363 = vst [vmem:[#allocation52_spill] sm:$0xff] %v10625_v55  ;;  %v1991_v54 = vsel %vm615_vm1, %v15365_v62, %v15364_v48  ;;  %v10636_v51 = vpop.permute.xlu1 %7381  ;;  %15369 = vst [vmem:[#allocation21_spill] sm:$0xff] %v10644_v26  ;;  %v10652_v62 = vmul.f32 %v15344_v3, %v1893_v37  ;;  %6540 = vmatpush3.bf16.msra.mxu0 %v8633_v41  ;;  %v10666_v42 = vsel %vm1581_vm7, %v10280_v59, %v7138_v61  ;;  %v15376_v37 = vld [vmem:[#allocation15_spill] sm:$0xff]  ;;  %v15380_v41 = vld [vmem:[#allocation18_spill] sm:$0xff] }
 0x13c   : > { %15366 = vst [vmem:[#allocation51_spill] sm:$0xff] %v10636_v51  ;;  %v10638_v50 = vpop.permute.xlu0 %7376  ;;  %15370 = vst [vmem:[#allocation13_spill] sm:$0xff] %v10647_v28  ;;  %v10656_v51 = vsel %vm1581_vm7, %v10283_v20, %v7139_v56  ;;  %v7154_v1 = vunpack.i.h.bf16 %v15376_v37  ;;  %v7153_v4 = vunpack.i.l.bf16 %v15376_v37  ;;  %v15377_v20 = vld [vmem:[#allocation24_spill] sm:$0xff]  ;;  %v15378_v56 = vld [vmem:[#allocation23_spill] sm:$0xff]  ;;  %v10682_v59 = vsel %vm1581_vm7, %v10295_v63, %v7143_v5  ;;  %6541 = vmatprep.subr.bf16.mxu0 %v8634_v47 }
 0x13d   : > { %15367 = vst [vmem:[#allocation22_spill] sm:$0xff] %v10638_v50  ;;  %15371 = vst [vmem:[#allocation109_spill] sm:$0xff] %v10652_v62  ;;  %v15373_v50 = vld [vmem:[#allocation16_spill] sm:$0xff]  ;;  %7666 = vrot.lane.b32.xlu1 %v15377_v20, %s9015_s20  ;;  %v10686_v61 = vsel %vm1581_vm7, %v10348_v35, %v7144_v36  ;;  %v7159_v37 = vunpack.i.h.bf16 %v15380_v41  ;;  %v1839_v20 = vrot.slane %v9932_v8, 7  ;;  %v10702_v35 = vpack.i.bf16 %v10662_v2, %v10652_v62 }
 0x13e   : > { %15372 = vst [vmem:[#allocation110_spill] sm:$0xff] %v10656_v51  ;;  %v7149_v55 = vunpack.i.h.bf16 %v15373_v50  ;;  %v7148_v11 = vunpack.i.l.bf16 %v15373_v50  ;;  %15374 = vst [vmem:[#allocation16_spill] sm:$0xff] %v10662_v2  ;;  %7661 = vrot.lane.b32.xlu0 %v15378_v56, %s9015_s20  ;;  %v10675_v50 = vmul.f32 %v9318_v44, %v1991_v54  ;;  %v8635_v54 = vld [vmem:[%s14805_s4 + $0x10] sm:$0xff]   ;;  %v7158_v56 = vunpack.i.l.bf16 %v15380_v41 }
 0x13f   : > { %15375 = vst [vmem:[#allocation111_spill] sm:$0xff] %v10666_v42  ;;  %v10694_v48 = vpop.permute.xlu1 %7391  ;;  %15383 = vst [vmem:[#allocation18_spill] sm:$0xff] %v10702_v35  ;;  %v14979_v36 = vrot.slane %v10463_v25, 1  ;;  %6542 = vmatpush3.bf16.msra.mxu0 %v8635_v54  ;;  %v10717_v63 = vsel %vm1581_vm7, %v10332_v6, %v7154_v1  ;;  %v10721_v47 = vsel %vm1581_vm7, %v10274_v15, %v7153_v4  ;;  %v8637_v54 = vld [vmem:[%s14805_s4 + $0x18] sm:$0xff]  }
 0x140   : > { %15379 = vst [vmem:[#allocation15_spill] sm:$0xff] %v10675_v50  ;;  %15381 = vst [vmem:[#allocation24_spill] sm:$0xff] %v10694_v48  ;;  %v10696_v42 = vpop.permute.xlu0 %7386  ;;  %v10707_v5 = vsel %vm1581_vm7, %v10270_v52, %v7149_v55  ;;  %v10711_v41 = vsel %vm1581_vm7, %v10344_v12, %v7148_v11  ;;  %v15384_v48 = vld [vmem:[#allocation17_spill] sm:$0xff]  ;;  %v15385_v52 = vld [vmem:[#allocation28_spill] sm:$0xff]  ;;  %v10734_v6 = vsel %vm1581_vm7, %v10391_v38, %v7159_v37 }
 0x141   : > { %15382 = vst [vmem:[#allocation23_spill] sm:$0xff] %v10696_v42  ;;  %v7164_v42 = vunpack.i.h.bf16 %v15384_v48  ;;  %v7163_v51 = vunpack.i.l.bf16 %v15384_v48  ;;  %7676 = vrot.lane.b32.xlu1 %v15385_v52, %s9015_s20  ;;  %v15386_v55 = vld [vmem:[#allocation27_spill] sm:$0xff]  ;;  %v15387_v12 = vld [vmem:[#allocation54_spill] sm:$0xff]  ;;  %v1891_v4 = vsel %vm514_vm3, %v1838_v45, %v1839_v20  ;;  %v10746_v52 = vsel %vm1581_vm7, %v10328_v14, %v7158_v56 }
 0x142   : > { %7671 = vrot.lane.b32.xlu0 %v15386_v55, %s9015_s20  ;;  %v8636_v48 = vld [vmem:[%s14805_s4 + $0x58] sm:$0xff]   ;;  %v15388_v55 = vld [vmem:[#allocation55_spill] sm:$0xff]  ;;  %v15391_v45 = vrot.slane %v9932_v8, 1 }
 0x143   : > { %v7169_v11 = vunpack.i.h.bf16 %v15388_v55  ;;  %v7168_v38 = vunpack.i.l.bf16 %v15388_v55  ;;  %v10750_v37 = vpop.permute.xlu1 %7401  ;;  %6543 = vmatprep.subr.bf16.mxu0 %v8636_v48  ;;  %v10764_v14 = vsel %vm1581_vm7, %v10369_v18, %v7164_v42  ;;  %v10768_v56 = vsel %vm1581_vm7, %v10373_v16, %v7163_v51  ;;  %v15393_v55 = vld [vmem:[#allocation56_spill] sm:$0xff]  ;;  %v15403_v42 = vld [vmem:[#allocation59_spill] sm:$0xff] }
 0x144   : > { %15389 = vst [vmem:[#allocation17_spill] sm:$0xff] %v10750_v37  ;;  %v10752_v15 = vpop.permute.xlu0 %7396  ;;  %v10760_v1 = vsel %vm615_vm1, %v15391_v45, %v14979_v36  ;;  %v7174_v62 = vunpack.i.h.bf16 %v15393_v55  ;;  %v7173_v2 = vunpack.i.l.bf16 %v15393_v55  ;;  %6544 = vmatpush3.bf16.msra.mxu0 %v8637_v54  ;;  %v15394_v45 = vld [vmem:[#allocation35_spill] sm:$0xff]  ;;  %v10779_v18 = vmul.f32 %v15344_v3, %v1891_v4  ;;  %v15398_v54 = vld [vmem:[#allocation58_spill] sm:$0xff]  ;;  %v15402_v37 = vld [vmem:[#allocation25_spill] sm:$0xff] }
 0x145   : > { %15390 = vst [vmem:[#allocation28_spill] sm:$0xff] %v10752_v15  ;;  %15392 = vst [vmem:[#allocation27_spill] sm:$0xff] %v10760_v1  ;;  %7686 = vrot.lane.b32.xlu1 %v10376_v23, %s9015_s20  ;;  %v8638_v55 = vld [vmem:[%s14805_s4 + $0x60] sm:$0xff]   ;;  %v7179_v36 = vunpack.i.h.bf16 %v15398_v54  ;;  %v10800_v51 = vsel %vm1581_vm7, %v10438_v7, %v7169_v11  ;;  %v10804_v16 = vsel %vm1581_vm7, %v15402_v37, %v7168_v38  ;;  %v7178_v23 = vunpack.i.l.bf16 %v15398_v54  ;;  %v15406_v37 = vld [vmem:[#allocation60_spill] sm:$0xff] }
 0x146   : > { %7681 = vrot.lane.b32.xlu0 %v15394_v45, %s9015_s20  ;;  %15395 = vst [vmem:[#allocation55_spill] sm:$0xff] %v10779_v18  ;;  %v15399_v15 = vld [vmem:[#allocation19_spill] sm:$0xff]  ;;  %v15400_v45 = vrot.slane %v10463_v25, 7  ;;  %v7184_v35 = vunpack.i.h.bf16 %v15403_v42  ;;  %6545 = vmatprep.subr.bf16.mxu0 %v8638_v55  ;;  %v10818_v7 = vsel %vm1581_vm7, %v10429_v32, %v7173_v2  ;;  %v7183_v11 = vunpack.i.l.bf16 %v15403_v42  ;;  %v15409_v32 = vld [vmem:[#allocation38_spill] sm:$0xff]  ;;  %v8640_v2 = vld [vmem:[%s14805_s4 + $0x68] sm:$0xff]  }
 0x147   : > { %v8639_v4 = vld [vmem:[%s14805_s4 + $0x20] sm:$0xff]   ;;  %v10808_v1 = vpop.permute.xlu1 %7411  ;;  %v7189_v54 = vunpack.i.h.bf16 %v15406_v37  ;;  %v10841_v42 = vsel %vm1581_vm7, %v10480_v40, %v7179_v36  ;;  %v15411_v40 = vld [vmem:[#allocation40_spill] sm:$0xff] }
 0x148   : > { %v10793_v48 = vsel %vm514_vm3, %v1839_v20, %v15400_v45  ;;  %15404 = vst [vmem:[#allocation35_spill] sm:$0xff] %v10808_v1  ;;  %v10810_v20 = vpop.permute.xlu0 %7406  ;;  %v10814_v45 = vsel %vm1581_vm7, %v10425_v19, %v7174_v62  ;;  %6546 = vmatpush3.bf16.msra.mxu0 %v8639_v4  ;;  %v7188_v1 = vunpack.i.l.bf16 %v15406_v37  ;;  %v15408_v19 = vpack.i.bf16 %v10355_v29, %v10336_v22 }
 0x149   : > { %15401 = vst [vmem:[#allocation56_spill] sm:$0xff] %v10793_v48  ;;  %15405 = vst [vmem:[#allocation58_spill] sm:$0xff] %v10810_v20  ;;  %v15407_v20 = vld [vmem:[#allocation61_spill] sm:$0xff]  ;;  %v10834_v62 = vpack.i.bf16 %v10793_v48, %v10779_v18  ;;  %v1841_v37 = vrot.slane %v10466_v43, 7  ;;  %v10855_v38 = vsel %vm1581_vm7, %v10454_v31, %v7184_v35  ;;  %v7199_v36 = vunpack.i.h.bf16 %v15411_v40  ;;  %6547 = vmatprep.subr.bf16.mxu0 %v8640_v2  ;;  %v15414_v18 = vld [vmem:[#allocation48_spill] sm:$0xff] }
 0x14a   : > { %v7194_v55 = vunpack.i.h.bf16 %v15407_v20  ;;  %7696 = vrot.lane.b32.xlu1 %v15408_v19, %s9015_s20  ;;  %7691 = vrot.lane.b32.xlu0 %v15409_v32, %s9015_s20  ;;  %v7193_v4 = vunpack.i.l.bf16 %v15407_v20  ;;  %v8641_v19 = vld [vmem:[%s14805_s4 + $0x28] sm:$0xff]   ;;  %v10851_v32 = vsel %vm1581_vm7, %v10421_v10, %v7178_v23  ;;  %v7198_v20 = vunpack.i.l.bf16 %v15411_v40 }
 0x14b   : > { %15410 = vst [vmem:[#allocation25_spill] sm:$0xff] %v10834_v62  ;;  %v10859_v22 = vpop.permute.xlu1 %7421  ;;  %v10865_v62 = vsel %vm1581_vm7, %v15414_v18, %v7183_v11  ;;  %v15415_v10 = vrot.slane %v9995_v0, 1  ;;  %v15416_v23 = vrot.slane %v10446_v34, 1  ;;  %v1939_v35 = vrot.slane %v10466_v43, 1  ;;  %v15418_v11 = vld [vmem:[#allocation64_spill] sm:$0xff] }
 0x14c   : > { %15412 = vst [vmem:[#allocation59_spill] sm:$0xff] %v10859_v22  ;;  %v10861_v48 = vpop.permute.xlu0 %7416  ;;  %6548 = vmatpush3.bf16.msra.mxu0 %v8641_v19  ;;  %v10876_v40 = vsel %vm1581_vm7, %v10538_v33, %v7189_v54  ;;  %v10884_v18 = vsel %vm1581_vm7, %v10503_v30, %v7194_v55  ;;  %v7204_v22 = vunpack.i.h.bf16 %v15418_v11  ;;  %v15420_v33 = vpack.i.bf16 %v9952_v13, %v10407_v53  ;;  %v8643_v30 = vld [vmem:[%s14805_s4 + $0x30] sm:$0xff]   ;;  %v15428_v54 = vld [vmem:[#allocation67_spill] sm:$0xff] }
 0x14d   : > { %15413 = vst [vmem:[#allocation60_spill] sm:$0xff] %v10861_v48  ;;  %v1985_v31 = vsel %vm615_vm1, %v15416_v23, %v15415_v10  ;;  %v15417_v48 = vld [vmem:[#allocation43_spill] sm:$0xff]  ;;  %v15419_v10 = vpack.i.bf16 %v9932_v8, %v9940_v24  ;;  %v7203_v8 = vunpack.i.l.bf16 %v15418_v11  ;;  %v15421_v55 = vrot.slane %v10463_v25, 7  ;;  %v10927_v11 = vld [vmem:[%s9925_s25 + $0x30] sm:$0xff] }
 0x14e   : > { %v10880_v2 = vsel %vm1581_vm7, %v15417_v48, %v7188_v1  ;;  %7701 = vrot.lane.b32.xlu0 %v15420_v33, %s9015_s20  ;;  %v8642_v1 = vld [vmem:[%s14805_s4 + $0x70] sm:$0xff]   ;;  %v10903_v48 = vsel %vm1581_vm7, %v10524_v27, %v7193_v4  ;;  %v10913_v23 = vsel %vm1581_vm7, %v10571_v9, %v7199_v36  ;;  %v10924_v4 = vmul.f32 %v9318_v44, %v1985_v31 }
 0x14f   : > { %7706 = vrot.lane.b32.xlu1 %v15419_v10, %s9015_s20  ;;  %v1889_v19 = vsel %vm514_vm3, %v15421_v55, %v1841_v37  ;;  %15422 = vst [vmem:[#allocation61_spill] sm:$0xff] %v10913_v23  ;;  %v10917_v10 = vsel %vm1581_vm7, %v10499_v39, %v7198_v20  ;;  %v10919_v33 = vpop.permute.xlu1 %7431  ;;  %15427 = vst [vmem:[#allocation64_spill] sm:$0xff] %v10927_v11  ;;  %6549 = vmatprep.subr.bf16.mxu0 %v8642_v1  ;;  %v7209_v9 = vunpack.i.h.bf16 %v15428_v54  ;;  %v15429_v23 = vld [vmem:[#allocation68_spill] sm:$0xff]  ;;  %v8645_v11 = vld [vmem:[%s14805_s4 + $0x38] sm:$0xff]  }
 0x150   : > { %15423 = vst [vmem:[#allocation38_spill] sm:$0xff] %v10917_v10  ;;  %15424 = vst [vmem:[#allocation40_spill] sm:$0xff] %v10919_v33  ;;  %v10921_v27 = vpop.permute.xlu0 %7426  ;;  %v7208_v36 = vunpack.i.l.bf16 %v15428_v54  ;;  %v7214_v39 = vunpack.i.h.bf16 %v15429_v23  ;;  %v15430_v20 = vrot.slane %v10463_v25, 1  ;;  %6550 = vmatpush3.bf16.msra.mxu0 %v8643_v30  ;;  %v10940_v31 = vsel %vm1581_vm7, %v10563_v57, %v7204_v22  ;;  %v8644_v57 = vld [vmem:[%s14805_s4 + $0x78] sm:$0xff]  }
 0x151   : > { %15425 = vst [vmem:[#allocation48_spill] sm:$0xff] %v10921_v27  ;;  %15426 = vst [vmem:[#allocation43_spill] sm:$0xff] %v10924_v4  ;;  %v7213_v33 = vunpack.i.l.bf16 %v15429_v23  ;;  %v15432_v1 = vpack.i.bf16 %v9995_v0, %v10446_v34  ;;  %v15433_v54 = vpack.i.bf16 %v10466_v43, %v10463_v25  ;;  %v10952_v55 = vmul.f32 %v15344_v3, %v1889_v19  ;;  %v15438_v0 = vld [vmem:[#allocation69_spill] sm:$0xff] }
 0x152   : > { %v1987_v27 = vsel %vm615_vm1, %v15430_v20, %v1939_v35  ;;  %15431 = vst [vmem:[#allocation67_spill] sm:$0xff] %v10940_v31  ;;  %v10961_v22 = vsel %vm1581_vm7, %v10567_v49, %v7203_v8  ;;  %v7224_v23 = vunpack.i.h.bf16 %v15438_v0  ;;  %v15441_v20 = vld [vmem:[#allocation70_spill] sm:$0xff]  ;;  %6551 = vmatprep.subr.bf16.mxu0 %v8644_v57 }
 0x153   : > { %7716 = vrot.lane.b32.xlu1 %v15432_v1, %s9015_s20  ;;  %7711 = vrot.lane.b32.xlu0 %v15433_v54, %s9015_s20  ;;  %15434 = vst [vmem:[#allocation68_spill] sm:$0xff] %v10952_v55  ;;  %15437 = vst [vmem:[#allocation112_spill] sm:$0xff] %v10961_v22  ;;  %v7223_v1 = vunpack.i.l.bf16 %v15438_v0  ;;  %v15439_v54 = vrot.slane %v10446_v34, 7  ;;  %v7219_v30 = vunpack.i.h.bf16 %v15441_v20  ;;  %v7218_v25 = vunpack.i.l.bf16 %v15441_v20  ;;  %v10976_v49 = vpop.permute.xlu1 %7441  ;;  %v15447_v20 = vld [vmem:[#allocation20_spill] sm:$0xff]  ;;  %v15450_v57 = vld [vmem:[#allocation14_spill] sm:$0xff] }
 0x154   : > { %15442 = vst [vmem:[#allocation70_spill] sm:$0xff] %v10976_v49  ;;  %v10978_v8 = vpop.permute.xlu0 %7436  ;;  %v10983_v31 = vmul.f32 %v9318_v44, %v1987_v27  ;;  %v10995_v49 = vsel %vm1581_vm7, %v15447_v20, %v7214_v39  ;;  %6552 = vmatpush3.bf16.msra.mxu0 %v8645_v11  ;;  %v11005_v10 = vsel %vm1581_vm7, %v15450_v57, %v7213_v33  ;;  %v15462_v0 = vld [vmem:[#allocation75_spill] sm:$0xff] }
 0x155   : > { %v10969_v19 = vsel %vm514_vm3, %v1841_v37, %v15439_v54  ;;  %15443 = vst [vmem:[#allocation113_spill] sm:$0xff] %v10978_v8  ;;  %v10987_v37 = vsel %vm1581_vm7, %v10609_v21, %v7209_v9  ;;  %v15446_v54 = vld [vmem:[#allocation45_spill] sm:$0xff]  ;;  %v15448_v8 = vrot.slane %v10446_v34, 1  ;;  %v15451_v21 = vld [vmem:[#allocation72_spill] sm:$0xff]  ;;  %v15452_v39 = vpack.i.bf16 %v10520_v60, %v10511_v46 }
 0x156   : > { %15440 = vst [vmem:[#allocation69_spill] sm:$0xff] %v10969_v19  ;;  %15445 = vst [vmem:[#allocation114_spill] sm:$0xff] %v10983_v31  ;;  %v10991_v22 = vsel %vm1581_vm7, %v15446_v54, %v7208_v36  ;;  %v7234_v9 = vunpack.i.h.bf16 %v15451_v21  ;;  %v7233_v36 = vunpack.i.l.bf16 %v15451_v21  ;;  %v15453_v54 = vld [vmem:[#allocation57_spill] sm:$0xff]  ;;  %v11023_v33 = vsel %vm1614_vm8, %v10682_v59, %v7223_v1  ;;  %v15459_v59 = vld [vmem:[#allocation111_spill] sm:$0xff] }
 0x157   : > { %v11001_v27 = vsel %vm615_vm1, %v1939_v35, %v15448_v8  ;;  %7726 = vrot.lane.b32.xlu1 %v15452_v39, %s9015_s20  ;;  %v15454_v20 = vpack.i.bf16 %v10542_v58, %v15453_v54  ;;  %v11019_v35 = vpack.i.bf16 %v10969_v19, %v10952_v55  ;;  %v11027_v11 = vsel %vm1614_vm8, %v10686_v61, %v7224_v23  ;;  %v15456_v8 = vld [vmem:[#allocation73_spill] sm:$0xff]  ;;  %v8822_v54 = vld [vmem:[%s14805_s4 + $0x80] sm:$0xff]   ;;  %v11046_v23 = vpop.permute.xlu1 %7451 }
 0x158   : > { %15449 = vst [vmem:[#allocation45_spill] sm:$0xff] %v11001_v27  ;;  %v7229_v57 = vunpack.i.h.bf16 %v15456_v8  ;;  %v11031_v21 = vld [vmem:[%s9925_s25 + $0x50] sm:$0xff]  ;;  %6816 = vmatprep.subr.bf16.mxu0 %v8822_v54  ;;  %v11043_v1 = vsel %vm1614_vm8, %v15459_v59, %v7218_v25  ;;  %v7228_v61 = vunpack.i.l.bf16 %v15456_v8  ;;  %15460 = vst [vmem:[#allocation72_spill] sm:$0xff] %v11046_v23  ;;  %v11048_v55 = vpop.permute.xlu0 %7446  ;;  %v7244_v54 = vunpack.i.h.bf16 %v15462_v0  ;;  %v15465_v59 = vld [vmem:[#allocation76_spill] sm:$0xff] }
 0x159   : > { %7721 = vrot.lane.b32.xlu0 %v15454_v20, %s9015_s20  ;;  %15455 = vst [vmem:[#allocation20_spill] sm:$0xff] %v11019_v35  ;;  %15457 = vst [vmem:[#allocation14_spill] sm:$0xff] %v11031_v21  ;;  %v1843_v39 = vrot.slane %v11031_v21, 7  ;;  %v15458_v20 = vld [vmem:[#allocation110_spill] sm:$0xff]  ;;  %v7243_v35 = vunpack.i.l.bf16 %v15462_v0  ;;  %v11060_v8 = vsel %vm1614_vm8, %v10721_v47, %v7233_v36  ;;  %v7239_v19 = vunpack.i.h.bf16 %v15465_v59  ;;  %v15466_v0 = vld [vmem:[#allocation107_spill] sm:$0xff] }
 0x15a   : > { %v11039_v44 = vsel %vm1614_vm8, %v15458_v20, %v7219_v30  ;;  %15461 = vst [vmem:[#allocation57_spill] sm:$0xff] %v11048_v55  ;;  %15463 = vst [vmem:[#allocation73_spill] sm:$0xff] %v11060_v8  ;;  %v11064_v20 = vsel %vm1614_vm8, %v10717_v63, %v7234_v9  ;;  %v7238_v55 = vunpack.i.l.bf16 %v15465_v59  ;;  %v15467_v30 = vld [vmem:[#allocation52_spill] sm:$0xff]  ;;  %v11074_v47 = vsel %vm1614_vm8, %v10707_v5, %v7229_v57  ;;  %v11078_v63 = vld [vmem:[%s9925_s25 + $0x58] sm:$0xff] }
 0x15b   : > { %15464 = vst [vmem:[#allocation110_spill] sm:$0xff] %v11064_v20  ;;  %7736 = vrot.lane.b32.xlu1 %v15466_v0, %s9016_s16  ;;  %15468 = vst [vmem:[#allocation111_spill] sm:$0xff] %v11074_v47  ;;  %v15469_v36 = vld [vmem:[#allocation80_spill] sm:$0xff]  ;;  %v1844_v9 = vrot.slane %v11078_v63, 7  ;;  %v15471_v59 = vrot.slane %v10446_v34, 7  ;;  %v11087_v0 = vsel %vm1614_vm8, %v10711_v41, %v7228_v61  ;;  %v15472_v20 = vld [vmem:[#allocation81_spill] sm:$0xff]  ;;  %v11091_v57 = vpop.permute.xlu1 %7461  ;;  %v11097_v8 = vsel %vm1614_vm8, %v10768_v56, %v7243_v35 }
 0x15c   : > { %v7253_v25 = vunpack.i.l.bf16 %v15469_v36  ;;  %15470 = vst [vmem:[#allocation75_spill] sm:$0xff] %v11078_v63  ;;  %v7254_v43 = vunpack.i.h.bf16 %v15469_v36  ;;  %v7249_v5 = vunpack.i.h.bf16 %v15472_v20  ;;  %15473 = vst [vmem:[#allocation76_spill] sm:$0xff] %v11091_v57  ;;  %v11093_v47 = vpop.permute.xlu0 %7456  ;;  %v11101_v34 = vsel %vm1614_vm8, %v10764_v14, %v7244_v54  ;;  %v11105_v41 = vld [vmem:[%s9925_s25 + $0x60] sm:$0xff]  ;;  %v11157_v54 = vld [vmem:[%s9925_s25 + $0x68] sm:$0xff] }
 0x15d   : > { %7731 = vrot.lane.b32.xlu0 %v15467_v30, %s9016_s16  ;;  %v1887_v23 = vsel %vm514_vm3, %v15471_v59, %v1843_v39  ;;  %15474 = vst [vmem:[#allocation107_spill] sm:$0xff] %v11093_v47  ;;  %v7248_v59 = vunpack.i.l.bf16 %v15472_v20  ;;  %v1845_v61 = vrot.slane %v11105_v41, 7  ;;  %v11110_v36 = vsel %vm1614_vm8, %v10734_v6, %v7239_v19  ;;  %v15479_v19 = vld [vmem:[#allocation27_spill] sm:$0xff] }
 0x15e   : > { %v11114_v47 = vsel %vm1614_vm8, %v10746_v52, %v7238_v55  ;;  %v15475_v14 = vpack.i.bf16 %v10644_v26, %v10647_v28  ;;  %v15476_v56 = vpack.i.bf16 %v10407_v53, %v10355_v29  ;;  %v11125_v35 = vmul.f32 %v15344_v3, %v1887_v23  ;;  %v15478_v52 = vld [vmem:[#allocation83_spill] sm:$0xff]  ;;  %v15481_v23 = vld [vmem:[#allocation84_spill] sm:$0xff]  ;;  %v15485_v26 = vld [vmem:[#allocation18_spill] sm:$0xff] }
 0x15f   : > { %v11129_v6 = vsel %vm1614_vm8, %v10818_v7, %v7253_v25  ;;  %v7263_v55 = vunpack.i.l.bf16 %v15478_v52  ;;  %v11136_v20 = vsel %vm514_vm3, %v1843_v39, %v1844_v9  ;;  %v11140_v29 = vsel %vm1614_vm8, %v10814_v45, %v7254_v43  ;;  %v15492_v21 = vld [vmem:[#allocation91_spill] sm:$0xff] }
 0x160   : > { %7746 = vrot.lane.b32.xlu1 %v15475_v14, %s9017_s17  ;;  %15477 = vst [vmem:[#allocation52_spill] sm:$0xff] %v11125_v35  ;;  %15480 = vst [vmem:[#allocation80_spill] sm:$0xff] %v11136_v20  ;;  %v11144_v53 = vsel %vm1614_vm8, %v10800_v51, %v7249_v5  ;;  %v7264_v7 = vunpack.i.h.bf16 %v15478_v52  ;;  %v7259_v25 = vunpack.i.h.bf16 %v15481_v23  ;;  %v11148_v14 = vpop.permute.xlu1 %7471  ;;  %v11154_v39 = vsel %vm1614_vm8, %v10804_v16, %v7248_v59  ;;  %v15484_v5 = vld [vmem:[#allocation86_spill] sm:$0xff] }
 0x161   : > { %7741 = vrot.lane.b32.xlu0 %v15476_v56, %s9017_s17  ;;  %15482 = vst [vmem:[#allocation81_spill] sm:$0xff] %v11148_v14  ;;  %v11150_v56 = vpop.permute.xlu0 %7466  ;;  %v1846_v43 = vrot.slane %v11157_v54, 7  ;;  %v1885_v51 = vsel %vm514_vm3, %v1844_v9, %v1845_v61  ;;  %v7258_v45 = vunpack.i.l.bf16 %v15481_v23  ;;  %v7274_v52 = vunpack.i.h.bf16 %v15484_v5  ;;  %v15487_v23 = vld [vmem:[#allocation87_spill] sm:$0xff] }
 0x162   : > { %15483 = vst [vmem:[#allocation83_spill] sm:$0xff] %v11150_v56  ;;  %v7273_v28 = vunpack.i.l.bf16 %v15484_v5  ;;  %v15486_v16 = vpack.i.bf16 %v15387_v12, %v10675_v50  ;;  %v11173_v59 = vpack.i.bf16 %v11136_v20, %v11125_v35  ;;  %v11177_v9 = vsel %vm1614_vm8, %v10865_v62, %v7263_v55  ;;  %v15488_v35 = vld [vmem:[#allocation90_spill] sm:$0xff] }
 0x163   : > { %v7269_v14 = vunpack.i.h.bf16 %v15487_v23  ;;  %v7268_v5 = vunpack.i.l.bf16 %v15487_v23  ;;  %v11189_v20 = vsel %vm1614_vm8, %v10841_v42, %v7259_v25  ;;  %v7283_v62 = vunpack.i.l.bf16 %v15488_v35 }
 0x164   : > { %7756 = vrot.lane.b32.xlu1 %v15485_v26, %s9016_s16  ;;  %v11192_v55 = vpop.permute.xlu1 %7481  ;;  %v11197_v23 = vmul.f32 %v15344_v3, %v1885_v51  ;;  %v7284_v56 = vunpack.i.h.bf16 %v15488_v35  ;;  %v7279_v63 = vunpack.i.h.bf16 %v15492_v21  ;;  %v11208_v42 = vsel %vm1614_vm8, %v10851_v32, %v7258_v45  ;;  %v11227_v32 = vld [vmem:[%s9925_s25 + $0x70] sm:$0xff]  ;;  %v15498_v45 = vld [vmem:[#allocation112_spill] sm:$0xff] }
 0x165   : > { %7751 = vrot.lane.b32.xlu0 %v15486_v16, %s9015_s20  ;;  %v11185_v16 = vsel %vm1614_vm8, %v10855_v38, %v7264_v7  ;;  %15489 = vst [vmem:[#allocation84_spill] sm:$0xff] %v11192_v55  ;;  %v11194_v57 = vpop.permute.xlu0 %7476  ;;  %v7278_v38 = vunpack.i.l.bf16 %v15492_v21  ;;  %v11204_v7 = vsel %vm514_vm3, %v1845_v61, %v1846_v43  ;;  %v11212_v25 = vsel %vm1614_vm8, %v10903_v48, %v7273_v28  ;;  %v15497_v48 = vld [vmem:[#allocation94_spill] sm:$0xff] }
 0x166   : > { %15490 = vst [vmem:[#allocation86_spill] sm:$0xff] %v11194_v57  ;;  %15491 = vst [vmem:[#allocation18_spill] sm:$0xff] %v11197_v23  ;;  %v11216_v51 = vsel %vm1614_vm8, %v10884_v18, %v7274_v52  ;;  %v15494_v21 = vpack.i.bf16 %v9940_v24, %v9952_v13  ;;  %v15495_v61 = vpack.i.bf16 %v10511_v46, %v10542_v58  ;;  %v1847_v35 = vrot.slane %v11227_v32, 7  ;;  %v15499_v58 = vld [vmem:[#allocation95_spill] sm:$0xff] }
 0x167   : > { %15493 = vst [vmem:[#allocation87_spill] sm:$0xff] %v11204_v7  ;;  %15496 = vst [vmem:[#allocation90_spill] sm:$0xff] %v11227_v32  ;;  %v11232_v28 = vsel %vm1614_vm8, %v10876_v40, %v7269_v14  ;;  %v11236_v18 = vsel %vm1614_vm8, %v10880_v2, %v7268_v5  ;;  %v7294_v13 = vunpack.i.h.bf16 %v15497_v48  ;;  %v7293_v24 = vunpack.i.l.bf16 %v15497_v48  ;;  %v15503_v14 = vld [vmem:[#allocation67_spill] sm:$0xff]  ;;  %v15504_v48 = vld [vmem:[#allocation61_spill] sm:$0xff] }
 0x168   : > { %7766 = vrot.lane.b32.xlu1 %v15494_v21, %s9017_s17  ;;  %v11242_v46 = vsel %vm1614_vm8, %v15498_v45, %v7283_v62  ;;  %v7289_v52 = vunpack.i.h.bf16 %v15499_v58  ;;  %v7288_v21 = vunpack.i.l.bf16 %v15499_v58  ;;  %v11252_v2 = vpack.i.bf16 %v11204_v7, %v11197_v23  ;;  %v15505_v45 = vld [vmem:[#allocation38_spill] sm:$0xff] }
 0x169   : > { %7761 = vrot.lane.b32.xlu0 %v15495_v61, %s9016_s16  ;;  %v11246_v61 = vpop.permute.xlu1 %7491  ;;  %v11248_v40 = vpop.permute.xlu0 %7486  ;;  %v11256_v5 = vsel %vm1614_vm8, %v15503_v14, %v7284_v56  ;;  %v11260_v62 = vsel %vm1614_vm8, %v15504_v48, %v7279_v63  ;;  %v11264_v55 = vsel %vm1614_vm8, %v15505_v45, %v7278_v38  ;;  %v15507_v23 = vpack.i.bf16 %v15479_v19, %v15399_v15  ;;  %v11278_v56 = vld [vmem:[%s9925_s25 + $0x78] sm:$0xff]  ;;  %v15510_v45 = vld [vmem:[#allocation99_spill] sm:$0xff] }
 0x16a   : > { %15500 = vst [vmem:[#allocation91_spill] sm:$0xff] %v11246_v61  ;;  %15501 = vst [vmem:[#allocation94_spill] sm:$0xff] %v11248_v40  ;;  %v15506_v61 = vld [vmem:[#allocation98_spill] sm:$0xff]  ;;  %v1848_v38 = vrot.slane %v11278_v56, 7  ;;  %v1883_v14 = vsel %vm514_vm3, %v1846_v43, %v1847_v35  ;;  %v11285_v48 = vsel %vm1614_vm8, %v11005_v10, %v7293_v24  ;;  %v7298_v58 = vunpack.i.l.bf16 %v15510_v45 }
 0x16b   : > { %15502 = vst [vmem:[#allocation112_spill] sm:$0xff] %v11252_v2  ;;  %v7303_v40 = vunpack.i.l.bf16 %v15506_v61  ;;  %15508 = vst [vmem:[#allocation95_spill] sm:$0xff] %v11278_v56  ;;  %v11295_v63 = vsel %vm1614_vm8, %v10987_v37, %v7289_v52  ;;  %v11299_v7 = vsel %vm1614_vm8, %v10991_v22, %v7288_v21  ;;  %v7299_v43 = vunpack.i.h.bf16 %v15510_v45  ;;  %v15511_v10 = vld [vmem:[#allocation26_spill] sm:$0xff]  ;;  %v15516_v52 = vld [vmem:[#allocation103_spill] sm:$0xff] }
 0x16c   : > { %7776 = vrot.lane.b32.xlu1 %v15507_v23, %s9015_s20  ;;  %v11289_v23 = vsel %vm1614_vm8, %v10995_v49, %v7294_v13  ;;  %v7313_v24 = vunpack.i.l.bf16 %v15511_v10  ;;  %v7314_v13 = vunpack.i.h.bf16 %v15511_v10  ;;  %v11311_v37 = vmul.f32 %v15344_v3, %v1883_v14  ;;  %v15518_v10 = vld [vmem:[#allocation25_spill] sm:$0xff] }
 0x16d   : > { %7771 = vrot.lane.b32.xlu0 %v15467_v30, %s9017_s17  ;;  %15509 = vst [vmem:[#allocation67_spill] sm:$0xff] %v11289_v23  ;;  %v7304_v30 = vunpack.i.h.bf16 %v15506_v61  ;;  %v11303_v57 = vpop.permute.xlu1 %7501  ;;  %v11305_v49 = vpop.permute.xlu0 %7496  ;;  %v15514_v61 = vld [vmem:[#allocation34_spill] sm:$0xff]  ;;  %v11315_v22 = vsel %vm1647_vm9, %v11023_v33, %v7303_v40  ;;  %v7323_v21 = vunpack.i.l.bf16 %v15516_v52  ;;  %v15517_v45 = vpack.i.bf16 %v10675_v50, %v10520_v60  ;;  %v15522_v60 = vld [vmem:[#allocation73_spill] sm:$0xff] }
 0x16e   : > { %15512 = vst [vmem:[#allocation61_spill] sm:$0xff] %v11303_v57  ;;  %15513 = vst [vmem:[#allocation38_spill] sm:$0xff] %v11305_v49  ;;  %v7309_v2 = vunpack.i.h.bf16 %v15514_v61  ;;  %v7308_v23 = vunpack.i.l.bf16 %v15514_v61  ;;  %v11326_v61 = vsel %vm514_vm3, %v1847_v35, %v1848_v38  ;;  %v11334_v33 = vsel %vm1647_vm9, %v11043_v1, %v7298_v58  ;;  %v15521_v57 = vld [vmem:[#allocation104_spill] sm:$0xff]  ;;  %v11352_v1 = vld [vmem:[%s9925_s25 + $0x80] sm:$0xff] }
 0x16f   : > { %15515 = vst [vmem:[#allocation98_spill] sm:$0xff] %v11311_v37  ;;  %15519 = vst [vmem:[#allocation99_spill] sm:$0xff] %v11326_v61  ;;  %v11330_v14 = vsel %vm1647_vm9, %v11027_v11, %v7304_v30  ;;  %v7324_v40 = vunpack.i.h.bf16 %v15516_v52  ;;  %v7318_v50 = vunpack.i.l.bf16 %v15521_v57  ;;  %v11344_v35 = vsel %vm1647_vm9, %v15522_v60, %v7313_v24  ;;  %v15526_v52 = vld [vmem:[#allocation110_spill] sm:$0xff]  ;;  %v15527_v60 = vld [vmem:[#allocation111_spill] sm:$0xff] }
 0x170   : > { %7786 = vrot.lane.b32.xlu1 %v15517_v45, %s9016_s16  ;;  %15520 = vst [vmem:[#allocation26_spill] sm:$0xff] %v11334_v33  ;;  %v11340_v45 = vsel %vm1647_vm9, %v11039_v44, %v7299_v43  ;;  %v7319_v49 = vunpack.i.h.bf16 %v15521_v57  ;;  %15525 = vst [vmem:[#allocation25_spill] sm:$0xff] %v11352_v1  ;;  %v1849_v58 = vrot.slane %v11352_v1, 7  ;;  %v11357_v33 = vsel %vm1647_vm9, %v15526_v52, %v7314_v13 }
 0x171   : > { %7781 = vrot.lane.b32.xlu0 %v15518_v10, %s9016_s16  ;;  %v11347_v11 = vpop.permute.xlu1 %7511  ;;  %v11349_v30 = vpop.permute.xlu0 %7506  ;;  %v11361_v44 = vsel %vm1647_vm9, %v11087_v0, %v7308_v23  ;;  %v11365_v57 = vsel %vm1647_vm9, %v15527_v60, %v7309_v2  ;;  %v11369_v43 = vpack.i.bf16 %v11326_v61, %v11311_v37  ;;  %v11373_v24 = vsel %vm1647_vm9, %v11097_v8, %v7323_v21  ;;  %v15530_v0 = vld [vmem:[#allocation37_spill] sm:$0xff]  ;;  %v15531_v23 = vld [vmem:[#allocation64_spill] sm:$0xff] }
 0x172   : > { %15523 = vst [vmem:[#allocation34_spill] sm:$0xff] %v11347_v11  ;;  %15524 = vst [vmem:[#allocation103_spill] sm:$0xff] %v11349_v30  ;;  %v15529_v30 = vld [vmem:[#allocation29_spill] sm:$0xff]  ;;  %v15532_v2 = vpack.i.bf16 %v15530_v0, %v15531_v23  ;;  %v11385_v60 = vsel %vm1647_vm9, %v11101_v34, %v7324_v40  ;;  %v11389_v8 = vsel %vm1647_vm9, %v11114_v47, %v7318_v50  ;;  %v15533_v21 = vld [vmem:[#allocation36_spill] sm:$0xff] }
 0x173   : > { %15528 = vst [vmem:[#allocation104_spill] sm:$0xff] %v11369_v43  ;;  %v7334_v13 = vunpack.i.h.bf16 %v15529_v30  ;;  %v7333_v52 = vunpack.i.l.bf16 %v15529_v30  ;;  %v7329_v37 = vunpack.i.h.bf16 %v15533_v21  ;;  %v7328_v30 = vunpack.i.l.bf16 %v15533_v21  ;;  %v11404_v40 = vld [vmem:[%s9925_s25 + $0x88] sm:$0xff]  ;;  %v15537_v23 = vld [vmem:[#allocation31_spill] sm:$0xff]  ;;  %v15541_v43 = vld [vmem:[#allocation42_spill] sm:$0xff] }
 0x174   : > { %7796 = vrot.lane.b32.xlu1 %v15485_v26, %s9017_s17  ;;  %v11395_v26 = vsel %vm1647_vm9, %v11110_v36, %v7319_v49  ;;  %v1850_v50 = vrot.slane %v11404_v40, 7  ;;  %v1881_v47 = vsel %vm514_vm3, %v1848_v38, %v1849_v58  ;;  %v7343_v36 = vunpack.i.l.bf16 %v15537_v23 }
 0x175   : > { %7791 = vrot.lane.b32.xlu0 %v15532_v2, %s9017_s17  ;;  %15534 = vst [vmem:[#allocation73_spill] sm:$0xff] %v11395_v26  ;;  %v11397_v61 = vpop.permute.xlu1 %7521  ;;  %v11399_v0 = vpop.permute.xlu0 %7516  ;;  %v7344_v2 = vunpack.i.h.bf16 %v15537_v23  ;;  %v11417_v34 = vsel %vm1647_vm9, %v11129_v6, %v7333_v52  ;;  %v11421_v11 = vsel %vm1647_vm9, %v11140_v29, %v7334_v13  ;;  %v7338_v38 = vunpack.i.l.bf16 %v15541_v43  ;;  %v15542_v26 = vld [vmem:[#allocation20_spill] sm:$0xff] }
 0x176   : > { %15535 = vst [vmem:[#allocation110_spill] sm:$0xff] %v11397_v61  ;;  %15536 = vst [vmem:[#allocation111_spill] sm:$0xff] %v11399_v0  ;;  %v15543_v23 = vpack.i.bf16 %v11001_v27, %v10983_v31  ;;  %v11431_v0 = vld [vmem:[%s9925_s25 + $0x90] sm:$0xff]  ;;  %v11436_v52 = vsel %vm1647_vm9, %v11154_v39, %v7328_v30  ;;  %v11440_v29 = vsel %vm1647_vm9, %v11144_v53, %v7329_v37  ;;  %v7339_v13 = vunpack.i.h.bf16 %v15541_v43  ;;  %v15547_v61 = vld [vmem:[#allocation47_spill] sm:$0xff] }
 0x177   : > { %15540 = vst [vmem:[#allocation29_spill] sm:$0xff] %v11421_v11  ;;  %15544 = vst [vmem:[#allocation37_spill] sm:$0xff] %v11431_v0  ;;  %v1851_v6 = vrot.slane %v11431_v0, 7  ;;  %v11444_v21 = vmul.f32 %v15344_v3, %v1881_v47  ;;  %v11453_v39 = vsel %vm514_vm3, %v1849_v58, %v1850_v50  ;;  %v11459_v37 = vsel %vm1647_vm9, %v11177_v9, %v7343_v36  ;;  %v11467_v47 = vld [vmem:[%s9925_s25 + $0xa0] sm:$0xff]  ;;  %v15554_v9 = vld [vmem:[#allocation46_spill] sm:$0xff] }
 0x178   : > { %7806 = vrot.lane.b32.xlu1 %v15542_v26, %s9016_s16  ;;  %15545 = vst [vmem:[#allocation64_spill] sm:$0xff] %v11440_v29  ;;  %15550 = vst [vmem:[#allocation20_spill] sm:$0xff] %v11453_v39  ;;  %v11463_v43 = vsel %vm1647_vm9, %v11185_v16, %v7344_v2  ;;  %v7354_v30 = vunpack.i.h.bf16 %v15547_v61  ;;  %v11472_v58 = vsel %vm1647_vm9, %v11208_v42, %v7338_v38  ;;  %v15553_v29 = vld [vmem:[#allocation44_spill] sm:$0xff] }
 0x179   : > { %7801 = vrot.lane.b32.xlu0 %v15543_v23, %s9015_s20  ;;  %15546 = vst [vmem:[#allocation36_spill] sm:$0xff] %v11444_v21  ;;  %v7353_v23 = vunpack.i.l.bf16 %v15547_v61  ;;  %v11447_v49 = vpop.permute.xlu1 %7531  ;;  %v11449_v11 = vpop.permute.xlu0 %7526  ;;  %15551 = vst [vmem:[#allocation47_spill] sm:$0xff] %v11472_v58  ;;  %v15555_v36 = vpack.i.bf16 %v15553_v29, %v15554_v9  ;;  %v15556_v16 = vpack.i.bf16 %v15399_v15, %v15387_v12  ;;  %v11484_v61 = vld [vmem:[%s9925_s25 + $0x98] sm:$0xff]  ;;  %v11520_v12 = vld [vmem:[%s9925_s25 + $0xa8] sm:$0xff] }
 0x17a   : > { %15548 = vst [vmem:[#allocation31_spill] sm:$0xff] %v11447_v49  ;;  %15549 = vst [vmem:[#allocation42_spill] sm:$0xff] %v11449_v11  ;;  %v1853_v49 = vrot.slane %v11467_v47, 7  ;;  %v15552_v11 = vld [vmem:[#allocation41_spill] sm:$0xff]  ;;  %v1852_v2 = vrot.slane %v11484_v61, 7  ;;  %v1879_v42 = vsel %vm514_vm3, %v1850_v50, %v1851_v6  ;;  %v11491_v38 = vsel %vm1647_vm9, %v11189_v20, %v7339_v13  ;;  %v15567_v9 = vld [vmem:[#allocation106_spill] sm:$0xff] }
 0x17b   : > { %v7348_v53 = vunpack.i.l.bf16 %v15552_v11  ;;  %v11495_v29 = vpack.i.bf16 %v11453_v39, %v11444_v21  ;;  %v11503_v15 = vsel %vm1647_vm9, %v11212_v25, %v7353_v23  ;;  %v7349_v50 = vunpack.i.h.bf16 %v15552_v11  ;;  %v15563_v39 = vld [vmem:[#allocation105_spill] sm:$0xff] }
 0x17c   : > { %7816 = vrot.lane.b32.xlu1 %v15555_v36, %s9017_s17  ;;  %v11514_v21 = vsel %vm1647_vm9, %v11216_v51, %v7354_v30  ;;  %v11517_v36 = vmul.f32 %v15344_v3, %v1879_v42  ;;  %v1854_v25 = vrot.slane %v11520_v12, 7  ;;  %v1877_v11 = vsel %vm514_vm3, %v1852_v2, %v1853_v49  ;;  %v15564_v51 = vld [vmem:[#allocation62_spill] sm:$0xff] }
 0x17d   : > { %7811 = vrot.lane.b32.xlu0 %v15556_v16, %s9016_s16  ;;  %15557 = vst [vmem:[#allocation41_spill] sm:$0xff] %v11495_v29  ;;  %v11506_v58 = vpop.permute.xlu1 %7541  ;;  %v11508_v20 = vpop.permute.xlu0 %7536  ;;  %v11527_v23 = vsel %vm1647_vm9, %v11236_v18, %v7348_v53  ;;  %v7364_v13 = vunpack.i.h.bf16 %v15563_v39  ;;  %v7363_v16 = vunpack.i.l.bf16 %v15563_v39  ;;  %v15565_v30 = vpack.i.bf16 %v15564_v51, %v10924_v4  ;;  %v15568_v29 = vld [vmem:[#allocation12_spill] sm:$0xff] }
 0x17e   : > { %15560 = vst [vmem:[#allocation44_spill] sm:$0xff] %v11506_v58  ;;  %15561 = vst [vmem:[#allocation46_spill] sm:$0xff] %v11508_v20  ;;  %v11539_v42 = vsel %vm514_vm3, %v1851_v6, %v1852_v2  ;;  %v7359_v18 = vunpack.i.h.bf16 %v15567_v9  ;;  %v7358_v53 = vunpack.i.l.bf16 %v15567_v9  ;;  %v7374_v32 = vunpack.i.h.bf16 %v15568_v29 }
 0x17f   : > { %15562 = vst [vmem:[#allocation115_spill] sm:$0xff] %v11517_v36  ;;  %15566 = vst [vmem:[#allocation105_spill] sm:$0xff] %v11539_v42  ;;  %v7373_v39 = vunpack.i.l.bf16 %v15568_v29  ;;  %v11547_v56 = vsel %vm1647_vm9, %v11232_v28, %v7349_v50  ;;  %v11556_v2 = vmul.f32 %v15344_v3, %v1877_v11  ;;  %v11560_v9 = vpack.i.bf16 %v11539_v42, %v11517_v36  ;;  %v11569_v50 = vld [vmem:[%s9925_s25 + $0xb0] sm:$0xff]  ;;  %v15576_v36 = vld [vmem:[#allocation51_spill] sm:$0xff] }
 0x180   : > { %7826 = vrot.lane.b32.xlu1 %v15565_v30, %s9015_s20  ;;  %v15569_v30 = vld [vmem:[#allocation53_spill] sm:$0xff]  ;;  %v11566_v28 = vsel %vm514_vm3, %v1853_v49, %v1854_v25  ;;  %15575 = vst [vmem:[#allocation117_spill] sm:$0xff] %v11569_v50  ;;  %v11578_v11 = vsel %vm1647_vm9, %v11256_v5, %v7364_v13  ;;  %v7383_v42 = vunpack.i.l.bf16 %v15576_v36  ;;  %v15577_v51 = vpack.i.bf16 %v10983_v31, %v15479_v19  ;;  %v15580_v13 = vld [vmem:[#allocation67_spill] sm:$0xff]  ;;  %v15589_v29 = vld [vmem:[#allocation14_spill] sm:$0xff] }
 0x181   : > { %7821 = vrot.lane.b32.xlu0 %v15518_v10, %s9017_s17  ;;  %v7369_v20 = vunpack.i.h.bf16 %v15569_v30  ;;  %v7368_v10 = vunpack.i.l.bf16 %v15569_v30  ;;  %v11551_v58 = vpop.permute.xlu1 %7551  ;;  %v11553_v6 = vpop.permute.xlu0 %7546  ;;  %15571 = vst [vmem:[#allocation12_spill] sm:$0xff] %v11556_v2  ;;  %15572 = vst [vmem:[#allocation53_spill] sm:$0xff] %v11560_v9  ;;  %v1855_v30 = vrot.slane %v11569_v50, 7  ;;  %v11595_v5 = vsel %vm1647_vm9, %v11260_v62, %v7359_v18 }
 0x182   : > { %15570 = vst [vmem:[#allocation106_spill] sm:$0xff] %v11551_v58  ;;  %15574 = vst [vmem:[#allocation116_spill] sm:$0xff] %v11566_v28  ;;  %v11574_v58 = vsel %vm1647_vm9, %v11242_v46, %v7363_v16  ;;  %v11591_v46 = vsel %vm1647_vm9, %v11264_v55, %v7358_v53  ;;  %v11599_v16 = vsel %vm1647_vm9, %v11285_v48, %v7373_v39  ;;  %v7384_v53 = vunpack.i.h.bf16 %v15576_v36 }
 0x183   : > { %15579 = vst [vmem:[#allocation51_spill] sm:$0xff] %v11599_v16  ;;  %v11607_v31 = vsel %vm1647_vm9, %v11299_v7, %v7368_v10  ;;  %v11611_v55 = vsel %vm1647_vm9, %v11295_v63, %v7369_v20  ;;  %v11620_v48 = vpack.i.bf16 %v11566_v28, %v11556_v2  ;;  %v11625_v7 = vld [vmem:[%s9925_s25 + $0xb8] sm:$0xff]  ;;  %v1875_v63 = vsel %vm514_vm3, %v1854_v25, %v1855_v30  ;;  %v15588_v20 = vld [vmem:[#allocation75_spill] sm:$0xff]  ;;  %v15591_v2 = vld [vmem:[#allocation24_spill] sm:$0xff] }
 0x184   : > { %7836 = vrot.lane.b32.xlu1 %v15577_v51, %s9016_s16  ;;  %v11603_v51 = vsel %vm1647_vm9, %v15580_v13, %v7374_v32  ;;  %15582 = vst [vmem:[#allocation118_spill] sm:$0xff] %v11607_v31  ;;  %15583 = vst [vmem:[#allocation119_spill] sm:$0xff] %v11611_v55  ;;  %v15586_v32 = vld [vmem:[#allocation22_spill] sm:$0xff]  ;;  %v1856_v10 = vrot.slane %v11625_v7, 7  ;;  %v11632_v36 = vsel %vm1680_vm10, %v11315_v22, %v7383_v42  ;;  %v7394_v28 = vunpack.i.h.bf16 %v15591_v2  ;;  %v15593_v42 = vld [vmem:[#allocation17_spill] sm:$0xff] }
 0x185   : > { %7831 = vrot.lane.b32.xlu0 %v11173_v59, %s9016_s16  ;;  %15581 = vst [vmem:[#allocation67_spill] sm:$0xff] %v11603_v51  ;;  %v11614_v62 = vpop.permute.xlu1 %7561  ;;  %v11616_v18 = vpop.permute.xlu0 %7556  ;;  %15585 = vst [vmem:[#allocation121_spill] sm:$0xff] %v11620_v48  ;;  %v7379_v39 = vunpack.i.h.bf16 %v15586_v32  ;;  %v7378_v13 = vunpack.i.l.bf16 %v15586_v32  ;;  %v15590_v19 = vpack.i.bf16 %v15588_v20, %v15589_v29  ;;  %v7393_v25 = vunpack.i.l.bf16 %v15591_v2  ;;  %v15592_v48 = vld [vmem:[#allocation23_spill] sm:$0xff]  ;;  %v15597_v2 = vld [vmem:[#allocation26_spill] sm:$0xff] }
 0x186   : > { %15584 = vst [vmem:[#allocation120_spill] sm:$0xff] %v11614_v62  ;;  %15587 = vst [vmem:[#allocation22_spill] sm:$0xff] %v11625_v7  ;;  %v7389_v49 = vunpack.i.h.bf16 %v15592_v48  ;;  %v7388_v22 = vunpack.i.l.bf16 %v15592_v48  ;;  %v7404_v51 = vunpack.i.h.bf16 %v15593_v42  ;;  %v7403_v29 = vunpack.i.l.bf16 %v15593_v42  ;;  %v15601_v55 = vld [vmem:[#allocation112_spill] sm:$0xff]  ;;  %v15611_v31 = vld [vmem:[#allocation73_spill] sm:$0xff] }
 0x187   : > { %v11657_v32 = vmul.f32 %v15344_v3, %v1875_v63  ;;  %v11661_v16 = vsel %vm1680_vm10, %v15597_v2, %v7378_v13  ;;  %v11665_v48 = vsel %vm1680_vm10, %v11340_v45, %v7379_v39  ;;  %v15602_v13 = vld [vmem:[#allocation65_spill] sm:$0xff]  ;;  %v15603_v2 = vld [vmem:[#allocation63_spill] sm:$0xff]  ;;  %v11689_v62 = vsel %vm1680_vm10, %v11344_v35, %v7393_v25 }
 0x188   : > { %7846 = vrot.lane.b32.xlu1 %v15542_v26, %s9017_s17  ;;  %v11648_v26 = vsel %vm1680_vm10, %v11330_v14, %v7384_v53  ;;  %v11669_v14 = vsel %vm514_vm3, %v1855_v30, %v1856_v10  ;;  %v11672_v53 = vld [vmem:[%s9925_s25 + $0xc0] sm:$0xff]  ;;  %v15604_v45 = vpack.i.bf16 %v15602_v13, %v15603_v2  ;;  %v11697_v1 = vsel %vm1680_vm10, %v11361_v44, %v7388_v22 }
 0x189   : > { %7841 = vrot.lane.b32.xlu0 %v15590_v19, %s9017_s17  ;;  %v11652_v19 = vpop.permute.xlu1 %7571  ;;  %v11654_v20 = vpop.permute.xlu0 %7566  ;;  %15596 = vst [vmem:[#allocation24_spill] sm:$0xff] %v11657_v32  ;;  %15598 = vst [vmem:[#allocation23_spill] sm:$0xff] %v11669_v14  ;;  %v1857_v42 = vrot.slane %v11672_v53, 7  ;;  %v11705_v39 = vsel %vm1680_vm10, %v11373_v24, %v7403_v29  ;;  %v11709_v35 = vsel %vm1680_vm10, %v11385_v60, %v7404_v51  ;;  %v15607_v25 = vld [vmem:[#allocation35_spill] sm:$0xff]  ;;  %v11723_v24 = vld [vmem:[%s9925_s25 + $0xc8] sm:$0xff] }
 0x18a   : > { %15594 = vst [vmem:[#allocation75_spill] sm:$0xff] %v11652_v19  ;;  %15595 = vst [vmem:[#allocation14_spill] sm:$0xff] %v11654_v20  ;;  %v15600_v19 = vld [vmem:[#allocation28_spill] sm:$0xff]  ;;  %v7414_v20 = vunpack.i.h.bf16 %v15607_v25  ;;  %v11718_v44 = vpack.i.bf16 %v11669_v14, %v11657_v32  ;;  %v15613_v29 = vpack.i.bf16 %v10924_v4, %v11001_v27  ;;  %v15620_v27 = vld [vmem:[#allocation29_spill] sm:$0xff] }
 0x18b   : > { %15599 = vst [vmem:[#allocation17_spill] sm:$0xff] %v11672_v53  ;;  %v7399_v9 = vunpack.i.h.bf16 %v15600_v19  ;;  %v7398_v63 = vunpack.i.l.bf16 %v15600_v19  ;;  %v11693_v19 = vsel %vm1680_vm10, %v11357_v33, %v7394_v28  ;;  %v1873_v60 = vsel %vm514_vm3, %v1856_v10, %v1857_v42  ;;  %v15614_v10 = vld [vmem:[#allocation59_spill] sm:$0xff] }
 0x18c   : > { %7856 = vrot.lane.b32.xlu1 %v15601_v55, %s9016_s16  ;;  %15609 = vst [vmem:[#allocation28_spill] sm:$0xff] %v11718_v44  ;;  %v7424_v14 = vunpack.i.h.bf16 %v15614_v10 }
 0x18d   : > { %7851 = vrot.lane.b32.xlu0 %v15604_v45, %s9015_s20  ;;  %v11701_v45 = vsel %vm1680_vm10, %v11365_v57, %v7389_v49  ;;  %v11712_v33 = vpop.permute.xlu1 %7581  ;;  %v11714_v28 = vpop.permute.xlu0 %7576  ;;  %v7413_v57 = vunpack.i.l.bf16 %v15607_v25  ;;  %v15610_v49 = vld [vmem:[#allocation58_spill] sm:$0xff]  ;;  %v11730_v51 = vsel %vm1680_vm10, %v11389_v8, %v7398_v63  ;;  %v11734_v30 = vsel %vm1680_vm10, %v15611_v31, %v7399_v9  ;;  %v15615_v63 = vld [vmem:[#allocation60_spill] sm:$0xff] }
 0x18e   : > { %15608 = vst [vmem:[#allocation26_spill] sm:$0xff] %v11712_v33  ;;  %v7408_v22 = vunpack.i.l.bf16 %v15610_v49  ;;  %v7409_v32 = vunpack.i.h.bf16 %v15610_v49  ;;  %v15612_v25 = vpack.i.bf16 %v11157_v54, %v11105_v41  ;;  %v7423_v8 = vunpack.i.l.bf16 %v15614_v10  ;;  %v15616_v49 = vld [vmem:[#allocation40_spill] sm:$0xff] }
 0x18f   : > { %v7418_v44 = vunpack.i.l.bf16 %v15615_v63  ;;  %v7419_v9 = vunpack.i.h.bf16 %v15615_v63  ;;  %v7434_v33 = vunpack.i.h.bf16 %v15616_v49  ;;  %v11762_v10 = vsel %vm1680_vm10, %v11417_v34, %v7413_v57  ;;  %v15624_v34 = vld [vmem:[#allocation48_spill] sm:$0xff] }
 0x190   : > { %7866 = vrot.lane.b32.xlu1 %v15612_v25, %s9017_s17  ;;  %v7433_v25 = vunpack.i.l.bf16 %v15616_v49  ;;  %v11766_v31 = vsel %vm1680_vm10, %v15620_v27, %v7414_v20  ;;  %v11770_v63 = vsel %vm1680_vm10, %v11436_v52, %v7408_v22  ;;  %v15621_v49 = vrot.slane %v11723_v24, 7  ;;  %v15625_v20 = vld [vmem:[#allocation71_spill] sm:$0xff] }
 0x191   : > { %7861 = vrot.lane.b32.xlu0 %v15613_v29, %s9016_s16  ;;  %v11753_v0 = vpop.permute.xlu1 %7591  ;;  %v11755_v4 = vpop.permute.xlu0 %7586  ;;  %v11758_v29 = vmul.f32 %v15344_v3, %v1873_v60  ;;  %v15623_v60 = vld [vmem:[#allocation64_spill] sm:$0xff]  ;;  %v7429_v57 = vunpack.i.h.bf16 %v15624_v34  ;;  %v7428_v27 = vunpack.i.l.bf16 %v15624_v34 }
 0x192   : > { %15617 = vst [vmem:[#allocation112_spill] sm:$0xff] %v11753_v0  ;;  %15618 = vst [vmem:[#allocation65_spill] sm:$0xff] %v11755_v4  ;;  %v11776_v50 = vsel %vm514_vm3, %v1857_v42, %v15621_v49  ;;  %v11780_v7 = vsel %vm1680_vm10, %v15623_v60, %v7409_v32  ;;  %v15626_v0 = vld [vmem:[#allocation66_spill] sm:$0xff]  ;;  %v11794_v49 = vsel %vm1680_vm10, %v11459_v37, %v7423_v8  ;;  %v15629_v60 = vld [vmem:[#allocation47_spill] sm:$0xff] }
 0x193   : > { %15619 = vst [vmem:[#allocation63_spill] sm:$0xff] %v11758_v29  ;;  %15622 = vst [vmem:[#allocation35_spill] sm:$0xff] %v11776_v50  ;;  %v15627_v52 = vpack.i.bf16 %v15625_v20, %v15626_v0  ;;  %v11798_v32 = vsel %vm1680_vm10, %v11463_v43, %v7424_v14  ;;  %v11802_v34 = vsel %vm1680_vm10, %v15629_v60, %v7418_v44  ;;  %v15635_v8 = vld [vmem:[#allocation70_spill] sm:$0xff] }
 0x194   : > { %v11812_v42 = vsel %vm1680_vm10, %v11503_v15, %v7433_v25  ;;  %v11816_v37 = vsel %vm1680_vm10, %v11514_v21, %v7434_v33  ;;  %v11824_v44 = vpack.i.bf16 %v11776_v50, %v11758_v29  ;;  %v7444_v60 = vunpack.i.h.bf16 %v15635_v8  ;;  %v15637_v25 = vld [vmem:[#allocation76_spill] sm:$0xff]  ;;  %v15638_v50 = vld [vmem:[#allocation62_spill] sm:$0xff] }
 0x195   : > { %7876 = vrot.lane.b32.xlu1 %v15627_v52, %s9015_s20  ;;  %7871 = vrot.lane.b32.xlu0 %v11173_v59, %s9017_s17  ;;  %v11808_v59 = vsel %vm1680_vm10, %v11491_v38, %v7419_v9  ;;  %15631 = vst [vmem:[#allocation58_spill] sm:$0xff] %v11816_v37  ;;  %v11818_v43 = vpop.permute.xlu1 %7601  ;;  %v11820_v14 = vpop.permute.xlu0 %7596  ;;  %v7443_v38 = vunpack.i.l.bf16 %v15635_v8  ;;  %v15636_v9 = vld [vmem:[#allocation113_spill] sm:$0xff]  ;;  %v11832_v21 = vsel %vm1680_vm10, %v11527_v23, %v7428_v27  ;;  %v7464_v4 = vunpack.i.h.bf16 %v15637_v25 }
 0x196   : > { %15632 = vst [vmem:[#allocation73_spill] sm:$0xff] %v11818_v43  ;;  %15633 = vst [vmem:[#allocation59_spill] sm:$0xff] %v11820_v14  ;;  %v7439_v52 = vunpack.i.h.bf16 %v15636_v9  ;;  %v7438_v15 = vunpack.i.l.bf16 %v15636_v9  ;;  %v11836_v33 = vsel %vm1680_vm10, %v11547_v56, %v7429_v57  ;;  %v7463_v29 = vunpack.i.l.bf16 %v15637_v25  ;;  %v15641_v9 = vld [vmem:[#allocation107_spill] sm:$0xff]  ;;  %v15643_v25 = vld [vmem:[#allocation44_spill] sm:$0xff] }
 0x197   : > { %15634 = vst [vmem:[#allocation60_spill] sm:$0xff] %v11824_v44  ;;  %v15639_v8 = vpack.i.bf16 %v15603_v2, %v15638_v50  ;;  %v15640_v44 = vld [vmem:[#allocation104_spill] sm:$0xff]  ;;  %v7459_v22 = vunpack.i.h.bf16 %v15641_v9  ;;  %v7458_v23 = vunpack.i.l.bf16 %v15641_v9  ;;  %v15642_v57 = vld [vmem:[#allocation83_spill] sm:$0xff]  ;;  %v7544_v14 = vunpack.i.h.bf16 %v15643_v25 }
 0x198   : > { %v7469_v27 = vunpack.i.h.bf16 %v15642_v57  ;;  %v7468_v43 = vunpack.i.l.bf16 %v15642_v57  ;;  %v7543_v37 = vunpack.i.l.bf16 %v15643_v25  ;;  %v11864_v9 = vsel %vm1680_vm10, %v11578_v11, %v7444_v60  ;;  %v15650_v11 = vld [vmem:[#allocation95_spill] sm:$0xff] }
 0x199   : > { %7886 = vrot.lane.b32.xlu1 %v15639_v8, %s9016_s16  ;;  %7881 = vrot.lane.b32.xlu0 %v15640_v44, %s9016_s16  ;;  %v11854_v50 = vpop.permute.xlu1 %1418  ;;  %v11856_v2 = vpop.permute.xlu0 %7606  ;;  %v11860_v8 = vsel %vm1680_vm10, %v11574_v58, %v7443_v38  ;;  %15646 = vst [vmem:[#allocation64_spill] sm:$0xff] %v11864_v9  ;;  %v11868_v57 = vsel %vm1680_vm10, %v11591_v46, %v7438_v15  ;;  %v15649_v58 = vld [vmem:[#allocation46_spill] sm:$0xff] }
 0x19a   : > { %15644 = vst [vmem:[#allocation40_spill] sm:$0xff] %v11854_v50  ;;  %15645 = vst [vmem:[#allocation29_spill] sm:$0xff] %v11856_v2  ;;  %v11872_v25 = vsel %vm1680_vm10, %v11595_v5, %v7439_v52  ;;  %v1716_v56 = vsel %vm1713_vm11, %v11632_v36, %v7463_v29  ;;  %v1717_v53 = vsel %vm1713_vm11, %v11648_v26, %v7464_v4  ;;  %v7539_v38 = vunpack.i.h.bf16 %v15649_v58  ;;  %v15651_v46 = vld [vmem:[#allocation90_spill] sm:$0xff]  ;;  %v15653_v29 = vld [vmem:[#allocation81_spill] sm:$0xff] }
 0x19b   : > { %15647 = vst [vmem:[#allocation48_spill] sm:$0xff] %v11868_v57  ;;  %15648 = vst [vmem:[#allocation71_spill] sm:$0xff] %v11872_v25  ;;  %v7538_v50 = vunpack.i.l.bf16 %v15649_v58  ;;  %v15652_v60 = vpack.i.bf16 %v15650_v11, %v15651_v46  ;;  %v1714_v5 = vsel %vm1713_vm11, %v11661_v16, %v7458_v23  ;;  %v1715_v36 = vsel %vm1713_vm11, %v11665_v48, %v7459_v22 }
 0x19c   : > { %v7474_v4 = vunpack.i.h.bf16 %v15653_v29  ;;  %v7473_v26 = vunpack.i.l.bf16 %v15653_v29  ;;  %v1718_v52 = vsel %vm1713_vm11, %v11697_v1, %v7468_v43  ;;  %v1749_v15 = vsel %vm1746_vm12, %v1716_v56, %v7543_v37 }
 0x19d   : > { %7896 = vrot.lane.b32.xlu1 %v15601_v55, %s9017_s17  ;;  %7891 = vrot.lane.b32.xlu0 %v15652_v60, %s9017_s17  ;;  %v1719_v55 = vsel %vm1713_vm11, %v11701_v45, %v7469_v27  ;;  %v1750_v58 = vsel %vm1746_vm12, %v1717_v53, %v7544_v14  ;;  %v7617_v60 = vpop.permute.xlu1 %7616  ;;  %v7612_v2 = vpop.permute.xlu0 %7611  ;;  %v1747_v22 = vsel %vm1746_vm12, %v1714_v5, %v7538_v50  ;;  %v7549_v57 = vunpack.i.h.bf16 %v11553_v6  ;;  %v15654_v45 = vld [vmem:[#allocation77_spill] sm:$0xff]  ;;  %v15656_v53 = vld [vmem:[#allocation74_spill] sm:$0xff] }
 0x19e   : > { %v7619_v16 = vunpack.i.h.bf16 %v7617_v60  ;;  %v7618_v23 = vunpack.i.l.bf16 %v7617_v60  ;;  %v7614_v25 = vunpack.i.h.bf16 %v7612_v2  ;;  %v7613_v48 = vunpack.i.l.bf16 %v7612_v2  ;;  %v15658_v2 = vld [vmem:[#allocation86_spill] sm:$0xff] }
 0x19f   : > { %v1748_v29 = vsel %vm1746_vm12, %v1715_v36, %v7539_v38  ;;  %v7548_v1 = vunpack.i.l.bf16 %v11553_v6  ;;  %v15655_v37 = vpack.i.bf16 %v15654_v45, %v11157_v54  ;;  %v15657_v43 = vpack.i.bf16 %v11105_v41, %v15656_v53 }
 0x1a0   : > { %v1782_v14 = vsel %vm1779_vm4, %v1749_v15, %v7618_v23  ;;  %v1783_v56 = vsel %vm1779_vm4, %v1750_v58, %v7619_v16  ;;  %v1780_v27 = vsel %vm1779_vm4, %v1747_v22, %v7613_v48  ;;  %v1781_v50 = vsel %vm1779_vm4, %v1748_v29, %v7614_v25  ;;  %v15661_v22 = vld [vmem:[#allocation41_spill] sm:$0xff] }
 0x1a1   : > { %7906 = vrot.lane.b32.xlu1 %v15655_v37, %s9015_s20  ;;  %7901 = vrot.lane.b32.xlu0 %v15657_v43, %s9015_s20  ;;  %v7479_v6 = vunpack.i.h.bf16 %v15658_v2  ;;  %v7478_v38 = vunpack.i.l.bf16 %v15658_v2  ;;  %v1813_v5 = vpack.c.bf16 %v1783_v56, %v1782_v14  ;;  %v7627_v54 = vpop.permute.xlu1 %7626  ;;  %v7622_v36 = vpop.permute.xlu0 %7621  ;;  %v1812_v60 = vpack.c.bf16 %v1781_v50, %v1780_v27  ;;  %v15659_v37 = vld [vmem:[#allocation106_spill] sm:$0xff]  ;;  %v11938_v27 = vld [vmem:[%s9925_s25 + $0xd0] sm:$0xff] }
 0x1a2   : > { %v7554_v9 = vunpack.i.h.bf16 %v15659_v37  ;;  %v7553_v41 = vunpack.i.l.bf16 %v15659_v37  ;;  %v7624_v43 = vunpack.i.h.bf16 %v7622_v36  ;;  %v7623_v15 = vunpack.i.l.bf16 %v7622_v36 }
 0x1a3   : > { %v1751_v58 = vsel %vm1746_vm12, %v1718_v52, %v7548_v1  ;;  %v1752_v16 = vsel %vm1746_vm12, %v1719_v55, %v7549_v57  ;;  %v7559_v25 = vunpack.i.h.bf16 %v11616_v18  ;;  %v7558_v23 = vunpack.i.l.bf16 %v11616_v18  ;;  %6858 = vmatprep.mubr.msk.bf16.mxu1 %vm3468_vm13, %v1812_v60  ;;  %v15662_v57 = vld [vmem:[#allocation72_spill] sm:$0xff] }
 0x1a4   : > { %v15660_v48 = vpack.i.bf16 %v15626_v0, %v15602_v13  ;;  %v7629_v29 = vunpack.i.h.bf16 %v7627_v54  ;;  %v7628_v14 = vunpack.i.l.bf16 %v7627_v54  ;;  %v1784_v56 = vsel %vm1779_vm4, %v1751_v58, %v7623_v15  ;;  %6859 = vmatmul.mubr.msk.bf16.vlgmr.msra.gmra.mrb[24].mxu1 %vm3468_vm13, %v1813_v5 }
 0x1a5   : > { %7911 = vrot.lane.b32.xlu0 %v15661_v22, %s9016_s16  ;;  %v1785_v52 = vsel %vm1779_vm4, %v1752_v16, %v7624_v43  ;;  %v7454_v55 = vunpack.i.h.bf16 %v15662_v57  ;;  %v1720_v18 = vsel %vm1713_vm11, %v11689_v62, %v7473_v26  ;;  %v11935_v0 = vpop.permute.xlu1 %7636  ;;  %v7632_v13 = vpop.permute.xlu0 %7631  ;;  %v1859_v50 = vrot.slane %v11938_v27, 7 }
 0x1a6   : > { %7916 = vrot.lane.b32.xlu1 %v15660_v48, %s9016_s16  ;;  %v1814_v1 = vpack.c.bf16 %v1785_v52, %v1784_v56  ;;  %v1721_v2 = vsel %vm1713_vm11, %v11693_v19, %v7474_v4  ;;  %v1722_v54 = vsel %vm1713_vm11, %v11730_v51, %v7478_v38  ;;  %v7634_v36 = vunpack.i.h.bf16 %v7632_v13  ;;  %v15663_v19 = vld [vmem:[#allocation25_spill] sm:$0xff]  ;;  %v15668_v52 = vld [vmem:[#allocation120_spill] sm:$0xff] }
 0x1a7   : > { %v7633_v60 = vunpack.i.l.bf16 %v7632_v13  ;;  %v7453_v62 = vunpack.i.l.bf16 %v15662_v57  ;;  %v1723_v26 = vsel %vm1713_vm11, %v11734_v30, %v7479_v6  ;;  %v1753_v5 = vsel %vm1746_vm12, %v1720_v18, %v7553_v41  ;;  %v15665_v6 = vld [vmem:[#allocation57_spill] sm:$0xff] }
 0x1a8   : > { %v1754_v37 = vsel %vm1746_vm12, %v1721_v2, %v7554_v9  ;;  %v15664_v4 = vpack.i.bf16 %v11404_v40, %v15663_v19  ;;  %v1755_v51 = vsel %vm1746_vm12, %v1722_v54, %v7558_v23  ;;  %v1756_v38 = vsel %vm1746_vm12, %v1723_v26, %v7559_v25  ;;  %6862 = vmatprep.mubr.msk.bf16.mxu1 %vm3468_vm13, %v1814_v1  ;;  %v15666_v23 = vld [vmem:[#allocation84_spill] sm:$0xff]  ;;  %v15669_v1 = vld [vmem:[#allocation14_spill] sm:$0xff]  ;;  %v15670_v54 = vld [vmem:[#allocation79_spill] sm:$0xff] }
 0x1a9   : > { %v1786_v43 = vsel %vm1779_vm4, %v1753_v5, %v7628_v14  ;;  %v1787_v30 = vsel %vm1779_vm4, %v1754_v37, %v7629_v29  ;;  %v7449_v9 = vunpack.i.h.bf16 %v15665_v6  ;;  %v7448_v41 = vunpack.i.l.bf16 %v15665_v6  ;;  %v11965_v58 = vpop.permute.xlu1 %7646  ;;  %v7642_v16 = vpop.permute.xlu0 %7641  ;;  %v15667_v14 = vld [vmem:[#allocation94_spill] sm:$0xff] }
 0x1aa   : > { %7926 = vrot.lane.b32.xlu1 %v15640_v44, %s9017_s17  ;;  %7921 = vrot.lane.b32.xlu0 %v15664_v4, %s9017_s17  ;;  %v1788_v44 = vsel %vm1779_vm4, %v1755_v51, %v7633_v60  ;;  %v1789_v15 = vsel %vm1779_vm4, %v1756_v38, %v7634_v36  ;;  %v7484_v48 = vunpack.i.h.bf16 %v15666_v23  ;;  %v7483_v25 = vunpack.i.l.bf16 %v15666_v23  ;;  %v15672_v60 = vld [vmem:[#allocation78_spill] sm:$0xff] }
 0x1ab   : > { %v7489_v56 = vunpack.i.h.bf16 %v15667_v14  ;;  %v7488_v29 = vunpack.i.l.bf16 %v15667_v14  ;;  %v7564_v18 = vunpack.i.h.bf16 %v15668_v52  ;;  %v7563_v13 = vunpack.i.l.bf16 %v15668_v52  ;;  %v15674_v6 = vld [vmem:[#allocation118_spill] sm:$0xff] }
 0x1ac   : > { %v7569_v2 = vunpack.i.h.bf16 %v15669_v1  ;;  %v15671_v36 = vpack.i.bf16 %v15670_v54, %v15650_v11  ;;  %v15673_v26 = vpack.i.bf16 %v15651_v46, %v15672_v60  ;;  %v1815_v5 = vpack.c.bf16 %v1787_v30, %v1786_v43  ;;  %v15676_v30 = vld [vmem:[#allocation119_spill] sm:$0xff] }
 0x1ad   : > { %v7568_v37 = vunpack.i.l.bf16 %v15669_v1  ;;  %v7639_v4 = vunpack.i.h.bf16 %v11935_v0  ;;  %v7638_v51 = vunpack.i.l.bf16 %v11935_v0  ;;  %v1816_v38 = vpack.c.bf16 %v1789_v15, %v1788_v44  ;;  %v11990_v52 = vpop.permute.xlu1 %7656  ;;  %v11992_v46 = vpop.permute.xlu0 %7651 }
 0x1ae   : > { %7936 = vrot.lane.b32.xlu1 %v15671_v36, %s9015_s20  ;;  %7931 = vrot.lane.b32.xlu0 %v15673_v26, %s9015_s20  ;;  %v11987_v23 = vsel %vm1680_vm10, %v15674_v6, %v7448_v41  ;;  %v7644_v14 = vunpack.i.h.bf16 %v7642_v16  ;;  %v7643_v11 = vunpack.i.l.bf16 %v7642_v16  ;;  %v15675_v43 = vrot.slane %v11723_v24, 7 }
 0x1af   : > { %6863 = vmatmul.mubr.msk.bf16.gmra.mrb[28].mxu1 %vm3468_vm13, %v1815_v5  ;;  %v12004_v41 = vsel %vm1680_vm10, %v15676_v30, %v7449_v9  ;;  %v1724_v44 = vsel %vm1713_vm11, %v11705_v39, %v7483_v25  ;;  %v1725_v15 = vsel %vm1713_vm11, %v11709_v35, %v7484_v48  ;;  %v1726_v16 = vsel %vm1713_vm11, %v11770_v63, %v7488_v29  ;;  %v15678_v39 = vld [vmem:[#allocation53_spill] sm:$0xff]  ;;  %v12024_v35 = vld [vmem:[%s9925_s25 + $0xd8] sm:$0xff]  ;;  %v15679_v29 = vld [vmem:[#allocation51_spill] sm:$0xff] }
 0x1b0   : > { %v12000_v0 = vsel %vm514_vm3, %v15675_v43, %v1859_v50  ;;  %6866 = vmatprep.mubr.msk.bf16.mxu1 %vm3468_vm13, %v1816_v38  ;;  %v1727_v1 = vsel %vm1713_vm11, %v11780_v7, %v7489_v56  ;;  %v1757_v36 = vsel %vm1746_vm12, %v1724_v44, %v7563_v13  ;;  %v1758_v26 = vsel %vm1746_vm12, %v1725_v15, %v7564_v18  ;;  %v15683_v43 = vld [vmem:[#allocation75_spill] sm:$0xff] }
 0x1b1   : > { %v15677_v9 = vpack.i.bf16 %v15656_v53, %v15625_v20  ;;  %v1860_v63 = vrot.slane %v12024_v35, 7  ;;  %v1759_v48 = vsel %vm1746_vm12, %v1726_v16, %v7568_v37  ;;  %v1760_v7 = vsel %vm1746_vm12, %v1727_v1, %v7569_v2  ;;  %v15680_v20 = vld [vmem:[#allocation67_spill] sm:$0xff]  ;;  %v12043_v37 = vpop.permute.xlu1 %7666  ;;  %v12045_v2 = vpop.permute.xlu0 %7661 }
 0x1b2   : > { %7941 = vrot.lane.b32.xlu0 %v15678_v39, %s9016_s16  ;;  %v1790_v25 = vsel %vm1779_vm4, %v1757_v36, %v7638_v51  ;;  %v1791_v56 = vsel %vm1779_vm4, %v1758_v26, %v7639_v4  ;;  %v12033_v18 = vsel %vm1680_vm10, %v15679_v29, %v7453_v62  ;;  %v12039_v53 = vsel %vm1680_vm10, %v15680_v20, %v7454_v55  ;;  %v15681_v51 = vld [vmem:[#allocation91_spill] sm:$0xff]  ;;  %v15682_v62 = vld [vmem:[#allocation38_spill] sm:$0xff] }
 0x1b3   : > { %7946 = vrot.lane.b32.xlu1 %v15677_v9, %s9016_s16  ;;  %v1792_v13 = vsel %vm1779_vm4, %v1759_v48, %v7643_v11  ;;  %v1793_v5 = vsel %vm1779_vm4, %v1760_v7, %v7644_v14  ;;  %v7494_v4 = vunpack.i.h.bf16 %v15681_v51  ;;  %v7493_v38 = vunpack.i.l.bf16 %v15681_v51  ;;  %v15684_v14 = vld [vmem:[#allocation37_spill] sm:$0xff] }
 0x1b4   : > { %v7499_v6 = vunpack.i.h.bf16 %v15682_v62  ;;  %v7498_v57 = vunpack.i.l.bf16 %v15682_v62  ;;  %v7574_v30 = vunpack.i.h.bf16 %v15683_v43  ;;  %v7573_v55 = vunpack.i.l.bf16 %v15683_v43  ;;  %v15686_v9 = vld [vmem:[#allocation61_spill] sm:$0xff] }
 0x1b5   : > { %v7579_v11 = vunpack.i.h.bf16 %v11714_v28  ;;  %v15685_v44 = vpack.i.bf16 %v11484_v61, %v15684_v14  ;;  %v1817_v15 = vpack.c.bf16 %v1791_v56, %v1790_v25  ;;  %v7578_v16 = vunpack.i.l.bf16 %v11714_v28  ;;  %v12069_v20 = vpop.permute.xlu0 %7671  ;;  %v15687_v51 = vld [vmem:[#allocation85_spill] sm:$0xff] }
 0x1b6   : > { %v7649_v1 = vunpack.i.h.bf16 %v11965_v58  ;;  %v7648_v36 = vunpack.i.l.bf16 %v11965_v58  ;;  %v1818_v26 = vpack.c.bf16 %v1793_v5, %v1792_v13  ;;  %v7503_v48 = vunpack.i.l.bf16 %v15686_v9 }
 0x1b7   : > { %7956 = vrot.lane.b32.xlu1 %v15661_v22, %s9017_s17  ;;  %7951 = vrot.lane.b32.xlu0 %v15685_v44, %s9017_s17  ;;  %v7654_v7 = vunpack.i.h.bf16 %v11992_v46  ;;  %v7653_v29 = vunpack.i.l.bf16 %v11992_v46  ;;  %v12067_v22 = vpop.permute.xlu1 %7676  ;;  %v12077_v28 = vsel %vm514_vm3, %v1859_v50, %v1860_v63  ;;  %v1728_v58 = vsel %vm1713_vm11, %v11762_v10, %v7493_v38 }
 0x1b8   : > { %6867 = vmatmul.mubr.msk.bf16.gmra.mrb[0].mxu1 %vm3468_vm13, %v1817_v15  ;;  %v1729_v46 = vsel %vm1713_vm11, %v11766_v31, %v7494_v4  ;;  %v7504_v25 = vunpack.i.h.bf16 %v15686_v9  ;;  %v1730_v56 = vsel %vm1713_vm11, %v11802_v34, %v7498_v57  ;;  %v1731_v13 = vsel %vm1713_vm11, %v11808_v59, %v7499_v6  ;;  %v15689_v31 = vld [vmem:[#allocation82_spill] sm:$0xff]  ;;  %v15692_v15 = vld [vmem:[#allocation103_spill] sm:$0xff]  ;;  %v15694_v9 = vld [vmem:[#allocation65_spill] sm:$0xff] }
 0x1b9   : > { %6870 = vmatprep.mubr.msk.bf16.mxu1 %vm3468_vm13, %v1818_v26  ;;  %v1761_v5 = vsel %vm1746_vm12, %v1728_v58, %v7573_v55  ;;  %v1762_v50 = vsel %vm1746_vm12, %v1729_v46, %v7574_v30  ;;  %v15688_v10 = vpack.i.bf16 %v15687_v51, %v11404_v40  ;;  %v15690_v4 = vpack.i.bf16 %v15663_v19, %v15689_v31  ;;  %v12109_v30 = vpop.permute.xlu0 %7681 }
 0x1ba   : > { %v1763_v34 = vsel %vm1746_vm12, %v1730_v56, %v7578_v16  ;;  %v1764_v38 = vsel %vm1746_vm12, %v1731_v13, %v7579_v11  ;;  %v1794_v59 = vsel %vm1779_vm4, %v1761_v5, %v7648_v36  ;;  %v1795_v62 = vsel %vm1779_vm4, %v1762_v50, %v7649_v1  ;;  %v15691_v11 = vld [vmem:[#allocation34_spill] sm:$0xff] }
 0x1bb   : > { %7966 = vrot.lane.b32.xlu1 %v15688_v10, %s9015_s20  ;;  %7961 = vrot.lane.b32.xlu0 %v15690_v4, %s9015_s20  ;;  %v1732_v6 = vsel %vm1713_vm11, %v11794_v49, %v7503_v48  ;;  %v1796_v57 = vsel %vm1779_vm4, %v1763_v34, %v7653_v29  ;;  %v1797_v40 = vsel %vm1779_vm4, %v1764_v38, %v7654_v7  ;;  %v12107_v43 = vpop.permute.xlu1 %7686  ;;  %v7513_v44 = vunpack.i.l.bf16 %v15691_v11  ;;  %v15693_v1 = vld [vmem:[#allocation26_spill] sm:$0xff]  ;;  %v15696_v7 = vld [vmem:[#allocation121_spill] sm:$0xff]  ;;  %v15698_v38 = vld [vmem:[#allocation111_spill] sm:$0xff] }
 0x1bc   : > { %v12113_v19 = vmul.f32 %v15344_v3, %v12000_v0  ;;  %v1733_v55 = vsel %vm1713_vm11, %v11798_v32, %v7504_v25  ;;  %v7509_v16 = vunpack.i.h.bf16 %v15692_v15  ;;  %v7508_v49 = vunpack.i.l.bf16 %v15692_v15  ;;  %v15697_v13 = vld [vmem:[#allocation110_spill] sm:$0xff] }
 0x1bd   : > { %v7584_v36 = vunpack.i.h.bf16 %v15693_v1  ;;  %v7583_v26 = vunpack.i.l.bf16 %v15693_v1  ;;  %v7589_v48 = vunpack.i.h.bf16 %v15694_v9  ;;  %v15695_v0 = vpack.i.bf16 %v15672_v60, %v15654_v45  ;;  %v12139_v10 = vpop.permute.xlu0 %7691  ;;  %v15700_v15 = vld [vmem:[#allocation58_spill] sm:$0xff] }
 0x1be   : > { %v1819_v32 = vpack.c.bf16 %v1795_v62, %v1794_v59  ;;  %v7588_v29 = vunpack.i.l.bf16 %v15694_v9  ;;  %v7659_v58 = vunpack.i.h.bf16 %v11990_v52  ;;  %v7658_v46 = vunpack.i.l.bf16 %v11990_v52  ;;  %v15702_v9 = vld [vmem:[#allocation48_spill] sm:$0xff] }
 0x1bf   : > { %7976 = vrot.lane.b32.xlu1 %v15695_v0, %s9016_s16  ;;  %7971 = vrot.lane.b32.xlu0 %v15696_v7, %s9016_s16  ;;  %v1820_v25 = vpack.c.bf16 %v1797_v40, %v1796_v57  ;;  %v7514_v56 = vunpack.i.h.bf16 %v15691_v11  ;;  %v7523_v5 = vunpack.i.l.bf16 %v15697_v13  ;;  %v7664_v50 = vunpack.i.h.bf16 %v12045_v2  ;;  %v12137_v60 = vpop.permute.xlu1 %7696  ;;  %v15703_v0 = vld [vmem:[#allocation42_spill] sm:$0xff] }
 0x1c0   : > { %v7663_v45 = vunpack.i.l.bf16 %v12045_v2  ;;  %6871 = vmatmul.mubr.msk.bf16.gmra.mrb[4].mxu1 %vm3468_vm13, %v1819_v32  ;;  %v1736_v4 = vsel %vm1713_vm11, %v11812_v42, %v7513_v44  ;;  %v1734_v52 = vsel %vm1713_vm11, %v11832_v21, %v7508_v49  ;;  %v7524_v34 = vunpack.i.h.bf16 %v15697_v13 }
 0x1c1   : > { %v7518_v59 = vunpack.i.l.bf16 %v15698_v38  ;;  %6874 = vmatprep.mubr.msk.bf16.mxu1 %vm3468_vm13, %v1820_v25  ;;  %v1735_v2 = vsel %vm1713_vm11, %v11836_v33, %v7509_v16  ;;  %v7519_v62 = vunpack.i.h.bf16 %v15698_v38  ;;  %v1765_v57 = vsel %vm1746_vm12, %v1732_v6, %v7583_v26  ;;  %v12171_v1 = vpop.permute.xlu0 %7701 }
 0x1c2   : > { %v1766_v40 = vsel %vm1746_vm12, %v1733_v55, %v7584_v36  ;;  %v15699_v42 = vpack.i.bf16 %v11520_v12, %v11467_v47  ;;  %v1767_v21 = vsel %vm1746_vm12, %v1734_v52, %v7588_v29  ;;  %v1768_v11 = vsel %vm1746_vm12, %v1735_v2, %v7589_v48  ;;  %v15701_v36 = vld [vmem:[#allocation64_spill] sm:$0xff] }
 0x1c3   : > { %7986 = vrot.lane.b32.xlu1 %v15678_v39, %s9017_s17  ;;  %v1798_v33 = vsel %vm1779_vm4, %v1765_v57, %v7658_v46  ;;  %v1799_v44 = vsel %vm1779_vm4, %v1766_v40, %v7659_v58  ;;  %v1737_v6 = vsel %vm1713_vm11, %v15700_v15, %v7514_v56  ;;  %v1740_v55 = vsel %vm1713_vm11, %v11860_v8, %v7523_v5  ;;  %v12169_v49 = vpop.permute.xlu1 %7706  ;;  %v15704_v29 = vld [vmem:[#allocation112_spill] sm:$0xff]  ;;  %v15705_v46 = vld [vmem:[#allocation71_spill] sm:$0xff]  ;;  %v15707_v5 = vld [vmem:[#allocation89_spill] sm:$0xff] }
 0x1c4   : > { %7981 = vrot.lane.b32.xlu0 %v15699_v42, %s9017_s17  ;;  %v1800_v39 = vsel %vm1779_vm4, %v1767_v21, %v7663_v45  ;;  %v1801_v16 = vsel %vm1779_vm4, %v1768_v11, %v7664_v50  ;;  %v1741_v26 = vsel %vm1713_vm11, %v15701_v36, %v7524_v34  ;;  %v1738_v48 = vsel %vm1713_vm11, %v15702_v9, %v7518_v59  ;;  %v15706_v56 = vld [vmem:[#allocation59_spill] sm:$0xff]  ;;  %v15709_v45 = vld [vmem:[#allocation88_spill] sm:$0xff]  ;;  %v15712_v15 = vld [vmem:[#allocation73_spill] sm:$0xff] }
 0x1c5   : > { %v7528_v32 = vunpack.i.l.bf16 %v15703_v0  ;;  %v7593_v58 = vunpack.i.l.bf16 %v15704_v29  ;;  %v1739_v8 = vsel %vm1713_vm11, %v15705_v46, %v7519_v62  ;;  %v7594_v25 = vunpack.i.h.bf16 %v15704_v29  ;;  %v15711_v57 = vld [vmem:[#allocation31_spill] sm:$0xff]  ;;  %v12201_v11 = vpop.permute.xlu0 %7711 }
 0x1c6   : > { %v7598_v13 = vunpack.i.l.bf16 %v15706_v56  ;;  %v15708_v50 = vpack.i.bf16 %v15707_v5, %v11484_v61  ;;  %v15710_v52 = vpack.i.bf16 %v15684_v14, %v15709_v45  ;;  %v1821_v34 = vpack.c.bf16 %v1799_v44, %v1798_v33 }
 0x1c7   : > { %v7599_v38 = vunpack.i.h.bf16 %v15706_v56  ;;  %v7669_v59 = vunpack.i.h.bf16 %v12043_v37  ;;  %v7668_v2 = vunpack.i.l.bf16 %v12043_v37  ;;  %v1822_v62 = vpack.c.bf16 %v1801_v16, %v1800_v39  ;;  %v12199_v14 = vpop.permute.xlu1 %7716 }
 0x1c8   : > { %7996 = vrot.lane.b32.xlu1 %v15708_v50, %s9015_s20  ;;  %7991 = vrot.lane.b32.xlu0 %v15710_v52, %s9015_s20  ;;  %v7534_v40 = vunpack.i.h.bf16 %v15711_v57  ;;  %v7533_v42 = vunpack.i.l.bf16 %v15711_v57  ;;  %v7674_v61 = vunpack.i.h.bf16 %v12069_v20  ;;  %v7673_v21 = vunpack.i.l.bf16 %v12069_v20 }
 0x1c9   : > { %6875 = vmatmul.mubr.msk.bf16.gmra.mrb[8].mxu1 %vm3468_vm13, %v1821_v34  ;;  %v7529_v33 = vunpack.i.h.bf16 %v15703_v0  ;;  %v1742_v37 = vsel %vm1713_vm11, %v11987_v23, %v7528_v32  ;;  %v1769_v44 = vsel %vm1746_vm12, %v1736_v4, %v7593_v58  ;;  %v7603_v39 = vunpack.i.l.bf16 %v15712_v15  ;;  %v15714_v23 = vld [vmem:[#allocation28_spill] sm:$0xff]  ;;  %v15715_v58 = vld [vmem:[#allocation29_spill] sm:$0xff] }
 0x1ca   : > { %6878 = vmatprep.mubr.msk.bf16.mxu1 %vm3468_vm13, %v1822_v62  ;;  %v1770_v20 = vsel %vm1746_vm12, %v1737_v6, %v7594_v25  ;;  %v7604_v16 = vunpack.i.h.bf16 %v15712_v15  ;;  %v1771_v36 = vsel %vm1746_vm12, %v1738_v48, %v7598_v13  ;;  %v7678_v9 = vunpack.i.l.bf16 %v12067_v22 }
 0x1cb   : > { %v15713_v0 = vpack.i.bf16 %v15689_v31, %v15670_v54  ;;  %v1772_v4 = vsel %vm1746_vm12, %v1739_v8, %v7599_v38  ;;  %v1802_v32 = vsel %vm1779_vm4, %v1769_v44, %v7668_v2  ;;  %v1803_v6 = vsel %vm1779_vm4, %v1770_v20, %v7669_v59  ;;  %v12227_v31 = vpop.permute.xlu1 %7726  ;;  %v12229_v56 = vpop.permute.xlu0 %7721  ;;  %v15716_v38 = vld [vmem:[#allocation22_spill] sm:$0xff]  ;;  %v15717_v59 = vld [vmem:[#allocation117_spill] sm:$0xff] }
 0x1cc   : > { %8001 = vrot.lane.b32.xlu0 %v15714_v23, %s9016_s16  ;;  %v7679_v29 = vunpack.i.h.bf16 %v12067_v22  ;;  %v7609_v48 = vunpack.i.h.bf16 %v15715_v58  ;;  %v7608_v46 = vunpack.i.l.bf16 %v15715_v58  ;;  %v1804_v25 = vsel %vm1779_vm4, %v1771_v36, %v7673_v21  ;;  %v15719_v36 = vld [vmem:[#allocation96_spill] sm:$0xff] }
 0x1cd   : > { %8006 = vrot.lane.b32.xlu1 %v15713_v0, %s9016_s16  ;;  %v1805_v54 = vsel %vm1779_vm4, %v1772_v4, %v7674_v61  ;;  %v1743_v8 = vsel %vm1713_vm11, %v12004_v41, %v7529_v33  ;;  %v1773_v13 = vsel %vm1746_vm12, %v1740_v55, %v7603_v39  ;;  %v7684_v50 = vunpack.i.h.bf16 %v12109_v30  ;;  %v15721_v0 = vld [vmem:[#allocation92_spill] sm:$0xff] }
 0x1ce   : > { %v7683_v22 = vunpack.i.l.bf16 %v12109_v30  ;;  %v1774_v52 = vsel %vm1746_vm12, %v1741_v26, %v7604_v16  ;;  %v1806_v34 = vsel %vm1779_vm4, %v1773_v13, %v7678_v9  ;;  %v15718_v2 = vpack.i.bf16 %v15716_v38, %v15717_v59  ;;  %v8841_v58 = vld [vmem:[%s9925_s25 + $0x8] sm:$0xff] }
 0x1cf   : > { %v1823_v62 = vpack.c.bf16 %v1803_v6, %v1802_v32  ;;  %v1807_v41 = vsel %vm1779_vm4, %v1774_v52, %v7679_v29  ;;  %v7728_v55 = vunpack.i.l.bf16 %v12227_v31  ;;  %v7724_v30 = vunpack.i.h.bf16 %v12229_v56  ;;  %v7737_v33 = vpop.permute.xlu1 %7736  ;;  %v7732_v44 = vpop.permute.xlu0 %7731  ;;  %v8840_v6 = vld [vmem:[%s9925_s25] sm:$0xff] }
 0x1d0   : > { %8011 = vrot.lane.b32.xlu0 %v15718_v2, %s9017_s17  ;;  %v1824_v57 = vpack.c.bf16 %v1805_v54, %v1804_v25  ;;  %v1744_v26 = vsel %vm1713_vm11, %v12033_v18, %v7533_v42  ;;  %v1775_v61 = vsel %vm1746_vm12, %v1742_v37, %v7608_v46  ;;  %v7693_v21 = vunpack.i.l.bf16 %v12139_v10  ;;  %v15723_v46 = vld [vmem:[#allocation93_spill] sm:$0xff]  ;;  %v15726_v2 = vld [vmem:[#allocation60_spill] sm:$0xff] }
 0x1d1   : > { %8016 = vrot.lane.b32.xlu1 %v15696_v7, %s9017_s17  ;;  %v1776_v7 = vsel %vm1746_vm12, %v1743_v8, %v7609_v48  ;;  %6879 = vmatmul.mubr.msk.bf16.gmra.mrb[12].mxu1 %vm3468_vm13, %v1823_v62  ;;  %v1745_v15 = vsel %vm1713_vm11, %v12039_v53, %v7534_v40  ;;  %v1808_v39 = vsel %vm1779_vm4, %v1775_v61, %v7683_v22  ;;  %v7733_v18 = vunpack.i.l.bf16 %v7732_v44 }
 0x1d2   : > { %v1809_v20 = vsel %vm1779_vm4, %v1776_v7, %v7684_v50  ;;  %6882 = vmatprep.mubr.msk.bf16.mxu1 %vm3468_vm13, %v1824_v57  ;;  %v7739_v42 = vunpack.i.h.bf16 %v7737_v33  ;;  %v7738_v37 = vunpack.i.l.bf16 %v7737_v33  ;;  %v7734_v16 = vunpack.i.h.bf16 %v7732_v44 }
 0x1d3   : > { %v15720_v9 = vpack.i.bf16 %v15719_v36, %v11520_v12  ;;  %v15722_v4 = vpack.i.bf16 %v11467_v47, %v15721_v0  ;;  %v1825_v53 = vpack.c.bf16 %v1807_v41, %v1806_v34  ;;  %v7689_v40 = vunpack.i.h.bf16 %v12107_v43  ;;  %v7747_v54 = vpop.permute.xlu1 %7746  ;;  %v7742_v47 = vpop.permute.xlu0 %7741 }
 0x1d4   : > { %v7688_v32 = vunpack.i.l.bf16 %v12107_v43  ;;  %v2795_v29 = vsel %vm1779_vm4, %v8840_v6, %v7724_v30  ;;  %v2796_v48 = vsel %vm1779_vm4, %v8841_v58, %v7728_v55  ;;  %v2697_v12 = vsel %vm1779_vm4, %v15723_v46, %v7693_v21  ;;  %v8842_v6 = vld [vmem:[%s9925_s25 + $0x18] sm:$0xff]  ;;  %v12320_v58 = vld [vmem:[%s9925_s25 + $0xe0] sm:$0xff] }
 0x1d5   : > { %8026 = vrot.lane.b32.xlu1 %v15720_v9, %s9015_s20  ;;  %8021 = vrot.lane.b32.xlu0 %v15722_v4, %s9015_s20  ;;  %v12275_v25 = vsel %vm1779_vm4, 0.0, %v7693_v21  ;;  %v1826_v8 = vpack.c.bf16 %v1809_v20, %v1808_v39  ;;  %v2827_v13 = vsel %vm2729_vm14, %v2795_v29, %v7733_v18  ;;  %v7749_v50 = vunpack.i.h.bf16 %v7747_v54  ;;  %v15729_v9 = vld [vmem:[#allocation17_spill] sm:$0xff] }
 0x1d6   : > { %15724 = vst [vmem:[#allocation66_spill] sm:$0xff] %v12275_v25  ;;  %v7748_v22 = vunpack.i.l.bf16 %v7747_v54  ;;  %v7744_v43 = vunpack.i.h.bf16 %v7742_v47  ;;  %v7743_v52 = vunpack.i.l.bf16 %v7742_v47  ;;  %v15725_v34 = vpack.i.bf16 %v15709_v45, %v15687_v51  ;;  %v15728_v45 = vld [vmem:[#allocation40_spill] sm:$0xff] }
 0x1d7   : > { %v2828_v62 = vsel %vm2729_vm14, %v2796_v48, %v7734_v16  ;;  %v12286_v41 = vsel %vm2729_vm14, %v2697_v12, %v7738_v37  ;;  %v2731_v55 = vsel %vm2729_vm14, %v12275_v25, %v7739_v42  ;;  %v1777_v7 = vsel %vm1746_vm12, %v1744_v26, %v15728_v45  ;;  %v7757_v33 = vpop.permute.xlu1 %7756  ;;  %v12300_v44 = vpop.permute.xlu0 %7751 }
 0x1d8   : > { %15727 = vst [vmem:[#allocation47_spill] sm:$0xff] %v12286_v41  ;;  %v2859_v30 = vsel %vm2762_vm15, %v2827_v13, %v7743_v52  ;;  %v2860_v57 = vsel %vm2762_vm15, %v2828_v62, %v7744_v43  ;;  %v2763_v61 = vsel %vm2762_vm15, %v12286_v41, %v7748_v22  ;;  %v2764_v51 = vsel %vm2762_vm15, %v2731_v55, %v7749_v50  ;;  %v8845_v43 = vld [vmem:[%s14805_s4 + $0x80] sm:$0xff]  }
 0x1d9   : > { %8036 = vrot.lane.b32.xlu1 %v15725_v34, %s9016_s16  ;;  %8031 = vrot.lane.b32.xlu0 %v15726_v2, %s9016_s16  ;;  %v1778_v21 = vsel %vm1746_vm12, %v1745_v15, %v15728_v45  ;;  %v2892_v39 = vpack.c.bf16 %v2860_v57, %v2859_v30  ;;  %v2891_v20 = vpack.c.bf16 %v2764_v51, %v2763_v61  ;;  %v7729_v37 = vunpack.i.h.bf16 %v12227_v31  ;;  %v8846_v30 = vld [vmem:[%s14805_s4 + $0x88] sm:$0xff]  }
 0x1da   : > { %6883 = vmatmul.mubr.msk.bf16.gmra.mrb[16].mxu1 %vm3468_vm13, %v1825_v53  ;;  %v1810_v18 = vsel %vm1779_vm4, %v1777_v7, %v7688_v32  ;;  %v1811_v42 = vsel %vm1779_vm4, %v1778_v21, %v7689_v40  ;;  %v7753_v26 = vunpack.i.l.bf16 %v12300_v44  ;;  %v7759_v15 = vunpack.i.h.bf16 %v7757_v33  ;;  %v15731_v53 = vld [vmem:[#allocation100_spill] sm:$0xff]  ;;  %v15732_v32 = vld [vmem:[#allocation97_spill] sm:$0xff] }
 0x1db   : > { %6886 = vmatprep.mubr.msk.bf16.mxu1 %vm3468_vm13, %v1826_v8  ;;  %v7758_v16 = vunpack.i.l.bf16 %v7757_v33  ;;  %v15730_v4 = vpack.i.bf16 %v11723_v24, %v15729_v9  ;;  %v8055_v40 = vpack.i.bf16 %v15731_v53, %v15716_v38  ;;  %v8050_v31 = vpack.i.bf16 %v15717_v59, %v15732_v32  ;;  %3163 = vmatprep.mubr.bf16.mxu0 %v2892_v39  ;;  %v7767_v46 = vpop.permute.xlu1 %7766  ;;  %v7762_v12 = vpop.permute.xlu0 %7761  ;;  %v8844_v8 = vld [vmem:[%s9925_s25 + $0x10] sm:$0xff]  ;;  %v12355_v7 = vld [vmem:[%s9925_s25 + $0xe8] sm:$0xff] }
 0x1dc   : > { %v2798_v29 = vsel %vm1779_vm4, %v8842_v6, %v7753_v26  ;;  %v7698_v48 = vunpack.i.l.bf16 %v12137_v60  ;;  %3164 = vmatmul.mubr.bf16.vlgmr.msra.gmra.mrb[0].mxu0 %v2891_v20  ;;  %v1827_v54 = vpack.c.bf16 %v1811_v42, %v1810_v18  ;;  %v8065_v38 = vpack.i.bf16 %v15721_v0, %v15707_v5  ;;  %v15733_v33 = vld [vmem:[#allocation21_spill] sm:$0xff] }
 0x1dd   : > { %8046 = vrot.lane.b32.xlu1 %v15714_v23, %s9017_s17  ;;  %8041 = vrot.lane.b32.xlu0 %v15730_v4, %s9017_s17  ;;  %v1861_v23 = vrot.slane %v12320_v58, 7  ;;  %v12328_v59 = vpack.i.bf16 %v12077_v28, %v12113_v19  ;;  %v7694_v47 = vunpack.i.h.bf16 %v12139_v10  ;;  %v2797_v13 = vsel %vm1779_vm4, %v8844_v8, %v7729_v37  ;;  %v15734_v39 = vld [vmem:[#allocation13_spill] sm:$0xff] }
 0x1de   : > { %v7769_v50 = vunpack.i.h.bf16 %v7767_v46  ;;  %v7768_v22 = vunpack.i.l.bf16 %v7767_v46  ;;  %6817 = vmatpush3.bf16.msra.mxu0 %v8845_v43  ;;  %v7764_v52 = vunpack.i.h.bf16 %v7762_v12  ;;  %v7763_v34 = vunpack.i.l.bf16 %v7762_v12  ;;  %v8848_v43 = vld [vmem:[%s9925_s25 + $0x20] sm:$0xff] }
 0x1df   : > { %v2829_v5 = vsel %vm2729_vm14, %v2797_v13, %v7758_v16  ;;  %v2830_v10 = vsel %vm2729_vm14, %v2798_v29, %v7759_v15  ;;  %v1869_v55 = vsel %vm514_vm3, %v1860_v63, %v1861_v23  ;;  %6818 = vmatprep.subr.bf16.mxu0 %v8846_v30  ;;  %v12350_v57 = vpop.permute.xlu1 %7776  ;;  %v7772_v61 = vpop.permute.xlu0 %7771  ;;  %v8070_v45 = vpack.i.bf16 %v12024_v35, %v11938_v27 }
 0x1e0   : > { %v2861_v0 = vsel %vm2762_vm15, %v2829_v5, %v7768_v22  ;;  %v2862_v62 = vsel %vm2762_vm15, %v2830_v10, %v7769_v50  ;;  %v1862_v21 = vrot.slane %v12355_v7, 7  ;;  %v2700_v63 = vsel %vm1779_vm4, %v15733_v33, %v7698_v48 }
 0x1e1   : > { %8056 = vrot.lane.b32.xlu1 %v8055_v40, %s9015_s20  ;;  %8051 = vrot.lane.b32.xlu0 %v8050_v31, %s9015_s20  ;;  %v2895_v51 = vpack.c.bf16 %v2862_v62, %v2861_v0  ;;  %v2699_v20 = vsel %vm1779_vm4, %v15734_v39, %v7694_v47  ;;  %v7774_v18 = vunpack.i.h.bf16 %v7772_v61  ;;  %v7773_v42 = vunpack.i.l.bf16 %v7772_v61  ;;  %v15738_v0 = vld [vmem:[#allocation108_spill] sm:$0xff]  ;;  %v12405_v61 = vld [vmem:[%s9925_s25 + $0xf0] sm:$0xff] }
 0x1e2   : > { %6887 = vmatmul.mubr.msk.bf16.gmra.mrb[20].mxu1 %vm3468_vm13, %v1827_v54  ;;  %6819 = vmatpush3.bf16.msra.mxu0 %v8846_v30  ;;  %v2732_v37 = vsel %vm2729_vm14, %v2699_v20, %v7763_v34  ;;  %v2733_v26 = vsel %vm2729_vm14, %v2700_v63, %v7764_v52  ;;  %v12368_v15 = vmul.f32 %v15344_v3, %v1869_v55  ;;  %v7754_v16 = vunpack.i.h.bf16 %v12300_v44  ;;  %v8849_v52 = vld [vmem:[%s9925_s25 + $0x28] sm:$0xff] }
 0x1e3   : > { %v7778_v4 = vunpack.i.l.bf16 %v12350_v57  ;;  %3171 = vmatprep.mubr.bf16.mxu0 %v2895_v51  ;;  %v2765_v40 = vsel %vm2762_vm15, %v2732_v37, %v7773_v42  ;;  %v2766_v31 = vsel %vm2762_vm15, %v2733_v26, %v7774_v18  ;;  %v7699_v6 = vunpack.i.h.bf16 %v12137_v60  ;;  %v7787_v48 = vpop.permute.xlu1 %7786  ;;  %v7782_v46 = vpop.permute.xlu0 %7781  ;;  %v15736_v60 = vld [vmem:[#allocation101_spill] sm:$0xff] }
 0x1e4   : > { %v7703_v29 = vunpack.i.l.bf16 %v12171_v1  ;;  %v2894_v12 = vpack.c.bf16 %v2766_v31, %v2765_v40  ;;  %v12380_v44 = vsel %vm514_vm3, %v1861_v23, %v1862_v21  ;;  %v7783_v54 = vunpack.i.l.bf16 %v7782_v46 }
 0x1e5   : > { %8066 = vrot.lane.b32.xlu1 %v8065_v38, %s9016_s16  ;;  %8061 = vrot.lane.b32.xlu0 %v12328_v59, %s9016_s16  ;;  %v15735_v38 = vld [vmem:[#allocation30_spill] sm:$0xff]  ;;  %v7789_v8 = vunpack.i.h.bf16 %v7787_v48  ;;  %v7788_v13 = vunpack.i.l.bf16 %v7787_v48  ;;  %v7784_v50 = vunpack.i.h.bf16 %v7782_v46  ;;  %v8080_v22 = vpack.i.bf16 %v15729_v9, %v15736_v60 }
 0x1e6   : > { %v8085_v47 = vpack.i.bf16 %v15735_v38, %v11723_v24  ;;  %v2799_v23 = vsel %vm1779_vm4, %v8848_v43, %v7754_v16  ;;  %v2800_v34 = vsel %vm1779_vm4, %v8849_v52, %v7778_v4  ;;  %3172 = vmatmul.mubr.bf16.gmra.mrb[4].mxu0 %v2894_v12  ;;  %v8095_v24 = vpack.i.bf16 %v15732_v32, %v15719_v36  ;;  %v15739_v43 = vld [vmem:[#allocation32_spill] sm:$0xff]  ;;  %v15740_v52 = vld [vmem:[#allocation102_spill] sm:$0xff] }
 0x1e7   : > { %v12397_v5 = vpack.i.bf16 %v12380_v44, %v12368_v15  ;;  %v2702_v9 = vsel %vm1779_vm4, %v15738_v0, %v7703_v29  ;;  %v7797_v62 = vpop.permute.xlu1 %7796  ;;  %v7792_v55 = vpop.permute.xlu0 %7791  ;;  %v2831_v30 = vsel %vm2729_vm14, %v2799_v23, %v7783_v54  ;;  %v1863_v51 = vrot.slane %v12405_v61, 7 }
 0x1e8   : > { %v7798_v36 = vunpack.i.l.bf16 %v7797_v62  ;;  %v7794_v32 = vunpack.i.h.bf16 %v7792_v55  ;;  %v7793_v33 = vunpack.i.l.bf16 %v7792_v55  ;;  %v2832_v63 = vsel %vm2729_vm14, %v2800_v34, %v7784_v50 }
 0x1e9   : > { %8076 = vrot.lane.b32.xlu1 %v15726_v2, %s9017_s17  ;;  %8071 = vrot.lane.b32.xlu0 %v8070_v45, %s9017_s17  ;;  %v15737_v2 = vld [vmem:[#allocation50_spill] sm:$0xff]  ;;  %v7799_v45 = vunpack.i.h.bf16 %v7797_v62  ;;  %v2735_v20 = vsel %vm2729_vm14, %v2702_v9, %v7789_v8  ;;  %v1867_v48 = vsel %vm514_vm3, %v1862_v21, %v1863_v51  ;;  %v8100_v54 = vpack.i.bf16 %v12355_v7, %v12320_v58 }
 0x1ea   : > { %v2701_v10 = vsel %vm1779_vm4, %v15737_v2, %v7699_v6  ;;  %v2863_v18 = vsel %vm2762_vm15, %v2831_v30, %v7793_v33  ;;  %v2864_v42 = vsel %vm2762_vm15, %v2832_v63, %v7794_v32  ;;  %v7779_v6 = vunpack.i.h.bf16 %v12350_v57  ;;  %v12433_v8 = vld [vmem:[%s9925_s25 + $0xf8] sm:$0xff] }
 0x1eb   : > { %v2734_v39 = vsel %vm2729_vm14, %v2701_v10, %v7788_v13  ;;  %v2768_v26 = vsel %vm2762_vm15, %v2735_v20, %v7799_v45  ;;  %v7807_v16 = vpop.permute.xlu1 %7806  ;;  %v12417_v4 = vpop.permute.xlu0 %7801  ;;  %v2898_v40 = vpack.c.bf16 %v2864_v42, %v2863_v18  ;;  %v1864_v13 = vrot.slane %v12433_v8, 7  ;;  %v8853_v10 = vld [vmem:[%s9925_s25 + $0x30] sm:$0xff] }
 0x1ec   : > { %v2767_v37 = vsel %vm2762_vm15, %v2734_v39, %v7798_v36  ;;  %v7803_v29 = vunpack.i.l.bf16 %v12417_v4  ;;  %v7809_v46 = vunpack.i.h.bf16 %v7807_v16  ;;  %v7808_v12 = vunpack.i.l.bf16 %v7807_v16  ;;  %v15741_v39 = vld [vmem:[#allocation16_spill] sm:$0xff]  ;;  %v15742_v18 = vld [vmem:[#allocation109_spill] sm:$0xff] }
 0x1ed   : > { %8086 = vrot.lane.b32.xlu1 %v8085_v47, %s9015_s20  ;;  %8081 = vrot.lane.b32.xlu0 %v8080_v22, %s9015_s20  ;;  %v2897_v31 = vpack.c.bf16 %v2768_v26, %v2767_v37  ;;  %v8851_v47 = vld [vmem:[%s9925_s25 + $0x38] sm:$0xff]  ;;  %v7708_v21 = vunpack.i.l.bf16 %v12169_v49  ;;  %v8115_v23 = vpack.i.bf16 %v15739_v43, %v12024_v35  ;;  %v8110_v34 = vpack.i.bf16 %v11938_v27, %v15740_v52 }
 0x1ee   : > { %v2802_v57 = vsel %vm1779_vm4, %v8851_v47, %v7803_v29  ;;  %3179 = vmatprep.mubr.bf16.mxu0 %v2898_v40  ;;  %v7704_v2 = vunpack.i.h.bf16 %v12171_v1  ;;  %v2801_v0 = vsel %vm1779_vm4, %v8853_v10, %v7779_v6  ;;  %v12456_v36 = vsel %vm514_vm3, %v1863_v51, %v1864_v13  ;;  %v15744_v10 = vld [vmem:[#allocation55_spill] sm:$0xff] }
 0x1ef   : > { %3180 = vmatmul.mubr.bf16.gmra.mrb[8].mxu0 %v2897_v31  ;;  %v7817_v50 = vpop.permute.xlu1 %7816  ;;  %v7812_v22 = vpop.permute.xlu0 %7811  ;;  %v2833_v35 = vsel %vm2729_vm14, %v2801_v0, %v7808_v12  ;;  %v2834_v27 = vsel %vm2729_vm14, %v2802_v57, %v7809_v46  ;;  %v2704_v20 = vsel %vm1779_vm4, %v15741_v39, %v7708_v21  ;;  %v7709_v29 = vunpack.i.h.bf16 %v12169_v49  ;;  %v8854_v49 = vld [vmem:[%s9925_s25 + $0x40] sm:$0xff] }
 0x1f0   : > { %v7819_v9 = vunpack.i.h.bf16 %v7817_v50  ;;  %v7818_v62 = vunpack.i.l.bf16 %v7817_v50  ;;  %v7814_v55 = vunpack.i.h.bf16 %v7812_v22  ;;  %v7813_v30 = vunpack.i.l.bf16 %v7812_v22 }
 0x1f1   : > { %8096 = vrot.lane.b32.xlu1 %v8095_v24, %s9016_s16  ;;  %8091 = vrot.lane.b32.xlu0 %v12397_v5, %s9016_s16  ;;  %v12442_v24 = vmul.f32 %v15344_v3, %v1867_v48  ;;  %v2703_v42 = vsel %vm1779_vm4, %v15742_v18, %v7704_v2  ;;  %v7713_v48 = vunpack.i.l.bf16 %v12201_v11  ;;  %v8130_v22 = vpack.i.bf16 %v12433_v8, %v12405_v61  ;;  %v15743_v2 = vld [vmem:[#allocation33_spill] sm:$0xff] }
 0x1f2   : > { %v2865_v45 = vsel %vm2762_vm15, %v2833_v35, %v7818_v62  ;;  %v2866_v1 = vsel %vm2762_vm15, %v2834_v27, %v7819_v9  ;;  %v2736_v16 = vsel %vm2729_vm14, %v2703_v42, %v7813_v30  ;;  %v2737_v40 = vsel %vm2729_vm14, %v2704_v20, %v7814_v55  ;;  %v15745_v9 = vld [vmem:[#allocation56_spill] sm:$0xff] }
 0x1f3   : > { %v12458_v32 = vpop.permute.xlu1 %7826  ;;  %v7822_v33 = vpop.permute.xlu0 %7821  ;;  %v2901_v63 = vpack.c.bf16 %v2866_v1, %v2865_v45  ;;  %v8120_v51 = vpack.i.bf16 %v12456_v36, %v12442_v24  ;;  %v2705_v0 = vsel %vm1779_vm4, %v15744_v10, %v7709_v29  ;;  %v2706_v62 = vsel %vm1779_vm4, %v15745_v9, %v7713_v48 }
 0x1f4   : > { %v7824_v37 = vunpack.i.h.bf16 %v7822_v33  ;;  %v7823_v26 = vunpack.i.l.bf16 %v7822_v33  ;;  %v8150_v29 = vpack.i.bf16 %v15740_v52, %v15735_v38  ;;  %v15746_v48 = vmov 0.0  }
 0x1f5   : > { %8106 = vrot.lane.b32.xlu1 %v12328_v59, %s9017_s17  ;;  %8101 = vrot.lane.b32.xlu0 %v8100_v54, %s9017_s17  ;;  %v8125_v59 = vpack.i.bf16 %v15736_v60, %v15731_v53  ;;  %v7804_v53 = vunpack.i.h.bf16 %v12417_v4  ;;  %v7828_v60 = vunpack.i.l.bf16 %v12458_v32  ;;  %v1865_v4 = vsel %vm514_vm3, %v1864_v13, 0.0 }
 0x1f6   : > { %3187 = vmatprep.mubr.bf16.mxu0 %v2901_v63  ;;  %v2769_v31 = vsel %vm2762_vm15, %v2736_v16, %v7823_v26  ;;  %v2770_v6 = vsel %vm2762_vm15, %v2737_v40, %v7824_v37  ;;  %v8140_v13 = vpack.i.bf16 %v12320_v58, %v15743_v2  ;;  %v1930_v27 = vmul.f32 %v15344_v3, %v1865_v4 }
 0x1f7   : > { %v7837_v46 = vpop.permute.xlu1 %7836  ;;  %v7832_v12 = vpop.permute.xlu0 %7831  ;;  %v2900_v54 = vpack.c.bf16 %v2770_v6, %v2769_v31  ;;  %v2803_v43 = vsel %vm1779_vm4, %v8854_v49, %v7804_v53  ;;  %v7829_v53 = vunpack.i.h.bf16 %v12458_v32  ;;  %v7718_v32 = vunpack.i.l.bf16 %v12199_v14 }
 0x1f8   : > { %v7833_v47 = vunpack.i.l.bf16 %v7832_v12  ;;  %v7839_v57 = vunpack.i.h.bf16 %v7837_v46  ;;  %v7838_v21 = vunpack.i.l.bf16 %v7837_v46  ;;  %v7834_v50 = vunpack.i.h.bf16 %v7832_v12  ;;  %v8856_v12 = vld [vmem:[%s9925_s25 + $0x58] sm:$0xff] }
 0x1f9   : > { %8116 = vrot.lane.b32.xlu1 %v8115_v23, %s9015_s20  ;;  %8111 = vrot.lane.b32.xlu0 %v8110_v34, %s9015_s20  ;;  %v8855_v23 = vld [vmem:[%s9925_s25 + $0x48] sm:$0xff]  ;;  %v8145_v46 = vpack.i.bf16 %v15746_v48, %v1930_v27 }
 0x1fa   : > { %v2804_v34 = vsel %vm1779_vm4, %v8855_v23, %v7828_v60  ;;  %3188 = vmatmul.mubr.bf16.gmra.mrb[12].mxu0 %v2900_v54  ;;  %v2835_v35 = vsel %vm2729_vm14, %v2803_v43, %v7833_v47  ;;  %v2738_v39 = vsel %vm2729_vm14, %v2705_v0, %v7838_v21  ;;  %v2739_v20 = vsel %vm2729_vm14, %v2706_v62, %v7839_v57  ;;  %v15747_v0 = vld [vmem:[#allocation69_spill] sm:$0xff]  ;;  %v15748_v62 = vld [vmem:[#allocation68_spill] sm:$0xff] }
 0x1fb   : > { %v7847_v55 = vpop.permute.xlu1 %7846  ;;  %v7842_v30 = vpop.permute.xlu0 %7841  ;;  %v8155_v57 = vpack.i.bf16 %v12442_v24, %v15746_v48  ;;  %v7714_v21 = vunpack.i.h.bf16 %v12201_v11  ;;  %v2708_v9 = vsel %vm1779_vm4, %v15747_v0, %v7718_v32 }
 0x1fc   : > { %v7849_v45 = vunpack.i.h.bf16 %v7847_v55  ;;  %v7848_v1 = vunpack.i.l.bf16 %v7847_v55  ;;  %v7844_v33 = vunpack.i.h.bf16 %v7842_v30  ;;  %v7843_v63 = vunpack.i.l.bf16 %v7842_v30 }
 0x1fd   : > { %8126 = vrot.lane.b32.xlu1 %v8125_v59, %s9016_s16  ;;  %8121 = vrot.lane.b32.xlu0 %v8120_v51, %s9016_s16  ;;  %v2836_v59 = vsel %vm2729_vm14, %v2804_v34, %v7834_v50  ;;  %v8857_v50 = vld [vmem:[%s9925_s25 + $0x50] sm:$0xff]  ;;  %v2707_v55 = vsel %vm1779_vm4, %v15748_v62, %v7714_v21 }
 0x1fe   : > { %v2867_v18 = vsel %vm2762_vm15, %v2835_v35, %v7843_v63  ;;  %v2868_v42 = vsel %vm2762_vm15, %v2836_v59, %v7844_v33  ;;  %v2771_v37 = vsel %vm2762_vm15, %v2738_v39, %v7848_v1  ;;  %v2772_v26 = vsel %vm2762_vm15, %v2739_v20, %v7849_v45 }
 0x1ff   : > { %v7857_v51 = vpop.permute.xlu1 %7856  ;;  %v12506_v16 = vpop.permute.xlu0 %7851  ;;  %v2903_v40 = vpack.c.bf16 %v2772_v26, %v2771_v37  ;;  %v7719_v59 = vunpack.i.h.bf16 %v12199_v14  ;;  %v7723_v39 = vunpack.i.l.bf16 %v12229_v56  ;;  %v8859_v56 = vld [vmem:[%s9925_s25 + $0x60] sm:$0xff] }
 0x200   : > { %v7853_v60 = vunpack.i.l.bf16 %v12506_v16  ;;  %v7859_v31 = vunpack.i.h.bf16 %v7857_v51  ;;  %v7858_v6 = vunpack.i.l.bf16 %v7857_v51 }
 0x201   : > { %8136 = vrot.lane.b32.xlu1 %v12397_v5, %s9017_s17  ;;  %8131 = vrot.lane.b32.xlu0 %v8130_v22, %s9017_s17  ;;  %v2904_v5 = vpack.c.bf16 %v2868_v42, %v2867_v18  ;;  %v2805_v22 = vsel %vm1779_vm4, %v8857_v50, %v7829_v53 }
 0x202   : > { %v2806_v54 = vsel %vm1779_vm4, %v8856_v12, %v7853_v60  ;;  %v2837_v23 = vsel %vm2729_vm14, %v2805_v22, %v7858_v6  ;;  %v15749_v60 = vld [vmem:[#allocation52_spill] sm:$0xff] }
 0x203   : > { %3195 = vmatprep.mubr.bf16.mxu0 %v2904_v5  ;;  %v7867_v47 = vpop.permute.xlu1 %7866  ;;  %v7862_v4 = vpop.permute.xlu0 %7861  ;;  %v2838_v34 = vsel %vm2729_vm14, %v2806_v54, %v7859_v31  ;;  %v2709_v31 = vsel %vm1779_vm4, %v15749_v60, %v7719_v59  ;;  %v15750_v6 = vld [vmem:[#allocation80_spill] sm:$0xff] }
 0x204   : > { %3196 = vmatmul.mubr.bf16.gmra.mrb[16].mxu0 %v2903_v40  ;;  %v7869_v38 = vunpack.i.h.bf16 %v7867_v47  ;;  %v7868_v52 = vunpack.i.l.bf16 %v7867_v47  ;;  %v7864_v49 = vunpack.i.h.bf16 %v7862_v4  ;;  %v7863_v43 = vunpack.i.l.bf16 %v7862_v4  ;;  %v8858_v40 = vld [vmem:[%s9925_s25 + $0x68] sm:$0xff] }
 0x205   : > { %2119 = vrot.lane.b32.xlu1 %v12355_v7, %s9015_s20  ;;  %8141 = vrot.lane.b32.xlu0 %v8140_v13, %s9015_s20  ;;  %v2710_v14 = vsel %vm1779_vm4, %v15750_v6, %v7723_v39  ;;  %v8861_v39 = vld [vmem:[%s9925_s25 + $0x78] sm:$0xff] }
 0x206   : > { %v2869_v2 = vsel %vm2762_vm15, %v2837_v23, %v7868_v52  ;;  %v2870_v24 = vsel %vm2762_vm15, %v2838_v34, %v7869_v38  ;;  %v2740_v27 = vsel %vm2729_vm14, %v2707_v55, %v7863_v43  ;;  %v2741_v45 = vsel %vm2729_vm14, %v2708_v9, %v7864_v49 }
 0x207   : > { %v12530_v11 = vpop.permute.xlu1 %7876  ;;  %v7872_v13 = vpop.permute.xlu0 %7871  ;;  %v2907_v10 = vpack.c.bf16 %v2870_v24, %v2869_v2 }
 0x208   : > { %v7874_v30 = vunpack.i.h.bf16 %v7872_v13  ;;  %v7873_v35 = vunpack.i.l.bf16 %v7872_v13  ;;  %v7878_v1 = vunpack.i.l.bf16 %v12530_v11  ;;  %v7879_v24 = vunpack.i.h.bf16 %v12530_v11 }
 0x209   : > { %8151 = vrot.lane.b32.xlu1 %v8150_v29, %s9016_s16  ;;  %8146 = vrot.lane.b32.xlu0 %v8145_v46, %s9016_s16 }
 0x20a   : > { %3203 = vmatprep.mubr.bf16.mxu0 %v2907_v10  ;;  %v2773_v33 = vsel %vm2762_vm15, %v2740_v27, %v7873_v35  ;;  %v2774_v63 = vsel %vm2762_vm15, %v2741_v45, %v7874_v30  ;;  %v2808_v53 = vsel %vm1779_vm4, %v8858_v40, %v7878_v1  ;;  %v15751_v27 = vld [vmem:[#allocation87_spill] sm:$0xff]  ;;  %v8860_v1 = vld [vmem:[%s9925_s25 + $0x70] sm:$0xff] }
 0x20b   : > { %v7887_v20 = vpop.permute.xlu1 %7886  ;;  %v7882_v18 = vpop.permute.xlu0 %7881  ;;  %v2906_v42 = vpack.c.bf16 %v2774_v63, %v2773_v33  ;;  %v2809_v33 = vsel %vm1779_vm4, %v8860_v1, %v7879_v24  ;;  %v15752_v63 = vld [vmem:[#allocation18_spill] sm:$0xff]  ;;  %v8863_v24 = vld [vmem:[%s9925_s25 + $0x88] sm:$0xff] }
 0x20c   : > { %v7889_v37 = vunpack.i.h.bf16 %v7887_v20  ;;  %v7888_v26 = vunpack.i.l.bf16 %v7887_v20  ;;  %v7884_v51 = vunpack.i.h.bf16 %v7882_v18  ;;  %v7883_v5 = vunpack.i.l.bf16 %v7882_v18 }
 0x20d   : > { %2373 = vrot.lane.b32.xlu1 %v12456_v36, %s9017_s17  ;;  %8156 = vrot.lane.b32.xlu0 %v8155_v57, %s9017_s17  ;;  %v7854_v36 = vunpack.i.h.bf16 %v12506_v16 }
 0x20e   : > { %3204 = vmatmul.mubr.bf16.gmra.mrb[20].mxu0 %v2906_v42  ;;  %v2840_v4 = vsel %vm2729_vm14, %v2808_v53, %v7884_v51  ;;  %v2742_v57 = vsel %vm2729_vm14, %v2709_v31, %v7888_v26  ;;  %v2743_v21 = vsel %vm2729_vm14, %v2710_v14, %v7889_v37 }
 0x20f   : > { %v2807_v16 = vsel %vm1779_vm4, %v8859_v56, %v7854_v36  ;;  %v7897_v29 = vpop.permute.xlu1 %7896  ;;  %v7892_v48 = vpop.permute.xlu0 %7891 }
 0x210   : > { %v7899_v46 = vunpack.i.h.bf16 %v7897_v29  ;;  %v7898_v12 = vunpack.i.l.bf16 %v7897_v29  ;;  %v7894_v54 = vunpack.i.h.bf16 %v7892_v48  ;;  %v7893_v32 = vunpack.i.l.bf16 %v7892_v48 }
 0x211   : > { %v2839_v47 = vsel %vm2729_vm14, %v2807_v16, %v7883_v5 }
 0x212   : > { %v2871_v50 = vsel %vm2762_vm15, %v2839_v47, %v7893_v32  ;;  %v2872_v22 = vsel %vm2762_vm15, %v2840_v4, %v7894_v54  ;;  %v2775_v38 = vsel %vm2762_vm15, %v2742_v57, %v7898_v12  ;;  %v2776_v52 = vsel %vm2762_vm15, %v2743_v21, %v7899_v46 }
 0x213   : > { %v7907_v49 = vpop.permute.xlu1 %7906  ;;  %v7902_v43 = vpop.permute.xlu0 %7901  ;;  %v2910_v23 = vpack.c.bf16 %v2872_v22, %v2871_v50  ;;  %v2909_v34 = vpack.c.bf16 %v2776_v52, %v2775_v38  ;;  %v15753_v38 = vld [vmem:[#allocation99_spill] sm:$0xff] }
 0x214   : > { %v7908_v2 = vunpack.i.l.bf16 %v7907_v49  ;;  %v7904_v13 = vunpack.i.h.bf16 %v7902_v43  ;;  %v7903_v10 = vunpack.i.l.bf16 %v7902_v43  ;;  %v7909_v12 = vunpack.i.h.bf16 %v7907_v49  ;;  %v8862_v43 = vld [vmem:[%s9925_s25 + $0x80] sm:$0xff] }
 0x215   : > { %3211 = vmatprep.mubr.bf16.mxu0 %v2910_v23 }
 0x216   : > { %3212 = vmatmul.mubr.bf16.gmra.mrb[24].mxu0 %v2909_v34  ;;  %v2712_v45 = vsel %vm1779_vm4, %v15751_v27, %v7908_v2  ;;  %v2711_v59 = vsel %vm1779_vm4, %v15752_v63, %v7904_v13  ;;  %v2810_v11 = vsel %vm1779_vm4, %v8861_v39, %v7903_v10  ;;  %v2811_v23 = vsel %vm1779_vm4, %v8862_v43, %v7909_v12  ;;  %v15754_v34 = vld [vmem:[#allocation98_spill] sm:$0xff] }
 0x217   : > { %v7912_v9 = vpop.permute.xlu0 %7911  ;;  %v8865_v12 = vld [vmem:[%s9925_s25 + $0x98] sm:$0xff] }
 0x218   : > { %v7917_v0 = vpop.permute.xlu1 %7916  ;;  %v7914_v30 = vunpack.i.h.bf16 %v7912_v9  ;;  %v7913_v35 = vunpack.i.l.bf16 %v7912_v9 }
 0x219   : > { %v7919_v62 = vunpack.i.h.bf16 %v7917_v0  ;;  %v7918_v55 = vunpack.i.l.bf16 %v7917_v0 }
 0x21a   : > { %v2841_v51 = vsel %vm2729_vm14, %v2809_v33, %v7913_v35  ;;  %v2842_v5 = vsel %vm2729_vm14, %v2810_v11, %v7914_v30 }
 0x21b   : > { %v2744_v40 = vsel %vm2729_vm14, %v2711_v59, %v7918_v55  ;;  %v2745_v53 = vsel %vm2729_vm14, %v2712_v45, %v7919_v62 }
 0x21c   : > { %v7927_v36 = vpop.permute.xlu1 %7926  ;;  %v7922_v20 = vpop.permute.xlu0 %7921 }
 0x21d   : > { %v7929_v18 = vunpack.i.h.bf16 %v7927_v36  ;;  %v7928_v42 = vunpack.i.l.bf16 %v7927_v36  ;;  %v7924_v37 = vunpack.i.h.bf16 %v7922_v20  ;;  %v7923_v26 = vunpack.i.l.bf16 %v7922_v20 }
 0x21f   : > { %v2873_v60 = vsel %vm2762_vm15, %v2841_v51, %v7923_v26  ;;  %v2874_v31 = vsel %vm2762_vm15, %v2842_v5, %v7924_v37  ;;  %v2777_v6 = vsel %vm2762_vm15, %v2744_v40, %v7928_v42  ;;  %v2778_v14 = vsel %vm2762_vm15, %v2745_v53, %v7929_v18 }
 0x220   : > { %v7937_v56 = vpop.permute.xlu1 %7936  ;;  %v7932_v16 = vpop.permute.xlu0 %7931  ;;  %v2913_v29 = vpack.c.bf16 %v2874_v31, %v2873_v60  ;;  %v2912_v48 = vpack.c.bf16 %v2778_v14, %v2777_v6  ;;  %v15755_v6 = vld [vmem:[#allocation20_spill] sm:$0xff] }
 0x221   : > { %v7938_v46 = vunpack.i.l.bf16 %v7937_v56  ;;  %v7934_v54 = vunpack.i.h.bf16 %v7932_v16  ;;  %v7933_v32 = vunpack.i.l.bf16 %v7932_v16  ;;  %v7939_v42 = vunpack.i.h.bf16 %v7937_v56  ;;  %v8864_v16 = vld [vmem:[%s9925_s25 + $0x90] sm:$0xff] }
 0x222   : > { %3219 = vmatprep.mubr.bf16.mxu0 %v2913_v29 }
 0x223   : > { %3220 = vmatmul.mubr.bf16.gmra.mrb[28].mxu0 %v2912_v48  ;;  %v2714_v52 = vsel %vm1779_vm4, %v15753_v38, %v7938_v46  ;;  %v2713_v2 = vsel %vm1779_vm4, %v15754_v34, %v7934_v54  ;;  %v2812_v49 = vsel %vm1779_vm4, %v8863_v24, %v7933_v32  ;;  %v2813_v29 = vsel %vm1779_vm4, %v8864_v16, %v7939_v42  ;;  %v15756_v48 = vld [vmem:[#allocation36_spill] sm:$0xff] }
 0x224   : > { %v7942_v4 = vpop.permute.xlu0 %7941  ;;  %v8867_v42 = vld [vmem:[%s9925_s25 + $0xa8] sm:$0xff] }
 0x225   : > { %v7947_v47 = vpop.permute.xlu1 %7946  ;;  %v7944_v50 = vunpack.i.h.bf16 %v7942_v4  ;;  %v7943_v22 = vunpack.i.l.bf16 %v7942_v4 }
 0x226   : > { %v7949_v57 = vunpack.i.h.bf16 %v7947_v47  ;;  %v7948_v21 = vunpack.i.l.bf16 %v7947_v47 }
 0x227   : > { %v2843_v30 = vsel %vm2729_vm14, %v2811_v23, %v7943_v22  ;;  %v2844_v35 = vsel %vm2729_vm14, %v2812_v49, %v7944_v50 }
 0x228   : > { %v2746_v27 = vsel %vm2729_vm14, %v2713_v2, %v7948_v21  ;;  %v2747_v45 = vsel %vm2729_vm14, %v2714_v52, %v7949_v57 }
 0x229   : > { %v7957_v13 = vpop.permute.xlu1 %7956  ;;  %v7952_v10 = vpop.permute.xlu0 %7951 }
 0x22a   : > { %v7959_v0 = vunpack.i.h.bf16 %v7957_v13  ;;  %v7958_v9 = vunpack.i.l.bf16 %v7957_v13  ;;  %v7954_v62 = vunpack.i.h.bf16 %v7952_v10  ;;  %v7953_v55 = vunpack.i.l.bf16 %v7952_v10 }
 0x22c   : > { %v2875_v1 = vsel %vm2762_vm15, %v2843_v30, %v7953_v55  ;;  %v2876_v33 = vsel %vm2762_vm15, %v2844_v35, %v7954_v62  ;;  %v2779_v63 = vsel %vm2762_vm15, %v2746_v27, %v7958_v9  ;;  %v2780_v59 = vsel %vm2762_vm15, %v2747_v45, %v7959_v0 }
 0x22d   : > { %v7967_v39 = vpop.permute.xlu1 %7966  ;;  %v7962_v11 = vpop.permute.xlu0 %7961  ;;  %v2916_v36 = vpack.c.bf16 %v2876_v33, %v2875_v1  ;;  %v2915_v20 = vpack.c.bf16 %v2780_v59, %v2779_v63  ;;  %v15757_v63 = vld [vmem:[#allocation105_spill] sm:$0xff] }
 0x22e   : > { %v7968_v18 = vunpack.i.l.bf16 %v7967_v39  ;;  %v7964_v37 = vunpack.i.h.bf16 %v7962_v11  ;;  %v7963_v26 = vunpack.i.l.bf16 %v7962_v11  ;;  %v7969_v9 = vunpack.i.h.bf16 %v7967_v39  ;;  %v8866_v11 = vld [vmem:[%s9925_s25 + $0xa0] sm:$0xff] }
 0x22f   : > { %3227 = vmatprep.mubr.bf16.mxu0 %v2916_v36 }
 0x230   : > { %3228 = vmatmul.mubr.bf16.gmra.mrb[32].mxu0 %v2915_v20  ;;  %v2716_v14 = vsel %vm1779_vm4, %v15755_v6, %v7968_v18  ;;  %v2715_v46 = vsel %vm1779_vm4, %v15756_v48, %v7964_v37  ;;  %v2814_v56 = vsel %vm1779_vm4, %v8865_v12, %v7963_v26  ;;  %v2815_v36 = vsel %vm1779_vm4, %v8866_v11, %v7969_v9  ;;  %v15758_v20 = vld [vmem:[#allocation115_spill] sm:$0xff]  ;;  %v8869_v9 = vld [vmem:[%s9925_s25 + $0xb8] sm:$0xff] }
 0x231   : > { %v7977_v51 = vpop.permute.xlu1 %7976  ;;  %v7972_v5 = vpop.permute.xlu0 %7971 }
 0x232   : > { %v7979_v40 = vunpack.i.h.bf16 %v7977_v51  ;;  %v7978_v53 = vunpack.i.l.bf16 %v7977_v51  ;;  %v7974_v60 = vunpack.i.h.bf16 %v7972_v5  ;;  %v7973_v31 = vunpack.i.l.bf16 %v7972_v5 }
 0x234   : > { %v2845_v50 = vsel %vm2729_vm14, %v2813_v29, %v7973_v31  ;;  %v2846_v22 = vsel %vm2729_vm14, %v2814_v56, %v7974_v60  ;;  %v2748_v38 = vsel %vm2729_vm14, %v2715_v46, %v7978_v53  ;;  %v2749_v52 = vsel %vm2729_vm14, %v2716_v14, %v7979_v40 }
 0x235   : > { %v7987_v54 = vpop.permute.xlu1 %7986 }
 0x236   : > { %v7982_v32 = vpop.permute.xlu0 %7981  ;;  %v7989_v47 = vunpack.i.h.bf16 %v7987_v54  ;;  %v7988_v4 = vunpack.i.l.bf16 %v7987_v54 }
 0x237   : > { %v7984_v57 = vunpack.i.h.bf16 %v7982_v32  ;;  %v7983_v21 = vunpack.i.l.bf16 %v7982_v32 }
 0x238   : > { %v2781_v34 = vsel %vm2762_vm15, %v2748_v38, %v7988_v4  ;;  %v2782_v2 = vsel %vm2762_vm15, %v2749_v52, %v7989_v47 }
 0x239   : > { %v2877_v43 = vsel %vm2762_vm15, %v2845_v50, %v7983_v21  ;;  %v2878_v23 = vsel %vm2762_vm15, %v2846_v22, %v7984_v57  ;;  %v2918_v10 = vpack.c.bf16 %v2782_v2, %v2781_v34  ;;  %v15759_v34 = vld [vmem:[#allocation116_spill] sm:$0xff] }
 0x23a   : > { %v7997_v24 = vpop.permute.xlu1 %7996  ;;  %v7992_v49 = vpop.permute.xlu0 %7991  ;;  %v2919_v13 = vpack.c.bf16 %v2878_v23, %v2877_v43 }
 0x23b   : > { %v7998_v0 = vunpack.i.l.bf16 %v7997_v24  ;;  %v7994_v62 = vunpack.i.h.bf16 %v7992_v49  ;;  %v7993_v55 = vunpack.i.l.bf16 %v7992_v49  ;;  %v7999_v4 = vunpack.i.h.bf16 %v7997_v24  ;;  %v8868_v49 = vld [vmem:[%s9925_s25 + $0xb0] sm:$0xff] }
 0x23c   : > { %3235 = vmatprep.mubr.bf16.mxu0 %v2919_v13 }
 0x23d   : > { %3236 = vmatmul.mubr.bf16.gmra.mrb[36].mxu0 %v2918_v10  ;;  %v2718_v59 = vsel %vm1779_vm4, %v15757_v63, %v7998_v0  ;;  %v2717_v18 = vsel %vm1779_vm4, %v15758_v20, %v7994_v62  ;;  %v2816_v39 = vsel %vm1779_vm4, %v8867_v42, %v7993_v55  ;;  %v2817_v13 = vsel %vm1779_vm4, %v8868_v49, %v7999_v4  ;;  %v15760_v10 = vld [vmem:[#allocation12_spill] sm:$0xff] }
 0x23e   : > { %v8002_v35 = vpop.permute.xlu0 %8001  ;;  %v8871_v4 = vld [vmem:[%s9925_s25 + $0xc8] sm:$0xff] }
 0x23f   : > { %v8007_v30 = vpop.permute.xlu1 %8006  ;;  %v8004_v1 = vunpack.i.h.bf16 %v8002_v35  ;;  %v8003_v33 = vunpack.i.l.bf16 %v8002_v35 }
 0x240   : > { %v8009_v27 = vunpack.i.h.bf16 %v8007_v30  ;;  %v8008_v45 = vunpack.i.l.bf16 %v8007_v30 }
 0x241   : > { %v2847_v60 = vsel %vm2729_vm14, %v2815_v36, %v8003_v33  ;;  %v2848_v31 = vsel %vm2729_vm14, %v2816_v39, %v8004_v1 }
 0x242   : > { %v8012_v26 = vpop.permute.xlu0 %8011  ;;  %v2750_v6 = vsel %vm2729_vm14, %v2717_v18, %v8008_v45  ;;  %v2751_v14 = vsel %vm2729_vm14, %v2718_v59, %v8009_v27 }
 0x243   : > { %v8017_v37 = vpop.permute.xlu1 %8016  ;;  %v8014_v40 = vunpack.i.h.bf16 %v8012_v26  ;;  %v8013_v53 = vunpack.i.l.bf16 %v8012_v26 }
 0x244   : > { %v8019_v51 = vunpack.i.h.bf16 %v8017_v37  ;;  %v8018_v5 = vunpack.i.l.bf16 %v8017_v37 }
 0x245   : > { %v2879_v16 = vsel %vm2762_vm15, %v2847_v60, %v8013_v53  ;;  %v2880_v29 = vsel %vm2762_vm15, %v2848_v31, %v8014_v40 }
 0x246   : > { %v2783_v48 = vsel %vm2762_vm15, %v2750_v6, %v8018_v5  ;;  %v2784_v46 = vsel %vm2762_vm15, %v2751_v14, %v8019_v51  ;;  %v2922_v54 = vpack.c.bf16 %v2880_v29, %v2879_v16 }
 0x247   : > { %v8027_v12 = vpop.permute.xlu1 %8026  ;;  %v8022_v56 = vpop.permute.xlu0 %8021  ;;  %v2921_v32 = vpack.c.bf16 %v2784_v46, %v2783_v48  ;;  %v15761_v48 = vld [vmem:[#allocation23_spill] sm:$0xff] }
 0x248   : > { %3243 = vmatprep.mubr.bf16.mxu0 %v2922_v54  ;;  %v8028_v47 = vunpack.i.l.bf16 %v8027_v12  ;;  %v8024_v57 = vunpack.i.h.bf16 %v8022_v56  ;;  %v8023_v21 = vunpack.i.l.bf16 %v8022_v56  ;;  %v8029_v5 = vunpack.i.h.bf16 %v8027_v12  ;;  %v8870_v56 = vld [vmem:[%s9925_s25 + $0xc0] sm:$0xff] }
 0x249   : > { %3244 = vmatmul.mubr.bf16.gmra.mrb[40].mxu0 %v2921_v32  ;;  %v15762_v32 = vld [vmem:[#allocation24_spill] sm:$0xff] }
 0x24a   : > { %v2720_v2 = vsel %vm1779_vm4, %v15759_v34, %v8028_v47  ;;  %v2719_v0 = vsel %vm1779_vm4, %v15760_v10, %v8024_v57  ;;  %v2818_v24 = vsel %vm1779_vm4, %v8869_v9, %v8023_v21  ;;  %v2819_v54 = vsel %vm1779_vm4, %v8870_v56, %v8029_v5  ;;  %v8873_v5 = vld [vmem:[%s9925_s25 + $0xd8] sm:$0xff] }
 0x24b   : > { %v8037_v50 = vpop.permute.xlu1 %8036  ;;  %v8032_v22 = vpop.permute.xlu0 %8031 }
 0x24c   : > { %v8039_v38 = vunpack.i.h.bf16 %v8037_v50  ;;  %v8038_v52 = vunpack.i.l.bf16 %v8037_v50  ;;  %v8034_v43 = vunpack.i.h.bf16 %v8032_v22  ;;  %v8033_v23 = vunpack.i.l.bf16 %v8032_v22 }
 0x24e   : > { %v2849_v1 = vsel %vm2729_vm14, %v2817_v13, %v8033_v23  ;;  %v2850_v33 = vsel %vm2729_vm14, %v2818_v24, %v8034_v43  ;;  %v2752_v63 = vsel %vm2729_vm14, %v2719_v0, %v8038_v52  ;;  %v2753_v59 = vsel %vm2729_vm14, %v2720_v2, %v8039_v38 }
 0x24f   : > { %v8047_v62 = vpop.permute.xlu1 %8046  ;;  %v8042_v55 = vpop.permute.xlu0 %8041 }
 0x250   : > { %v8049_v30 = vunpack.i.h.bf16 %v8047_v62  ;;  %v8048_v35 = vunpack.i.l.bf16 %v8047_v62  ;;  %v8044_v27 = vunpack.i.h.bf16 %v8042_v55  ;;  %v8043_v45 = vunpack.i.l.bf16 %v8042_v55 }
 0x252   : > { %v2881_v11 = vsel %vm2762_vm15, %v2849_v1, %v8043_v45  ;;  %v2882_v36 = vsel %vm2762_vm15, %v2850_v33, %v8044_v27  ;;  %v2785_v20 = vsel %vm2762_vm15, %v2752_v63, %v8048_v35  ;;  %v2786_v18 = vsel %vm2762_vm15, %v2753_v59, %v8049_v30 }
 0x253   : > { %v8057_v42 = vpop.permute.xlu1 %8056  ;;  %v8052_v39 = vpop.permute.xlu0 %8051  ;;  %v2925_v37 = vpack.c.bf16 %v2882_v36, %v2881_v11  ;;  %v2924_v26 = vpack.c.bf16 %v2786_v18, %v2785_v20  ;;  %v15763_v20 = vld [vmem:[#allocation35_spill] sm:$0xff] }
 0x254   : > { %v8058_v51 = vunpack.i.l.bf16 %v8057_v42  ;;  %v8054_v40 = vunpack.i.h.bf16 %v8052_v39  ;;  %v8053_v53 = vunpack.i.l.bf16 %v8052_v39  ;;  %v8059_v35 = vunpack.i.h.bf16 %v8057_v42  ;;  %v8872_v39 = vld [vmem:[%s9925_s25 + $0xd0] sm:$0xff]  ;;  %s14394_s25 = scalar_lea.vmem [#allocation5], %s9178_s23  ;;  %s15162_s23 = sshll.u32 %s9092_s13, 12 }
 0x255   : > { %3251 = vmatprep.mubr.bf16.mxu0 %v2925_v37 }
 0x256   : > { %3252 = vmatmul.mubr.bf16.gmra.mrb[44].mxu0 %v2924_v26  ;;  %v2722_v46 = vsel %vm1779_vm4, %v15761_v48, %v8058_v51  ;;  %v2721_v47 = vsel %vm1779_vm4, %v15762_v32, %v8054_v40  ;;  %v2820_v12 = vsel %vm1779_vm4, %v8871_v4, %v8053_v53  ;;  %v2821_v37 = vsel %vm1779_vm4, %v8872_v39, %v8059_v35  ;;  %v15764_v26 = vld [vmem:[#allocation63_spill] sm:$0xff] }
 0x257   : > { %v8067_v60 = vpop.permute.xlu1 %8066  ;;  %v8062_v31 = vpop.permute.xlu0 %8061 }
 0x258   : > { %v8069_v6 = vunpack.i.h.bf16 %v8067_v60  ;;  %v8068_v14 = vunpack.i.l.bf16 %v8067_v60  ;;  %v8064_v16 = vunpack.i.h.bf16 %v8062_v31  ;;  %v8063_v29 = vunpack.i.l.bf16 %v8062_v31 }
 0x25a   : > { %v2851_v43 = vsel %vm2729_vm14, %v2819_v54, %v8063_v29  ;;  %v2852_v23 = vsel %vm2729_vm14, %v2820_v12, %v8064_v16  ;;  %v2754_v34 = vsel %vm2729_vm14, %v2721_v47, %v8068_v14  ;;  %v2755_v2 = vsel %vm2729_vm14, %v2722_v46, %v8069_v6 }
 0x25b   : > { %v8077_v57 = vpop.permute.xlu1 %8076  ;;  %v8072_v21 = vpop.permute.xlu0 %8071 }
 0x25c   : > { %v8079_v50 = vunpack.i.h.bf16 %v8077_v57  ;;  %v8078_v22 = vunpack.i.l.bf16 %v8077_v57  ;;  %v8074_v38 = vunpack.i.h.bf16 %v8072_v21  ;;  %v8073_v52 = vunpack.i.l.bf16 %v8072_v21 }
 0x25e   : > { %v2883_v49 = vsel %vm2762_vm15, %v2851_v43, %v8073_v52  ;;  %v2884_v13 = vsel %vm2762_vm15, %v2852_v23, %v8074_v38  ;;  %v2787_v10 = vsel %vm2762_vm15, %v2754_v34, %v8078_v22  ;;  %v2788_v0 = vsel %vm2762_vm15, %v2755_v2, %v8079_v50 }
 0x25f   : > { %v8087_v9 = vpop.permute.xlu1 %8086  ;;  %v8082_v24 = vpop.permute.xlu0 %8081  ;;  %v2928_v62 = vpack.c.bf16 %v2884_v13, %v2883_v49  ;;  %v2927_v55 = vpack.c.bf16 %v2788_v0, %v2787_v10 }
 0x260   : > { %v8088_v30 = vunpack.i.l.bf16 %v8087_v9  ;;  %v8084_v27 = vunpack.i.h.bf16 %v8082_v24  ;;  %v8083_v45 = vunpack.i.l.bf16 %v8082_v24  ;;  %v8089_v22 = vunpack.i.h.bf16 %v8087_v9 }
 0x261   : > { %3259 = vmatprep.mubr.bf16.mxu0 %v2928_v62 }
 0x262   : > { %3260 = vmatmul.mubr.bf16.gmra.mrb[48].mxu0 %v2927_v55  ;;  %v2724_v18 = vsel %vm1779_vm4, %v15763_v20, %v8088_v30  ;;  %v2723_v51 = vsel %vm1779_vm4, %v15764_v26, %v8084_v27  ;;  %v2822_v42 = vsel %vm1779_vm4, %v8873_v5, %v8083_v45  ;;  %v2823_v0 = vsel %vm1779_vm4, %v12320_v58, %v8089_v22 }
 0x263   : > { %v8097_v1 = vpop.permute.xlu1 %8096  ;;  %v8092_v33 = vpop.permute.xlu0 %8091 }
 0x264   : > { %v8099_v63 = vunpack.i.h.bf16 %v8097_v1  ;;  %v8098_v59 = vunpack.i.l.bf16 %v8097_v1  ;;  %v8094_v11 = vunpack.i.h.bf16 %v8092_v33  ;;  %v8093_v36 = vunpack.i.l.bf16 %v8092_v33 }
 0x266   : > { %v2853_v16 = vsel %vm2729_vm14, %v2821_v37, %v8093_v36  ;;  %v2854_v29 = vsel %vm2729_vm14, %v2822_v42, %v8094_v11  ;;  %v2756_v48 = vsel %vm2729_vm14, %v2723_v51, %v8098_v59  ;;  %v2757_v46 = vsel %vm2729_vm14, %v2724_v18, %v8099_v63 }
 0x267   : > { %v8107_v40 = vpop.permute.xlu1 %8106  ;;  %v8102_v53 = vpop.permute.xlu0 %8101 }
 0x268   : > { %v8109_v60 = vunpack.i.h.bf16 %v8107_v40  ;;  %v8108_v31 = vunpack.i.l.bf16 %v8107_v40  ;;  %v8104_v6 = vunpack.i.h.bf16 %v8102_v53  ;;  %v8103_v14 = vunpack.i.l.bf16 %v8102_v53 }
 0x26a   : > { %v2885_v56 = vsel %vm2762_vm15, %v2853_v16, %v8103_v14  ;;  %v2886_v54 = vsel %vm2762_vm15, %v2854_v29, %v8104_v6  ;;  %v2789_v32 = vsel %vm2762_vm15, %v2756_v48, %v8108_v31  ;;  %v2790_v47 = vsel %vm2762_vm15, %v2757_v46, %v8109_v60 }
 0x26b   : > { %v8117_v4 = vpop.permute.xlu1 %8116  ;;  %v8112_v12 = vpop.permute.xlu0 %8111  ;;  %v2931_v57 = vpack.c.bf16 %v2886_v54, %v2885_v56  ;;  %v2930_v21 = vpack.c.bf16 %v2790_v47, %v2789_v32 }
 0x26c   : > { %v8118_v50 = vunpack.i.l.bf16 %v8117_v4  ;;  %v8114_v38 = vunpack.i.h.bf16 %v8112_v12  ;;  %v8113_v52 = vunpack.i.l.bf16 %v8112_v12  ;;  %v8119_v26 = vunpack.i.h.bf16 %v8117_v4 }
 0x26d   : > { %3267 = vmatprep.mubr.bf16.mxu0 %v2931_v57 }
 0x26e   : > { %3268 = vmatmul.mubr.bf16.gmra.mrb[52].mxu0 %v2930_v21  ;;  %v2726_v10 = vsel %vm1779_vm4, %v12077_v28, %v8118_v50  ;;  %v2725_v24 = vsel %vm1779_vm4, %v12113_v19, %v8114_v38  ;;  %v2824_v9 = vsel %vm1779_vm4, %v12355_v7, %v8113_v52  ;;  %v2825_v29 = vsel %vm1779_vm4, %v12405_v61, %v8119_v26  ;;  %v15767_v52 = vld [vmem:[#allocation49_spill] sm:$0xff] }
 0x26f   : > { %v8127_v43 = vpop.permute.xlu1 %8126  ;;  %v8122_v23 = vpop.permute.xlu0 %8121 }
 0x270   : > { %v8129_v34 = vunpack.i.h.bf16 %v8127_v43  ;;  %v8128_v2 = vunpack.i.l.bf16 %v8127_v43  ;;  %v8124_v49 = vunpack.i.h.bf16 %v8122_v23  ;;  %v8123_v13 = vunpack.i.l.bf16 %v8122_v23  ;;  %v15768_v43 = vld [vmem:[#allocation15_spill] sm:$0xff] }
 0x271   : > { %v2893_v23 = vpack.c.bf16 %v15768_v43, %v15767_v52 }
 0x272   : > { %v2855_v1 = vsel %vm2729_vm14, %v2823_v0, %v8123_v13  ;;  %v2856_v33 = vsel %vm2729_vm14, %v2824_v9, %v8124_v49  ;;  %v2758_v28 = vsel %vm2729_vm14, %v2725_v24, %v8128_v2  ;;  %v2759_v58 = vsel %vm2729_vm14, %v2726_v10, %v8129_v34  ;;  %v15769_v10 = vld [vmem:[#allocation27_spill] sm:$0xff]  ;;  %v15770_v0 = vld [vmem:[#allocation114_spill] sm:$0xff] }
 0x273   : > { %v8137_v62 = vpop.permute.xlu1 %8136  ;;  %v8132_v55 = vpop.permute.xlu0 %8131  ;;  %v2899_v24 = vpack.c.bf16 %v15770_v0, %v15769_v10 }
 0x274   : > { %v8139_v30 = vunpack.i.h.bf16 %v8137_v62  ;;  %v8138_v35 = vunpack.i.l.bf16 %v8137_v62  ;;  %v8134_v27 = vunpack.i.h.bf16 %v8132_v55  ;;  %v8133_v45 = vunpack.i.l.bf16 %v8132_v55  ;;  %v15771_v62 = vld [vmem:[#allocation19_spill] sm:$0xff]  ;;  %v15772_v55 = vld [vmem:[#allocation54_spill] sm:$0xff] }
 0x276   : > { %v2887_v63 = vsel %vm2762_vm15, %v2855_v1, %v8133_v45  ;;  %v2888_v19 = vsel %vm2762_vm15, %v2856_v33, %v8134_v27  ;;  %v2791_v7 = vsel %vm2762_vm15, %v2758_v28, %v8138_v35  ;;  %v2792_v59 = vsel %vm2762_vm15, %v2759_v58, %v8139_v30  ;;  %v15774_v1 = vld [vmem:[#allocation45_spill] sm:$0xff]  ;;  %v15775_v33 = vld [vmem:[#allocation43_spill] sm:$0xff] }
 0x277   : > { %v2120_v11 = vpop.permute.xlu1 %2119  ;;  %v8142_v36 = vpop.permute.xlu0 %8141  ;;  %v2934_v20 = vpack.c.bf16 %v2888_v19, %v2887_v63  ;;  %v2933_v18 = vpack.c.bf16 %v2792_v59, %v2791_v7  ;;  %v15773_v30 = vpack.c.bf16 %v15771_v62, %v15772_v55  ;;  %v2902_v28 = vpack.c.bf16 %v15775_v33, %v15774_v1 }
 0x278   : > { %v8144_v5 = vunpack.i.h.bf16 %v8142_v36  ;;  %v8143_v42 = vunpack.i.l.bf16 %v8142_v36  ;;  %v12696_v31 = vpop.f32.mrb[24].mxu1  ;;  %v2728_v6 = vsel %vm1779_vm4, %v12380_v44, %v2120_v11 }
 0x279   : > { %3275 = vmatprep.mubr.bf16.mxu0 %v2934_v20  ;;  %v12700_v14 = vpop.f32.mrb[25].mxu1 }
 0x27a   : > { %3276 = vmatmul.mubr.bf16.gmra.mrb[56].mxu0 %v2933_v18  ;;  %v12705_v56 = vpop.f32.mrb[26].mxu1  ;;  %v2727_v54 = vsel %vm1779_vm4, %v12368_v15, %v8144_v5  ;;  %v2826_v32 = vsel %vm1779_vm4, %v12433_v8, %v8143_v42 }
 0x27b   : > { %v8152_v39 = vpop.permute.xlu1 %8151  ;;  %v12692_v37 = vpop.permute.xlu0 %8146 }
 0x27c   : > { %15765 = vst [vmem:[#allocation70_spill] sm:$0xff] %v12692_v37  ;;  %v8154_v51 = vunpack.i.h.bf16 %v8152_v39  ;;  %v8153_v40 = vunpack.i.l.bf16 %v8152_v39  ;;  %v15085_v53 = vunpack.i.h.bf16 %v12692_v37  ;;  %v8148_v60 = vunpack.i.l.bf16 %v12692_v37  ;;  %v12713_v44 = vpop.f32.mrb[27].mxu1 }
 0x27e   : > { %v2761_v48 = vsel %vm2729_vm14, %v2728_v6, %v8154_v51  ;;  %v2857_v12 = vsel %vm2729_vm14, %v2825_v29, %v8148_v60  ;;  %v2858_v61 = vsel %vm2729_vm14, %v2826_v32, %v15085_v53  ;;  %v2760_v57 = vsel %vm2729_vm14, %v2727_v54, %v8153_v40 }
 0x27f   : > { %v2374_v16 = vpop.permute.xlu1 %2373  ;;  %v8157_v46 = vpop.permute.xlu0 %8156 }
 0x280   : > { %v8159_v47 = vunpack.i.h.bf16 %v8157_v46  ;;  %v12711_v4 = vunpack.i.l.bf16 %v8157_v46  ;;  %v2794_v21 = vsel %vm2762_vm15, %v2761_v48, %v2374_v16 }
 0x282   : > { %15766 = vst [vmem:[#allocation113_spill] sm:$0xff] %v12711_v4  ;;  %v2889_v15 = vsel %vm2762_vm15, %v2857_v12, %v12711_v4  ;;  %v2890_v8 = vsel %vm2762_vm15, %v2858_v61, %v12711_v4  ;;  %v2793_v50 = vsel %vm2762_vm15, %v2760_v57, %v8159_v47  ;;  %v12728_v34 = vpop.f32.mrb[28].mxu1 }
 0x283   : > { %v2937_v22 = vpack.c.bf16 %v2890_v8, %v2889_v15  ;;  %v2936_v38 = vpack.c.bf16 %v2794_v21, %v2793_v50  ;;  %v12730_v2 = vpop.f32.mrb[29].mxu1 }
 0x284   : > { %v12732_v49 = vpop.f32.mrb[30].mxu1 }
 0x285   : > { %3283 = vmatprep.mubr.bf16.mxu0 %v2937_v22  ;;  %v12735_v13 = vpop.f32.mrb[31].mxu1 }
 0x286   : > { %3284 = vmatmul.mubr.bf16.gmra.mrb[60].mxu0 %v2936_v38 }
 0x287   : > { %6820 = vmatprep.mubr.msk.bf16.mxu0 %vm1779_vm4, %v2893_v23 }
 0x28b   : > { %v12739_v9 = vpop.f32.mrb[0].mxu1 }
 0x28c   : > { %v3587_v35 = vpop.f32.mrb[1].mxu1 }
 0x28d   : > { %v12745_v27 = vpop.f32.mrb[2].mxu1 }
 0x28e   : > { %6821 = vmatmul.mubr.msk.bf16.vlgmr.msra.gmra.mrb[64].mxu0 %vm1779_vm4, %v15773_v30  ;;  %v3590_v45 = vpop.f32.mrb[3].mxu1 }
 0x28f   : > { %6824 = vmatprep.mubr.msk.bf16.mxu0 %vm1779_vm4, %v2899_v24 }
 0x293   : > { %v12750_v58 = vpop.f32.mrb[4].mxu1 }
 0x294   : > { %v12753_v63 = vpop.f32.mrb[5].mxu1 }
 0x295   : > { %v12755_v19 = vpop.f32.mrb[6].mxu1 }
 0x296   : > { %6825 = vmatmul.mubr.msk.bf16.gmra.mrb[68].mxu0 %vm1779_vm4, %v2902_v28  ;;  %v12757_v7 = vpop.f32.mrb[7].mxu1 }
 0x29c   : > { %v12759_v59 = vpop.f32.mrb[8].mxu1 }
 0x29d   : > { %v12761_v11 = vpop.f32.mrb[9].mxu1 }
 0x29e   : > { %v12763_v36 = vpop.f32.mrb[10].mxu1 }
 0x29f   : > { %v12765_v20 = vpop.f32.mrb[11].mxu1 }
 0x2a4   : > { %v12767_v18 = vpop.f32.mrb[12].mxu1 }
 0x2a5   : > { %v12769_v39 = vpop.f32.mrb[13].mxu1 }
 0x2a6   : > { %v12771_v26 = vpop.f32.mrb[14].mxu1 }
 0x2a7   : > { %v12773_v51 = vpop.f32.mrb[15].mxu1 }
 0x2ad   : > { %v12775_v5 = vpop.f32.mrb[16].mxu1 }
 0x2ae   : > { %v12777_v42 = vpop.f32.mrb[17].mxu1 }
 0x2af   : > { %v12779_v40 = vpop.f32.mrb[18].mxu1  ;;  %v6553_v6 = vpop.f32.mrb[0].mxu0 }
 0x2b0   : > { %v12781_v60 = vpop.f32.mrb[19].mxu1  ;;  %v6554_v16 = vpop.f32.mrb[1].mxu0 }
 0x2b1   : > { %v12783_v29 = vadd.f32 %v6554_v16, %v6553_v6  ;;  %v6556_v48 = vpop.f32.mrb[2].mxu0 }
 0x2b2   : > { %v6557_v46 = vpop.f32.mrb[3].mxu0 }
 0x2b3   : > { %v12785_v54 = vadd.f32 %v6557_v46, %v6556_v48 }
 0x2b5   : > { %v12787_v32 = vpop.f32.mrb[20].mxu1 }
 0x2b6   : > { %v12789_v47 = vpop.f32.mrb[21].mxu1 }
 0x2b7   : > { %v12791_v12 = vpop.f32.mrb[22].mxu1 }
 0x2b8   : > { %v12793_v61 = vpop.f32.mrb[23].mxu1 }
 0x2b9   : > { %v6559_v57 = vpop.f32.mrb[4].mxu0 }
 0x2ba   : > { %v6560_v21 = vpop.f32.mrb[5].mxu0 }
 0x2bb   : > { %v12795_v15 = vadd.f32 %v6560_v21, %v6559_v57  ;;  %v6562_v8 = vpop.f32.mrb[6].mxu0 }
 0x2bc   : > { %v6563_v50 = vpop.f32.mrb[7].mxu0 }
 0x2bd   : > { %v12797_v22 = vadd.f32 %v6563_v50, %v6562_v8  ;;  %v12810_v8 = vld [vmem:[%s14807_s6] ss:$0 sm:$0xff] }
 0x2c2   : > { %v6565_v38 = vpop.f32.mrb[8].mxu0 }
 0x2c3   : > { %v6566_v52 = vpop.f32.mrb[9].mxu0 }
 0x2c4   : > { %v12799_v43 = vadd.f32 %v6566_v52, %v6565_v38  ;;  %v6568_v23 = vpop.f32.mrb[10].mxu0 }
 0x2c5   : > { %v6569_v10 = vpop.f32.mrb[11].mxu0 }
 0x2c6   : > { %v12801_v0 = vadd.f32 %v6569_v10, %v6568_v23 }
 0x2cd   : > { %v6571_v24 = vpop.f32.mrb[12].mxu0 }
 0x2ce   : > { %v6572_v62 = vpop.f32.mrb[13].mxu0 }
 0x2cf   : > { %v12803_v55 = vadd.f32 %v6572_v62, %v6571_v24  ;;  %v6574_v30 = vpop.f32.mrb[14].mxu0 }
 0x2d0   : > { %v6575_v1 = vpop.f32.mrb[15].mxu0 }
 0x2d1   : > { %v12805_v33 = vadd.f32 %v6575_v1, %v6574_v30 }
 0x2d7   : > { %v6577_v28 = vpop.f32.mrb[16].mxu0 }
 0x2d8   : > { %v6578_v6 = vpop.f32.mrb[17].mxu0 }
 0x2d9   : > { %v6579_v16 = vadd.f32 %v6578_v6, %v6577_v28  ;;  %v6580_v48 = vpop.f32.mrb[18].mxu0 }
 0x2da   : > { %v6581_v46 = vpop.f32.mrb[19].mxu0 }
 0x2db   : > { %v6947_v57 = vadd.f32 %v6579_v16, %v3587_v35  ;;  %v6582_v21 = vadd.f32 %v6581_v46, %v6580_v48 }
 0x2dd   : > { %v6949_v50 = vadd.f32 %v6582_v21, %v3590_v45  ;;  %v12813_v38 = vadd.f32 %v6947_v57, %v12810_v8 }
 0x2df   : > { %15776 = vst [vmem:[#allocation76_spill] sm:$0xff] %v12813_v38  ;;  %v12816_v52 = vadd.f32 %v6949_v50, %v12810_v8 }
 0x2e1   : > { %v6583_v23 = vpop.f32.mrb[20].mxu0  ;;  %v12820_v10 = vpack.i.bf16 %v12816_v52, %v12813_v38 }
 0x2e2   : > { %v6584_v24 = vpop.f32.mrb[21].mxu0 }
 0x2e3   : > { %v6585_v35 = vadd.f32 %v6584_v24, %v6583_v23  ;;  %8161 = vrot.lane.b32.xlu0 %v12820_v10, %s9015_s20  ;;  %v6586_v62 = vpop.f32.mrb[22].mxu0 }
 0x2e4   : > { %v6587_v30 = vpop.f32.mrb[23].mxu0 }
 0x2e5   : > { %v6946_v45 = vadd.f32 %v12739_v9, %v6585_v35  ;;  %v6588_v1 = vadd.f32 %v6587_v30, %v6586_v62  ;;  %v8646_v35 = vld [vmem:[%s14806_s5 + $0x80] sm:$0xff]  }
 0x2e6   : > { %6890 = vmatprep.subr.bf16.mxu0 %v8646_v35 }
 0x2e7   : > { %v6948_v28 = vadd.f32 %v12745_v27, %v6588_v1  ;;  %v12827_v6 = vadd.f32 %v6946_v45, %v12810_v8  ;;  %6891 = vmatpush3.bf16.msra.mxu0 %v8646_v35 }
 0x2e9   : > { %15777 = vst [vmem:[#allocation62_spill] sm:$0xff] %v12827_v6  ;;  %v12830_v16 = vadd.f32 %v6948_v28, %v12810_v8  ;;  %v6589_v48 = vpop.f32.mrb[24].mxu0 }
 0x2ea   : > { %v6590_v46 = vpop.f32.mrb[25].mxu0 }
 0x2eb   : > { %v12834_v57 = vpack.i.bf16 %v12830_v16, %v12827_v6  ;;  %v6591_v21 = vadd.f32 %v6590_v46, %v6589_v48  ;;  %v6592_v50 = vpop.f32.mrb[26].mxu0 }
 0x2ec   : > { %v6593_v23 = vpop.f32.mrb[27].mxu0 }
 0x2ed   : > { %8166 = vrot.lane.b32.xlu1 %v12834_v57, %s9015_s20  ;;  %v6951_v9 = vadd.f32 %v6591_v21, %v12753_v63  ;;  %v6594_v27 = vadd.f32 %v6593_v23, %v6592_v50  ;;  %v8647_v63 = vld [vmem:[%s14806_s5 + $0x88] sm:$0xff]  }
 0x2ee   : > { %6892 = vmatprep.subr.bf16.mxu0 %v8647_v63 }
 0x2ef   : > { %v6953_v24 = vadd.f32 %v6594_v27, %v12757_v7  ;;  %v12844_v62 = vadd.f32 %v6951_v9, %v12810_v8  ;;  %6893 = vmatpush3.bf16.msra.mxu0 %v8647_v63 }
 0x2f1   : > { %v12847_v30 = vadd.f32 %v6953_v24, %v12810_v8 }
 0x2f3   : > { %v12851_v45 = vpack.i.bf16 %v12847_v30, %v12844_v62 }
 0x2f5   : > { %15778 = vst [vmem:[#allocation104_spill] sm:$0xff] %v12851_v45  ;;  %8171 = vrot.lane.b32.xlu0 %v12851_v45, %s9015_s20 }
 0x2f6   : > { %v6595_v7 = vpop.f32.mrb[28].mxu0 }
 0x2f7   : > { %v6596_v1 = vpop.f32.mrb[29].mxu0 }
 0x2f8   : > { %v6597_v28 = vadd.f32 %v6596_v1, %v6595_v7  ;;  %v6598_v48 = vpop.f32.mrb[30].mxu0 }
 0x2f9   : > { %v6599_v46 = vpop.f32.mrb[31].mxu0 }
 0x2fa   : > { %v6950_v21 = vadd.f32 %v12750_v58, %v6597_v28  ;;  %v6600_v50 = vadd.f32 %v6599_v46, %v6598_v48 }
 0x2fc   : > { %v6952_v23 = vadd.f32 %v12755_v19, %v6600_v50  ;;  %v12861_v9 = vadd.f32 %v6950_v21, %v12810_v8 }
 0x2fe   : > { %v12864_v27 = vadd.f32 %v6952_v23, %v12810_v8 }
 0x300   : > { %v12868_v24 = vpack.i.bf16 %v12864_v27, %v12861_v9 }
 0x302   : > { %15779 = vst [vmem:[#allocation107_spill] sm:$0xff] %v12868_v24  ;;  %8176 = vrot.lane.b32.xlu1 %v12868_v24, %s9015_s20 }
 0x303   : > { %v6601_v35 = vpop.f32.mrb[32].mxu0 }
 0x304   : > { %v6602_v63 = vpop.f32.mrb[33].mxu0 }
 0x305   : > { %v6603_v7 = vadd.f32 %v6602_v63, %v6601_v35  ;;  %v6604_v58 = vpop.f32.mrb[34].mxu0 }
 0x306   : > { %v6605_v1 = vpop.f32.mrb[35].mxu0 }
 0x307   : > { %v6955_v19 = vadd.f32 %v6603_v7, %v12761_v11  ;;  %v6606_v28 = vadd.f32 %v6605_v1, %v6604_v58 }
 0x309   : > { %v6957_v48 = vadd.f32 %v6606_v28, %v12765_v20  ;;  %v12875_v46 = vadd.f32 %v6955_v19, %v12810_v8 }
 0x30b   : > { %v12878_v21 = vadd.f32 %v6957_v48, %v12810_v8 }
 0x30d   : > { %v12882_v50 = vpack.i.bf16 %v12878_v21, %v12875_v46 }
 0x30f   : > { %15780 = vst [vmem:[#allocation83_spill] sm:$0xff] %v12882_v50  ;;  %8181 = vrot.lane.b32.xlu0 %v12882_v50, %s9015_s20 }
 0x310   : > { %v6607_v23 = vpop.f32.mrb[36].mxu0 }
 0x311   : > { %v6608_v35 = vpop.f32.mrb[37].mxu0 }
 0x312   : > { %v6609_v63 = vadd.f32 %v6608_v35, %v6607_v23  ;;  %v6610_v11 = vpop.f32.mrb[38].mxu0 }
 0x313   : > { %v6611_v7 = vpop.f32.mrb[39].mxu0 }
 0x314   : > { %v6954_v20 = vadd.f32 %v12759_v59, %v6609_v63  ;;  %v6612_v58 = vadd.f32 %v6611_v7, %v6610_v11 }
 0x316   : > { %v6956_v1 = vadd.f32 %v12763_v36, %v6612_v58  ;;  %v12889_v19 = vadd.f32 %v6954_v20, %v12810_v8 }
 0x318   : > { %15781 = vst [vmem:[#allocation44_spill] sm:$0xff] %v12889_v19  ;;  %v12892_v28 = vadd.f32 %v6956_v1, %v12810_v8 }
 0x31a   : > { %15782 = vst [vmem:[#allocation46_spill] sm:$0xff] %v12892_v28  ;;  %v12896_v48 = vpack.i.bf16 %v12892_v28, %v12889_v19 }
 0x31c   : > { %15783 = vst [vmem:[#allocation95_spill] sm:$0xff] %v12896_v48  ;;  %v6613_v53 = vpop.f32.mrb[40].mxu0  ;;  %8186 = vrot.lane.b32.xlu1 %v12896_v48, %s9015_s20 }
 0x31d   : > { %v6614_v23 = vpop.f32.mrb[41].mxu0 }
 0x31e   : > { %v6615_v35 = vadd.f32 %v6614_v23, %v6613_v53  ;;  %v6616_v59 = vpop.f32.mrb[42].mxu0 }
 0x31f   : > { %v6617_v63 = vpop.f32.mrb[43].mxu0 }
 0x320   : > { %v6959_v36 = vadd.f32 %v6615_v35, %v12769_v39  ;;  %v6618_v11 = vadd.f32 %v6617_v63, %v6616_v59 }
 0x322   : > { %v6961_v7 = vadd.f32 %v6618_v11, %v12773_v51  ;;  %v12903_v20 = vadd.f32 %v6959_v36, %v12810_v8 }
 0x324   : > { %15784 = vst [vmem:[#allocation90_spill] sm:$0xff] %v12903_v20  ;;  %v12906_v58 = vadd.f32 %v6961_v7, %v12810_v8  ;;  %v15094_v41 = vrot.slane %v12903_v20, 1 }
 0x326   : > { %15785 = vst [vmem:[#allocation81_spill] sm:$0xff] %v12906_v58  ;;  %v12910_v1 = vpack.i.bf16 %v12906_v58, %v12903_v20  ;;  %v3840_v37 = vrot.slane %v12906_v58, 1 }
 0x328   : > { %15786 = vst [vmem:[#allocation77_spill] sm:$0xff] %v12910_v1  ;;  %8191 = vrot.lane.b32.xlu0 %v12910_v1, %s9015_s20 }
 0x329   : > { %v6619_v4 = vpop.f32.mrb[44].mxu0 }
 0x32a   : > { %v6620_v53 = vpop.f32.mrb[45].mxu0 }
 0x32b   : > { %v6621_v23 = vadd.f32 %v6620_v53, %v6619_v4  ;;  %v6622_v39 = vpop.f32.mrb[46].mxu0  ;;  %v15790_v53 = vld [vmem:[#allocation11_spill] sm:$0xff] }
 0x32c   : > { %v6623_v35 = vpop.f32.mrb[47].mxu0 }
 0x32d   : > { %v6958_v51 = vadd.f32 %v12767_v18, %v6621_v23  ;;  %v6624_v59 = vadd.f32 %v6623_v35, %v6622_v39  ;;  %v12940_v39 = vsel %vm615_vm1, %v15094_v41, %v3840_v37 }
 0x32f   : > { %v12916_v63 = vadd.f32 %v6958_v51, %v12810_v8  ;;  %v6960_v36 = vadd.f32 %v12771_v26, %v6624_v59 }
 0x331   : > { %15787 = vst [vmem:[#allocation74_spill] sm:$0xff] %v12916_v63  ;;  %v3841_v11 = vrot.slane %v12916_v63, 1  ;;  %v12921_v7 = vadd.f32 %v6960_v36, %v12810_v8 }
 0x333   : > { %15788 = vst [vmem:[#allocation86_spill] sm:$0xff] %v12921_v7  ;;  %v12927_v4 = vpack.i.bf16 %v12921_v7, %v12916_v63  ;;  %v3861_v18 = vsel %vm615_vm1, %v3840_v37, %v3841_v11  ;;  %v3842_v41 = vrot.slane %v12921_v7, 1 }
 0x334   : > { %v12932_v23 = vmul.f32 %v15790_v53, %v3861_v18  ;;  %v8648_v18 = vld [vmem:[%s14806_s5 + $0x40] sm:$0xff]  }
 0x335   : > { %15789 = vst [vmem:[#allocation106_spill] sm:$0xff] %v12927_v4  ;;  %v6625_v26 = vpop.f32.mrb[48].mxu0  ;;  %8196 = vrot.lane.b32.xlu1 %v12927_v4, %s9015_s20  ;;  %v8649_v4 = vld [vmem:[%s14806_s5] sm:$0xff]   ;;  %6686 = vmatprep.subr.bf16.mxu1 %v8648_v18 }
 0x336   : > { %v6626_v35 = vpop.f32.mrb[49].mxu0  ;;  %6687 = vmatpush3.bf16.msra.mxu1 %v8649_v4  ;;  %v12979_v4 = vsel %vm615_vm1, %v3841_v11, %v3842_v41  ;;  %v8653_v11 = vld [vmem:[%s14806_s5 + $0x10] sm:$0xff]  }
 0x337   : > { %v6627_v59 = vadd.f32 %v6626_v35, %v6625_v26  ;;  %v6628_v36 = vpop.f32.mrb[50].mxu0 }
 0x338   : > { %v6629_v25 = vpop.f32.mrb[51].mxu0 }
 0x339   : > { %v6963_v1 = vadd.f32 %v6627_v59, %v12777_v42  ;;  %v6630_v48 = vadd.f32 %v6629_v25, %v6628_v36 }
 0x33b   : > { %v12952_v37 = vadd.f32 %v6963_v1, %v12810_v8  ;;  %v6965_v51 = vadd.f32 %v6630_v48, %v12781_v60  ;;  %v8650_v60 = vld [vmem:[%s14806_s5 + $0x48] sm:$0xff]  }
 0x33c   : > { %v8651_v48 = vld [vmem:[%s14806_s5 + $0x8] sm:$0xff]   ;;  %6688 = vmatprep.subr.bf16.mxu1 %v8650_v60 }
 0x33d   : > { %15791 = vst [vmem:[#allocation41_spill] sm:$0xff] %v12952_v37  ;;  %v3843_v26 = vrot.slane %v12952_v37, 1  ;;  %v12957_v35 = vadd.f32 %v6965_v51, %v12810_v8  ;;  %6689 = vmatpush3.bf16.msra.mxu1 %v8651_v48 }
 0x33f   : > { %15792 = vst [vmem:[#allocation72_spill] sm:$0xff] %v12957_v35  ;;  %v12962_v58 = vpack.i.bf16 %v12957_v35, %v12952_v37  ;;  %v3859_v25 = vsel %vm615_vm1, %v3842_v41, %v3843_v26  ;;  %v8652_v41 = vld [vmem:[%s14806_s5 + $0x50] sm:$0xff]  }
 0x340   : > { %v12967_v42 = vmul.f32 %v15790_v53, %v3859_v25  ;;  %6690 = vmatprep.subr.bf16.mxu1 %v8652_v41 }
 0x341   : > { %15793 = vst [vmem:[#allocation25_spill] sm:$0xff] %v12962_v58  ;;  %v6631_v1 = vpop.f32.mrb[52].mxu0  ;;  %8201 = vrot.lane.b32.xlu0 %v12962_v58, %s9015_s20  ;;  %6691 = vmatpush3.bf16.msra.mxu1 %v8653_v11  ;;  %v8654_v11 = vld [vmem:[%s14806_s5 + $0x58] sm:$0xff]  }
 0x342   : > { %v6632_v51 = vpop.f32.mrb[53].mxu0  ;;  %6692 = vmatprep.subr.bf16.mxu1 %v8654_v11 }
 0x343   : > { %v6633_v36 = vadd.f32 %v6632_v51, %v6631_v1  ;;  %v6634_v18 = vpop.f32.mrb[54].mxu0 }
 0x344   : > { %v6635_v25 = vpop.f32.mrb[55].mxu0 }
 0x345   : > { %v6962_v37 = vadd.f32 %v12775_v5, %v6633_v36  ;;  %v6636_v7 = vadd.f32 %v6635_v25, %v6634_v18  ;;  %v3844_v5 = vrot.slane %v12957_v35, 1 }
 0x347   : > { %v12985_v63 = vadd.f32 %v6962_v37, %v12810_v8  ;;  %v6964_v58 = vadd.f32 %v12779_v40, %v6636_v7 }
 0x349   : > { %15794 = vst [vmem:[#allocation57_spill] sm:$0xff] %v12985_v63  ;;  %v3845_v60 = vrot.slane %v12985_v63, 1  ;;  %v12996_v48 = vadd.f32 %v6964_v58, %v12810_v8  ;;  %v13012_v58 = vsel %vm615_vm1, %v3843_v26, %v3844_v5 }
 0x34b   : > { %15795 = vst [vmem:[#allocation84_spill] sm:$0xff] %v12996_v48  ;;  %v13001_v37 = vpack.i.bf16 %v12996_v48, %v12985_v63  ;;  %v3857_v40 = vsel %vm615_vm1, %v3844_v5, %v3845_v60  ;;  %v3846_v36 = vrot.slane %v12996_v48, 1 }
 0x34c   : > { %v13006_v7 = vmul.f32 %v15790_v53, %v3857_v40  ;;  %v8655_v40 = vld [vmem:[%s14806_s5 + $0x18] sm:$0xff]  }
 0x34d   : > { %15796 = vst [vmem:[#allocation94_spill] sm:$0xff] %v13001_v37  ;;  %v6637_v1 = vpop.f32.mrb[56].mxu0  ;;  %8206 = vrot.lane.b32.xlu1 %v13001_v37, %s9015_s20  ;;  %6693 = vmatpush3.bf16.msra.mxu1 %v8655_v40 }
 0x34e   : > { %v6638_v51 = vpop.f32.mrb[57].mxu0 }
 0x34f   : > { %v6639_v18 = vadd.f32 %v6638_v51, %v6637_v1  ;;  %v6640_v25 = vpop.f32.mrb[58].mxu0 }
 0x350   : > { %v6641_v41 = vpop.f32.mrb[59].mxu0 }
 0x351   : > { %v6967_v59 = vadd.f32 %v6639_v18, %v12789_v47  ;;  %v6642_v37 = vadd.f32 %v6641_v41, %v6640_v25  ;;  %v13053_v18 = vsel %vm615_vm1, %v3845_v60, %v3846_v36  ;;  %v8658_v60 = vld [vmem:[%s14806_s5 + $0x68] sm:$0xff]  }
 0x353   : > { %v13024_v26 = vadd.f32 %v6967_v59, %v12810_v8  ;;  %v6969_v5 = vadd.f32 %v6642_v37, %v12793_v61  ;;  %v8656_v61 = vld [vmem:[%s14806_s5 + $0x60] sm:$0xff]  }
 0x354   : > { %v8657_v37 = vld [vmem:[%s14806_s5 + $0x20] sm:$0xff]   ;;  %6694 = vmatprep.subr.bf16.mxu1 %v8656_v61 }
 0x355   : > { %15797 = vst [vmem:[#allocation120_spill] sm:$0xff] %v13024_v26  ;;  %v15107_v1 = vrot.slane %v13024_v26, 1  ;;  %v13029_v51 = vadd.f32 %v6969_v5, %v12810_v8  ;;  %6695 = vmatpush3.bf16.msra.mxu1 %v8657_v37  ;;  %v15821_v50 = vrot.slane %v13024_v26, 1 }
 0x356   : > { %6696 = vmatprep.subr.bf16.mxu1 %v8658_v60 }
 0x357   : > { %15798 = vst [vmem:[#allocation14_spill] sm:$0xff] %v13029_v51  ;;  %v13034_v35 = vpack.i.bf16 %v13029_v51, %v13024_v26  ;;  %v3855_v47 = vsel %vm615_vm1, %v3846_v36, %v15107_v1  ;;  %v8659_v36 = vld [vmem:[%s14806_s5 + $0x28] sm:$0xff]  }
 0x358   : > { %v13041_v59 = vmul.f32 %v15790_v53, %v3855_v47 }
 0x359   : > { %15799 = vst [vmem:[#allocation79_spill] sm:$0xff] %v13034_v35  ;;  %8211 = vrot.lane.b32.xlu0 %v13034_v35, %s9015_s20  ;;  %v6643_v25 = vpop.f32.mrb[60].mxu0  ;;  %6697 = vmatpush3.bf16.msra.mxu1 %v8659_v36  ;;  %v15813_v35 = vrot.slane %v12813_v38, 1 }
 0x35a   : > { %v6644_v11 = vpop.f32.mrb[61].mxu0 }
 0x35b   : > { %v6645_v40 = vadd.f32 %v6644_v11, %v6643_v25  ;;  %v6646_v5 = vpop.f32.mrb[62].mxu0 }
 0x35c   : > { %v6647_v47 = vpop.f32.mrb[63].mxu0 }
 0x35d   : > { %v6966_v1 = vadd.f32 %v12787_v32, %v6645_v40  ;;  %v6648_v48 = vadd.f32 %v6647_v47, %v6646_v5  ;;  %v15112_v5 = vrot.slane %v12827_v6, 1 }
 0x35f   : > { %v6968_v63 = vadd.f32 %v12791_v12, %v6648_v48 }
 0x361   : > { %v6822_v61 = vpop.f32.mrb[64].mxu0 }
 0x362   : > { %v3335_v37 = vadd.f32 %v6822_v61, %v12795_v15  ;;  %v3326_v25 = vpop.f32.mrb[65].mxu0  ;;  %v13074_v15 = vadd.f32 %v6966_v1, %v12810_v8 }
 0x363   : > { %v3327_v11 = vadd.f32 %v12783_v29, %v3326_v25  ;;  %v6823_v32 = vpop.f32.mrb[66].mxu0 }
 0x364   : > { %v3564_v40 = vadd.f32 %v12696_v31, %v3335_v37  ;;  %v3338_v12 = vadd.f32 %v6823_v32, %v12797_v22  ;;  %v3329_v48 = vpop.f32.mrb[67].mxu0  ;;  %v15113_v31 = vrot.slane %v12816_v52, 1  ;;  %v15822_v24 = vrot.slane %v13074_v15, 1 }
 0x365   : > { %v3556_v47 = vadd.f32 %v12700_v14, %v3327_v11  ;;  %v3330_v41 = vadd.f32 %v12785_v54, %v3329_v48  ;;  %v8660_v14 = vld [vmem:[%s14806_s5 + $0x70] sm:$0xff]  }
 0x366   : > { %v3567_v60 = vadd.f32 %v12705_v56, %v3338_v12  ;;  %v13082_v22 = vadd.f32 %v12810_v8, %v3564_v40  ;;  %v8661_v56 = vld [vmem:[%s14806_s5 + $0x30] sm:$0xff]   ;;  %6698 = vmatprep.subr.bf16.mxu1 %v8660_v14 }
 0x367   : > { %v13077_v36 = vadd.f32 %v12810_v8, %v3556_v47  ;;  %v3559_v29 = vadd.f32 %v12713_v44, %v3330_v41  ;;  %v13103_v41 = vsel %vm615_vm1, %v15113_v31, %v15112_v5  ;;  %6699 = vmatpush3.bf16.msra.mxu1 %v8661_v56 }
 0x368   : > { %15801 = vst [vmem:[#allocation118_spill] sm:$0xff] %v13082_v22  ;;  %v13085_v61 = vadd.f32 %v12810_v8, %v3567_v60  ;;  %v3821_v14 = vrot.slane %v13082_v22, 1 }
 0x369   : > { %15800 = vst [vmem:[#allocation78_spill] sm:$0xff] %v13077_v36  ;;  %v13095_v44 = vadd.f32 %v12810_v8, %v3559_v29  ;;  %v6826_v1 = vpop.f32.mrb[68].mxu0  ;;  %v3819_v40 = vrot.slane %v13077_v36, 1  ;;  %v3721_v31 = vrot.slane %v13077_v36, 7 }
 0x36a   : > { %15802 = vst [vmem:[#allocation119_spill] sm:$0xff] %v13085_v61  ;;  %v3351_v25 = vadd.f32 %v6826_v1, %v12803_v55  ;;  %v3342_v11 = vpop.f32.mrb[69].mxu0  ;;  %v8215_v32 = vpack.i.bf16 %v13085_v61, %v13082_v22 }
 0x36b   : > { %15803 = vst [vmem:[#allocation53_spill] sm:$0xff] %v13095_v44  ;;  %v3820_v47 = vrot.slane %v13095_v44, 1  ;;  %v3343_v60 = vadd.f32 %v12799_v43, %v3342_v11  ;;  %v6827_v29 = vpop.f32.mrb[70].mxu0  ;;  %v3722_v48 = vrot.slane %v13095_v44, 7  ;;  %v3883_v11 = vsel %vm615_vm1, 0.0, %v3819_v40 }
 0x36c   : > { %v3580_v5 = vadd.f32 %v12728_v34, %v3351_v25  ;;  %v3354_v55 = vadd.f32 %v6827_v29, %v12805_v33  ;;  %v3345_v1 = vpop.f32.mrb[71].mxu0  ;;  %8216 = vrot.lane.b32.xlu1 %v8215_v32, %s9015_s20  ;;  %8221 = vrot.lane.b32.xlu0 %v8215_v32, %s9017_s17  ;;  %v8225_v34 = vpack.i.bf16 %v13095_v44, %v13077_v36 }
 0x36d   : > { %v3572_v37 = vadd.f32 %v12730_v2, %v3343_v60  ;;  %v3346_v43 = vadd.f32 %v12801_v0, %v3345_v1  ;;  %v3882_v25 = vsel %vm615_vm1, %v3819_v40, %v3820_v47  ;;  %v3884_v0 = vmul.f32 %v15790_v53, %v3883_v11 }
 0x36e   : > { %v13126_v33 = vadd.f32 %v12810_v8, %v3580_v5  ;;  %v3583_v56 = vadd.f32 %v12732_v49, %v3354_v55  ;;  %v3881_v60 = vsel %vm615_vm1, %v3820_v47, %v3821_v14  ;;  %v8662_v49 = vld [vmem:[%s14806_s5 + $0x78] sm:$0xff]   ;;  %v13147_v40 = vadd.f32 %v6968_v63, %v12810_v8 }
 0x36f   : > { %v13134_v32 = vadd.f32 %v12810_v8, %v3572_v37  ;;  %v3575_v2 = vadd.f32 %v12735_v13, %v3346_v43  ;;  %v8663_v5 = vld [vmem:[%s14806_s5 + $0x38] sm:$0xff]   ;;  %v13154_v13 = vmul.f32 %v15790_v53, %v3881_v60  ;;  %v3723_v47 = vrot.slane %v13082_v22, 7  ;;  %6700 = vmatprep.subr.bf16.mxu1 %v8662_v49 }
 0x370   : > { %15804 = vst [vmem:[#allocation51_spill] sm:$0xff] %v13126_v33  ;;  %15806 = vst [vmem:[#allocation91_spill] sm:$0xff] %v13147_v40  ;;  %v13150_v37 = vadd.f32 %v12810_v8, %v3583_v56  ;;  %8226 = vrot.lane.b32.xlu0 %v8225_v34, %s9015_s20  ;;  %v8230_v1 = vpack.i.bf16 %v3882_v25, %v3884_v0  ;;  %v3822_v43 = vrot.slane %v13085_v61, 1  ;;  %v3785_v34 = vsel %vm514_vm3, 0.0, %v3721_v31 }
 0x371   : > { %15805 = vst [vmem:[#allocation67_spill] sm:$0xff] %v13134_v32  ;;  %v3823_v29 = vrot.slane %v13134_v32, 1  ;;  %v13159_v55 = vadd.f32 %v12810_v8, %v3575_v2  ;;  %v8240_v63 = vpack.i.bf16 %v13154_v13, %v3882_v25  ;;  %v13165_v56 = vsel %vm514_vm3, %v3721_v31, %v3722_v48  ;;  %6701 = vmatpush3.bf16.msra.mxu1 %v8663_v5 }
 0x372   : > { %15807 = vst [vmem:[#allocation38_spill] sm:$0xff] %v13150_v37  ;;  %15809 = vst [vmem:[#allocation37_spill] sm:$0xff] %v13165_v56  ;;  %v3724_v11 = vrot.slane %v13085_v61, 7  ;;  %v3825_v60 = vrot.slane %v13126_v33, 1  ;;  %8231 = vrot.lane.b32.xlu1 %v8230_v1, %s9016_s16  ;;  %v13174_v2 = vmul.f32 %v15344_v3, %v3785_v34  ;;  %v3783_v31 = vsel %vm514_vm3, %v3722_v48, %v3723_v47 }
 0x373   : > { %15808 = vst [vmem:[#allocation75_spill] sm:$0xff] %v13159_v55  ;;  %v3824_v8 = vrot.slane %v13159_v55, 1  ;;  %v3879_v25 = vsel %vm615_vm1, %v3822_v43, %v3823_v29  ;;  %v3826_v49 = vrot.slane %v13150_v37, 1  ;;  %v3850_v5 = vrot.slane %v13147_v40, 1 }
 0x374   : > { %15810 = vst [vmem:[#allocation61_spill] sm:$0xff] %v13174_v2  ;;  %8241 = vrot.lane.b32.xlu0 %v8240_v63, %s9015_s20  ;;  %v13180_v0 = vmul.f32 %v15790_v53, %v3879_v25  ;;  %v8235_v34 = vpack.i.bf16 %v13165_v56, %v13174_v2  ;;  %v13192_v12 = vsel %vm615_vm1, %v3821_v14, %v3822_v43  ;;  %v3727_v61 = vrot.slane %v13126_v33, 7 }
 0x375   : > { %v3877_v1 = vsel %vm615_vm1, %v3824_v8, %v3825_v60  ;;  %v13195_v63 = vmul.f32 %v15344_v3, %v3783_v31  ;;  %v13201_v25 = vsel %vm514_vm3, %v3723_v47, %v3724_v11  ;;  %v3875_v22 = vsel %vm615_vm1, %v3826_v49, %v15813_v35 }
 0x376   : > { %v4764_v48 = vpack.c.bf16 %v13180_v0, %v13192_v12  ;;  %15812 = vst [vmem:[#allocation82_spill] sm:$0xff] %v13201_v25  ;;  %v13204_v54 = vmul.f32 %v15790_v53, %v3877_v1  ;;  %8236 = vrot.lane.b32.xlu1 %v8235_v34, %s9017_s17  ;;  %v13215_v43 = vsel %vm615_vm1, %v3823_v29, %v3824_v8  ;;  %v3848_v47 = vrot.slane %v13029_v51, 1 }
 0x377   : > { %15811 = vst [vmem:[#allocation85_spill] sm:$0xff] %v13195_v63  ;;  %v8250_v14 = vpack.i.bf16 %v13201_v25, %v13195_v63  ;;  %v3726_v31 = vrot.slane %v13159_v55, 7  ;;  %v13223_v35 = vmul.f32 %v15790_v53, %v3875_v22  ;;  %v15814_v34 = vrot.slane %v12844_v62, 1 }
 0x378   : > { %6894 = vmatprep.mubr.msk.bf16.mxu0 %vm1779_vm4, %v4764_v48  ;;  %v4767_v1 = vpack.c.bf16 %v13204_v54, %v13215_v43  ;;  %v15815_v63 = vrot.slane %v12830_v16, 1  ;;  %v13234_v8 = vsel %vm615_vm1, %v3825_v60, %v3826_v49  ;;  %v13238_v48 = vmul.f32 %v15790_v53, %v13103_v41 }
 0x379   : > { %8251 = vrot.lane.b32.xlu0 %v8250_v14, %s9017_s17  ;;  %v15816_v22 = vrot.slane %v13074_v15, 1  ;;  %v3851_v60 = vsel %vm615_vm1, %v3850_v5, 0.0  ;;  %v8260_v41 = vpack.i.bf16 %v13159_v55, %v13134_v32  ;;  %v3779_v40 = vsel %vm514_vm3, %v3726_v31, %v3727_v61 }
 0x37a   : > { %v3871_v29 = vsel %vm615_vm1, %v15815_v63, %v15814_v34  ;;  %6895 = vmatmul.mubr.msk.bf16.vlgmr.msra.gmra.mrb[72].mxu0 %vm1779_vm4, %v4767_v1  ;;  %v4770_v63 = vpack.c.bf16 %v13223_v35, %v13234_v8  ;;  %v3725_v34 = vrot.slane %v13134_v32, 7  ;;  %8246 = vrot.lane.b32.xlu1 %v8250_v14, %s9016_s16  ;;  %v15817_v1 = vrot.slane %v12816_v52, 1 }
 0x37b   : > { %v3853_v25 = vsel %vm615_vm1, %v3848_v47, %v15816_v22  ;;  %v13255_v49 = vmul.f32 %v15790_v53, %v3871_v29  ;;  %v15818_v22 = vrot.slane %v12813_v38, 1  ;;  %v3833_v32 = vrot.slane %v12861_v9, 1 }
 0x37c   : > { %6898 = vmatprep.mubr.msk.bf16.mxu0 %vm1779_vm4, %v4770_v63  ;;  %v13269_v14 = vmul.f32 %v15790_v53, %v3853_v25  ;;  %v8255_v29 = vpack.i.bf16 %v13150_v37, %v13126_v33  ;;  %v13278_v55 = vmul.f32 %v15790_v53, %v3851_v60  ;;  %v15820_v25 = vrot.slane %v12827_v6, 1 }
 0x37d   : > { %v13264_v56 = vsel %vm615_vm1, %v15818_v22, %v15817_v1  ;;  %8261 = vrot.lane.b32.xlu0 %v8260_v41, %s9015_s20  ;;  %v3835_v1 = vrot.slane %v12875_v46, 1  ;;  %v15819_v22 = vrot.slane %v12830_v16, 1  ;;  %v3781_v36 = vsel %vm514_vm3, %v3724_v11, %v3725_v34 }
 0x37e   : > { %v4773_v63 = vpack.c.bf16 %v13238_v48, %v13264_v56  ;;  %v3832_v33 = vrot.slane %v12847_v30, 1  ;;  %8256 = vrot.lane.b32.xlu1 %v8255_v29, %s9015_s20  ;;  %v8270_v60 = vpack.i.bf16 %v13180_v0, %v13192_v12  ;;  %v13298_v51 = vmul.f32 %v15344_v3, %v3779_v40 }
 0x37f   : > { %v13287_v2 = vsel %vm615_vm1, %v15820_v25, %v15819_v22  ;;  %v13304_v22 = vsel %vm615_vm1, %v15821_v50, %v3848_v47  ;;  %v3728_v11 = vrot.slane %v13150_v37, 7  ;;  %v3834_v25 = vrot.slane %v12864_v27, 1 }
 0x380   : > { %v4776_v44 = vpack.c.bf16 %v13255_v49, %v13287_v2  ;;  %v13312_v45 = vsel %vm615_vm1, %v15822_v24, %v3850_v5  ;;  %v13316_v40 = vpack.i.bf16 %v13269_v14, %v13304_v22  ;;  %v13320_v26 = vmul.f32 %v15344_v3, %v3781_v36 }
 0x381   : > { %8271 = vrot.lane.b32.xlu0 %v8270_v60, %s9015_s20  ;;  %v3869_v50 = vsel %vm615_vm1, %v3832_v33, %v3833_v32  ;;  %v13329_v24 = vsel %vm514_vm3, %v3725_v34, %v3726_v31  ;;  %v3867_v5 = vsel %vm615_vm1, %v3834_v25, %v3835_v1  ;;  %v8280_v36 = vpack.i.bf16 %v13298_v51, %v13154_v13 }
 0x382   : > { %15823 = vst [vmem:[#allocation34_spill] sm:$0xff] %v13320_v26  ;;  %6899 = vmatmul.mubr.msk.bf16.gmra.mrb[76].mxu0 %vm1779_vm4, %v4773_v63  ;;  %8266 = vrot.lane.b32.xlu1 %v8260_v41, %s9017_s17  ;;  %v3729_v60 = vrot.slane %v12813_v38, 7  ;;  %v13340_v47 = vsel %vm514_vm3, %v3727_v61, %v3728_v11  ;;  %v13343_v63 = vmul.f32 %v15790_v53, %v3869_v50  ;;  %v3837_v31 = vrot.slane %v12889_v19, 1 }
 0x383   : > { %6902 = vmatprep.mubr.msk.bf16.mxu0 %vm1779_vm4, %v4776_v44  ;;  %v8275_v34 = vpack.i.bf16 %v13329_v24, %v13320_v26  ;;  %v13350_v44 = vmul.f32 %v15790_v53, %v3867_v5  ;;  %v8285_v61 = vpack.i.bf16 %v13192_v12, %v13340_v47  ;;  %v15824_v41 = vrot.slane %v12844_v62, 1 }
 0x384   : > { %v3777_v13 = vsel %vm514_vm3, %v3728_v11, %v3729_v60  ;;  %v13368_v38 = vsel %vm615_vm1, %v3833_v32, %v3834_v25  ;;  %v3838_v11 = vrot.slane %v12892_v28, 1  ;;  %v8290_v12 = vpack.i.bf16 %v13204_v54, %v13215_v43 }
 0x385   : > { %8281 = vrot.lane.b32.xlu0 %v8280_v36, %s9016_s16  ;;  %v13361_v50 = vsel %vm615_vm1, %v15824_v41, %v3832_v33  ;;  %v3836_v36 = vrot.slane %v12878_v21, 1  ;;  %v4782_v33 = vpack.c.bf16 %v13350_v44, %v13368_v38  ;;  %v13377_v41 = vmul.f32 %v15344_v3, %v3777_v13 }
 0x386   : > { %8276 = vrot.lane.b32.xlu1 %v8275_v34, %s9016_s16  ;;  %v4779_v5 = vpack.c.bf16 %v13343_v63, %v13361_v50  ;;  %v3731_v26 = vrot.slane %v12827_v6, 7  ;;  %v15825_v32 = vrot.slane %v12903_v20, 1 }
 0x387   : > { %v3865_v37 = vsel %vm615_vm1, %v3836_v36, %v3837_v31  ;;  %v8295_v6 = vpack.i.bf16 %v13377_v41, %v13180_v0  ;;  %v13412_v0 = vsel %vm615_vm1, %v3837_v31, %v3838_v11 }
 0x388   : > { %v3863_v25 = vsel %vm615_vm1, %v3838_v11, %v15825_v32  ;;  %v13391_v13 = vmul.f32 %v15790_v53, %v3865_v37  ;;  %v13406_v37 = vsel %vm615_vm1, %v3835_v1, %v3836_v36  ;;  %v3732_v11 = vrot.slane %v12830_v16, 7 }
 0x389   : > { %8286 = vrot.lane.b32.xlu0 %v8285_v61, %s9016_s16  ;;  %v3730_v61 = vrot.slane %v12816_v52, 7 }
 0x38a   : > { %6903 = vmatmul.mubr.msk.bf16.gmra.mrb[80].mxu0 %vm1779_vm4, %v4779_v5  ;;  %8291 = vrot.lane.b32.xlu1 %v8290_v12, %s9015_s20  ;;  %v13397_v5 = vmul.f32 %v15790_v53, %v3863_v25  ;;  %v8310_v12 = vpack.i.bf16 %v13223_v35, %v13234_v8 }
 0x38b   : > { %6906 = vmatprep.mubr.msk.bf16.mxu0 %vm1779_vm4, %v4782_v33  ;;  %v3775_v32 = vsel %vm514_vm3, %v3730_v61, %v3731_v26  ;;  %v13427_v31 = vsel %vm514_vm3, %v3729_v60, %v3730_v61  ;;  %v3733_v33 = vrot.slane %v12844_v62, 7  ;;  %v4794_v60 = vpack.c.bf16 %v12967_v42, %v12979_v4 }
 0x38c   : > { %v13415_v53 = vmul.f32 %v15344_v3, %v3775_v32  ;;  %v8315_v36 = vpack.i.bf16 %v13215_v43, %v13427_v31  ;;  %v13444_v43 = vsel %vm514_vm3, %v3731_v26, %v3732_v11  ;;  %v3735_v32 = vrot.slane %v12861_v9, 7 }
 0x38d   : > { %8301 = vrot.lane.b32.xlu0 %v8255_v29, %s9017_s17  ;;  %v4785_v29 = vpack.c.bf16 %v13391_v13, %v13406_v37  ;;  %v8340_v25 = vpack.i.bf16 %v13234_v8, %v13444_v43  ;;  %v3773_v61 = vsel %vm514_vm3, %v3732_v11, %v3733_v33  ;;  %v8335_v26 = vpack.i.bf16 %v13238_v48, %v13264_v56 }
 0x38e   : > { %8296 = vrot.lane.b32.xlu1 %v8295_v6, %s9016_s16  ;;  %v4788_v6 = vpack.c.bf16 %v13397_v5, %v13412_v0  ;;  %v8320_v1 = vpack.i.bf16 %v13415_v53, %v13204_v54  ;;  %v4791_v54 = vpack.c.bf16 %v12932_v23, %v12940_v39  ;;  %v4797_v8 = vpack.c.bf16 %v13006_v7, %v13012_v58 }
 0x38f   : > { %v8360_v11 = vpack.i.bf16 %v13255_v49, %v13287_v2 }
 0x391   : > { %8311 = vrot.lane.b32.xlu0 %v8310_v12, %s9015_s20  ;;  %v3734_v12 = vrot.slane %v12847_v30, 7 }
 0x392   : > { %6907 = vmatmul.mubr.msk.bf16.gmra.mrb[84].mxu0 %vm1779_vm4, %v4785_v29  ;;  %8306 = vrot.lane.b32.xlu1 %v8275_v34, %s9017_s17  ;;  %v8330_v34 = vpack.i.bf16 %v13340_v47, %v13298_v51  ;;  %v13460_v29 = vmul.f32 %v15344_v3, %v3773_v61  ;;  %v4806_v61 = vpack.c.bf16 %v13278_v55, %v13312_v45 }
 0x393   : > { %6910 = vmatprep.mubr.msk.bf16.mxu0 %vm1779_vm4, %v4788_v6 }
 0x394   : > { %v8345_v6 = vpack.i.bf16 %v13460_v29, %v13223_v35  ;;  %v13486_v35 = vsel %vm514_vm3, %v3733_v33, %v3734_v12  ;;  %v3737_v33 = vrot.slane %v12875_v46, 7 }
 0x395   : > { %8321 = vrot.lane.b32.xlu0 %v8320_v1, %s9016_s16  ;;  %v4800_v1 = vpack.c.bf16 %v13041_v59, %v13053_v18 }
 0x396   : > { %8316 = vrot.lane.b32.xlu1 %v8315_v36, %s9016_s16 }
 0x399   : > { %8331 = vrot.lane.b32.xlu0 %v8330_v34, %s9017_s17 }
 0x39a   : > { %6911 = vmatmul.mubr.msk.bf16.gmra.mrb[88].mxu0 %vm1779_vm4, %v4791_v54  ;;  %8326 = vrot.lane.b32.xlu1 %v12820_v10, %s9017_s17  ;;  %v3771_v10 = vsel %vm514_vm3, %v3734_v12, %v3735_v32  ;;  %v3736_v54 = vrot.slane %v12864_v27, 7  ;;  %v3739_v12 = vrot.slane %v12889_v19, 7 }
 0x39b   : > { %6914 = vmatprep.mubr.msk.bf16.mxu0 %vm1779_vm4, %v4794_v60  ;;  %v13475_v36 = vmul.f32 %v15344_v3, %v3771_v10  ;;  %v4803_v60 = vpack.c.bf16 %v13269_v14, %v13304_v22  ;;  %v15828_v22 = vld [vmem:[#allocation104_spill] sm:$0xff] }
 0x39c   : > { %v13507_v14 = vsel %vm514_vm3, %v3735_v32, %v3736_v54  ;;  %v8385_v32 = vpack.i.bf16 %v13343_v63, %v13361_v50 }
 0x39d   : > { %8341 = vrot.lane.b32.xlu0 %v8340_v25, %s9016_s16  ;;  %15826 = vst [vmem:[#allocation103_spill] sm:$0xff] %v13475_v36  ;;  %v8370_v34 = vpack.i.bf16 %v13475_v36, %v13238_v48  ;;  %v8365_v25 = vpack.i.bf16 %v13264_v56, %v13486_v35  ;;  %v8380_v48 = vpack.i.bf16 %v13444_v43, %v13415_v53  ;;  %15827 = vst [vmem:[#allocation26_spill] sm:$0xff] %v13507_v14 }
 0x39e   : > { %8336 = vrot.lane.b32.xlu1 %v8335_v26, %s9015_s20  ;;  %v3769_v56 = vsel %vm514_vm3, %v3736_v54, %v3737_v33  ;;  %v8390_v26 = vpack.i.bf16 %v13287_v2, %v13507_v14  ;;  %v8405_v54 = vpack.i.bf16 %v13486_v35, %v13460_v29 }
 0x39f   : > { %v13518_v10 = vmul.f32 %v15344_v3, %v3769_v56 }
 0x3a1   : > { %8351 = vrot.lane.b32.xlu0 %v12834_v57, %s9017_s17  ;;  %v8355_v57 = vpack.i.bf16 %v13427_v31, %v13377_v41  ;;  %15829 = vst [vmem:[#allocation65_spill] sm:$0xff] %v13518_v10 }
 0x3a2   : > { %6915 = vmatmul.mubr.msk.bf16.gmra.mrb[92].mxu0 %vm1779_vm4, %v4797_v8  ;;  %8346 = vrot.lane.b32.xlu1 %v8345_v6, %s9016_s16  ;;  %v3738_v8 = vrot.slane %v12878_v21, 7  ;;  %v15830_v6 = vld [vmem:[#allocation39_spill] sm:$0xff] }
 0x3a3   : > { %6918 = vmatprep.mubr.msk.bf16.mxu0 %vm1779_vm4, %v4800_v1  ;;  %v15831_v1 = vld [vmem:[#allocation107_spill] sm:$0xff] }
 0x3a4   : > { %v3767_v2 = vsel %vm514_vm3, %v3738_v8, %v3739_v12 }
 0x3a5   : > { %8361 = vrot.lane.b32.xlu0 %v8360_v11, %s9015_s20  ;;  %v8395_v11 = vpack.i.bf16 %v13518_v10, %v13255_v49 }
 0x3a6   : > { %8356 = vrot.lane.b32.xlu1 %v8355_v57, %s9017_s17  ;;  %v13534_v57 = vmul.f32 %v15344_v3, %v3767_v2  ;;  %v15838_v2 = vld [vmem:[#allocation81_spill] sm:$0xff] }
 0x3a8   : > { %15832 = vst [vmem:[#allocation121_spill] sm:$0xff] %v13534_v57  ;;  %v8420_v49 = vpack.i.bf16 %v13534_v57, %v13343_v63 }
 0x3a9   : > { %8371 = vrot.lane.b32.xlu0 %v8370_v34, %s9016_s16  ;;  %v8410_v34 = vpack.i.bf16 %v13350_v44, %v13368_v38 }
 0x3aa   : > { %6919 = vmatmul.mubr.msk.bf16.gmra.mrb[96].mxu0 %vm1779_vm4, %v4803_v60  ;;  %8366 = vrot.lane.b32.xlu1 %v8365_v25, %s9016_s16  ;;  %v13544_v60 = vsel %vm514_vm3, %v3737_v33, %v3738_v8  ;;  %v3740_v25 = vrot.slane %v12892_v28, 7  ;;  %v8430_v33 = vpack.i.bf16 %v13507_v14, %v13475_v36  ;;  %v15869_v14 = vrot.slane %v13074_v15, 7  ;;  %v15871_v36 = vld [vmem:[#allocation94_spill] sm:$0xff] }
 0x3ab   : > { %6922 = vmatprep.mubr.msk.bf16.mxu0 %vm1779_vm4, %v4806_v61  ;;  %15833 = vst [vmem:[#allocation110_spill] sm:$0xff] %v13544_v60  ;;  %v8415_v61 = vpack.i.bf16 %v13361_v50, %v13544_v60 }
 0x3ac   : > { %v13559_v56 = vsel %vm514_vm3, %v3739_v12, %v3740_v25  ;;  %v8435_v12 = vpack.i.bf16 %v13391_v13, %v13406_v37 }
 0x3ad   : > { %8381 = vrot.lane.b32.xlu0 %v8380_v48, %s9017_s17  ;;  %v3741_v48 = vrot.slane %v12903_v20, 7  ;;  %15834 = vst [vmem:[#allocation111_spill] sm:$0xff] %v13559_v56  ;;  %v8440_v50 = vpack.i.bf16 %v13368_v38, %v13559_v56  ;;  %v15839_v38 = vld [vmem:[#allocation95_spill] sm:$0xff] }
 0x3ae   : > { %8376 = vrot.lane.b32.xlu1 %v15828_v22, %s9017_s17  ;;  %v15835_v22 = vld [vmem:[#allocation83_spill] sm:$0xff] }
 0x3af   : > { %v3765_v63 = vsel %vm514_vm3, %v3740_v25, %v3741_v48 }
 0x3b0   : > { %v13570_v8 = vmul.f32 %v15344_v3, %v3765_v63 }
 0x3b1   : > { %8391 = vrot.lane.b32.xlu0 %v8390_v26, %s9016_s16  ;;  %v15836_v26 = vld [vmem:[#allocation74_spill] sm:$0xff] }
 0x3b2   : > { %6923 = vmatmul.mubr.msk.bf16.gmra.mrb[100].mxu0 %vm1779_vm4, %v15830_v6  ;;  %8386 = vrot.lane.b32.xlu1 %v8385_v32, %s9015_s20  ;;  %v3743_v32 = vrot.slane %v15836_v26, 7  ;;  %15837 = vst [vmem:[#allocation58_spill] sm:$0xff] %v13570_v8  ;;  %v13575_v6 = vpop.permute.xlu0 %8161 }
 0x3b5   : > { %8401 = vrot.lane.b32.xlu0 %v15831_v1, %s9017_s17  ;;  %v3742_v1 = vrot.slane %v15838_v2, 7 }
 0x3b6   : > { %8396 = vrot.lane.b32.xlu1 %v8395_v11, %s9016_s16 }
 0x3b7   : > { %v3763_v11 = vsel %vm514_vm3, %v3742_v1, %v3743_v32 }
 0x3b8   : > { %v13590_v25 = vmul.f32 %v15344_v3, %v3763_v11 }
 0x3b9   : > { %8411 = vrot.lane.b32.xlu0 %v8410_v34, %s9015_s20  ;;  %v8445_v34 = vpack.i.bf16 %v13570_v8, %v13350_v44  ;;  %v13602_v44 = vsel %vm514_vm3, %v3741_v48, %v3742_v1  ;;  %v8480_v1 = vpack.i.bf16 %v13559_v56, %v13534_v57  ;;  %v15861_v57 = vld [vmem:[#allocation84_spill] sm:$0xff] }
 0x3ba   : > { %8406 = vrot.lane.b32.xlu1 %v8405_v54, %s9017_s17  ;;  %v13585_v54 = vpop.permute.xlu0 %8171  ;;  %15840 = vst [vmem:[#allocation64_spill] sm:$0xff] %v13590_v25  ;;  %15842 = vst [vmem:[#allocation42_spill] sm:$0xff] %v13602_v44 }
 0x3bd   : > { %8421 = vrot.lane.b32.xlu0 %v8420_v49, %s9016_s16  ;;  %v13587_v49 = vpop.permute.xlu1 %8166 }
 0x3be   : > { %8416 = vrot.lane.b32.xlu1 %v8415_v61, %s9016_s16  ;;  %v8460_v61 = vpack.i.bf16 %v13397_v5, %v13412_v0  ;;  %v13598_v63 = vpop.permute.xlu0 %8181 }
 0x3bf   : > { %15841 = vst [vmem:[#allocation48_spill] sm:$0xff] %v13598_v63 }
 0x3c1   : > { %8431 = vrot.lane.b32.xlu0 %v8430_v33, %s9017_s17  ;;  %v8455_v33 = vpack.i.bf16 %v13544_v60, %v13518_v10  ;;  %v15865_v60 = vld [vmem:[#allocation53_spill] sm:$0xff] }
 0x3c2   : > { %8426 = vrot.lane.b32.xlu1 %v15835_v22, %s9017_s17  ;;  %v13604_v22 = vpop.permute.xlu1 %8176 }
 0x3c5   : > { %8441 = vrot.lane.b32.xlu0 %v8440_v50, %s9016_s16  ;;  %v8470_v50 = vpack.i.bf16 %v13590_v25, %v13391_v13 }
 0x3c6   : > { %8436 = vrot.lane.b32.xlu1 %v8435_v12, %s9015_s20  ;;  %v15843_v12 = vld [vmem:[#allocation86_spill] sm:$0xff]  ;;  %v13616_v48 = vpop.permute.xlu1 %8186 }
 0x3c7   : > { %v3744_v11 = vrot.slane %v15843_v12, 7  ;;  %15846 = vst [vmem:[#allocation71_spill] sm:$0xff] %v13616_v48  ;;  %v15851_v12 = vld [vmem:[#allocation57_spill] sm:$0xff]  ;;  %v3748_v48 = vrot.slane %v15861_v57, 7 }
 0x3c9   : > { %8451 = vrot.lane.b32.xlu0 %v15839_v38, %s9017_s17  ;;  %v8465_v38 = vpack.i.bf16 %v13406_v37, %v13602_v44  ;;  %v13623_v13 = vsel %vm514_vm3, %v3743_v32, %v3744_v11 }
 0x3ca   : > { %8446 = vrot.lane.b32.xlu1 %v8445_v34, %s9016_s16  ;;  %v13613_v34 = vpop.permute.xlu0 %8191  ;;  %15847 = vst [vmem:[#allocation59_spill] sm:$0xff] %v13623_v13 }
 0x3cb   : > { %15844 = vst [vmem:[#allocation112_spill] sm:$0xff] %v13613_v34  ;;  %v3747_v34 = vrot.slane %v15851_v12, 7  ;;  %v15857_v12 = vld [vmem:[#allocation106_spill] sm:$0xff] }
 0x3cd   : > { %8461 = vrot.lane.b32.xlu0 %v8460_v61, %s9015_s20  ;;  %v15845_v61 = vld [vmem:[#allocation41_spill] sm:$0xff] }
 0x3ce   : > { %8456 = vrot.lane.b32.xlu1 %v8455_v33, %s9017_s17  ;;  %v3745_v26 = vrot.slane %v15845_v61, 7  ;;  %v13628_v33 = vpop.permute.xlu0 %8201  ;;  %v15850_v61 = vld [vmem:[#allocation77_spill] sm:$0xff] }
 0x3cf   : > { %15848 = vst [vmem:[#allocation89_spill] sm:$0xff] %v13628_v33 }
 0x3d0   : > { %v3761_v37 = vsel %vm514_vm3, %v3744_v11, %v3745_v26 }
 0x3d1   : > { %8471 = vrot.lane.b32.xlu0 %v8470_v50, %s9016_s16  ;;  %v13630_v50 = vpop.permute.xlu1 %8196  ;;  %v13638_v32 = vmul.f32 %v15344_v3, %v3761_v37 }
 0x3d2   : > { %8466 = vrot.lane.b32.xlu1 %v8465_v38, %s9016_s16  ;;  %15849 = vst [vmem:[#allocation88_spill] sm:$0xff] %v13630_v50  ;;  %v8490_v38 = vpack.i.bf16 %v13412_v0, %v13623_v13  ;;  %v13642_v11 = vpop.permute.xlu0 %8211 }
 0x3d3   : > { %15852 = vst [vmem:[#allocation31_spill] sm:$0xff] %v13638_v32  ;;  %15854 = vst [vmem:[#allocation73_spill] sm:$0xff] %v13642_v11  ;;  %v8495_v37 = vpack.i.bf16 %v13638_v32, %v13397_v5 }
 0x3d5   : > { %8481 = vrot.lane.b32.xlu0 %v8480_v1, %s9017_s17  ;;  %v15853_v1 = vld [vmem:[#allocation72_spill] sm:$0xff]  ;;  %v13644_v33 = vpop.permute.xlu1 %8206 }
 0x3d6   : > { %8476 = vrot.lane.b32.xlu1 %v15850_v61, %s9017_s17  ;;  %v3746_v56 = vrot.slane %v15853_v1, 7  ;;  %15855 = vst [vmem:[#allocation28_spill] sm:$0xff] %v13644_v33  ;;  %v15856_v61 = vpack.i.bf16 %v12932_v23, %v12940_v39  ;;  %v8505_v33 = vpack.i.bf16 %v13602_v44, %v13570_v8  ;;  %v15863_v8 = vld [vmem:[#allocation25_spill] sm:$0xff] }
 0x3d8   : > { %v3759_v0 = vsel %vm514_vm3, %v3746_v56, %v3747_v34 }
 0x3d9   : > { %8491 = vrot.lane.b32.xlu0 %v8490_v38, %s9016_s16  ;;  %v13657_v50 = vmul.f32 %v15344_v3, %v3759_v0  ;;  %v15860_v0 = vld [vmem:[#allocation120_spill] sm:$0xff] }
 0x3da   : > { %8486 = vrot.lane.b32.xlu1 %v15856_v61, %s9015_s20  ;;  %v15859_v61 = vpack.i.bf16 %v12967_v42, %v12979_v4  ;;  %v3749_v1 = vrot.slane %v15860_v0, 7 }
 0x3db   : > { %15858 = vst [vmem:[#allocation29_spill] sm:$0xff] %v13657_v50 }
 0x3dd   : > { %8501 = vrot.lane.b32.xlu0 %v15857_v12, %s9017_s17  ;;  %v13670_v12 = vsel %vm514_vm3, %v3745_v26, %v3746_v56  ;;  %v3757_v26 = vsel %vm514_vm3, %v3748_v48, %v3749_v1 }
 0x3de   : > { %v8222_v38 = vpop.permute.xlu0 %8221  ;;  %8496 = vrot.lane.b32.xlu1 %v8495_v37, %s9016_s16  ;;  %v13660_v11 = vpop.permute.xlu1 %8216  ;;  %v8520_v37 = vpack.i.bf16 %v13657_v50, %v12932_v23  ;;  %v13691_v23 = vsel %vm514_vm3, %v3747_v34, %v3748_v48 }
 0x3df   : > { %15862 = vst [vmem:[#allocation22_spill] sm:$0xff] %v13691_v23  ;;  %v8224_v19 = vunpack.i.h.bf16 %v8222_v38  ;;  %v8223_v10 = vunpack.i.l.bf16 %v8222_v38 }
 0x3e1   : > { %8511 = vrot.lane.b32.xlu0 %v15859_v61, %s9015_s20  ;;  %v8515_v61 = vpack.i.bf16 %v12940_v39, %v13670_v12 }
 0x3e2   : > { %v13672_v5 = vpop.permute.xlu0 %8226  ;;  %8506 = vrot.lane.b32.xlu1 %v8505_v33, %s9017_s17  ;;  %v8530_v33 = vpack.i.bf16 %v13623_v13, %v13590_v25  ;;  %v15866_v13 = vld [vmem:[#allocation78_spill] sm:$0xff] }
 0x3e4   : > { %v13679_v20 = vpop.permute.xlu1 %8231 }
 0x3e5   : > { %8521 = vrot.lane.b32.xlu0 %v8520_v37, %s9016_s16  ;;  %v13695_v37 = vmul.f32 %v15344_v3, %v3757_v26  ;;  %v8233_v34 = vunpack.i.l.bf16 %v13679_v20  ;;  %v15864_v26 = vld [vmem:[#allocation14_spill] sm:$0xff] }
 0x3e6   : > { %v8242_v56 = vpop.permute.xlu0 %8241  ;;  %8516 = vrot.lane.b32.xlu1 %v8515_v61, %s9016_s16  ;;  %v8540_v61 = vpack.i.bf16 %v12979_v4, %v13691_v23  ;;  %v3750_v2 = vrot.slane %v15864_v26, 7  ;;  %v15868_v26 = vld [vmem:[#allocation66_spill] sm:$0xff] }
 0x3e7   : > { %v8244_v39 = vunpack.i.h.bf16 %v8242_v56  ;;  %v8243_v57 = vunpack.i.l.bf16 %v8242_v56 }
 0x3e8   : > { %v8237_v0 = vpop.permute.xlu1 %8236 }
 0x3e9   : > { %8531 = vrot.lane.b32.xlu0 %v8530_v33, %s9017_s17  ;;  %v8239_v48 = vunpack.i.h.bf16 %v8237_v0  ;;  %v8238_v25 = vunpack.i.l.bf16 %v8237_v0  ;;  %v4667_v4 = vsel %vm1779_vm4, %v15865_v60, %v8244_v39  ;;  %v4666_v63 = vsel %vm1779_vm4, %v15866_v13, %v8243_v57  ;;  %v15870_v13 = vld [vmem:[#allocation47_spill] sm:$0xff] }
 0x3ea   : > { %8526 = vrot.lane.b32.xlu1 %v15863_v8, %s9017_s17  ;;  %v8545_v8 = vpack.i.bf16 %v13695_v37, %v12967_v42  ;;  %v15867_v0 = vpack.i.bf16 %v13006_v7, %v13012_v58  ;;  %v3755_v60 = vsel %vm514_vm3, %v3750_v2, %v15869_v14 }
 0x3eb   : > { %v13699_v44 = vpop.permute.xlu0 %8251  ;;  %v4634_v39 = vsel %vm2762_vm15, %v15870_v13, %v8238_v25  ;;  %v8229_v25 = vunpack.i.h.bf16 %v13672_v5  ;;  %v15874_v13 = vld [vmem:[#allocation91_spill] sm:$0xff] }
 0x3ec   : > { %v8247_v33 = vpop.permute.xlu1 %8246 }
 0x3ed   : > { %8541 = vrot.lane.b32.xlu0 %v8540_v61, %s9016_s16  ;;  %v8249_v56 = vunpack.i.h.bf16 %v8247_v33  ;;  %v8248_v28 = vunpack.i.l.bf16 %v8247_v33  ;;  %v4603_v33 = vsel %vm2729_vm14, %v15868_v26, %v8233_v34 }
 0x3ee   : > { %8536 = vrot.lane.b32.xlu1 %v15867_v0, %s9015_s20  ;;  %v4635_v57 = vsel %vm2762_vm15, %v4603_v33, %v8239_v48  ;;  %v13739_v48 = vmul.f32 %v15344_v3, %v3755_v60  ;;  %v15873_v33 = vld [vmem:[#allocation61_spill] sm:$0xff] }
 0x3ef   : > { %v13717_v61 = vpop.permute.xlu0 %8261  ;;  %v4698_v42 = vsel %vm2729_vm14, %v4666_v63, %v8248_v28  ;;  %v4699_v38 = vsel %vm2729_vm14, %v4667_v4, %v8249_v56  ;;  %v8228_v63 = vunpack.i.l.bf16 %v13672_v5  ;;  %v4762_v56 = vpack.c.bf16 %v4635_v57, %v4634_v39 }
 0x3f0   : > { %v13730_v0 = vpop.permute.xlu1 %8256  ;;  %v4730_v34 = vsel %vm2762_vm15, %v4698_v42, %v8223_v10  ;;  %v4731_v28 = vsel %vm2762_vm15, %v4699_v38, %v8224_v19  ;;  %v8234_v4 = vunpack.i.h.bf16 %v13679_v20  ;;  %v15872_v19 = vpack.i.bf16 %v13041_v59, %v13053_v18 }
 0x3f1   : > { %8551 = vrot.lane.b32.xlu0 %v15871_v36, %s9017_s17  ;;  %v4763_v26 = vpack.c.bf16 %v4731_v28, %v4730_v34  ;;  %v8555_v10 = vpack.i.bf16 %v13670_v12, %v13638_v32  ;;  %v4573_v42 = vsel %vm1779_vm4, %v15873_v33, %v8228_v63  ;;  %v8570_v60 = vpack.i.bf16 %v13739_v48, %v13006_v7  ;;  %v15875_v34 = vld [vmem:[#allocation37_spill] sm:$0xff] }
 0x3f2   : > { %8546 = vrot.lane.b32.xlu1 %v8545_v8, %s9016_s16  ;;  %v13751_v8 = vsel %vm514_vm3, %v3749_v1, %v3750_v2  ;;  %v8580_v57 = vpack.i.bf16 %v13691_v23, %v13657_v50  ;;  %v3752_v39 = vrot.slane %v15874_v13, 7  ;;  %v8253_v2 = vunpack.i.l.bf16 %v13699_v44  ;;  %v15877_v50 = vld [vmem:[#allocation118_spill] sm:$0xff] }
 0x3f3   : > { %v8272_v14 = vpop.permute.xlu0 %8271  ;;  %5037 = vmatprep.mubr.bf16.mxu1 %v4763_v26  ;;  %v4574_v28 = vsel %vm1779_vm4, %v15875_v34, %v8229_v25  ;;  %v8254_v63 = vunpack.i.h.bf16 %v13699_v44  ;;  %v4604_v7 = vsel %vm2729_vm14, %v4573_v42, %v8234_v4 }
 0x3f4   : > { %v8267_v36 = vpop.permute.xlu1 %8266  ;;  %v8274_v5 = vunpack.i.h.bf16 %v8272_v14  ;;  %5038 = vmatmul.mubr.bf16.vlgmr.msra.gmra.mrb[32].mxu1 %v4762_v56  ;;  %v8273_v20 = vunpack.i.l.bf16 %v8272_v14  ;;  %v8565_v14 = vpack.i.bf16 %v13012_v58, %v13751_v8  ;;  %v15876_v56 = vld [vmem:[#allocation119_spill] sm:$0xff]  ;;  %v4636_v42 = vsel %vm2762_vm15, %v4604_v7, %v8253_v2 }
 0x3f5   : > { %8561 = vrot.lane.b32.xlu0 %v15872_v19, %s9015_s20  ;;  %v8269_v34 = vunpack.i.h.bf16 %v8267_v36  ;;  %v8268_v44 = vunpack.i.l.bf16 %v8267_v36  ;;  %v3753_v2 = vsel %vm514_vm3, %v3752_v39, 0.0 }
 0x3f6   : > { %8556 = vrot.lane.b32.xlu1 %v8555_v10, %s9017_s17  ;;  %v4669_v19 = vsel %vm1779_vm4, %v15876_v56, %v8274_v5  ;;  %v4668_v25 = vsel %vm1779_vm4, %v15877_v50, %v8273_v20  ;;  %v15878_v5 = vrot.slane %v13074_v15, 7  ;;  %v15879_v56 = vld [vmem:[#allocation79_spill] sm:$0xff]  ;;  %v3818_v17 = vmul.f32 %v15344_v3, %v3753_v2 }
 0x3f7   : > { %v8282_v38 = vpop.permute.xlu0 %8281  ;;  %v8600_v3 = vpack.i.bf16 %v15874_v13, %v13074_v15 }
 0x3f8   : > { %v8283_v1 = vunpack.i.l.bf16 %v8282_v38  ;;  %v8277_v26 = vpop.permute.xlu1 %8276  ;;  %v8284_v7 = vunpack.i.h.bf16 %v8282_v38 }
 0x3f9   : > { %8571 = vrot.lane.b32.xlu0 %v8570_v60, %s9016_s16  ;;  %v8279_v10 = vunpack.i.h.bf16 %v8277_v26  ;;  %v8278_v33 = vunpack.i.l.bf16 %v8277_v26 }
 0x3fa   : > { %v4605_v23 = vsel %vm2729_vm14, %v4574_v28, %v8283_v1  ;;  %8566 = vrot.lane.b32.xlu1 %v8565_v14, %s9016_s16  ;;  %v13783_v1 = vsel %vm514_vm3, %v15878_v5, %v3752_v39  ;;  %v8219_v39 = vunpack.i.h.bf16 %v13660_v11 }
 0x3fb   : > { %v8287_v60 = vpop.permute.xlu0 %8286  ;;  %v4637_v32 = vsel %vm2762_vm15, %v4605_v23, %v8254_v63  ;;  %v4700_v58 = vsel %vm2729_vm14, %v4668_v25, %v8278_v33  ;;  %v4701_v4 = vsel %vm2729_vm14, %v4669_v19, %v8279_v10  ;;  %v8590_v10 = vpack.i.bf16 %v13053_v18, %v13783_v1  ;;  %v15881_v25 = vld [vmem:[#allocation67_spill] sm:$0xff] }
 0x3fc   : > { %v8288_v50 = vunpack.i.l.bf16 %v8287_v60  ;;  %v8292_v20 = vpop.permute.xlu1 %8291  ;;  %v4732_v36 = vsel %vm2762_vm15, %v4700_v58, %v8268_v44  ;;  %v4733_v23 = vsel %vm2762_vm15, %v4701_v4, %v8269_v34  ;;  %v4765_v28 = vpack.c.bf16 %v4637_v32, %v4636_v42 }
 0x3fd   : > { %8581 = vrot.lane.b32.xlu0 %v8580_v57, %s9017_s17  ;;  %v8294_v63 = vunpack.i.h.bf16 %v8292_v20  ;;  %v8293_v26 = vunpack.i.l.bf16 %v8292_v20  ;;  %v4766_v14 = vpack.c.bf16 %v4733_v23, %v4732_v36  ;;  %v15880_v57 = vld [vmem:[#allocation75_spill] sm:$0xff]  ;;  %v8218_v4 = vunpack.i.l.bf16 %v13660_v11 }
 0x3fe   : > { %8576 = vrot.lane.b32.xlu1 %v15879_v56, %s9017_s17  ;;  %v8289_v20 = vunpack.i.h.bf16 %v8287_v60  ;;  %v8595_v11 = vpack.i.bf16 %v3818_v17, %v13041_v59  ;;  %v15883_v60 = vld [vmem:[#allocation85_spill] sm:$0xff]  ;;  %v8264_v56 = vunpack.i.h.bf16 %v13717_v61  ;;  %v8263_v59 = vunpack.i.l.bf16 %v13717_v61 }
 0x3ff   : > { %v8302_v19 = vpop.permute.xlu0 %8301  ;;  %v4671_v33 = vsel %vm1779_vm4, %v15880_v57, %v8294_v63  ;;  %v4670_v32 = vsel %vm1779_vm4, %v15881_v25, %v8293_v26  ;;  %5045 = vmatprep.mubr.bf16.mxu1 %v4766_v14  ;;  %v15882_v63 = vld [vmem:[#allocation82_spill] sm:$0xff]  ;;  %v4575_v14 = vsel %vm1779_vm4, %v15883_v60, %v8218_v4 }
 0x400   : > { %v8304_v34 = vunpack.i.h.bf16 %v8302_v19  ;;  %v8303_v44 = vunpack.i.l.bf16 %v8302_v19  ;;  %v13798_v58 = vpop.permute.xlu1 %8296  ;;  %5046 = vmatmul.mubr.bf16.gmra.mrb[36].mxu1 %v4765_v28  ;;  %v4702_v38 = vsel %vm2729_vm14, %v4670_v32, %v8284_v7  ;;  %v4703_v18 = vsel %vm2729_vm14, %v4671_v33, %v8288_v50 }
 0x401   : > { %8591 = vrot.lane.b32.xlu0 %v8590_v10, %s9016_s16  ;;  %v8298_v36 = vunpack.i.l.bf16 %v13798_v58  ;;  %v4576_v26 = vsel %vm1779_vm4, %v15882_v63, %v8219_v39  ;;  %v4606_v10 = vsel %vm2729_vm14, %v4575_v14, %v8289_v20  ;;  %v4578_v61 = vsel %vm1779_vm4, %v13329_v24, %v8264_v56 }
 0x402   : > { %v4734_v42 = vsel %vm2762_vm15, %v4702_v38, %v8303_v44  ;;  %v4735_v5 = vsel %vm2762_vm15, %v4703_v18, %v8304_v34  ;;  %8586 = vrot.lane.b32.xlu1 %v13316_v40, %s9015_s20  ;;  %v15884_v38 = vpack.i.bf16 %v13278_v55, %v13312_v45  ;;  %v8605_v18 = vpack.i.bf16 %v13751_v8, %v13695_v37  ;;  %v15886_v55 = vld [vmem:[#allocation51_spill] sm:$0xff] }
 0x403   : > { %v8312_v23 = vpop.permute.xlu0 %8311  ;;  %v4769_v28 = vpack.c.bf16 %v4735_v5, %v4734_v42  ;;  %v4607_v57 = vsel %vm2729_vm14, %v4576_v26, %v8298_v36  ;;  %v8620_v20 = vpack.i.bf16 %v13783_v1, %v13739_v48  ;;  %v15885_v36 = vld [vmem:[#allocation34_spill] sm:$0xff] }
 0x404   : > { %v8307_v50 = vpop.permute.xlu1 %8306  ;;  %v8313_v33 = vunpack.i.l.bf16 %v8312_v23  ;;  %v8314_v34 = vunpack.i.h.bf16 %v8312_v23  ;;  %v4577_v45 = vsel %vm1779_vm4, %v15885_v36, %v8263_v59  ;;  %v8259_v36 = vunpack.i.h.bf16 %v13730_v0 }
 0x405   : > { %8601 = vrot.lane.b32.xlu0 %v8600_v3, %s9017_s17  ;;  %5053 = vmatprep.mubr.bf16.mxu1 %v4769_v28  ;;  %v8309_v2 = vunpack.i.h.bf16 %v8307_v50  ;;  %v8308_v7 = vunpack.i.l.bf16 %v8307_v50  ;;  %v8299_v50 = vunpack.i.h.bf16 %v13798_v58 }
 0x406   : > { %8596 = vrot.lane.b32.xlu1 %v8595_v11, %s9016_s16  ;;  %v4672_v23 = vsel %vm1779_vm4, %v15886_v55, %v8313_v33  ;;  %v15887_v11 = vld [vmem:[#allocation38_spill] sm:$0xff] }
 0x407   : > { %v8322_v19 = vpop.permute.xlu0 %8321  ;;  %v4638_v25 = vsel %vm2762_vm15, %v4606_v10, %v8308_v7  ;;  %v4639_v32 = vsel %vm2762_vm15, %v4607_v57, %v8309_v2  ;;  %v4673_v24 = vsel %vm1779_vm4, %v15887_v11, %v8314_v34  ;;  %v4704_v7 = vsel %vm2729_vm14, %v4672_v23, %v8299_v50 }
 0x408   : > { %v8323_v44 = vunpack.i.l.bf16 %v8322_v19  ;;  %v8317_v17 = vpop.permute.xlu1 %8316  ;;  %v4768_v39 = vpack.c.bf16 %v4639_v32, %v4638_v25  ;;  %v4580_v11 = vsel %vm1779_vm4, %v13340_v47, %v8259_v36 }
 0x409   : > { %8611 = vrot.lane.b32.xlu0 %v15884_v38, %s9015_s20  ;;  %v8319_v4 = vunpack.i.h.bf16 %v8317_v17  ;;  %v8318_v42 = vunpack.i.l.bf16 %v8317_v17  ;;  %v8324_v17 = vunpack.i.h.bf16 %v8322_v19  ;;  %v8258_v19 = vunpack.i.l.bf16 %v13730_v0 }
 0x40a   : > { %8606 = vrot.lane.b32.xlu1 %v8605_v18, %s9017_s17  ;;  %5054 = vmatmul.mubr.bf16.gmra.mrb[40].mxu1 %v4768_v39  ;;  %v4609_v48 = vsel %vm2729_vm14, %v4578_v61, %v8323_v44  ;;  %v15888_v18 = vld [vmem:[#allocation76_spill] sm:$0xff]  ;;  %v8164_v0 = vunpack.i.h.bf16 %v13575_v6 }
 0x40b   : > { %v8332_v5 = vpop.permute.xlu0 %8331  ;;  %v4608_v26 = vsel %vm2729_vm14, %v4577_v45, %v8319_v4  ;;  %v4705_v56 = vsel %vm2729_vm14, %v4673_v24, %v8318_v42  ;;  %v4579_v24 = vsel %vm1779_vm4, %v13298_v51, %v8258_v19  ;;  %v8163_v51 = vunpack.i.l.bf16 %v13575_v6 }
 0x40c   : > { %v8334_v3 = vunpack.i.h.bf16 %v8332_v5  ;;  %v8333_v28 = vunpack.i.l.bf16 %v8332_v5  ;;  %v8327_v63 = vpop.permute.xlu1 %8326 }
 0x40d   : > { %8621 = vrot.lane.b32.xlu0 %v8620_v20, %s9017_s17  ;;  %v8329_v1 = vunpack.i.h.bf16 %v8327_v63  ;;  %v8328_v60 = vunpack.i.l.bf16 %v8327_v63 }
 0x40e   : > { %v4640_v14 = vsel %vm2762_vm15, %v4608_v26, %v8333_v28  ;;  %v4641_v2 = vsel %vm2762_vm15, %v4609_v48, %v8334_v3  ;;  %8616 = vrot.lane.b32.xlu1 %v13316_v40, %s9016_s16 }
 0x40f   : > { %v8342_v58 = vpop.permute.xlu0 %8341  ;;  %v4736_v10 = vsel %vm2762_vm15, %v4704_v7, %v8328_v60  ;;  %v4737_v57 = vsel %vm2762_vm15, %v4705_v56, %v8329_v1  ;;  %v4771_v59 = vpack.c.bf16 %v4641_v2, %v4640_v14 }
 0x410   : > { %v8343_v33 = vunpack.i.l.bf16 %v8342_v58  ;;  %v8337_v25 = vpop.permute.xlu1 %8336  ;;  %v4772_v32 = vpack.c.bf16 %v4737_v57, %v4736_v10 }
 0x411   : > { %v8339_v34 = vunpack.i.h.bf16 %v8337_v25  ;;  %v8338_v44 = vunpack.i.l.bf16 %v8337_v25 }
 0x412   : > { %5061 = vmatprep.mubr.bf16.mxu1 %v4772_v32  ;;  %v15889_v32 = vld [vmem:[#allocation62_spill] sm:$0xff] }
 0x413   : > { %v8352_v38 = vpop.permute.xlu0 %8351  ;;  %v4675_v40 = vsel %vm1779_vm4, %v12816_v52, %v8339_v34  ;;  %v4674_v39 = vsel %vm1779_vm4, %v15888_v18, %v8338_v44  ;;  %5062 = vmatmul.mubr.bf16.gmra.mrb[44].mxu1 %v4771_v59  ;;  %v8344_v52 = vunpack.i.h.bf16 %v8342_v58  ;;  %v4582_v59 = vsel %vm1779_vm4, %v13427_v31, %v8164_v0 }
 0x414   : > { %v8354_v4 = vunpack.i.h.bf16 %v8352_v38  ;;  %v8353_v61 = vunpack.i.l.bf16 %v8352_v38  ;;  %v8347_v42 = vpop.permute.xlu1 %8346  ;;  %v4706_v5 = vsel %vm2729_vm14, %v4674_v39, %v8324_v17  ;;  %v4707_v20 = vsel %vm2729_vm14, %v4675_v40, %v8343_v33 }
 0x415   : > { %v8348_v23 = vunpack.i.l.bf16 %v8347_v42  ;;  %v4610_v1 = vsel %vm2729_vm14, %v4579_v24, %v8344_v52  ;;  %v4581_v38 = vsel %vm1779_vm4, %v13377_v41, %v8163_v51  ;;  %v8349_v40 = vunpack.i.h.bf16 %v8347_v42 }
 0x416   : > { %v4738_v45 = vsel %vm2762_vm15, %v4706_v5, %v8353_v61  ;;  %v4739_v55 = vsel %vm2762_vm15, %v4707_v20, %v8354_v4 }
 0x417   : > { %v8362_v3 = vpop.permute.xlu0 %8361  ;;  %v4775_v28 = vpack.c.bf16 %v4739_v55, %v4738_v45  ;;  %v4611_v60 = vsel %vm2729_vm14, %v4580_v11, %v8348_v23 }
 0x418   : > { %v8357_v50 = vpop.permute.xlu1 %8356  ;;  %v8363_v14 = vunpack.i.l.bf16 %v8362_v3  ;;  %v8364_v7 = vunpack.i.h.bf16 %v8362_v3 }
 0x419   : > { %5069 = vmatprep.mubr.bf16.mxu1 %v4775_v28  ;;  %v8359_v63 = vunpack.i.h.bf16 %v8357_v50  ;;  %v8358_v26 = vunpack.i.l.bf16 %v8357_v50 }
 0x41a   : > { %v4676_v34 = vsel %vm1779_vm4, %v15889_v32, %v8363_v14  ;;  %v4677_v18 = vsel %vm1779_vm4, %v12830_v16, %v8364_v7 }
 0x41b   : > { %v8372_v48 = vpop.permute.xlu0 %8371  ;;  %v4642_v2 = vsel %vm2762_vm15, %v4610_v1, %v8358_v26  ;;  %v4643_v58 = vsel %vm2762_vm15, %v4611_v60, %v8359_v63  ;;  %v4708_v19 = vsel %vm2729_vm14, %v4676_v34, %v8349_v40 }
 0x41c   : > { %v8373_v56 = vunpack.i.l.bf16 %v8372_v48  ;;  %v8367_v47 = vpop.permute.xlu1 %8366  ;;  %v4774_v10 = vpack.c.bf16 %v4643_v58, %v4642_v2  ;;  %v8374_v50 = vunpack.i.h.bf16 %v8372_v48  ;;  %v8169_v2 = vunpack.i.h.bf16 %v13587_v49 }
 0x41d   : > { %v8369_v57 = vunpack.i.h.bf16 %v8367_v47  ;;  %v8368_v33 = vunpack.i.l.bf16 %v8367_v47  ;;  %v8168_v48 = vunpack.i.l.bf16 %v13587_v49  ;;  %v8174_v49 = vunpack.i.h.bf16 %v13585_v54 }
 0x41e   : > { %5070 = vmatmul.mubr.bf16.gmra.mrb[48].mxu1 %v4774_v10  ;;  %v4613_v31 = vsel %vm2729_vm14, %v4582_v59, %v8373_v56 }
 0x41f   : > { %v8382_v25 = vpop.permute.xlu0 %8381  ;;  %v4612_v39 = vsel %vm2729_vm14, %v4581_v38, %v8369_v57  ;;  %v4709_v41 = vsel %vm2729_vm14, %v4677_v18, %v8368_v33  ;;  %v4583_v51 = vsel %vm1779_vm4, %v13415_v53, %v8168_v48  ;;  %v4584_v57 = vsel %vm1779_vm4, %v13444_v43, %v8169_v2 }
 0x420   : > { %v8384_v44 = vunpack.i.h.bf16 %v8382_v25  ;;  %v8383_v17 = vunpack.i.l.bf16 %v8382_v25  ;;  %v8377_v6 = vpop.permute.xlu1 %8376 }
 0x421   : > { %v8379_v4 = vunpack.i.h.bf16 %v8377_v6  ;;  %v8378_v61 = vunpack.i.l.bf16 %v8377_v6 }
 0x422   : > { %v4644_v5 = vsel %vm2762_vm15, %v4612_v39, %v8383_v17  ;;  %v4645_v20 = vsel %vm2762_vm15, %v4613_v31, %v8384_v44  ;;  %v8173_v44 = vunpack.i.l.bf16 %v13585_v54  ;;  %v4586_v31 = vsel %vm1779_vm4, %v13486_v35, %v8174_v49  ;;  %v15890_v49 = vld [vmem:[#allocation103_spill] sm:$0xff] }
 0x423   : > { %v8392_v36 = vpop.permute.xlu0 %8391  ;;  %v4777_v42 = vpack.c.bf16 %v4645_v20, %v4644_v5  ;;  %v4740_v45 = vsel %vm2762_vm15, %v4708_v19, %v8378_v61  ;;  %v4741_v16 = vsel %vm2762_vm15, %v4709_v41, %v8379_v4 }
 0x424   : > { %v8393_v55 = vunpack.i.l.bf16 %v8392_v36  ;;  %v8387_v52 = vpop.permute.xlu1 %8386  ;;  %v4778_v23 = vpack.c.bf16 %v4741_v16, %v4740_v45  ;;  %v4585_v5 = vsel %vm1779_vm4, %v13460_v29, %v8173_v44 }
 0x425   : > { %v8389_v3 = vunpack.i.h.bf16 %v8387_v52  ;;  %v8388_v28 = vunpack.i.l.bf16 %v8387_v52 }
 0x426   : > { %5077 = vmatprep.mubr.bf16.mxu1 %v4778_v23 }
 0x427   : > { %v8402_v11 = vpop.permute.xlu0 %8401  ;;  %v4679_v24 = vsel %vm1779_vm4, %v12847_v30, %v8389_v3  ;;  %v4678_v63 = vsel %vm1779_vm4, %v12844_v62, %v8388_v28  ;;  %5078 = vmatmul.mubr.bf16.gmra.mrb[52].mxu1 %v4777_v42  ;;  %v8394_v30 = vunpack.i.h.bf16 %v8392_v36 }
 0x428   : > { %v8404_v26 = vunpack.i.h.bf16 %v8402_v11  ;;  %v8403_v0 = vunpack.i.l.bf16 %v8402_v11  ;;  %v8397_v1 = vpop.permute.xlu1 %8396  ;;  %v4710_v60 = vsel %vm2729_vm14, %v4678_v63, %v8374_v50  ;;  %v4711_v14 = vsel %vm2729_vm14, %v4679_v24, %v8393_v55 }
 0x429   : > { %v8398_v56 = vunpack.i.l.bf16 %v8397_v1  ;;  %v4614_v32 = vsel %vm2729_vm14, %v4583_v51, %v8394_v30  ;;  %v8399_v19 = vunpack.i.h.bf16 %v8397_v1 }
 0x42a   : > { %v4742_v58 = vsel %vm2762_vm15, %v4710_v60, %v8403_v0  ;;  %v4743_v7 = vsel %vm2762_vm15, %v4711_v14, %v8404_v26 }
 0x42b   : > { %v8412_v47 = vpop.permute.xlu0 %8411  ;;  %v4781_v62 = vpack.c.bf16 %v4743_v7, %v4742_v58  ;;  %v4615_v34 = vsel %vm2729_vm14, %v4584_v57, %v8398_v56 }
 0x42c   : > { %v8407_v10 = vpop.permute.xlu1 %8406  ;;  %v8413_v17 = vunpack.i.l.bf16 %v8412_v47  ;;  %v8414_v53 = vunpack.i.h.bf16 %v8412_v47  ;;  %v8179_v47 = vunpack.i.h.bf16 %v13604_v22 }
 0x42d   : > { %5085 = vmatprep.mubr.bf16.mxu1 %v4781_v62  ;;  %v8409_v59 = vunpack.i.h.bf16 %v8407_v10  ;;  %v8408_v33 = vunpack.i.l.bf16 %v8407_v10  ;;  %v8178_v62 = vunpack.i.l.bf16 %v13604_v22 }
 0x42e   : > { %v4680_v54 = vsel %vm1779_vm4, %v12861_v9, %v8413_v17  ;;  %v4681_v41 = vsel %vm1779_vm4, %v12864_v27, %v8414_v53 }
 0x42f   : > { %v8422_v25 = vpop.permute.xlu0 %8421  ;;  %v4646_v38 = vsel %vm2762_vm15, %v4614_v32, %v8408_v33  ;;  %v4647_v40 = vsel %vm2762_vm15, %v4615_v34, %v8409_v59  ;;  %v4712_v9 = vsel %vm2729_vm14, %v4680_v54, %v8399_v19  ;;  %v15891_v32 = vld [vmem:[#allocation26_spill] sm:$0xff] }
 0x430   : > { %v8423_v18 = vunpack.i.l.bf16 %v8422_v25  ;;  %v8417_v6 = vpop.permute.xlu1 %8416  ;;  %v4780_v43 = vpack.c.bf16 %v4647_v40, %v4646_v38  ;;  %v8424_v1 = vunpack.i.h.bf16 %v8422_v25  ;;  %v4587_v25 = vsel %vm1779_vm4, %v15890_v49, %v8178_v62  ;;  %v15892_v38 = vld [vmem:[#allocation48_spill] sm:$0xff] }
 0x431   : > { %v8419_v39 = vunpack.i.h.bf16 %v8417_v6  ;;  %v8418_v4 = vunpack.i.l.bf16 %v8417_v6  ;;  %v4588_v34 = vsel %vm1779_vm4, %v15891_v32, %v8179_v47  ;;  %v8184_v22 = vunpack.i.h.bf16 %v15892_v38 }
 0x432   : > { %5086 = vmatmul.mubr.bf16.gmra.mrb[56].mxu1 %v4780_v43  ;;  %v4617_v35 = vsel %vm2729_vm14, %v4586_v31, %v8423_v18  ;;  %v8183_v6 = vunpack.i.l.bf16 %v15892_v38 }
 0x433   : > { %v8432_v61 = vpop.permute.xlu0 %8431  ;;  %v4616_v45 = vsel %vm2729_vm14, %v4585_v5, %v8419_v39  ;;  %v4713_v3 = vsel %vm2729_vm14, %v4681_v41, %v8418_v4 }
 0x434   : > { %v8434_v20 = vunpack.i.h.bf16 %v8432_v61  ;;  %v8433_v36 = vunpack.i.l.bf16 %v8432_v61  ;;  %v8427_v42 = vpop.permute.xlu1 %8426 }
 0x435   : > { %v8429_v16 = vunpack.i.h.bf16 %v8427_v42  ;;  %v8428_v55 = vunpack.i.l.bf16 %v8427_v42 }
 0x436   : > { %v4648_v52 = vsel %vm2762_vm15, %v4616_v45, %v8433_v36  ;;  %v4649_v29 = vsel %vm2762_vm15, %v4617_v35, %v8434_v20  ;;  %v15893_v36 = vld [vmem:[#allocation110_spill] sm:$0xff]  ;;  %v15894_v45 = vld [vmem:[#allocation65_spill] sm:$0xff] }
 0x437   : > { %v8442_v23 = vpop.permute.xlu0 %8441  ;;  %v4744_v28 = vsel %vm2762_vm15, %v4712_v9, %v8428_v55  ;;  %v4745_v27 = vsel %vm2762_vm15, %v4713_v3, %v8429_v16  ;;  %v4783_v50 = vpack.c.bf16 %v4649_v29, %v4648_v52  ;;  %v4590_v19 = vsel %vm1779_vm4, %v15893_v36, %v8184_v22  ;;  %v15895_v16 = vld [vmem:[#allocation44_spill] sm:$0xff]  ;;  %v15896_v9 = vld [vmem:[#allocation46_spill] sm:$0xff]  ;;  %v15899_v22 = vld [vmem:[#allocation71_spill] sm:$0xff] }
 0x438   : > { %v8443_v11 = vunpack.i.l.bf16 %v8442_v23  ;;  %v8437_v24 = vpop.permute.xlu1 %8436  ;;  %v4784_v63 = vpack.c.bf16 %v4745_v27, %v4744_v28  ;;  %v4589_v35 = vsel %vm1779_vm4, %v15894_v45, %v8183_v6  ;;  %v15901_v36 = vld [vmem:[#allocation111_spill] sm:$0xff] }
 0x439   : > { %v8439_v26 = vunpack.i.h.bf16 %v8437_v24  ;;  %v8438_v0 = vunpack.i.l.bf16 %v8437_v24 }
 0x43a   : > { %5093 = vmatprep.mubr.bf16.mxu1 %v4784_v63 }
 0x43b   : > { %v8452_v60 = vpop.permute.xlu0 %8451  ;;  %v4683_v14 = vsel %vm1779_vm4, %v12878_v21, %v8439_v26  ;;  %v4682_v2 = vsel %vm1779_vm4, %v12875_v46, %v8438_v0  ;;  %5094 = vmatmul.mubr.bf16.gmra.mrb[60].mxu1 %v4783_v50  ;;  %v8444_v21 = vunpack.i.h.bf16 %v8442_v23 }
 0x43c   : > { %v8454_v48 = vunpack.i.h.bf16 %v8452_v60  ;;  %v8453_v58 = vunpack.i.l.bf16 %v8452_v60  ;;  %v8447_v7 = vpop.permute.xlu1 %8446  ;;  %v4714_v30 = vsel %vm2729_vm14, %v4682_v2, %v8424_v1  ;;  %v4715_v56 = vsel %vm2729_vm14, %v4683_v14, %v8443_v11 }
 0x43d   : > { %v8448_v57 = vunpack.i.l.bf16 %v8447_v7  ;;  %v4618_v53 = vsel %vm2729_vm14, %v4587_v25, %v8444_v21  ;;  %v8449_v23 = vunpack.i.h.bf16 %v8447_v7 }
 0x43e   : > { %v4746_v10 = vsel %vm2762_vm15, %v4714_v30, %v8453_v58  ;;  %v4747_v51 = vsel %vm2762_vm15, %v4715_v56, %v8454_v48 }
 0x43f   : > { %v8462_v59 = vpop.permute.xlu0 %8461  ;;  %v4787_v46 = vpack.c.bf16 %v4747_v51, %v4746_v10  ;;  %v4619_v18 = vsel %vm2729_vm14, %v4588_v34, %v8448_v57 }
 0x440   : > { %v8457_v33 = vpop.permute.xlu1 %8456  ;;  %v8463_v43 = vunpack.i.l.bf16 %v8462_v59  ;;  %v8464_v4 = vunpack.i.h.bf16 %v8462_v59  ;;  %v15897_v59 = vld [vmem:[#allocation81_spill] sm:$0xff] }
 0x441   : > { %5101 = vmatprep.mubr.bf16.mxu1 %v4787_v46  ;;  %v8459_v44 = vunpack.i.h.bf16 %v8457_v33  ;;  %v8458_v17 = vunpack.i.l.bf16 %v8457_v33  ;;  %v15898_v33 = vld [vmem:[#allocation90_spill] sm:$0xff] }
 0x442   : > { %v4684_v55 = vsel %vm1779_vm4, %v15895_v16, %v8463_v43  ;;  %v4685_v3 = vsel %vm1779_vm4, %v15896_v9, %v8464_v4 }
 0x443   : > { %v8472_v40 = vpop.permute.xlu0 %8471  ;;  %v4650_v39 = vsel %vm2762_vm15, %v4618_v53, %v8458_v17  ;;  %v4651_v31 = vsel %vm2762_vm15, %v4619_v18, %v8459_v44  ;;  %v4716_v1 = vsel %vm2729_vm14, %v4684_v55, %v8449_v23  ;;  %v8188_v53 = vunpack.i.l.bf16 %v15899_v22 }
 0x444   : > { %v8473_v61 = vunpack.i.l.bf16 %v8472_v40  ;;  %v8467_v5 = vpop.permute.xlu1 %8466  ;;  %v4786_v54 = vpack.c.bf16 %v4651_v31, %v4650_v39  ;;  %v8474_v51 = vunpack.i.h.bf16 %v8472_v40  ;;  %v8189_v40 = vunpack.i.h.bf16 %v15899_v22 }
 0x445   : > { %v8469_v20 = vunpack.i.h.bf16 %v8467_v5  ;;  %v8468_v41 = vunpack.i.l.bf16 %v8467_v5 }
 0x446   : > { %5102 = vmatmul.mubr.bf16.gmra.mrb[64].mxu1 %v4786_v54  ;;  %v4621_v50 = vsel %vm2729_vm14, %v4590_v19, %v8473_v61  ;;  %v15900_v54 = vld [vmem:[#allocation121_spill] sm:$0xff]  ;;  %v4592_v19 = vsel %vm1779_vm4, %v15901_v36, %v8189_v40 }
 0x447   : > { %v8482_v42 = vpop.permute.xlu0 %8481  ;;  %v4620_v27 = vsel %vm2729_vm14, %v4589_v35, %v8469_v20  ;;  %v4717_v60 = vsel %vm2729_vm14, %v4685_v3, %v8468_v41  ;;  %v4591_v20 = vsel %vm1779_vm4, %v15900_v54, %v8188_v53  ;;  %v15902_v35 = vld [vmem:[#allocation112_spill] sm:$0xff] }
 0x448   : > { %v8484_v52 = vunpack.i.h.bf16 %v8482_v42  ;;  %v8483_v29 = vunpack.i.l.bf16 %v8482_v42  ;;  %v8477_v28 = vpop.permute.xlu1 %8476  ;;  %v8194_v16 = vunpack.i.h.bf16 %v15902_v35  ;;  %v8193_v9 = vunpack.i.l.bf16 %v15902_v35  ;;  %v15907_v35 = vld [vmem:[#allocation72_spill] sm:$0xff] }
 0x449   : > { %v8479_v11 = vunpack.i.h.bf16 %v8477_v28  ;;  %v8478_v24 = vunpack.i.l.bf16 %v8477_v28 }
 0x44a   : > { %v4652_v63 = vsel %vm2762_vm15, %v4620_v27, %v8483_v29  ;;  %v4653_v26 = vsel %vm2762_vm15, %v4621_v50, %v8484_v52 }
 0x44b   : > { %v8492_v0 = vpop.permute.xlu0 %8491  ;;  %v4748_v14 = vsel %vm2762_vm15, %v4716_v1, %v8478_v24  ;;  %v4749_v2 = vsel %vm2762_vm15, %v4717_v60, %v8479_v11  ;;  %v4789_v48 = vpack.c.bf16 %v4653_v26, %v4652_v63  ;;  %v15903_v1 = vld [vmem:[#allocation42_spill] sm:$0xff] }
 0x44c   : > { %v8493_v58 = vunpack.i.l.bf16 %v8492_v0  ;;  %v8487_v7 = vpop.permute.xlu1 %8486  ;;  %v4790_v30 = vpack.c.bf16 %v4749_v2, %v4748_v14  ;;  %v8494_v43 = vunpack.i.h.bf16 %v8492_v0  ;;  %v4594_v60 = vsel %vm1779_vm4, %v15903_v1, %v8194_v16 }
 0x44d   : > { %v13963_v56 = vpop.f32.mrb[72].mxu0  ;;  %v8489_v47 = vunpack.i.h.bf16 %v8487_v7  ;;  %v8488_v62 = vunpack.i.l.bf16 %v8487_v7  ;;  %v15905_v7 = vld [vmem:[#allocation74_spill] sm:$0xff] }
 0x44e   : > { %v13965_v10 = vpop.f32.mrb[73].mxu0  ;;  %5109 = vmatprep.mubr.bf16.mxu1 %v4790_v30  ;;  %v4622_v29 = vsel %vm2729_vm14, %v4591_v20, %v8494_v43 }
 0x44f   : > { %v8502_v21 = vpop.permute.xlu0 %8501  ;;  %v13967_v57 = vpop.f32.mrb[74].mxu0  ;;  %v4687_v46 = vsel %vm1779_vm4, %v15897_v59, %v8489_v47  ;;  %v4686_v49 = vsel %vm1779_vm4, %v15898_v33, %v8488_v62  ;;  %5110 = vmatmul.mubr.bf16.gmra.mrb[68].mxu1 %v4789_v48  ;;  %v15904_v48 = vld [vmem:[#allocation58_spill] sm:$0xff] }
 0x450   : > { %v8504_v25 = vunpack.i.h.bf16 %v8502_v21  ;;  %v8503_v32 = vunpack.i.l.bf16 %v8502_v21  ;;  %v13973_v34 = vpop.f32.mrb[75].mxu0  ;;  %v8497_v44 = vpop.permute.xlu1 %8496  ;;  %v4718_v17 = vsel %vm2729_vm14, %v4686_v49, %v8474_v51  ;;  %v4719_v38 = vsel %vm2729_vm14, %v4687_v46, %v8493_v58  ;;  %v15906_v21 = vld [vmem:[#allocation86_spill] sm:$0xff] }
 0x451   : > { %v8498_v39 = vunpack.i.l.bf16 %v8497_v44  ;;  %v4593_v58 = vsel %vm1779_vm4, %v15904_v48, %v8193_v9  ;;  %v8499_v51 = vunpack.i.h.bf16 %v8497_v44 }
 0x452   : > { %v4750_v18 = vsel %vm2762_vm15, %v4718_v17, %v8503_v32  ;;  %v4751_v6 = vsel %vm2762_vm15, %v4719_v38, %v8504_v25 }
 0x453   : > { %v8512_v31 = vpop.permute.xlu0 %8511  ;;  %v4793_v4 = vpack.c.bf16 %v4751_v6, %v4750_v18  ;;  %v4623_v23 = vsel %vm2729_vm14, %v4592_v19, %v8498_v39 }
 0x454   : > { %v8507_v61 = vpop.permute.xlu1 %8506  ;;  %v8513_v3 = vunpack.i.l.bf16 %v8512_v31  ;;  %v8514_v11 = vunpack.i.h.bf16 %v8512_v31 }
 0x455   : > { %5117 = vmatprep.mubr.bf16.mxu1 %v4793_v4  ;;  %v13981_v5 = vpop.f32.mrb[76].mxu0  ;;  %v8509_v41 = vunpack.i.h.bf16 %v8507_v61  ;;  %v8508_v42 = vunpack.i.l.bf16 %v8507_v61 }
 0x456   : > { %v13987_v45 = vpop.f32.mrb[77].mxu0  ;;  %v4688_v30 = vsel %vm1779_vm4, %v15905_v7, %v8513_v3  ;;  %v4689_v59 = vsel %vm1779_vm4, %v15906_v21, %v8514_v11  ;;  %v15911_v21 = vld [vmem:[#allocation59_spill] sm:$0xff] }
 0x457   : > { %v8522_v55 = vpop.permute.xlu0 %8521  ;;  %v13990_v52 = vpop.f32.mrb[78].mxu0  ;;  %v4654_v28 = vsel %vm2762_vm15, %v4622_v29, %v8508_v42  ;;  %v4655_v27 = vsel %vm2762_vm15, %v4623_v23, %v8509_v41  ;;  %v4720_v18 = vsel %vm2729_vm14, %v4688_v30, %v8499_v51  ;;  %v15908_v29 = vld [vmem:[#allocation41_spill] sm:$0xff] }
 0x458   : > { %v13997_v50 = vpop.f32.mrb[79].mxu0  ;;  %v8523_v24 = vunpack.i.l.bf16 %v8522_v55  ;;  %v8517_v63 = vpop.permute.xlu1 %8516  ;;  %v4792_v26 = vpack.c.bf16 %v4655_v27, %v4654_v28  ;;  %v8524_v41 = vunpack.i.h.bf16 %v8522_v55 }
 0x459   : > { %v8519_v0 = vunpack.i.h.bf16 %v8517_v63  ;;  %v8518_v14 = vunpack.i.l.bf16 %v8517_v63  ;;  %v15909_v63 = vld [vmem:[#allocation88_spill] sm:$0xff] }
 0x45a   : > { %5118 = vmatmul.mubr.bf16.gmra.mrb[72].mxu1 %v4792_v26  ;;  %v4625_v25 = vsel %vm2729_vm14, %v4594_v60, %v8523_v24  ;;  %v8199_v55 = vunpack.i.h.bf16 %v15909_v63  ;;  %v8198_v26 = vunpack.i.l.bf16 %v15909_v63 }
 0x45b   : > { %v8532_v2 = vpop.permute.xlu0 %8531  ;;  %v4624_v49 = vsel %vm2729_vm14, %v4593_v58, %v8519_v0  ;;  %v4721_v6 = vsel %vm2729_vm14, %v4689_v59, %v8518_v14 }
 0x45c   : > { %v8534_v47 = vunpack.i.h.bf16 %v8532_v2  ;;  %v8533_v62 = vunpack.i.l.bf16 %v8532_v2  ;;  %v8527_v46 = vpop.permute.xlu1 %8526  ;;  %v4596_v59 = vsel %vm1779_vm4, %v15911_v21, %v8199_v55 }
 0x45d   : > { %v14007_v33 = vpop.f32.mrb[80].mxu0  ;;  %v8529_v32 = vunpack.i.h.bf16 %v8527_v46  ;;  %v8528_v17 = vunpack.i.l.bf16 %v8527_v46 }
 0x45e   : > { %v14011_v38 = vpop.f32.mrb[81].mxu0  ;;  %v4656_v22 = vsel %vm2762_vm15, %v4624_v49, %v8533_v62  ;;  %v4657_v40 = vsel %vm2762_vm15, %v4625_v25, %v8534_v47  ;;  %v15910_v62 = vld [vmem:[#allocation64_spill] sm:$0xff]  ;;  %v15912_v25 = vld [vmem:[#allocation89_spill] sm:$0xff] }
 0x45f   : > { %v8542_v53 = vpop.permute.xlu0 %8541  ;;  %v14015_v44 = vpop.f32.mrb[82].mxu0  ;;  %v4752_v43 = vsel %vm2762_vm15, %v4720_v18, %v8528_v17  ;;  %v4753_v39 = vsel %vm2762_vm15, %v4721_v6, %v8529_v32  ;;  %v4795_v4 = vpack.c.bf16 %v4657_v40, %v4656_v22  ;;  %v4595_v51 = vsel %vm1779_vm4, %v15910_v62, %v8198_v26  ;;  %v15915_v26 = vld [vmem:[#allocation84_spill] sm:$0xff] }
 0x460   : > { %v14021_v31 = vpop.f32.mrb[83].mxu0  ;;  %v8543_v61 = vunpack.i.l.bf16 %v8542_v53  ;;  %v8537_v54 = vpop.permute.xlu1 %8536  ;;  %v4796_v20 = vpack.c.bf16 %v4753_v39, %v4752_v43  ;;  %v8544_v14 = vunpack.i.h.bf16 %v8542_v53  ;;  %v8204_v32 = vunpack.i.h.bf16 %v15912_v25 }
 0x461   : > { %v8539_v36 = vunpack.i.h.bf16 %v8537_v54  ;;  %v8538_v19 = vunpack.i.l.bf16 %v8537_v54  ;;  %v8203_v53 = vunpack.i.l.bf16 %v15912_v25 }
 0x462   : > { %5125 = vmatprep.mubr.bf16.mxu1 %v4796_v20  ;;  %v4626_v22 = vsel %vm2729_vm14, %v4595_v51, %v8544_v14 }
 0x463   : > { %v8552_v42 = vpop.permute.xlu0 %8551  ;;  %v4691_v16 = vsel %vm1779_vm4, %v15907_v35, %v8539_v36  ;;  %v4690_v23 = vsel %vm1779_vm4, %v15908_v29, %v8538_v19  ;;  %5126 = vmatmul.mubr.bf16.gmra.mrb[76].mxu1 %v4795_v4  ;;  %v15913_v29 = vld [vmem:[#allocation31_spill] sm:$0xff] }
 0x464   : > { %v8554_v9 = vunpack.i.h.bf16 %v8552_v42  ;;  %v8553_v3 = vunpack.i.l.bf16 %v8552_v42  ;;  %v8547_v28 = vpop.permute.xlu1 %8546  ;;  %v4722_v11 = vsel %vm2729_vm14, %v4690_v23, %v8524_v41  ;;  %v4723_v24 = vsel %vm2729_vm14, %v4691_v16, %v8543_v61 }
 0x465   : > { %v14027_v27 = vpop.f32.mrb[84].mxu0  ;;  %v8548_v2 = vunpack.i.l.bf16 %v8547_v28  ;;  %v4598_v41 = vsel %vm1779_vm4, %v13670_v12, %v8204_v32  ;;  %v4597_v23 = vsel %vm1779_vm4, %v15913_v29, %v8203_v53  ;;  %v8549_v55 = vunpack.i.h.bf16 %v8547_v28 }
 0x466   : > { %v14033_v0 = vpop.f32.mrb[85].mxu0  ;;  %v4754_v1 = vsel %vm2762_vm15, %v4722_v11, %v8553_v3  ;;  %v4755_v60 = vsel %vm2762_vm15, %v4723_v24, %v8554_v9  ;;  %v15914_v9 = vld [vmem:[#allocation57_spill] sm:$0xff] }
 0x467   : > { %v8562_v48 = vpop.permute.xlu0 %8561  ;;  %v14037_v58 = vpop.f32.mrb[86].mxu0  ;;  %v4799_v7 = vpack.c.bf16 %v4755_v60, %v4754_v1  ;;  %v4627_v40 = vsel %vm2729_vm14, %v4596_v59, %v8548_v2 }
 0x468   : > { %v14039_v30 = vpop.f32.mrb[87].mxu0  ;;  %v8557_v47 = vpop.permute.xlu1 %8556  ;;  %v8563_v18 = vunpack.i.l.bf16 %v8562_v48  ;;  %v8564_v39 = vunpack.i.h.bf16 %v8562_v48 }
 0x469   : > { %5133 = vmatprep.mubr.bf16.mxu1 %v4799_v7  ;;  %v8559_v46 = vunpack.i.h.bf16 %v8557_v47  ;;  %v8558_v49 = vunpack.i.l.bf16 %v8557_v47 }
 0x46a   : > { %v4692_v3 = vsel %vm1779_vm4, %v15914_v9, %v8563_v18  ;;  %v4693_v1 = vsel %vm1779_vm4, %v15915_v26, %v8564_v39 }
 0x46b   : > { %v8572_v17 = vpop.permute.xlu0 %8571  ;;  %v4658_v6 = vsel %vm2762_vm15, %v4626_v22, %v8558_v49  ;;  %v4659_v43 = vsel %vm2762_vm15, %v4627_v40, %v8559_v46  ;;  %v4724_v51 = vsel %vm2729_vm14, %v4692_v3, %v8549_v55 }
 0x46c   : > { %v8573_v4 = vunpack.i.l.bf16 %v8572_v17  ;;  %v8567_v61 = vpop.permute.xlu1 %8566  ;;  %v4798_v54 = vpack.c.bf16 %v4659_v43, %v4658_v6  ;;  %v15916_v6 = vld [vmem:[#allocation28_spill] sm:$0xff]  ;;  %v8574_v39 = vunpack.i.h.bf16 %v8572_v17 }
 0x46d   : > { %v14051_v20 = vpop.f32.mrb[88].mxu0  ;;  %v8569_v36 = vunpack.i.h.bf16 %v8567_v61  ;;  %v8568_v42 = vunpack.i.l.bf16 %v8567_v61  ;;  %v8208_v43 = vunpack.i.l.bf16 %v15916_v6  ;;  %v8209_v9 = vunpack.i.h.bf16 %v15916_v6 }
 0x46e   : > { %v14053_v19 = vpop.f32.mrb[89].mxu0  ;;  %5134 = vmatmul.mubr.bf16.gmra.mrb[80].mxu1 %v4798_v54  ;;  %v4629_v14 = vsel %vm2729_vm14, %v4598_v41, %v8573_v4  ;;  %v15917_v54 = vld [vmem:[#allocation14_spill] sm:$0xff]  ;;  %v15918_v41 = vld [vmem:[#allocation120_spill] sm:$0xff] }
 0x46f   : > { %v8582_v35 = vpop.permute.xlu0 %8581  ;;  %v14057_v16 = vpop.f32.mrb[90].mxu0  ;;  %v4628_v60 = vsel %vm2729_vm14, %v4597_v23, %v8569_v36  ;;  %v4725_v21 = vsel %vm2729_vm14, %v4693_v1, %v8568_v42 }
 0x470   : > { %v8584_v11 = vunpack.i.h.bf16 %v8582_v35  ;;  %v8583_v24 = vunpack.i.l.bf16 %v8582_v35  ;;  %v14063_v63 = vpop.f32.mrb[91].mxu0  ;;  %v8577_v12 = vpop.permute.xlu1 %8576 }
 0x471   : > { %v8579_v2 = vunpack.i.h.bf16 %v8577_v12  ;;  %v8578_v48 = vunpack.i.l.bf16 %v8577_v12 }
 0x472   : > { %v4660_v7 = vsel %vm2762_vm15, %v4628_v60, %v8583_v24  ;;  %v4661_v47 = vsel %vm2762_vm15, %v4629_v14, %v8584_v11  ;;  %v15919_v14 = vld [vmem:[#allocation29_spill] sm:$0xff] }
 0x473   : > { %v8592_v62 = vpop.permute.xlu0 %8591  ;;  %v4756_v28 = vsel %vm2762_vm15, %v4724_v51, %v8578_v48  ;;  %v4757_v59 = vsel %vm2762_vm15, %v4725_v21, %v8579_v2  ;;  %v4801_v46 = vpack.c.bf16 %v4661_v47, %v4660_v7  ;;  %v4599_v2 = vsel %vm1779_vm4, %v15919_v14, %v8208_v43  ;;  %v15920_v47 = vld [vmem:[#allocation22_spill] sm:$0xff]  ;;  %v15921_v21 = vld [vmem:[#allocation73_spill] sm:$0xff] }
 0x474   : > { %v8593_v49 = vunpack.i.l.bf16 %v8592_v62  ;;  %v8587_v25 = vpop.permute.xlu1 %8586  ;;  %v4802_v32 = vpack.c.bf16 %v4757_v59, %v4756_v28  ;;  %v8594_v26 = vunpack.i.h.bf16 %v8592_v62  ;;  %v4600_v51 = vsel %vm1779_vm4, %v15920_v47, %v8209_v9 }
 0x475   : > { %v14075_v22 = vpop.f32.mrb[92].mxu0  ;;  %v8589_v40 = vunpack.i.h.bf16 %v8587_v25  ;;  %v8588_v53 = vunpack.i.l.bf16 %v8587_v25  ;;  %v8214_v28 = vunpack.i.h.bf16 %v15921_v21  ;;  %v8213_v59 = vunpack.i.l.bf16 %v15921_v21 }
 0x476   : > { %v14077_v18 = vpop.f32.mrb[93].mxu0  ;;  %5141 = vmatprep.mubr.bf16.mxu1 %v4802_v32 }
 0x477   : > { %v8602_v4 = vpop.permute.xlu0 %8601  ;;  %v14080_v61 = vpop.f32.mrb[94].mxu0  ;;  %v4695_v36 = vsel %vm1779_vm4, %v15917_v54, %v8589_v40  ;;  %v4694_v42 = vsel %vm1779_vm4, %v15918_v41, %v8588_v53  ;;  %5142 = vmatmul.mubr.bf16.gmra.mrb[84].mxu1 %v4801_v46  ;;  %v15922_v41 = vld [vmem:[#allocation70_spill] sm:$0xff]  ;;  %v4602_v14 = vsel %vm1779_vm4, %v13751_v8, %v8214_v28  ;;  %v14134_v8 = vld [vmem:[%s14808_s7] ss:$0 sm:$0xff] }
 0x478   : > { %v8604_v35 = vunpack.i.h.bf16 %v8602_v4  ;;  %v8603_v29 = vunpack.i.l.bf16 %v8602_v4  ;;  %v14086_v23 = vpop.f32.mrb[95].mxu0  ;;  %v8597_v3 = vpop.permute.xlu1 %8596  ;;  %v4726_v17 = vsel %vm2729_vm14, %v4694_v42, %v8574_v39  ;;  %v4727_v11 = vsel %vm2729_vm14, %v4695_v36, %v8593_v49 }
 0x479   : > { %v8598_v1 = vunpack.i.l.bf16 %v8597_v3  ;;  %v8599_v46 = vunpack.i.h.bf16 %v8597_v3  ;;  %v4630_v4 = vsel %vm2729_vm14, %v4599_v2, %v8594_v26  ;;  %v15923_v42 = vunpack.i.h.bf16 %v15922_v41 }
 0x47a   : > { %v4758_v24 = vsel %vm2762_vm15, %v4726_v17, %v8603_v29  ;;  %v4759_v55 = vsel %vm2762_vm15, %v4727_v11, %v8604_v35  ;;  %v15924_v11 = vld [vmem:[#allocation113_spill] sm:$0xff]  ;;  %v4601_v2 = vsel %vm1779_vm4, %v13695_v37, %v8213_v59 }
 0x47b   : > { %v8612_v12 = vpop.permute.xlu0 %8611  ;;  %v4805_v60 = vpack.c.bf16 %v4759_v55, %v4758_v24  ;;  %v4631_v54 = vsel %vm2729_vm14, %v4600_v51, %v8598_v1 }
 0x47c   : > { %v8614_v48 = vunpack.i.h.bf16 %v8612_v12  ;;  %v8613_v7 = vunpack.i.l.bf16 %v8612_v12  ;;  %v8607_v49 = vpop.permute.xlu1 %8606 }
 0x47d   : > { %5149 = vmatprep.mubr.bf16.mxu1 %v4805_v60  ;;  %v14099_v25 = vpop.f32.mrb[96].mxu0  ;;  %v8609_v40 = vunpack.i.h.bf16 %v8607_v49  ;;  %v8608_v53 = vunpack.i.l.bf16 %v8607_v49 }
 0x47e   : > { %v4697_v62 = vsel %vm1779_vm4, %v15874_v13, %v8614_v48  ;;  %v4696_v32 = vsel %vm1779_vm4, %v13074_v15, %v8613_v7  ;;  %v14105_v6 = vpop.f32.mrb[97].mxu0 }
 0x47f   : > { %v8622_v43 = vpop.permute.xlu0 %8621  ;;  %v14107_v39 = vpop.f32.mrb[98].mxu0  ;;  %v4728_v36 = vsel %vm2729_vm14, %v4696_v32, %v8599_v46  ;;  %v4729_v13 = vsel %vm2729_vm14, %v4697_v62, %v15923_v42  ;;  %v4662_v35 = vsel %vm2762_vm15, %v4630_v4, %v8608_v53  ;;  %v4663_v15 = vsel %vm2762_vm15, %v4631_v54, %v8609_v40 }
 0x480   : > { %v14117_v29 = vpop.f32.mrb[99].mxu0  ;;  %v8624_v9 = vunpack.i.h.bf16 %v8622_v43  ;;  %v8617_v3 = vpop.permute.xlu1 %8616  ;;  %v4804_v17 = vpack.c.bf16 %v4663_v15, %v4662_v35  ;;  %v4760_v24 = vsel %vm2762_vm15, %v4728_v36, %v15924_v11  ;;  %v4761_v55 = vsel %vm2762_vm15, %v4729_v13, %v15924_v11 }
 0x481   : > { %v8623_v26 = vunpack.i.l.bf16 %v8622_v43  ;;  %v8619_v1 = vunpack.i.h.bf16 %v8617_v3  ;;  %v8618_v12 = vunpack.i.l.bf16 %v8617_v3  ;;  %v4808_v60 = vpack.c.bf16 %v4761_v55, %v4760_v24 }
 0x482   : > { %5150 = vmatmul.mubr.bf16.gmra.mrb[88].mxu1 %v4804_v17 }
 0x483   : > { %v4633_v48 = vsel %vm2729_vm14, %v4602_v14, %v8619_v1  ;;  %v4632_v7 = vsel %vm2729_vm14, %v4601_v2, %v8618_v12  ;;  %5157 = vmatprep.mubr.bf16.mxu1 %v4808_v60 }
 0x484   : > { %v4664_v47 = vsel %vm2762_vm15, %v4632_v7, %v8623_v26  ;;  %v4665_v51 = vsel %vm2762_vm15, %v4633_v48, %v8624_v9 }
 0x485   : > { %v4807_v21 = vpack.c.bf16 %v4665_v51, %v4664_v47 }
 0x48a   : > { %5158 = vmatmul.mubr.bf16.gmra.mrb[92].mxu1 %v4807_v21 }
 0x4c7   : > { %v6702_v46 = vpop.f32.mrb[32].mxu1 }
 0x4c8   : > { %v6703_v28 = vpop.f32.mrb[33].mxu1 }
 0x4c9   : > { %v6704_v37 = vadd.f32 %v6703_v28, %v6702_v46  ;;  %v6705_v59 = vpop.f32.mrb[34].mxu1 }
 0x4ca   : > { %v6706_v49 = vpop.f32.mrb[35].mxu1 }
 0x4cb   : > { %v5040_v62 = vadd.f32 %v6704_v37, %v14134_v8  ;;  %v6707_v32 = vadd.f32 %v6706_v49, %v6705_v59 }
 0x4cd   : > { %v5201_v40 = vadd.f32 %v13965_v10, %v5040_v62  ;;  %v5043_v53 = vadd.f32 %v6707_v32, %v14134_v8  ;;  %v14151_v32 = vpop.f32.mrb[100].mxu0 }
 0x4cf   : > { %v6492_v43 = vmul.f32 -1.442695, %v5201_v40  ;;  %v5551_v4 = vmax.f32 %v5201_v40, 0.0  ;;  %v5204_v54 = vadd.f32 %v13973_v34, %v5043_v53  ;;  %v14153_v40 = vpop.f32.mrb[101].mxu0 }
 0x4d1   : > { %8664 = vpow2.f32 %v6492_v43  ;;  %v5583_v36 = vmin.f32 %v5551_v4, 6.0  ;;  %v6493_v41 = vmul.f32 -1.442695, %v5204_v54  ;;  %v5552_v42 = vmax.f32 %v5204_v54, 0.0 }
 0x4d3   : > { %v6708_v13 = vpop.f32.mrb[36].mxu1  ;;  %8666 = vpow2.f32 %v6493_v41  ;;  %v5584_v35 = vmin.f32 %v5552_v42, 6.0  ;;  %5807 = vrot.lane.b32.xlu1 %v5583_v36, %s9017_s17 }
 0x4d4   : > { %v6709_v15 = vpop.f32.mrb[37].mxu1 }
 0x4d5   : > { %v6710_v9 = vadd.f32 %v6709_v15, %v6708_v13  ;;  %v6711_v3 = vpop.f32.mrb[38].mxu1  ;;  %5809 = vrot.lane.b32.xlu0 %v5584_v35, %s9017_s17 }
 0x4d6   : > { %v6712_v10 = vpop.f32.mrb[39].mxu1 }
 0x4d7   : > { %v5048_v17 = vadd.f32 %v6710_v9, %v14134_v8  ;;  %v6713_v11 = vadd.f32 %v6712_v10, %v6711_v3 }
 0x4d9   : > { %v5209_v34 = vadd.f32 %v13963_v56, %v5048_v17  ;;  %v5051_v24 = vadd.f32 %v6713_v11, %v14134_v8 }
 0x4db   : > { %v6494_v55 = vmul.f32 -1.442695, %v5209_v34  ;;  %v5553_v26 = vmax.f32 %v5209_v34, 0.0  ;;  %v5212_v1 = vadd.f32 %v13967_v57, %v5051_v24  ;;  %v8665_v12 = vpop.eup %8664 }
 0x4dc   : > { %v5455_v7 = vadd.f32 1.0, %v8665_v12 }
 0x4dd   : > { %8668 = vpow2.f32 %v6494_v55  ;;  %v5585_v60 = vmin.f32 %v5553_v26, 6.0  ;;  %v6495_v14 = vmul.f32 -1.442695, %v5212_v1  ;;  %v6714_v2 = vpop.f32.mrb[40].mxu1  ;;  %v8667_v48 = vpop.eup %8666  ;;  %v5554_v47 = vmax.f32 %v5212_v1, 0.0 }
 0x4de   : > { %v6715_v51 = vpop.f32.mrb[41].mxu1  ;;  %v5456_v56 = vadd.f32 1.0, %v8667_v48  ;;  %v14163_v1 = vpop.f32.mrb[102].mxu0 }
 0x4df   : > { %v6716_v21 = vadd.f32 %v6715_v51, %v6714_v2  ;;  %v6717_v46 = vpop.f32.mrb[42].mxu1  ;;  %5811 = vrot.lane.b32.xlu1 %v5585_v60, %s9017_s17  ;;  %8670 = vpow2.f32 %v6495_v14  ;;  %v5586_v28 = vmin.f32 %v5554_v47, 6.0  ;;  %v14167_v12 = vpop.f32.mrb[103].mxu0 }
 0x4e0   : > { %v6718_v37 = vpop.f32.mrb[43].mxu1  ;;  %8672 = vrcp.f32 %v5455_v7 }
 0x4e1   : > { %v5056_v59 = vadd.f32 %v6716_v21, %v14134_v8  ;;  %v6719_v57 = vadd.f32 %v6718_v37, %v6717_v46  ;;  %5813 = vrot.lane.b32.xlu0 %v5586_v28, %s9017_s17  ;;  %8674 = vrcp.f32 %v5456_v56 }
 0x4e3   : > { %v5217_v49 = vadd.f32 %v13987_v45, %v5056_v59  ;;  %v5059_v62 = vadd.f32 %v6719_v57, %v14134_v8 }
 0x4e5   : > { %v6496_v53 = vmul.f32 -1.442695, %v5217_v49  ;;  %v5555_v43 = vmax.f32 %v5217_v49, 0.0  ;;  %v5220_v4 = vadd.f32 %v13997_v50, %v5059_v62 }
 0x4e6   : > { %v6720_v54 = vpop.f32.mrb[44].mxu1 }
 0x4e7   : > { %v8669_v36 = vpop.eup %8668  ;;  %v5587_v41 = vmin.f32 %v5555_v43, 6.0  ;;  %v6497_v42 = vmul.f32 -1.442695, %v5220_v4  ;;  %v5556_v13 = vmax.f32 %v5220_v4, 0.0  ;;  %v6721_v35 = vpop.f32.mrb[45].mxu1  ;;  %8676 = vpow2.f32 %v6496_v53 }
 0x4e8   : > { %v6722_v15 = vadd.f32 %v6721_v35, %v6720_v54  ;;  %v6723_v9 = vpop.f32.mrb[46].mxu1  ;;  %v5457_v17 = vadd.f32 1.0, %v8669_v36 }
 0x4e9   : > { %v5588_v45 = vmin.f32 %v5556_v13, 6.0  ;;  %v6724_v3 = vpop.f32.mrb[47].mxu1  ;;  %5815 = vrot.lane.b32.xlu1 %v5587_v41, %s9017_s17  ;;  %v8671_v10 = vpop.eup %8670  ;;  %8678 = vpow2.f32 %v6497_v42 }
 0x4ea   : > { %v5064_v11 = vadd.f32 %v6722_v15, %v14134_v8  ;;  %v6725_v34 = vadd.f32 %v6724_v3, %v6723_v9  ;;  %v14159_v50 = vpop.eup %8672  ;;  %v5458_v24 = vadd.f32 1.0, %v8671_v10  ;;  %8680 = vrcp.f32 %v5457_v17 }
 0x4eb   : > { %5817 = vrot.lane.b32.xlu0 %v5588_v45, %s9017_s17  ;;  %v14169_v60 = vpop.eup %8674 }
 0x4ec   : > { %v5225_v55 = vadd.f32 %v13981_v5, %v5064_v11  ;;  %v5067_v26 = vadd.f32 %v6725_v34, %v14134_v8  ;;  %8682 = vrcp.f32 %v5458_v24 }
 0x4ed   : > { %5647 = vrot.lane.b32.xlu1 %v14159_v50, %s9016_s16 }
 0x4ee   : > { %v5228_v14 = vadd.f32 %v13990_v52, %v5067_v26  ;;  %v5557_v2 = vmax.f32 %v5225_v55, 0.0  ;;  %v6498_v5 = vmul.f32 -1.442695, %v5225_v55 }
 0x4ef   : > { %5649 = vrot.lane.b32.xlu0 %v14169_v60, %s9016_s16 }
 0x4f0   : > { %v5558_v48 = vmax.f32 %v5228_v14, 0.0  ;;  %v5589_v21 = vmin.f32 %v5557_v2, 6.0  ;;  %v6499_v46 = vmul.f32 -1.442695, %v5228_v14  ;;  %8684 = vpow2.f32 %v6498_v5 }
 0x4f1   : > { %v6726_v7 = vpop.f32.mrb[48].mxu1  ;;  %6031 = vrot.lane.b32.xlu1 %v14159_v50, %s9015_s20  ;;  %v8677_v51 = vpop.eup %8676 }
 0x4f2   : > { %v6727_v47 = vpop.f32.mrb[49].mxu1  ;;  %v5590_v59 = vmin.f32 %v5558_v48, 6.0  ;;  %v5459_v62 = vadd.f32 1.0, %v8677_v51  ;;  %8686 = vpow2.f32 %v6499_v46 }
 0x4f3   : > { %v6728_v56 = vadd.f32 %v6727_v47, %v6726_v7  ;;  %v6729_v28 = vpop.f32.mrb[50].mxu1  ;;  %6033 = vrot.lane.b32.xlu0 %v14169_v60, %s9015_s20  ;;  %v8679_v37 = vpop.eup %8678 }
 0x4f4   : > { %v6730_v52 = vpop.f32.mrb[51].mxu1  ;;  %v14183_v4 = vpop.eup %8680  ;;  %v5460_v54 = vadd.f32 1.0, %v8679_v37  ;;  %8688 = vrcp.f32 %v5459_v62 }
 0x4f5   : > { %v5072_v57 = vadd.f32 %v6728_v56, %v14134_v8  ;;  %v6731_v49 = vadd.f32 %v6730_v52, %v6729_v28  ;;  %5819 = vrot.lane.b32.xlu1 %v5589_v21, %s9017_s17 }
 0x4f6   : > { %v14188_v41 = vpop.eup %8682  ;;  %8690 = vrcp.f32 %v5460_v54 }
 0x4f7   : > { %v5233_v53 = vadd.f32 %v14011_v38, %v5072_v57  ;;  %v5075_v43 = vadd.f32 %v6731_v49, %v14134_v8  ;;  %5821 = vrot.lane.b32.xlu0 %v5590_v59, %s9017_s17 }
 0x4f9   : > { %v5236_v36 = vadd.f32 %v14021_v31, %v5075_v43  ;;  %5651 = vrot.lane.b32.xlu1 %v14183_v4, %s9016_s16  ;;  %v5559_v13 = vmax.f32 %v5233_v53, 0.0  ;;  %v6500_v9 = vmul.f32 -1.442695, %v5233_v53 }
 0x4fa   : > { %v6732_v42 = vpop.f32.mrb[52].mxu1  ;;  %v8685_v17 = vpop.eup %8684 }
 0x4fb   : > { %v6733_v35 = vpop.f32.mrb[53].mxu1  ;;  %5653 = vrot.lane.b32.xlu0 %v14188_v41, %s9016_s16  ;;  %v5560_v45 = vmax.f32 %v5236_v36, 0.0  ;;  %v5591_v11 = vmin.f32 %v5559_v13, 6.0  ;;  %v6501_v34 = vmul.f32 -1.442695, %v5236_v36  ;;  %8692 = vpow2.f32 %v6500_v9 }
 0x4fc   : > { %v6734_v38 = vadd.f32 %v6733_v35, %v6732_v42  ;;  %v6735_v15 = vpop.f32.mrb[54].mxu1  ;;  %v8687_v26 = vpop.eup %8686  ;;  %v5461_v2 = vadd.f32 1.0, %v8685_v17 }
 0x4fd   : > { %v6736_v3 = vpop.f32.mrb[55].mxu1  ;;  %6035 = vrot.lane.b32.xlu1 %v14183_v4, %s9015_s20  ;;  %v5592_v14 = vmin.f32 %v5560_v45, 6.0  ;;  %8694 = vpow2.f32 %v6501_v34  ;;  %v5462_v7 = vadd.f32 1.0, %v8687_v26 }
 0x4fe   : > { %v5080_v31 = vadd.f32 %v6734_v38, %v14134_v8  ;;  %v6737_v10 = vadd.f32 %v6736_v3, %v6735_v15  ;;  %v14202_v48 = vpop.eup %8688  ;;  %8696 = vrcp.f32 %v5461_v2 }
 0x4ff   : > { %6037 = vrot.lane.b32.xlu0 %v14188_v41, %s9015_s20  ;;  %8698 = vrcp.f32 %v5462_v7 }
 0x500   : > { %v5241_v24 = vadd.f32 %v14007_v33, %v5080_v31  ;;  %v5083_v55 = vadd.f32 %v6737_v10, %v14134_v8  ;;  %v14206_v33 = vpop.eup %8690 }
 0x501   : > { %5823 = vrot.lane.b32.xlu1 %v5591_v11, %s9017_s17 }
 0x502   : > { %v5244_v5 = vadd.f32 %v14015_v44, %v5083_v55  ;;  %v5561_v21 = vmax.f32 %v5241_v24, 0.0  ;;  %v6502_v28 = vmul.f32 -1.442695, %v5241_v24 }
 0x503   : > { %5825 = vrot.lane.b32.xlu0 %v5592_v14, %s9017_s17 }
 0x504   : > { %v5562_v52 = vmax.f32 %v5244_v5, 0.0  ;;  %v5593_v49 = vmin.f32 %v5561_v21, 6.0  ;;  %v6503_v62 = vmul.f32 -1.442695, %v5244_v5  ;;  %8700 = vpow2.f32 %v6502_v28 }
 0x505   : > { %v6738_v47 = vpop.f32.mrb[56].mxu1  ;;  %5655 = vrot.lane.b32.xlu1 %v14202_v48, %s9016_s16  ;;  %v8693_v57 = vpop.eup %8692 }
 0x506   : > { %v6739_v51 = vpop.f32.mrb[57].mxu1  ;;  %v5594_v36 = vmin.f32 %v5562_v52, 6.0  ;;  %v5463_v13 = vadd.f32 1.0, %v8693_v57  ;;  %8702 = vpow2.f32 %v6503_v62 }
 0x507   : > { %v6740_v46 = vadd.f32 %v6739_v51, %v6738_v47  ;;  %v6741_v56 = vpop.f32.mrb[58].mxu1  ;;  %5657 = vrot.lane.b32.xlu0 %v14206_v33, %s9016_s16  ;;  %v8695_v54 = vpop.eup %8694 }
 0x508   : > { %v6742_v44 = vpop.f32.mrb[59].mxu1  ;;  %v14220_v15 = vpop.eup %8696  ;;  %8704 = vrcp.f32 %v5463_v13 }
 0x509   : > { %v5088_v37 = vadd.f32 %v6740_v46, %v14134_v8  ;;  %v6743_v59 = vadd.f32 %v6742_v44, %v6741_v56  ;;  %6039 = vrot.lane.b32.xlu1 %v14202_v48, %s9015_s20  ;;  %v14224_v31 = vpop.eup %8698 }
 0x50b   : > { %v5249_v53 = vadd.f32 %v14033_v0, %v5088_v37  ;;  %v5091_v43 = vadd.f32 %v6743_v59, %v14134_v8  ;;  %6041 = vrot.lane.b32.xlu0 %v14206_v33, %s9015_s20  ;;  %v5464_v0 = vadd.f32 1.0, %v8695_v54 }
 0x50d   : > { %v5252_v42 = vadd.f32 %v14039_v30, %v5091_v43  ;;  %5827 = vrot.lane.b32.xlu1 %v5593_v49, %s9017_s17  ;;  %v5563_v17 = vmax.f32 %v5249_v53, 0.0  ;;  %8706 = vrcp.f32 %v5464_v0  ;;  %v6504_v24 = vmul.f32 -1.442695, %v5249_v53 }
 0x50e   : > { %v6744_v35 = vpop.f32.mrb[60].mxu1  ;;  %v8701_v14 = vpop.eup %8700 }
 0x50f   : > { %v6745_v38 = vpop.f32.mrb[61].mxu1  ;;  %5829 = vrot.lane.b32.xlu0 %v5594_v36, %s9017_s17  ;;  %v5564_v55 = vmax.f32 %v5252_v42, 0.0  ;;  %v5595_v2 = vmin.f32 %v5563_v17, 6.0  ;;  %v6505_v5 = vmul.f32 -1.442695, %v5252_v42  ;;  %8708 = vpow2.f32 %v6504_v24 }
 0x510   : > { %v6746_v9 = vadd.f32 %v6745_v38, %v6744_v35  ;;  %v6747_v45 = vpop.f32.mrb[62].mxu1  ;;  %v8703_v7 = vpop.eup %8702 }
 0x511   : > { %v6748_v3 = vpop.f32.mrb[63].mxu1  ;;  %5659 = vrot.lane.b32.xlu1 %v14220_v15, %s9016_s16  ;;  %v5596_v47 = vmin.f32 %v5564_v55, 6.0  ;;  %8710 = vpow2.f32 %v6505_v5  ;;  %v5466_v44 = vadd.f32 1.0, %v8703_v7 }
 0x512   : > { %v5096_v30 = vadd.f32 %v6746_v9, %v14134_v8  ;;  %v6749_v10 = vadd.f32 %v6748_v3, %v6747_v45 }
 0x513   : > { %5661 = vrot.lane.b32.xlu0 %v14224_v31, %s9016_s16 }
 0x514   : > { %v5257_v11 = vadd.f32 %v14027_v27, %v5096_v30  ;;  %v5099_v34 = vadd.f32 %v6749_v10, %v14134_v8  ;;  %v5465_v27 = vadd.f32 1.0, %v8701_v14 }
 0x515   : > { %6043 = vrot.lane.b32.xlu1 %v14220_v15, %s9015_s20 }
 0x516   : > { %v5260_v26 = vadd.f32 %v14037_v58, %v5099_v34  ;;  %v14238_v58 = vpop.eup %8704  ;;  %8712 = vrcp.f32 %v5465_v27  ;;  %v5565_v57 = vmax.f32 %v5257_v11, 0.0  ;;  %v6506_v53 = vmul.f32 -1.442695, %v5257_v11 }
 0x517   : > { %6045 = vrot.lane.b32.xlu0 %v14224_v31, %s9015_s20  ;;  %v14243_v59 = vpop.eup %8706  ;;  %8714 = vrcp.f32 %v5466_v44 }
 0x518   : > { %v5566_v43 = vmax.f32 %v5260_v26, 0.0  ;;  %v5597_v13 = vmin.f32 %v5565_v57, 6.0  ;;  %v6507_v35 = vmul.f32 -1.442695, %v5260_v26  ;;  %8716 = vpow2.f32 %v6506_v53 }
 0x519   : > { %v6750_v51 = vpop.f32.mrb[64].mxu1  ;;  %5831 = vrot.lane.b32.xlu1 %v5595_v2, %s9017_s17  ;;  %v8709_v42 = vpop.eup %8708 }
 0x51a   : > { %v6751_v21 = vpop.f32.mrb[65].mxu1  ;;  %v5598_v45 = vmin.f32 %v5566_v43, 6.0  ;;  %8718 = vpow2.f32 %v6507_v35 }
 0x51b   : > { %v6752_v46 = vadd.f32 %v6751_v21, %v6750_v51  ;;  %v6753_v56 = vpop.f32.mrb[66].mxu1  ;;  %5833 = vrot.lane.b32.xlu0 %v5596_v47, %s9017_s17  ;;  %v8711_v9 = vpop.eup %8710 }
 0x51c   : > { %v6754_v28 = vpop.f32.mrb[67].mxu1  ;;  %v5468_v11 = vadd.f32 1.0, %v8711_v9 }
 0x51d   : > { %v5104_v52 = vadd.f32 %v6752_v46, %v14134_v8  ;;  %v6755_v37 = vadd.f32 %v6754_v28, %v6753_v56  ;;  %5663 = vrot.lane.b32.xlu1 %v14238_v58, %s9016_s16 }
 0x51f   : > { %v5265_v49 = vadd.f32 %v14053_v19, %v5104_v52  ;;  %v5107_v62 = vadd.f32 %v6755_v37, %v14134_v8  ;;  %5665 = vrot.lane.b32.xlu0 %v14243_v59, %s9016_s16 }
 0x520   : > { %v14257_v17 = vpop.eup %8712 }
 0x521   : > { %v5268_v54 = vadd.f32 %v14063_v63, %v5107_v62  ;;  %6047 = vrot.lane.b32.xlu1 %v14238_v58, %s9015_s20  ;;  %v5467_v63 = vadd.f32 1.0, %v8709_v42  ;;  %v14263_v55 = vpop.eup %8714  ;;  %v5567_v14 = vmax.f32 %v5265_v49, 0.0  ;;  %v6508_v2 = vmul.f32 -1.442695, %v5265_v49 }
 0x522   : > { %v6756_v36 = vpop.f32.mrb[68].mxu1  ;;  %v8717_v47 = vpop.eup %8716 }
 0x523   : > { %v6757_v38 = vpop.f32.mrb[69].mxu1  ;;  %6049 = vrot.lane.b32.xlu0 %v14243_v59, %s9015_s20  ;;  %8720 = vrcp.f32 %v5467_v63  ;;  %v5568_v5 = vmax.f32 %v5268_v54, 0.0  ;;  %v5599_v51 = vmin.f32 %v5567_v14, 6.0  ;;  %v6509_v27 = vmul.f32 -1.442695, %v5268_v54 }
 0x524   : > { %v6758_v19 = vadd.f32 %v6757_v38, %v6756_v36  ;;  %v6759_v0 = vpop.f32.mrb[70].mxu1  ;;  %8722 = vrcp.f32 %v5468_v11  ;;  %v8719_v56 = vpop.eup %8718  ;;  %v5469_v37 = vadd.f32 1.0, %v8717_v47 }
 0x525   : > { %v6760_v3 = vpop.f32.mrb[71].mxu1  ;;  %5835 = vrot.lane.b32.xlu1 %v5597_v13, %s9017_s17  ;;  %8724 = vpow2.f32 %v6508_v2  ;;  %v5600_v44 = vmin.f32 %v5568_v5, 6.0  ;;  %v5470_v53 = vadd.f32 1.0, %v8719_v56 }
 0x526   : > { %v5112_v30 = vadd.f32 %v6758_v19, %v14134_v8  ;;  %v6761_v10 = vadd.f32 %v6760_v3, %v6759_v0  ;;  %8726 = vpow2.f32 %v6509_v27 }
 0x527   : > { %5837 = vrot.lane.b32.xlu0 %v5598_v45, %s9017_s17  ;;  %8728 = vrcp.f32 %v5469_v37 }
 0x528   : > { %v5273_v34 = vadd.f32 %v14051_v20, %v5112_v30  ;;  %v5115_v24 = vadd.f32 %v6761_v10, %v14134_v8  ;;  %8730 = vrcp.f32 %v5470_v53 }
 0x529   : > { %5667 = vrot.lane.b32.xlu1 %v14257_v17, %s9016_s16 }
 0x52a   : > { %v5276_v26 = vadd.f32 %v14057_v16, %v5115_v24  ;;  %v5569_v42 = vmax.f32 %v5273_v34, 0.0  ;;  %v6510_v38 = vmul.f32 -1.442695, %v5273_v34 }
 0x52b   : > { %5669 = vrot.lane.b32.xlu0 %v14263_v55, %s9016_s16 }
 0x52c   : > { %v5570_v19 = vmax.f32 %v5276_v26, 0.0  ;;  %v5601_v3 = vmin.f32 %v5569_v42, 6.0  ;;  %v6511_v63 = vmul.f32 -1.442695, %v5276_v26  ;;  %8732 = vpow2.f32 %v6510_v38 }
 0x52d   : > { %v6762_v7 = vpop.f32.mrb[72].mxu1  ;;  %6051 = vrot.lane.b32.xlu1 %v14257_v17, %s9015_s20  ;;  %v14277_v62 = vpop.eup %8720 }
 0x52e   : > { %v6763_v20 = vpop.f32.mrb[73].mxu1  ;;  %v14282_v54 = vpop.eup %8722  ;;  %v5602_v34 = vmin.f32 %v5570_v19, 6.0  ;;  %8734 = vpow2.f32 %v6511_v63 }
 0x52f   : > { %v6764_v21 = vadd.f32 %v6763_v20, %v6762_v7  ;;  %v6765_v46 = vpop.f32.mrb[74].mxu1  ;;  %6053 = vrot.lane.b32.xlu0 %v14263_v55, %s9015_s20  ;;  %v8725_v45 = vpop.eup %8724 }
 0x530   : > { %v6766_v16 = vpop.f32.mrb[75].mxu1  ;;  %v8727_v11 = vpop.eup %8726  ;;  %v5471_v24 = vadd.f32 1.0, %v8725_v45 }
 0x531   : > { %v5120_v28 = vadd.f32 %v6764_v21, %v14134_v8  ;;  %v6767_v52 = vadd.f32 %v6766_v16, %v6765_v46  ;;  %5839 = vrot.lane.b32.xlu1 %v5599_v51, %s9017_s17  ;;  %v14300_v26 = vpop.eup %8728  ;;  %v5472_v2 = vadd.f32 1.0, %v8727_v11 }
 0x532   : > { %8736 = vrcp.f32 %v5471_v24 }
 0x533   : > { %v5281_v57 = vadd.f32 %v14077_v18, %v5120_v28  ;;  %v5123_v49 = vadd.f32 %v6767_v52, %v14134_v8  ;;  %5841 = vrot.lane.b32.xlu0 %v5600_v44, %s9017_s17  ;;  %8738 = vrcp.f32 %v5472_v2 }
 0x535   : > { %v5284_v43 = vadd.f32 %v14086_v23, %v5123_v49  ;;  %5671 = vrot.lane.b32.xlu1 %v14277_v62, %s9016_s16  ;;  %v5571_v20 = vmax.f32 %v5281_v57, 0.0  ;;  %v6512_v27 = vmul.f32 -1.442695, %v5281_v57 }
 0x536   : > { %v6768_v36 = vpop.f32.mrb[76].mxu1 }
 0x537   : > { %v6769_v13 = vpop.f32.mrb[77].mxu1  ;;  %5673 = vrot.lane.b32.xlu0 %v14282_v54, %s9016_s16  ;;  %v5572_v21 = vmax.f32 %v5284_v43, 0.0  ;;  %v5603_v44 = vmin.f32 %v5571_v20, 6.0  ;;  %v6513_v28 = vmul.f32 -1.442695, %v5284_v43  ;;  %8740 = vpow2.f32 %v6512_v27 }
 0x538   : > { %v6770_v18 = vadd.f32 %v6769_v13, %v6768_v36  ;;  %v6771_v35 = vpop.f32.mrb[78].mxu1 }
 0x539   : > { %v6772_v0 = vpop.f32.mrb[79].mxu1  ;;  %6055 = vrot.lane.b32.xlu1 %v14277_v62, %s9015_s20  ;;  %v5604_v57 = vmin.f32 %v5572_v21, 6.0  ;;  %8742 = vpow2.f32 %v6513_v28 }
 0x53a   : > { %v5128_v23 = vadd.f32 %v6770_v18, %v14134_v8  ;;  %v6773_v9 = vadd.f32 %v6772_v0, %v6771_v35 }
 0x53b   : > { %6057 = vrot.lane.b32.xlu0 %v14282_v54, %s9015_s20 }
 0x53c   : > { %v14292_v30 = vadd.f32 %v14075_v22, %v5128_v23  ;;  %v5131_v10 = vadd.f32 %v6773_v9, %v14134_v8  ;;  %v14304_v22 = vpop.eup %8730 }
 0x53d   : > { %5843 = vrot.lane.b32.xlu1 %v5601_v3, %s9017_s17  ;;  %v8733_v56 = vpop.eup %8732 }
 0x53e   : > { %v14297_v14 = vadd.f32 %v14080_v61, %v5131_v10  ;;  %v8735_v49 = vpop.eup %8734  ;;  %v5473_v36 = vadd.f32 1.0, %v8733_v56  ;;  %v5573_v23 = vmax.f32 %v14292_v30, 0.0  ;;  %v6514_v3 = vmul.f32 -1.442695, %v14292_v30 }
 0x53f   : > { %5845 = vrot.lane.b32.xlu0 %v5602_v34, %s9017_s17  ;;  %v5474_v13 = vadd.f32 1.0, %v8735_v49 }
 0x540   : > { %8744 = vrcp.f32 %v5473_v36  ;;  %v5574_v63 = vmax.f32 %v14297_v14, 0.0  ;;  %v5605_v34 = vmin.f32 %v5573_v23, 6.0  ;;  %v6515_v24 = vmul.f32 -1.442695, %v14297_v14 }
 0x541   : > { %v6774_v5 = vpop.f32.mrb[80].mxu1  ;;  %5675 = vrot.lane.b32.xlu1 %v14300_v26, %s9016_s16  ;;  %8746 = vrcp.f32 %v5474_v13 }
 0x542   : > { %v6775_v7 = vpop.f32.mrb[81].mxu1  ;;  %8748 = vpow2.f32 %v6514_v3 }
 0x543   : > { %v6776_v47 = vadd.f32 %v6775_v7, %v6774_v5  ;;  %v6777_v51 = vpop.f32.mrb[82].mxu1  ;;  %5677 = vrot.lane.b32.xlu0 %v14304_v22, %s9016_s16  ;;  %v5606_v5 = vmin.f32 %v5574_v63, 6.0  ;;  %8750 = vpow2.f32 %v6515_v24 }
 0x544   : > { %v6778_v61 = vpop.f32.mrb[83].mxu1 }
 0x545   : > { %v5136_v46 = vadd.f32 %v6776_v47, %v14134_v8  ;;  %v6779_v16 = vadd.f32 %v6778_v61, %v6777_v51  ;;  %6059 = vrot.lane.b32.xlu1 %v14300_v26, %s9015_s20  ;;  %v5808_v2 = vpop.permute.xlu1 %5807 }
 0x547   : > { %v14312_v52 = vadd.f32 %v14105_v6, %v5136_v46  ;;  %v5139_v37 = vadd.f32 %v6779_v16, %v14134_v8  ;;  %6061 = vrot.lane.b32.xlu0 %v14304_v22, %s9015_s20  ;;  %v14322_v6 = vpop.eup %8736  ;;  %v5810_v30 = vpop.permute.xlu0 %5809 }
 0x548   : > { %v14326_v19 = vpop.eup %8738 }
 0x549   : > { %v14318_v53 = vadd.f32 %v14117_v29, %v5139_v37  ;;  %5847 = vrot.lane.b32.xlu1 %v5603_v44, %s9017_s17  ;;  %v8741_v11 = vpop.eup %8740  ;;  %v5575_v28 = vmax.f32 %v14312_v52, 0.0  ;;  %v6516_v36 = vmul.f32 -1.442695, %v14312_v52 }
 0x54a   : > { %v6780_v42 = vpop.f32.mrb[84].mxu1  ;;  %v5475_v20 = vadd.f32 1.0, %v8741_v11  ;;  %v5328_v11 = vld [vmem:[%s9182_s19 + $0x8] sm:$0xff] }
 0x54b   : > { %v6781_v43 = vpop.f32.mrb[85].mxu1  ;;  %5849 = vrot.lane.b32.xlu0 %v5604_v57, %s9017_s17 }
 0x54c   : > { %v6782_v18 = vadd.f32 %v6781_v43, %v6780_v42  ;;  %v6783_v35 = vpop.f32.mrb[86].mxu1  ;;  %8752 = vrcp.f32 %v5475_v20  ;;  %v5576_v42 = vmax.f32 %v14318_v53, 0.0 }
 0x54d   : > { %v6784_v38 = vpop.f32.mrb[87].mxu1  ;;  %5679 = vrot.lane.b32.xlu1 %v14322_v6, %s9016_s16 }
 0x54e   : > { %v5144_v29 = vadd.f32 %v6782_v18, %v14134_v8  ;;  %v6785_v0 = vadd.f32 %v6784_v38, %v6783_v35  ;;  %v5608_v24 = vmin.f32 %v5576_v42, 6.0 }
 0x54f   : > { %5681 = vrot.lane.b32.xlu0 %v14326_v19, %s9016_s16 }
 0x550   : > { %v14333_v9 = vadd.f32 %v14099_v25, %v5144_v29  ;;  %v5147_v45 = vadd.f32 %v6785_v0, %v14134_v8  ;;  %v8743_v25 = vpop.eup %8742  ;;  %v5607_v29 = vmin.f32 %v5575_v28, 6.0  ;;  %v6517_v0 = vmul.f32 -1.442695, %v14318_v53 }
 0x551   : > { %6063 = vrot.lane.b32.xlu1 %v14322_v6, %s9015_s20  ;;  %v14350_v14 = vpop.eup %8744  ;;  %v5476_v27 = vadd.f32 1.0, %v8743_v25 }
 0x552   : > { %v14341_v10 = vadd.f32 %v14107_v39, %v5147_v45  ;;  %v14347_v39 = vpop.permute.xlu1 %5811  ;;  %v14357_v44 = vpop.eup %8746  ;;  %v5577_v28 = vmax.f32 %v14333_v9, 0.0  ;;  %v6518_v42 = vmul.f32 -1.442695, %v14333_v9 }
 0x553   : > { %6065 = vrot.lane.b32.xlu0 %v14326_v19, %s9015_s20  ;;  %v14352_v46 = vpop.permute.xlu0 %5813  ;;  %8754 = vrcp.f32 %v5476_v27  ;;  %v8749_v38 = vpop.eup %8748 }
 0x554   : > { %8756 = vpow2.f32 %v6516_v36  ;;  %v5477_v53 = vadd.f32 1.0, %v8749_v38  ;;  %v5329_v38 = vld [vmem:[%s9182_s19 + $0x10] sm:$0xff] }
 0x555   : > { %v6786_v7 = vpop.f32.mrb[88].mxu1  ;;  %5851 = vrot.lane.b32.xlu1 %v5605_v34, %s9017_s17  ;;  %v8751_v34 = vpop.eup %8750  ;;  %8758 = vpow2.f32 %v6517_v0  ;;  %v5609_v0 = vmin.f32 %v5577_v28, 6.0 }
 0x556   : > { %v6787_v47 = vpop.f32.mrb[89].mxu1  ;;  %v5478_v27 = vadd.f32 1.0, %v8751_v34  ;;  %8760 = vrcp.f32 %v5477_v53 }
 0x557   : > { %v6788_v51 = vadd.f32 %v6787_v47, %v6786_v7  ;;  %v6789_v61 = vpop.f32.mrb[90].mxu1  ;;  %5853 = vrot.lane.b32.xlu0 %v5606_v5, %s9017_s17  ;;  %v5904_v47 = vmul.f32 %v14169_v60, %v5810_v30 }
 0x558   : > { %v6790_v21 = vpop.f32.mrb[91].mxu1  ;;  %8762 = vrcp.f32 %v5478_v27 }
 0x559   : > { %v6791_v16 = vadd.f32 %v6790_v21, %v6789_v61  ;;  %5683 = vrot.lane.b32.xlu1 %v14350_v14, %s9016_s16  ;;  %v5152_v56 = vadd.f32 %v6788_v51, %v14134_v8  ;;  %v14388_v61 = vpop.eup %8752  ;;  %8764 = vpow2.f32 %v6518_v42 }
 0x55b   : > { %v14361_v37 = vadd.f32 %v14153_v40, %v5152_v56  ;;  %5685 = vrot.lane.b32.xlu0 %v14357_v44, %s9016_s16  ;;  %v14365_v49 = vpop.permute.xlu1 %5815  ;;  %v5155_v57 = vadd.f32 %v6791_v16, %v14134_v8  ;;  %v5327_v40 = vld [vmem:[%s9182_s19] sm:$0xff] }
 0x55d   : > { %v14371_v43 = vadd.f32 %v14167_v12, %v5155_v57  ;;  %v6792_v13 = vpop.f32.mrb[92].mxu1  ;;  %v14373_v18 = vpop.permute.xlu0 %5817  ;;  %6067 = vrot.lane.b32.xlu1 %v14350_v14, %s9015_s20  ;;  %v5903_v12 = vmul.f32 %v14159_v50, %v5808_v2 }
 0x55e   : > { %v6793_v35 = vpop.f32.mrb[93].mxu1  ;;  %v14403_v56 = vpop.eup %8754 }
 0x55f   : > { %v6795_v23 = vpop.f32.mrb[94].mxu1  ;;  %6069 = vrot.lane.b32.xlu0 %v14357_v44, %s9015_s20  ;;  %v5648_v52 = vpop.permute.xlu1 %5647  ;;  %v6794_v45 = vadd.f32 %v6793_v35, %v6792_v13  ;;  %v5578_v13 = vmax.f32 %v14341_v10, 0.0  ;;  %v6521_v27 = vmul.f32 -1.442695, %v14371_v43 }
 0x560   : > { %v5743_v3 = vmul.f32 %v5648_v52, %v5327_v40  ;;  %v6796_v63 = vpop.f32.mrb[95].mxu1 }
 0x561   : > { %v6797_v25 = vadd.f32 %v6796_v63, %v6795_v23  ;;  %v5650_v5 = vpop.permute.xlu0 %5649  ;;  %5855 = vrot.lane.b32.xlu1 %v5607_v29, %s9017_s17  ;;  %v5160_v7 = vadd.f32 %v6794_v45, %v14134_v8  ;;  %v8757_v29 = vpop.eup %8756  ;;  %v6519_v23 = vmul.f32 -1.442695, %v14341_v10  ;;  %v5905_v45 = vmul.f32 %v14183_v4, %v14347_v39 }
 0x562   : > { %v5935_v20 = vadd.f32 %v5903_v12, %v5743_v3  ;;  %v5744_v2 = vmul.f32 %v5650_v5, %v5328_v11  ;;  %v5330_v12 = vld [vmem:[%s9182_s19 + $0x18] sm:$0xff]  ;;  %v8759_v63 = vpop.eup %8758  ;;  %v5610_v11 = vmin.f32 %v5578_v13, 6.0  ;;  %v5479_v10 = vadd.f32 1.0, %v8757_v29 }
 0x563   : > { %v5163_v50 = vadd.f32 %v6797_v25, %v14134_v8  ;;  %5857 = vrot.lane.b32.xlu0 %v5608_v24, %s9017_s17  ;;  %v6032_v51 = vpop.permute.xlu1 %6031  ;;  %v14391_v21 = vadd.f32 %v14151_v32, %v5160_v7  ;;  %v5906_v24 = vmul.f32 %v14188_v41, %v14352_v46  ;;  %8766 = vpow2.f32 %v6519_v23  ;;  %v14436_v39 = vpop.eup %8760 }
 0x564   : > { %6159 = vst.msk [vmem:[%s14394_s25] sm:$0xff] %vm1779_vm4, %v5935_v20  ;;  %v5967_v16 = vmax.f32 %v5935_v20, 0.0  ;;  %v5936_v8 = vadd.f32 %v5904_v47, %v5744_v2  ;;  %v5480_v53 = vadd.f32 1.0, %v8759_v63  ;;  %v6520_v47 = vmul.f32 -1.442695, %v14361_v37  ;;  %v14443_v41 = vpop.eup %8762 }
 0x565   : > { %v14399_v60 = vadd.f32 %v14163_v1, %v5163_v50  ;;  %v6034_v30 = vpop.permute.xlu0 %6033  ;;  %5687 = vrot.lane.b32.xlu1 %v14388_v61, %s9016_s16  ;;  %8768 = vrcp.f32 %v5479_v10  ;;  %v6522_v28 = vmul.f32 -1.442695, %v14391_v21  ;;  %v8765_v42 = vpop.eup %8764  ;;  %v5907_v29 = vmul.f32 %v14202_v48, %v14365_v49 }
 0x566   : > { %v5999_v32 = vmin.f32 %v5967_v16, 6.0  ;;  %6160 = vst.msk [vmem:[%s14394_s25 + $0x8] sm:$0xff] %vm1779_vm4, %v5936_v8  ;;  %v5968_v57 = vmax.f32 %v5936_v8, 0.0  ;;  %8770 = vrcp.f32 %v5480_v53 }
 0x567   : > { %5689 = vrot.lane.b32.xlu0 %v14403_v56, %s9016_s16  ;;  %v14410_v1 = vpop.permute.xlu1 %5819  ;;  %8772 = vpow2.f32 %v6520_v47 }
 0x568   : > { %v6127_v36 = vmul.f32 %v6032_v51, %v5999_v32  ;;  %v6000_v40 = vmin.f32 %v5968_v57, 6.0  ;;  %v5579_v51 = vmax.f32 %v14361_v37, 0.0  ;;  %v5580_v32 = vmax.f32 %v14371_v43, 0.0  ;;  %v5331_v37 = vld [vmem:[%s9182_s19 + $0x20] sm:$0xff] }
 0x569   : > { %v14414_v35 = vpop.permute.xlu0 %5821  ;;  %6071 = vrot.lane.b32.xlu1 %v14388_v61, %s9015_s20  ;;  %8774 = vpow2.f32 %v6521_v27 }
 0x56a   : > { %6191 = vst.msk [vmem:[%s14420_s28] sm:$0xff] %vm1779_vm4, %v6127_v36  ;;  %v6128_v9 = vmul.f32 %v6034_v30, %v6000_v40  ;;  %v5611_v13 = vmin.f32 %v5579_v51, 6.0  ;;  %v6523_v40 = vmul.f32 -1.442695, %v14399_v60  ;;  %8776 = vpow2.f32 %v6522_v28 }
 0x56b   : > { %6073 = vrot.lane.b32.xlu0 %v14403_v56, %s9015_s20  ;;  %v5652_v52 = vpop.permute.xlu1 %5651 }
 0x56c   : > { %v5745_v3 = vmul.f32 %v5652_v52, %v5329_v38  ;;  %6192 = vst.msk [vmem:[%s14420_s28 + $0x8] sm:$0xff] %vm1779_vm4, %v6128_v9  ;;  %v5332_v38 = vld [vmem:[%s9182_s19 + $0x28] sm:$0xff]  ;;  %v5612_v9 = vmin.f32 %v5580_v32, 6.0  ;;  %8778 = vpow2.f32 %v6523_v40  ;;  %v5334_v32 = vld [vmem:[%s9182_s19 + $0x38] sm:$0xff] }
 0x56d   : > { %v5654_v34 = vpop.permute.xlu0 %5653  ;;  %5859 = vrot.lane.b32.xlu1 %v5609_v0, %s9017_s17  ;;  %v8767_v23 = vpop.eup %8766 }
 0x56e   : > { %v5937_v25 = vadd.f32 %v5905_v45, %v5745_v3  ;;  %v5746_v5 = vmul.f32 %v5654_v34, %v5330_v12  ;;  %v5481_v12 = vadd.f32 1.0, %v8765_v42  ;;  %v5908_v45 = vmul.f32 %v14206_v33, %v14373_v18 }
 0x56f   : > { %5861 = vrot.lane.b32.xlu0 %v5610_v11, %s9017_s17  ;;  %v6036_v4 = vpop.permute.xlu1 %6035  ;;  %v14474_v49 = vpop.eup %8768  ;;  %v5482_v11 = vadd.f32 1.0, %v8767_v23 }
 0x570   : > { %6161 = vst.msk [vmem:[%s14394_s25 + $0x10] sm:$0xff] %vm1779_vm4, %v5937_v25  ;;  %v5938_v7 = vadd.f32 %v5906_v24, %v5746_v5  ;;  %v5969_v20 = vmax.f32 %v5937_v25, 0.0  ;;  %v14480_v25 = vpop.eup %8770  ;;  %8780 = vrcp.f32 %v5481_v12 }
 0x571   : > { %v6038_v50 = vpop.permute.xlu0 %6037  ;;  %5691 = vrot.lane.b32.xlu1 %v14436_v39, %s9016_s16  ;;  %v8773_v5 = vpop.eup %8772  ;;  %8782 = vrcp.f32 %v5482_v11  ;;  %v5335_v11 = vld [vmem:[%s9182_s19 + $0x40] sm:$0xff] }
 0x572   : > { %6162 = vst.msk [vmem:[%s14394_s25 + $0x18] sm:$0xff] %vm1779_vm4, %v5938_v7  ;;  %v6001_v46 = vmin.f32 %v5969_v20, 6.0  ;;  %v5970_v2 = vmax.f32 %v5938_v7, 0.0 }
 0x573   : > { %5693 = vrot.lane.b32.xlu0 %v14443_v41, %s9016_s16  ;;  %v14451_v16 = vpop.permute.xlu1 %5823  ;;  %v8775_v47 = vpop.eup %8774 }
 0x574   : > { %v6129_v8 = vmul.f32 %v6036_v4, %v6001_v46  ;;  %v6002_v30 = vmin.f32 %v5970_v2, 6.0  ;;  %v5581_v4 = vmax.f32 %v14391_v21, 0.0  ;;  %v5333_v2 = vld [vmem:[%s9182_s19 + $0x30] sm:$0xff]  ;;  %v5483_v21 = vadd.f32 1.0, %v8773_v5  ;;  %v8777_v27 = vpop.eup %8776 }
 0x575   : > { %v14455_v57 = vpop.permute.xlu0 %5825  ;;  %6075 = vrot.lane.b32.xlu1 %v14436_v39, %s9015_s20  ;;  %v5484_v28 = vadd.f32 1.0, %v8775_v47 }
 0x576   : > { %6193 = vst.msk [vmem:[%s14420_s28 + $0x10] sm:$0xff] %vm1779_vm4, %v6129_v8  ;;  %v6130_v36 = vmul.f32 %v6038_v50, %v6002_v30  ;;  %v5582_v50 = vmax.f32 %v14399_v60, 0.0  ;;  %v5613_v8 = vmin.f32 %v5581_v4, 6.0  ;;  %v5909_v60 = vmul.f32 %v14220_v15, %v14410_v1 }
 0x577   : > { %6077 = vrot.lane.b32.xlu0 %v14443_v41, %s9015_s20  ;;  %v5656_v43 = vpop.permute.xlu1 %5655  ;;  %8784 = vrcp.f32 %v5483_v21 }
 0x578   : > { %6194 = vst.msk [vmem:[%s14420_s28 + $0x18] sm:$0xff] %vm1779_vm4, %v6130_v36  ;;  %v5747_v0 = vmul.f32 %v5656_v43, %v5331_v37  ;;  %v8779_v36 = vpop.eup %8778  ;;  %v5614_v42 = vmin.f32 %v5582_v50, 6.0  ;;  %v5485_v43 = vadd.f32 1.0, %v8777_v27  ;;  %8786 = vrcp.f32 %v5484_v28 }
 0x579   : > { %v5658_v52 = vpop.permute.xlu0 %5657  ;;  %5863 = vrot.lane.b32.xlu1 %v5611_v13, %s9017_s17  ;;  %v5910_v13 = vmul.f32 %v14224_v31, %v14414_v35 }
 0x57a   : > { %v5939_v3 = vadd.f32 %v5907_v29, %v5747_v0  ;;  %v5748_v63 = vmul.f32 %v5658_v52, %v5332_v38  ;;  %v14508_v1 = vpop.eup %8780  ;;  %v5486_v0 = vadd.f32 1.0, %v8779_v36  ;;  %8788 = vrcp.f32 %v5485_v43 }
 0x57b   : > { %5865 = vrot.lane.b32.xlu0 %v5612_v9, %s9017_s17  ;;  %v6040_v48 = vpop.permute.xlu1 %6039  ;;  %v14514_v9 = vpop.eup %8782 }
 0x57c   : > { %6163 = vst.msk [vmem:[%s14394_s25 + $0x20] sm:$0xff] %vm1779_vm4, %v5939_v3  ;;  %v5940_v34 = vadd.f32 %v5908_v45, %v5748_v63  ;;  %v5971_v10 = vmax.f32 %v5939_v3, 0.0  ;;  %8790 = vrcp.f32 %v5486_v0 }
 0x57d   : > { %v6042_v24 = vpop.permute.xlu0 %6041  ;;  %5695 = vrot.lane.b32.xlu1 %v14474_v49, %s9016_s16 }
 0x57e   : > { %6164 = vst.msk [vmem:[%s14394_s25 + $0x28] sm:$0xff] %vm1779_vm4, %v5940_v34  ;;  %v6003_v33 = vmin.f32 %v5971_v10, 6.0  ;;  %v5972_v18 = vmax.f32 %v5940_v34, 0.0 }
 0x57f   : > { %5697 = vrot.lane.b32.xlu0 %v14480_v25, %s9016_s16  ;;  %v14487_v53 = vpop.permute.xlu1 %5827 }
 0x580   : > { %v6131_v7 = vmul.f32 %v6040_v48, %v6003_v33  ;;  %v6004_v20 = vmin.f32 %v5972_v18, 6.0  ;;  %v5911_v18 = vmul.f32 %v14238_v58, %v14451_v16 }
 0x581   : > { %v14490_v46 = vpop.permute.xlu0 %5829  ;;  %6079 = vrot.lane.b32.xlu1 %v14474_v49, %s9015_s20  ;;  %v14532_v33 = vpop.eup %8784 }
 0x582   : > { %6195 = vst.msk [vmem:[%s14420_s28 + $0x20] sm:$0xff] %vm1779_vm4, %v6131_v7  ;;  %v6132_v51 = vmul.f32 %v6042_v24, %v6004_v20  ;;  %v5336_v24 = vld [vmem:[%s9182_s19 + $0x48] sm:$0xff]  ;;  %v14540_v7 = vpop.eup %8786  ;;  %v5912_v20 = vmul.f32 %v14243_v59, %v14455_v57 }
 0x583   : > { %6081 = vrot.lane.b32.xlu0 %v14480_v25, %s9015_s20  ;;  %v5660_v30 = vpop.permute.xlu1 %5659 }
 0x584   : > { %6196 = vst.msk [vmem:[%s14420_s28 + $0x28] sm:$0xff] %vm1779_vm4, %v6132_v51  ;;  %v5749_v37 = vmul.f32 %v5660_v30, %v5333_v2  ;;  %v14546_v58 = vpop.eup %8788 }
 0x585   : > { %v5662_v40 = vpop.permute.xlu0 %5661  ;;  %5867 = vrot.lane.b32.xlu1 %v5613_v8, %s9017_s17 }
 0x586   : > { %v5941_v38 = vadd.f32 %v5909_v60, %v5749_v37  ;;  %v5750_v29 = vmul.f32 %v5662_v40, %v5334_v32  ;;  %v14552_v59 = vpop.eup %8790  ;;  %v5337_v60 = vld [vmem:[%s9182_s19 + $0x50] sm:$0xff] }
 0x587   : > { %5869 = vrot.lane.b32.xlu0 %v5614_v42, %s9017_s17  ;;  %v6044_v15 = vpop.permute.xlu1 %6043  ;;  %v5338_v42 = vld [vmem:[%s9182_s19 + $0x58] sm:$0xff]  ;;  %s14701_s17 = scalar_lea.hbm %s14809_s8, %s15162_s23 }
 0x588   : > { %6165 = vst.msk [vmem:[%s14394_s25 + $0x30] sm:$0xff] %vm1779_vm4, %v5941_v38  ;;  %v5942_v23 = vadd.f32 %v5910_v13, %v5750_v29  ;;  %v5973_v31 = vmax.f32 %v5941_v38, 0.0  ;;  %v5913_v13 = vmul.f32 %v14257_v17, %v14487_v53  ;;  %v5914_v38 = vmul.f32 %v14263_v55, %v14490_v46 }
 0x589   : > { %v6046_v35 = vpop.permute.xlu0 %6045  ;;  %5699 = vrot.lane.b32.xlu1 %v14508_v1, %s9016_s16 }
 0x58a   : > { %6166 = vst.msk [vmem:[%s14394_s25 + $0x38] sm:$0xff] %vm1779_vm4, %v5942_v23  ;;  %v6005_v52 = vmin.f32 %v5973_v31, 6.0  ;;  %v5974_v12 = vmax.f32 %v5942_v23, 0.0 }
 0x58b   : > { %5701 = vrot.lane.b32.xlu0 %v14514_v9, %s9016_s16  ;;  %v14520_v45 = vpop.permute.xlu1 %5831 }
 0x58c   : > { %v6133_v3 = vmul.f32 %v6044_v15, %v6005_v52  ;;  %v6006_v63 = vmin.f32 %v5974_v12, 6.0 }
 0x58d   : > { %v14522_v48 = vpop.permute.xlu0 %5833  ;;  %6083 = vrot.lane.b32.xlu1 %v14508_v1, %s9015_s20 }
 0x58e   : > { %6197 = vst.msk [vmem:[%s14420_s28 + $0x30] sm:$0xff] %vm1779_vm4, %v6133_v3  ;;  %v6134_v34 = vmul.f32 %v6046_v35, %v6006_v63  ;;  %v5339_v3 = vld [vmem:[%s9182_s19 + $0x60] sm:$0xff] }
 0x58f   : > { %6085 = vrot.lane.b32.xlu0 %v14514_v9, %s9015_s20  ;;  %v5664_v10 = vpop.permute.xlu1 %5663 }
 0x590   : > { %6198 = vst.msk [vmem:[%s14420_s28 + $0x38] sm:$0xff] %vm1779_vm4, %v6134_v34  ;;  %v5751_v5 = vmul.f32 %v5664_v10, %v5335_v11  ;;  %v5340_v34 = vld [vmem:[%s9182_s19 + $0x68] sm:$0xff]  ;;  %v5915_v10 = vmul.f32 %v14277_v62, %v14520_v45 }
 0x591   : > { %v5666_v4 = vpop.permute.xlu0 %5665  ;;  %5703 = vrot.lane.b32.xlu1 %v14532_v33, %s9016_s16 }
 0x592   : > { %v5943_v47 = vadd.f32 %v5911_v18, %v5751_v5  ;;  %v5752_v50 = vmul.f32 %v5666_v4, %v5336_v24  ;;  %v5916_v5 = vmul.f32 %v14282_v54, %v14522_v48  ;;  %v5341_v48 = vld [vmem:[%s9182_s19 + $0x70] sm:$0xff] }
 0x593   : > { %5705 = vrot.lane.b32.xlu0 %v14540_v7, %s9016_s16  ;;  %v6048_v2 = vpop.permute.xlu1 %6047 }
 0x594   : > { %6167 = vst.msk [vmem:[%s14394_s25 + $0x40] sm:$0xff] %vm1779_vm4, %v5943_v47  ;;  %v5944_v16 = vadd.f32 %v5912_v20, %v5752_v50  ;;  %v5975_v21 = vmax.f32 %v5943_v47, 0.0 }
 0x595   : > { %v6050_v51 = vpop.permute.xlu0 %6049  ;;  %5707 = vrot.lane.b32.xlu1 %v14546_v58, %s9016_s16 }
 0x596   : > { %6168 = vst.msk [vmem:[%s14394_s25 + $0x48] sm:$0xff] %vm1779_vm4, %v5944_v16  ;;  %v6007_v57 = vmin.f32 %v5975_v21, 6.0  ;;  %v5976_v27 = vmax.f32 %v5944_v16, 0.0 }
 0x597   : > { %5709 = vrot.lane.b32.xlu0 %v14552_v59, %s9016_s16  ;;  %v5836_v8 = vpop.permute.xlu1 %5835 }
 0x598   : > { %v6135_v30 = vmul.f32 %v6048_v2, %v6007_v57  ;;  %v6008_v32 = vmin.f32 %v5976_v27, 6.0 }
 0x599   : > { %v5838_v28 = vpop.permute.xlu0 %5837  ;;  %6087 = vrot.lane.b32.xlu1 %v14532_v33, %s9015_s20 }
 0x59a   : > { %6199 = vst.msk [vmem:[%s14420_s28 + $0x40] sm:$0xff] %vm1779_vm4, %v6135_v30  ;;  %v6136_v37 = vmul.f32 %v6050_v51, %v6008_v32  ;;  %v5342_v32 = vld [vmem:[%s9182_s19 + $0x78] sm:$0xff] }
 0x59b   : > { %6089 = vrot.lane.b32.xlu0 %v14540_v7, %s9015_s20  ;;  %v5668_v36 = vpop.permute.xlu1 %5667 }
 0x59c   : > { %6200 = vst.msk [vmem:[%s14420_s28 + $0x48] sm:$0xff] %vm1779_vm4, %v6136_v37  ;;  %v5753_v40 = vmul.f32 %v5668_v36, %v5337_v60  ;;  %v5917_v60 = vmul.f32 %v14300_v26, %v5836_v8 }
 0x59d   : > { %v5670_v43 = vpop.permute.xlu0 %5669  ;;  %6091 = vrot.lane.b32.xlu1 %v14546_v58, %s9015_s20 }
 0x59e   : > { %v5945_v29 = vadd.f32 %v5913_v13, %v5753_v40  ;;  %v5754_v15 = vmul.f32 %v5670_v43, %v5338_v42  ;;  %v5918_v42 = vmul.f32 %v14304_v22, %v5838_v28  ;;  %v5343_v28 = vld [vmem:[%s9182_s19 + $0x80] sm:$0xff] }
 0x59f   : > { %6093 = vrot.lane.b32.xlu0 %v14552_v59, %s9015_s20  ;;  %v6052_v0 = vpop.permute.xlu1 %6051  ;;  %s6242_s20 = sshll.u32 %s14394_s25, 4  ;;  %s14705_s20 = int_to_ptr.vmem [resolvable:$true] %s6242_s20 }
 0x5a0   : > { %6169 = vst.msk [vmem:[%s14394_s25 + $0x50] sm:$0xff] %vm1779_vm4, %v5945_v29  ;;  %v5946_v17 = vadd.f32 %v5914_v38, %v5754_v15  ;;  %v5977_v53 = vmax.f32 %v5945_v29, 0.0  ;;  %s8904_s24 = scalar_lea.vmem %s14705_s20, 4096 }
 0x5a1   : > { %v6054_v23 = vpop.permute.xlu0 %6053  ;;  %p8905_p6 = scmp.ne.s32.totalorder %s14705_s20, %s8904_s24 }
 0x5a2   : > { %6170 = vst.msk [vmem:[%s14394_s25 + $0x58] sm:$0xff] %vm1779_vm4, %v5946_v17  ;;  %v6009_v31 = vmin.f32 %v5977_v53, 6.0  ;;  %v5978_v35 = vmax.f32 %v5946_v17, 0.0 }
 0x5a3   : > { %v5840_v55 = vpop.permute.xlu1 %5839  ;;  %p8906_p13 = pnand %p8905_p6, %p15925_p12 }
 0x5a4   : > { %v6137_v46 = vmul.f32 %v6052_v0, %v6009_v31  ;;  %v6010_v52 = vmin.f32 %v5978_v35, 6.0  ;;  %v5344_v35 = vld [vmem:[%s9182_s19 + $0x88] sm:$0xff] }
 0x5a5   : > { %v5842_v12 = vpop.permute.xlu0 %5841  ;;  %p8907_p8 = pneg %p8906_p13 }
 0x5a6   : > { %6201 = vst.msk [vmem:[%s14420_s28 + $0x50] sm:$0xff] %vm1779_vm4, %v6137_v46  ;;  %v6138_v63 = vmul.f32 %v6054_v23, %v6010_v52  ;;  %v5919_v46 = vmul.f32 %v14322_v6, %v5840_v55 }
 0x5a7   : > { %v5672_v11 = vpop.permute.xlu1 %5671 }
 0x5a8   : > { %6202 = vst.msk [vmem:[%s14420_s28 + $0x58] sm:$0xff] %vm1779_vm4, %v6138_v63  ;;  %v5755_v24 = vmul.f32 %v5672_v11, %v5339_v3  ;;  %v5920_v63 = vmul.f32 %v14326_v19, %v5842_v12  ;;  %v5345_v12 = vld [vmem:[%s9182_s19 + $0x90] sm:$0xff] }
 0x5a9   : > { %v5674_v18 = vpop.permute.xlu0 %5673 }
 0x5aa   : > { %v5947_v4 = vadd.f32 %v5915_v10, %v5755_v24  ;;  %v5756_v20 = vmul.f32 %v5674_v18, %v5340_v34 }
 0x5ab   : > { %v6056_v47 = vpop.permute.xlu1 %6055 }
 0x5ac   : > { %6171 = vst.msk [vmem:[%s14394_s25 + $0x60] sm:$0xff] %vm1779_vm4, %v5947_v4  ;;  %v5948_v50 = vadd.f32 %v5916_v5, %v5756_v20  ;;  %v5979_v2 = vmax.f32 %v5947_v4, 0.0 }
 0x5ad   : > { %v6058_v16 = vpop.permute.xlu0 %6057 }
 0x5ae   : > { %6172 = vst.msk [vmem:[%s14394_s25 + $0x68] sm:$0xff] %vm1779_vm4, %v5948_v50  ;;  %v6011_v62 = vmin.f32 %v5979_v2, 6.0  ;;  %v5980_v45 = vmax.f32 %v5948_v50, 0.0 }
 0x5af   : > { %v5844_v21 = vpop.permute.xlu1 %5843 }
 0x5b0   : > { %v6139_v51 = vmul.f32 %v6056_v47, %v6011_v62  ;;  %v6012_v57 = vmin.f32 %v5980_v45, 6.0  ;;  %v5921_v62 = vmul.f32 %v14350_v14, %v5844_v21 }
 0x5b1   : > { %v5846_v54 = vpop.permute.xlu0 %5845 }
 0x5b2   : > { %6203 = vst.msk [vmem:[%s14420_s28 + $0x60] sm:$0xff] %vm1779_vm4, %v6139_v51  ;;  %v6140_v27 = vmul.f32 %v6058_v16, %v6012_v57  ;;  %v5346_v16 = vld [vmem:[%s9182_s19 + $0x98] sm:$0xff]  ;;  %v5922_v57 = vmul.f32 %v14357_v44, %v5846_v54  ;;  %v5347_v54 = vld [vmem:[%s9182_s19 + $0xa0] sm:$0xff] }
 0x5b3   : > { %v5676_v30 = vpop.permute.xlu1 %5675 }
 0x5b4   : > { %6204 = vst.msk [vmem:[%s14420_s28 + $0x68] sm:$0xff] %vm1779_vm4, %v6140_v27  ;;  %v5757_v37 = vmul.f32 %v5676_v30, %v5341_v48 }
 0x5b5   : > { %v5678_v36 = vpop.permute.xlu0 %5677 }
 0x5b6   : > { %v5949_v13 = vadd.f32 %v5917_v60, %v5757_v37  ;;  %v5758_v40 = vmul.f32 %v5678_v36, %v5342_v32 }
 0x5b7   : > { %v6060_v43 = vpop.permute.xlu1 %6059 }
 0x5b8   : > { %6173 = vst.msk [vmem:[%s14394_s25 + $0x70] sm:$0xff] %vm1779_vm4, %v5949_v13  ;;  %v5950_v38 = vadd.f32 %v5918_v42, %v5758_v40  ;;  %v5981_v29 = vmax.f32 %v5949_v13, 0.0 }
 0x5b9   : > { %v6062_v15 = vpop.permute.xlu0 %6061 }
 0x5ba   : > { %6174 = vst.msk [vmem:[%s14394_s25 + $0x78] sm:$0xff] %vm1779_vm4, %v5950_v38  ;;  %v6013_v26 = vmin.f32 %v5981_v29, 6.0  ;;  %v5982_v8 = vmax.f32 %v5950_v38, 0.0  ;;  %v5348_v38 = vld [vmem:[%s9182_s19 + $0xa8] sm:$0xff] }
 0x5bb   : > { %v5848_v0 = vpop.permute.xlu1 %5847 }
 0x5bc   : > { %v6141_v17 = vmul.f32 %v6060_v43, %v6013_v26  ;;  %v6014_v53 = vmin.f32 %v5982_v8, 6.0  ;;  %v5923_v29 = vmul.f32 %v14388_v61, %v5848_v0 }
 0x5bd   : > { %v5850_v22 = vpop.permute.xlu0 %5849 }
 0x5be   : > { %6205 = vst.msk [vmem:[%s14420_s28 + $0x70] sm:$0xff] %vm1779_vm4, %v6141_v17  ;;  %v6142_v23 = vmul.f32 %v6062_v15, %v6014_v53  ;;  %v5924_v8 = vmul.f32 %v14403_v56, %v5850_v22  ;;  %v5349_v22 = vld [vmem:[%s9182_s19 + $0xb0] sm:$0xff] }
 0x5bf   : > { %v5680_v31 = vpop.permute.xlu1 %5679 }
 0x5c0   : > { %6206 = vst.msk [vmem:[%s14420_s28 + $0x78] sm:$0xff] %vm1779_vm4, %v6142_v23  ;;  %v5759_v52 = vmul.f32 %v5680_v31, %v5343_v28 }
 0x5c1   : > { %v5682_v3 = vpop.permute.xlu0 %5681 }
 0x5c2   : > { %v5951_v11 = vadd.f32 %v5919_v46, %v5759_v52  ;;  %v5760_v34 = vmul.f32 %v5682_v3, %v5344_v35 }
 0x5c3   : > { %v6064_v10 = vpop.permute.xlu1 %6063 }
 0x5c4   : > { %6175 = vst.msk [vmem:[%s14394_s25 + $0x80] sm:$0xff] %vm1779_vm4, %v5951_v11  ;;  %v5952_v24 = vadd.f32 %v5920_v63, %v5760_v34  ;;  %v5983_v18 = vmax.f32 %v5951_v11, 0.0  ;;  %v5350_v34 = vld [vmem:[%s9182_s19 + $0xb8] sm:$0xff] }
 0x5c5   : > { %v6066_v5 = vpop.permute.xlu0 %6065 }
 0x5c6   : > { %6176 = vst.msk [vmem:[%s14394_s25 + $0x88] sm:$0xff] %vm1779_vm4, %v5952_v24  ;;  %v6015_v6 = vmin.f32 %v5983_v18, 6.0  ;;  %v5984_v55 = vmax.f32 %v5952_v24, 0.0 }
 0x5c7   : > { %v5852_v4 = vpop.permute.xlu1 %5851 }
 0x5c8   : > { %v6143_v20 = vmul.f32 %v6064_v10, %v6015_v6  ;;  %v6016_v47 = vmin.f32 %v5984_v55, 6.0  ;;  %v5925_v10 = vmul.f32 %v14436_v39, %v5852_v4 }
 0x5c9   : > { %v5854_v19 = vpop.permute.xlu0 %5853 }
 0x5ca   : > { %6207 = vst.msk [vmem:[%s14420_s28 + $0x80] sm:$0xff] %vm1779_vm4, %v6143_v20  ;;  %v6144_v50 = vmul.f32 %v6066_v5, %v6016_v47  ;;  %v5926_v5 = vmul.f32 %v14443_v41, %v5854_v19  ;;  %v5351_v19 = vld [vmem:[%s9182_s19 + $0xc0] sm:$0xff] }
 0x5cb   : > { %v5684_v2 = vpop.permute.xlu1 %5683 }
 0x5cc   : > { %6208 = vst.msk [vmem:[%s14420_s28 + $0x88] sm:$0xff] %vm1779_vm4, %v6144_v50  ;;  %v5761_v45 = vmul.f32 %v5684_v2, %v5345_v12 }
 0x5cd   : > { %v5686_v51 = vpop.permute.xlu0 %5685 }
 0x5ce   : > { %v5953_v48 = vadd.f32 %v5921_v62, %v5761_v45  ;;  %v5762_v27 = vmul.f32 %v5686_v51, %v5346_v16 }
 0x5cf   : > { %v6068_v30 = vpop.permute.xlu1 %6067 }
 0x5d0   : > { %6177 = vst.msk [vmem:[%s14394_s25 + $0x90] sm:$0xff] %vm1779_vm4, %v5953_v48  ;;  %v5954_v32 = vadd.f32 %v5922_v57, %v5762_v27  ;;  %v5985_v60 = vmax.f32 %v5953_v48, 0.0  ;;  %v5352_v57 = vld [vmem:[%s9182_s19 + $0xc8] sm:$0xff] }
 0x5d1   : > { %v6070_v37 = vpop.permute.xlu0 %6069 }
 0x5d2   : > { %6178 = vst.msk [vmem:[%s14394_s25 + $0x98] sm:$0xff] %vm1779_vm4, %v5954_v32  ;;  %v6017_v14 = vmin.f32 %v5985_v60, 6.0  ;;  %v5986_v21 = vmax.f32 %v5954_v32, 0.0 }
 0x5d3   : > { %v5856_v36 = vpop.permute.xlu1 %5855 }
 0x5d4   : > { %v6145_v42 = vmul.f32 %v6068_v30, %v6017_v14  ;;  %v6018_v13 = vmin.f32 %v5986_v21, 6.0  ;;  %v5927_v48 = vmul.f32 %v14474_v49, %v5856_v36 }
 0x5d5   : > { %v5858_v44 = vpop.permute.xlu0 %5857 }
 0x5d6   : > { %6209 = vst.msk [vmem:[%s14420_s28 + $0x90] sm:$0xff] %vm1779_vm4, %v6145_v42  ;;  %v6146_v40 = vmul.f32 %v6070_v37, %v6018_v13  ;;  %v5928_v32 = vmul.f32 %v14480_v25, %v5858_v44  ;;  %v5353_v44 = vld [vmem:[%s9182_s19 + $0xd0] sm:$0xff] }
 0x5d7   : > { %v5688_v43 = vpop.permute.xlu1 %5687 }
 0x5d8   : > { %6210 = vst.msk [vmem:[%s14420_s28 + $0x98] sm:$0xff] %vm1779_vm4, %v6146_v40  ;;  %v5763_v15 = vmul.f32 %v5688_v43, %v5347_v54 }
 0x5d9   : > { %v5690_v26 = vpop.permute.xlu0 %5689 }
 0x5da   : > { %v5955_v17 = vadd.f32 %v5923_v29, %v5763_v15  ;;  %v5764_v53 = vmul.f32 %v5690_v26, %v5348_v38  ;;  %v5354_v15 = vld [vmem:[%s9182_s19 + $0xd8] sm:$0xff] }
 0x5db   : > { %v6072_v28 = vpop.permute.xlu1 %6071 }
 0x5dc   : > { %6179 = vst.msk [vmem:[%s14394_s25 + $0xa0] sm:$0xff] %vm1779_vm4, %v5955_v17  ;;  %v5956_v23 = vadd.f32 %v5924_v8, %v5764_v53  ;;  %v5987_v31 = vmax.f32 %v5955_v17, 0.0 }
 0x5dd   : > { %v6074_v35 = vpop.permute.xlu0 %6073 }
 0x5de   : > { %6180 = vst.msk [vmem:[%s14394_s25 + $0xa8] sm:$0xff] %vm1779_vm4, %v5956_v23  ;;  %v6019_v61 = vmin.f32 %v5987_v31, 6.0  ;;  %v5988_v0 = vmax.f32 %v5956_v23, 0.0 }
 0x5df   : > { %v5860_v46 = vpop.permute.xlu1 %5859 }
 0x5e0   : > { %v6147_v52 = vmul.f32 %v6072_v28, %v6019_v61  ;;  %v6020_v3 = vmin.f32 %v5988_v0, 6.0  ;;  %v5929_v26 = vmul.f32 %v14508_v1, %v5860_v46 }
 0x5e1   : > { %v5862_v56 = vpop.permute.xlu0 %5861 }
 0x5e2   : > { %6211 = vst.msk [vmem:[%s14420_s28 + $0xa0] sm:$0xff] %vm1779_vm4, %v6147_v52  ;;  %v6148_v63 = vmul.f32 %v6074_v35, %v6020_v3  ;;  %v5930_v53 = vmul.f32 %v14514_v9, %v5862_v56  ;;  %v5355_v52 = vld [vmem:[%s9182_s19 + $0xe0] sm:$0xff] }
 0x5e3   : > { %v5692_v11 = vpop.permute.xlu1 %5691 }
 0x5e4   : > { %6212 = vst.msk [vmem:[%s14420_s28 + $0xa8] sm:$0xff] %vm1779_vm4, %v6148_v63  ;;  %v5765_v24 = vmul.f32 %v5692_v11, %v5349_v22  ;;  %v5356_v22 = vld [vmem:[%s9182_s19 + $0xe8] sm:$0xff] }
 0x5e5   : > { %v5694_v18 = vpop.permute.xlu0 %5693 }
 0x5e6   : > { %v5957_v6 = vadd.f32 %v5925_v10, %v5765_v24  ;;  %v5766_v55 = vmul.f32 %v5694_v18, %v5350_v34  ;;  %v5357_v10 = vld [vmem:[%s9182_s19 + $0xf0] sm:$0xff] }
 0x5e7   : > { %v6076_v20 = vpop.permute.xlu1 %6075 }
 0x5e8   : > { %6181 = vst.msk [vmem:[%s14394_s25 + $0xb0] sm:$0xff] %vm1779_vm4, %v5957_v6  ;;  %v5958_v47 = vadd.f32 %v5926_v5, %v5766_v55  ;;  %v5989_v12 = vmax.f32 %v5957_v6, 0.0 }
 0x5e9   : > { %v6078_v50 = vpop.permute.xlu0 %6077 }
 0x5ea   : > { %6182 = vst.msk [vmem:[%s14394_s25 + $0xb8] sm:$0xff] %vm1779_vm4, %v5958_v47  ;;  %v6021_v39 = vmin.f32 %v5989_v12, 6.0  ;;  %v5990_v4 = vmax.f32 %v5958_v47, 0.0 }
 0x5eb   : > { %v5864_v2 = vpop.permute.xlu1 %5863 }
 0x5ec   : > { %v6149_v16 = vmul.f32 %v6076_v20, %v6021_v39  ;;  %v6022_v62 = vmin.f32 %v5990_v4, 6.0  ;;  %v5931_v9 = vmul.f32 %v14532_v33, %v5864_v2  ;;  %v5358_v20 = vld [vmem:[%s9182_s19 + $0xf8] sm:$0xff]  ;;  %s9018_s19 = smov [#allocation5]  }
 0x5ed   : > { %v5866_v41 = vpop.permute.xlu0 %5865  ;;  %s8908_s16 = sshll.u32 %s9018_s19, 4  ;;  %s8909_s16 = int_to_ptr.vmem [resolvable:$false] %s8908_s16 }
 0x5ee   : > { %6213 = vst.msk [vmem:[%s14420_s28 + $0xb0] sm:$0xff] %vm1779_vm4, %v6149_v16  ;;  %v6150_v45 = vmul.f32 %v6078_v50, %v6022_v62  ;;  %v5932_v24 = vmul.f32 %v14540_v7, %v5866_v41  ;;  %s8910_s23 = scalar_lea.vmem %s8909_s16, 8192  ;;  %p8911_p10 = scmp.lt.s32.totalorder %s14705_s20, %s8909_s16 }
 0x5ef   : > { %v5696_v51 = vpop.permute.xlu1 %5695  ;;  %p8912_p0 = scmp.lt.s32.totalorder %s8910_s23, %s8904_s24 }
 0x5f0   : > { %6214 = vst.msk [vmem:[%s14420_s28 + $0xb8] sm:$0xff] %vm1779_vm4, %v6150_v45  ;;  %v5767_v27 = vmul.f32 %v5696_v51, %v5351_v19 }
 0x5f1   : > { %v5698_v30 = vpop.permute.xlu0 %5697  ;;  %p8913_p2 = por %p8912_p0, %p8911_p10 }
 0x5f2   : > { %v5959_v60 = vadd.f32 %v5927_v48, %v5767_v27  ;;  %v5768_v37 = vmul.f32 %v5698_v30, %v5352_v57 }
 0x5f3   : > { %v6080_v14 = vpop.permute.xlu1 %6079  ;;  %p8914_p4 = pnand %p8913_p2, %p8907_p8 }
 0x5f4   : > { %6183 = vst.msk [vmem:[%s14394_s25 + $0xc0] sm:$0xff] %vm1779_vm4, %v5959_v60  ;;  %v5960_v21 = vadd.f32 %v5928_v32, %v5768_v37  ;;  %v5991_v42 = vmax.f32 %v5959_v60, 0.0 }
 0x5f5   : > { %v6082_v13 = vpop.permute.xlu0 %6081 }
 0x5f6   : > { %6184 = vst.msk [vmem:[%s14394_s25 + $0xc8] sm:$0xff] %vm1779_vm4, %v5960_v21  ;;  %v6023_v49 = vmin.f32 %v5991_v42, 6.0  ;;  %v5992_v36 = vmax.f32 %v5960_v21, 0.0 }
 0x5f7   : > { %v5868_v54 = vpop.permute.xlu1 %5867 }
 0x5f8   : > { %v6151_v40 = vmul.f32 %v6080_v14, %v6023_v49  ;;  %v6024_v43 = vmin.f32 %v5992_v36, 6.0  ;;  %v5933_v47 = vmul.f32 %v14546_v58, %v5868_v54 }
 0x5f9   : > { %v5870_v25 = vpop.permute.xlu0 %5869 }
 0x5fa   : > { %6215 = vst.msk [vmem:[%s14420_s28 + $0xc0] sm:$0xff] %vm1779_vm4, %v6151_v40  ;;  %v6152_v38 = vmul.f32 %v6082_v13, %v6024_v43  ;;  %v5934_v50 = vmul.f32 %v14552_v59, %v5870_v25 }
 0x5fb   : > { %v5700_v29 = vpop.permute.xlu1 %5699 }
 0x5fc   : > { %6216 = vst.msk [vmem:[%s14420_s28 + $0xc8] sm:$0xff] %vm1779_vm4, %v6152_v38  ;;  %v5769_v8 = vmul.f32 %v5700_v29, %v5353_v44 }
 0x5fd   : > { %v5702_v17 = vpop.permute.xlu0 %5701 }
 0x5fe   : > { %v5961_v28 = vadd.f32 %v5929_v26, %v5769_v8  ;;  %v5770_v23 = vmul.f32 %v5702_v17, %v5354_v15 }
 0x5ff   : > { %v6084_v31 = vpop.permute.xlu1 %6083 }
 0x600   : > { %6185 = vst.msk [vmem:[%s14394_s25 + $0xd0] sm:$0xff] %vm1779_vm4, %v5961_v28  ;;  %v5962_v35 = vadd.f32 %v5930_v53, %v5770_v23  ;;  %v5993_v61 = vmax.f32 %v5961_v28, 0.0 }
 0x601   : > { %v6086_v0 = vpop.permute.xlu0 %6085 }
 0x602   : > { %6186 = vst.msk [vmem:[%s14394_s25 + $0xd8] sm:$0xff] %vm1779_vm4, %v5962_v35  ;;  %v6025_v1 = vmin.f32 %v5993_v61, 6.0  ;;  %v5994_v46 = vmax.f32 %v5962_v35, 0.0 }
 0x603   : > { %v5704_v3 = vpop.permute.xlu1 %5703 }
 0x604   : > { %v6153_v56 = vmul.f32 %v6084_v31, %v6025_v1  ;;  %v6026_v63 = vmin.f32 %v5994_v46, 6.0  ;;  %v5771_v11 = vmul.f32 %v5704_v3, %v5355_v52 }
 0x605   : > { %v5706_v34 = vpop.permute.xlu0 %5705 }
 0x606   : > { %6217 = vst.msk [vmem:[%s14420_s28 + $0xd0] sm:$0xff] %vm1779_vm4, %v6153_v56  ;;  %v6154_v18 = vmul.f32 %v6086_v0, %v6026_v63  ;;  %v5963_v5 = vadd.f32 %v5931_v9, %v5771_v11  ;;  %v5772_v6 = vmul.f32 %v5706_v34, %v5356_v22 }
 0x607   : > { %v5708_v55 = vpop.permute.xlu1 %5707 }
 0x608   : > { %6218 = vst.msk [vmem:[%s14420_s28 + $0xd8] sm:$0xff] %vm1779_vm4, %v6154_v18  ;;  %6187 = vst.msk [vmem:[%s14394_s25 + $0xe0] sm:$0xff] %vm1779_vm4, %v5963_v5  ;;  %v5964_v33 = vadd.f32 %v5932_v24, %v5772_v6  ;;  %v5773_v12 = vmul.f32 %v5708_v55, %v5357_v10  ;;  %v5995_v7 = vmax.f32 %v5963_v5, 0.0 }
 0x609   : > { %v5710_v39 = vpop.permute.xlu0 %5709 }
 0x60a   : > { %6188 = vst.msk [vmem:[%s14394_s25 + $0xe8] sm:$0xff] %vm1779_vm4, %v5964_v33  ;;  %v5965_v4 = vadd.f32 %v5933_v47, %v5773_v12  ;;  %v5774_v58 = vmul.f32 %v5710_v39, %v5358_v20  ;;  %v6027_v2 = vmin.f32 %v5995_v7, 6.0  ;;  %v5996_v16 = vmax.f32 %v5964_v33, 0.0 }
 0x60b   : > { %v6088_v62 = vpop.permute.xlu1 %6087 }
 0x60c   : > { %6189 = vst.msk [vmem:[%s14394_s25 + $0xf0] sm:$0xff] %vm1779_vm4, %v5965_v4  ;;  %v5966_v59 = vadd.f32 %v5934_v50, %v5774_v58  ;;  %v6155_v41 = vmul.f32 %v6088_v62, %v6027_v2  ;;  %v6028_v19 = vmin.f32 %v5996_v16, 6.0  ;;  %v5997_v45 = vmax.f32 %v5965_v4, 0.0 }
 0x60d   : > { %v6090_v51 = vpop.permute.xlu0 %6089 }
 0x60e   : > { %6190 = vst.msk [vmem:[%s14394_s25 + $0xf8] sm:$0xff] %vm1779_vm4, %v5966_v59  ;;  %6219 = vst.msk [vmem:[%s14420_s28 + $0xe0] sm:$0xff] %vm1779_vm4, %v6155_v41  ;;  %v6156_v57 = vmul.f32 %v6090_v51, %v6028_v19  ;;  %v6029_v48 = vmin.f32 %v5997_v45, 6.0  ;;  %v5998_v27 = vmax.f32 %v5966_v59, 0.0 }
 0x60f   : > { %v6092_v30 = vpop.permute.xlu1 %6091 }
 0x610   : > { %8917 = shalt.err (!%p8914_p4)
}
 0x611   : > { %s8918_s25 = scalar_lea.hbm %s14701_s17, 4096  ;;  %s8922_s19 = scalar_lea.hbm %s14809_s8, 8192 }
 0x612   : > { %p8919_p5 = scmp.ne.s32.totalorder %s14701_s17, %s8918_s25  ;;  %p8923_p1 = scmp.lt.u32.totalorder %s14701_s17, %s14809_s8 }
 0x613   : > { %p8924_p3 = scmp.lt.u32.totalorder %s8922_s19, %s8918_s25  ;;  %p8926_p6 = scmp.lt.u32.totalorder %s8918_s25, %s14701_s17 }
 0x614   : > { %p8920_p7 = pnand %p8919_p5, %p15925_p12 }
 0x615   : > { %p8925_p11 = por %p8924_p3, %p8923_p1 }
 0x616   : > { %p8921_p9 = pneg %p8920_p7 }
 0x617   : > { %p8927_p13 = por %p8926_p6, %p8925_p11 }
 0x619   : > { %p8928_p8 = pnand %p8927_p13, %p8921_p9 }
 0x61b   : > { %8931 = shalt.err (!%p8928_p8)
}
 0x61c   : > { %s9019_s23 = smov 128   ;;  %s15926_s24 = smov 8   ;;  %6220 = vst.msk [vmem:[%s14420_s28 + $0xe8] sm:$0xff] %vm1779_vm4, %v6156_v57  ;;  %v6157_v32 = vmul.f32 %v6092_v30, %v6029_v48  ;;  %v6030_v60 = vmin.f32 %v5998_v27, 6.0  ;;  %v6094_v37 = vpop.permute.xlu0 %6093 }
 0x61d   : > { %s15927_s0 = scalar_lea.sflag [#allocation4], %s9175_s29  ;;  %s15928_s26 = sshll.u32 %s9092_s13, 12 }
 0x61e   : > { %6997 = dma.vmem_to_hbm [thread:$0]  (%p15925_p12), %s14705_s20, 4096, %s14701_s17, %s15927_s0, %s9019_s23, %s9019_s23, %s15926_s24   ;;  %v6158_v14 = vmul.f32 %v6094_v37, %v6030_v60 }
 0x61f   : > { %6221 = vst.msk [vmem:[%s14420_s28 + $0xf0] sm:$0xff] %vm1779_vm4, %v6157_v32  ;;  %s14748_s25 = scalar_lea.hbm %s14810_s9, %s15928_s26  ;;  %s15929_s19 = sshll.u32 %s14420_s28, 4  ;;  %s14752_s19 = int_to_ptr.vmem [resolvable:$true] %s15929_s19 }
 0x620   : > { %6222 = vst.msk [vmem:[%s14420_s28 + $0xf8] sm:$0xff] %vm1779_vm4, %v6158_v14  ;;  %s6229_s0 = scalar_lea.sflag [#allocation7], %s9175_s29  ;;  %s8932_s20 = scalar_lea.vmem %s14752_s19, 4096 }
 0x621   : > { %p8933_p10 = scmp.ne.s32.totalorder %s14752_s19, %s8932_s20  ;;  %s9020_s13 = smov [#allocation6]  }
 0x622   : > { %s8936_s17 = sshll.u32 %s9020_s13, 4  ;;  %s8937_s17 = int_to_ptr.vmem [resolvable:$false] %s8936_s17 }
 0x623   : > { %p8934_p0 = pnand %p8933_p10, %p15925_p12  ;;  %s8938_s16 = scalar_lea.vmem %s8937_s17, 8192 }
 0x624   : > { %p8939_p4 = scmp.lt.s32.totalorder %s14752_s19, %s8937_s17  ;;  %p8940_p5 = scmp.lt.s32.totalorder %s8938_s16, %s8932_s20 }
 0x625   : > { %p8935_p2 = pneg %p8934_p0 }
 0x626   : > { %p8941_p7 = por %p8940_p5, %p8939_p4 }
 0x628   : > { %p8942_p9 = pnand %p8941_p7, %p8935_p2 }
 0x62a   : > { %8945 = shalt.err (!%p8942_p9)
}
 0x62b   : > { %s8946_s28 = scalar_lea.hbm %s14748_s25, 4096  ;;  %s8950_s27 = scalar_lea.hbm %s14810_s9, 8192 }
 0x62c   : > { %p8947_p1 = scmp.ne.s32.totalorder %s14748_s25, %s8946_s28  ;;  %p8951_p6 = scmp.lt.u32.totalorder %s14748_s25, %s14810_s9 }
 0x62d   : > { %p8952_p13 = scmp.lt.u32.totalorder %s8950_s27, %s8946_s28  ;;  %p8954_p10 = scmp.lt.u32.totalorder %s8946_s28, %s14748_s25 }
 0x62e   : > { %p8948_p3 = pnand %p8947_p1, %p15925_p12 }
 0x62f   : > { %p8953_p8 = por %p8952_p13, %p8951_p6 }
 0x630   : > { %p8949_p11 = pneg %p8948_p3 }
 0x631   : > { %p8955_p0 = por %p8954_p10, %p8953_p8 }
 0x633   : > { %p8956_p2 = pnand %p8955_p0, %p8949_p11 }
 0x635   : > { %8959 = shalt.err (!%p8956_p2)
}
 0x636   : > { %6998 = dma.vmem_to_hbm [thread:$0]  (%p15925_p12), %s14752_s19, 4096, %s14748_s25, %s6229_s0, %s9019_s23, %s9019_s23, %s15926_s24  }
 0x637 PF: > { %s6273_s20 = sand.u32 1, %s8990_s30   ;;  %p15930_p4 = scmp.ne.s32.totalorder %s15169_s22, 0 }
 0x638   : > { %p15931_p5 = scmp.ge.s32.totalorder %s9002_s12, 2  ;;  %s6274_s16 = scalar_lea.sflag [#allocation4], %s6273_s20 }
 0x63a   : > { %p7006_p7 = pnand %p15931_p5, %p15930_p4 }
 0x63c   : > { %8981 = dma.done.wait (!%p7006_p7), %s6274_s16, 4096  }
 0x63d   : > { %8983 = vsyncadd (!%p7006_p7), %s6274_s16, 4294963200  ;;  %s6283_s21 = scalar_lea.sflag [#allocation7], %s6273_s20 }
 0x63e   : > { %8985 = dma.done.wait (!%p7006_p7), %s6283_s21, 4096  }
 0x63f   : > { %8987 = vsyncadd (!%p7006_p7), %s6283_s21, 4294963200  ;;  %p26_p12 = scmp.ge.s32.totalorder %s9096_s15, 4   ;;  %s15932_s30 = smov %s8994_s10 }
 0x640   : > { %s15933_s10 = smov %s8998_s11  ;;  %s15934_s11 = smov %s9108_s18 }
 0x641   : > { %s15935_s12 = smov %s9096_s15  ;;  %28 = sbr.rel (!%p26_p12) target bundleno = 9 (0x9), region = 120 }
 0x648   :  { %6288 = vsyncpa [#allocation3], 1 }
 0x649   :  { %6290 = vsyncpa [#allocation3 + $0x1], 1 }
 0x64a   :  { %6291 = vsyncpa [#allocation4], 1 }
 0x64b   :  { %6293 = vsyncpa [#allocation4 + $0x1], 1 }
 0x64c   :  { %6294 = vsyncpa [#allocation7], 1 }
 0x64d   :  { %6296 = vsyncpa [#allocation7 + $0x1], 1 }

</bundles_post_ra>
